<compile_context>
chip_gen: v7x
topology: tpu7x:2x2x1
jax: 0.10.0
libtpu: 0.0.40
codegen_flags: <defaults>
</compile_context>

<pallas_src>
import functools

import jax
import jax.numpy as jnp
from jax import lax
from jax.experimental import pallas as pl
from jax.experimental.pallas import tpu as pltpu

RK4_SUBSTEPS = 8  # fixed substeps per interval of the time grid


def _bf16_vector_units_available():
    """bf16 VPU/EUP exist on v6e and later; v5e/v4 keep the f32 path."""
    try:
        kind = jax.devices()[0].device_kind.lower()
    except Exception:
        return False
    return any(tag in kind for tag in ("v6", "v7", "7x"))


def replicator_ode_kernel(t_ref, b2_ref, x0_ref, hb_ref, w_ref, y_ref, *,
                          act_dtype, substeps, n_intervals, unroll):
    """Integrate one block of Bb batch rows across ALL time intervals.

    t_ref : SMEM (T,)          time grid
    b2_ref: SMEM (1,)          fitness-MLP output bias
    x0_ref: VMEM (Bb, Np)      initial state (f32, lane-padded)
    hb_ref: VMEM (Bb, H, Np)   loop-invariant  W1e @ emb + b1   (act_dtype)
    w_ref : VMEM (H, 2)        column 0 = w1x, column 1 = w2    (f32)
    y_ref : VMEM (T-1, Bb, Np) states at t[1:]                  (f32)
    """
    h_base = hb_ref[...]                                    # (Bb, H, Np)
    wp = w_ref[...]                                         # (H, 2) f32
    w1x = wp[:, 0:1][None].astype(act_dtype)                # (1, H, 1)
    w2 = wp[:, 1:2][None]                                   # (1, H, 1) f32
    b2 = b2_ref[0]                                          # scalar f32

    def ode_f(x):                                           # (Bb, Np) f32
        xb = x[:, None, :]                                  # (Bb, 1, Np)
        # fitness-MLP hidden layer: VPU (+EUP tanh) on the (Bb, H, Np) tile
        a = jnp.tanh(h_base + w1x * xb.astype(act_dtype))   # (Bb, H, Np)
        wa = w2 * a.astype(jnp.float32)                     # (Bb, H, Np) f32
        # hidden reduction over the (small) H axis: sublane reduce on VPU/XLU
        # instead of a 1-row MXU matmul (avoids MXU push+pop latency per eval).
        f = jnp.sum(wa, axis=1) + b2                        # (Bb, Np)
        # x.f reformulated so it contracts `a` directly instead of serially
        # waiting on f:  sum_n x*f = sum_{h,n} w2[h] a[h,n] x[n] + b2*sum_n x
        sx = jnp.sum(x, axis=-1, keepdims=True)             # (Bb, 1)
        xT = (jnp.sum(jnp.sum(wa * xb, axis=1), axis=-1, keepdims=True)
              + b2 * sx)                                    # (Bb, 1)
        return x * (f - xT)                                 # gate = Identity

    inv_sub = 1.0 / float(substeps)

    def interval(k, x):
        # scalar time bookkeeping from SMEM, once per interval (dynamic index)
        dt = (t_ref[k + 1] - t_ref[k]) * inv_sub
        half_dt = 0.5 * dt
        sixth_dt = dt * (1.0 / 6.0)

        def rk4_substep(_, xc):
            k1 = ode_f(xc)
            k2 = ode_f(xc + half_dt * k1)
            k3 = ode_f(xc + half_dt * k2)
            k4 = ode_f(xc + dt * k3)
            return xc + sixth_dt * (k1 + 2.0 * k2 + 2.0 * k3 + k4)

        x = lax.fori_loop(0, substeps, rk4_substep, x, unroll=unroll)
        y_ref[k] = x                                        # state at t[k+1]
        return x

    lax.fori_loop(0, n_intervals, interval, x0_ref[...])


def replicator_forward(t, x0, ids, embed_table, w1e, w1x, b1, w2, b2,
                       activation_dtype=None, substeps=RK4_SUBSTEPS,
                       batch_block=None):
    """Pallas forward; returns y of shape (T, B, N) with y[k] = state at t[k]."""
    B, N = x0.shape
    H = w1e.shape[0]
    T = int(t.shape[0])

    if activation_dtype is None:
        activation_dtype = (jnp.bfloat16 if _bf16_vector_units_available()
                            else jnp.float32)

    x0_f = x0.astype(jnp.float32)
    if T < 2:
        return x0_f[None]

    # ---- lane-dense species axis (pad N up to a multiple of 128) ------------
    n_pad = (-N) % 128
    Np = N + n_pad

    # ---- glue (constant wrt. the ODE): IdEmbedder lookup + the loop-invariant
    # part of the fitness MLP, hoisted to XLA so the kernel pipeline simply
    # prefetches the next batch block's h_base while the current one computes.
    emb = jnp.take(embed_table.astype(jnp.float32), ids, axis=0)      # (B, N, E)
    hb = (jnp.einsum('he,bne->bhn', w1e.astype(jnp.float32), emb)
          + b1.astype(jnp.float32)[None, :, None])                    # (B, H, N)
    hb = jnp.pad(hb, ((0, 0), (0, 0), (0, n_pad)))                    # (B, H, Np)
    x0_p = jnp.pad(x0_f, ((0, 0), (0, n_pad)))                        # (B, Np)

    # ---- batch blocking ------------------------------------------------------
    # Bb rows are integrated together inside one grid step.  Keep Bb == B for
    # small batches (block == full dim), otherwise a multiple of 8 so the
    # sublane-dim block stays layout-legal; the remaining grid axis over batch
    # blocks is "parallel" (shards across v7x's two TensorCores).
    if batch_block is None:
        batch_block = 8
    if B <= batch_block:
        Bb = B
    else:
        Bb = max(8, (batch_block // 8) * 8)
    nb = pl.cdiv(B, Bb)
    Bp = nb * Bb
    if Bp != B:           # zero-padded rows stay exactly 0 through x*(f - xT_fx)
        hb = jnp.pad(hb, ((0, Bp - B), (0, 0), (0, 0)))
        x0_p = jnp.pad(x0_p, ((0, Bp - B), (0, 0)))
    hb = hb.astype(activation_dtype)

    w_pack = jnp.stack([w1x.astype(jnp.float32),
                        w2.astype(jnp.float32)], axis=-1)              # (H, 2)
    t_k = t.astype(jnp.float32)
    b2_k = jnp.asarray(b2, jnp.float32).reshape(1)

    # ---- vreg-pressure guard for the RK4 substep unroll ----------------------
    itemsize = jnp.dtype(activation_dtype).itemsize
    act_tile_bytes = Bb * H * Np * itemsize
    unroll = substeps if act_tile_bytes <= (64 << 10) else 2

    # ---- VMEM budget / scheduler hints ---------------------------------------
    y_blk = (T - 1) * Bb * Np * 4
    hb_blk = Bb * H * Np * itemsize
    x0_blk = Bb * Np * 4
    w_blk = H * 128 * 4
    vmem_need = 2 * (y_blk + hb_blk + x0_blk + w_blk) + (2 << 20)
    # cap below v7x's 64 MiB/TC physical VMEM; never shrink below 32 MiB scoped
    vmem_limit = int(min(max(vmem_need, 32 << 20), 60 << 20))

    n_evals = Bp * (T - 1) * substeps * 4
    cost = pl.CostEstimate(
        flops=int(n_evals * (6 * H * Np + 4 * Np)),
        transcendentals=int(n_evals * H * Np),
        bytes_accessed=int(hb.size * itemsize + x0_p.size * 4
                           + (T - 1) * Bp * Np * 4 + T * 4),
    )

    kernel = functools.partial(replicator_ode_kernel,
                               act_dtype=activation_dtype,
                               substeps=substeps,
                               n_intervals=T - 1,
                               unroll=unroll)

    y_steps = pl.pallas_call(
        kernel,
        out_shape=jax.ShapeDtypeStruct((T - 1, Bp, Np), jnp.float32),
        grid_spec=pltpu.PrefetchScalarGridSpec(
            num_scalar_prefetch=0,
            grid=(nb,),                                    # batch blocks only
            in_specs=[
                pl.BlockSpec(memory_space=pltpu.MemorySpace.SMEM),   # t
                pl.BlockSpec(memory_space=pltpu.MemorySpace.SMEM),   # b2
                pl.BlockSpec((Bb, Np), lambda b: (b, 0)),            # x0
                pl.BlockSpec((Bb, H, Np), lambda b: (b, 0, 0)),      # h_base
                pl.BlockSpec((H, 2), lambda b: (0, 0)),              # [w1x | w2]
            ],
            out_specs=pl.BlockSpec((T - 1, Bb, Np), lambda b: (0, b, 0)),
        ),
        compiler_params=pltpu.CompilerParams(
            dimension_semantics=("parallel",),
            vmem_limit_bytes=vmem_limit),
        cost_estimate=cost,
    )(t_k, b2_k, x0_p, hb, w_pack)

    y = jnp.concatenate([x0_p[None], y_steps], axis=0)      # (T, Bp, Np)
    return y[:, :B, :N]                                     # (T, B, N)


def replicator_reference(t, x0, ids, embed_table, w1e, w1x, b1, w2, b2,
                         substeps=RK4_SUBSTEPS):
    """Pure-JAX reference mirroring the PyTorch forward (same fixed-step RK4)."""
    emb = embed_table[ids]                                   # (B, N, E)

    def fitness(x):
        z = jnp.einsum('bne,he->bnh', emb, w1e) + x[..., None] * w1x + b1
        return jnp.sum(jnp.tanh(z) * w2, axis=-1) + b2[0]

    def ode_f(x):
        f = fitness(x)
        xT_fx = jnp.sum(x * f, axis=-1, keepdims=True)
        return x * (f - xT_fx)

    ys = [x0]
    x = x0
    for k in range(t.shape[0] - 1):
        dt = (t[k + 1] - t[k]) / substeps
        for _ in range(substeps):
            k1 = ode_f(x)
            k2 = ode_f(x + 0.5 * dt * k1)
            k3 = ode_f(x + 0.5 * dt * k2)
            k4 = ode_f(x + dt * k3)
            x = x + (dt / 6.0) * (k1 + 2.0 * k2 + 2.0 * k3 + k4)
        ys.append(x)
    return jnp.stack(ys, axis=0)


if __name__ == "__main__":
    B, N, E, H, T = 2, 16, 8, 32, 5   # batch, species, embed_dim, hidden, times

    key = jax.random.PRNGKey(0)
    ks = jax.random.split(key, 10)

    # initial abundances on the simplex
    x0 = jax.nn.softmax(jax.random.normal(ks[0], (B, N)), axis=-1).astype(jnp.float32)
    ids = jnp.broadcast_to(jnp.arange(N, dtype=jnp.int32), (B, N))

    # deterministic synthetic parameters (IdEmbedder table + fitness MLP)
    embed_table = (0.1 * jax.random.normal(ks[1], (N, E))).astype(jnp.float32)
    w1e = (0.3 * jax.random.normal(ks[2], (H, E))).astype(jnp.float32)
    w1x = (0.3 * jax.random.normal(ks[3], (H,))).astype(jnp.float32)
    b1 = (0.1 * jax.random.normal(ks[4], (H,))).astype(jnp.float32)
    w2 = (0.3 * jax.random.normal(ks[5], (H,))).astype(jnp.float32)
    b2 = (0.1 * jax.random.normal(ks[6], (1,))).astype(jnp.float32)

    t = jnp.linspace(0.0, 1.0, T).astype(jnp.float32)

    # --- single batch block (Bb == B), f32 activations: correctness gate -----
    y_ref = replicator_reference(t, x0, ids, embed_table, w1e, w1x, b1, w2, b2)
    y = replicator_forward(t, x0, ids, embed_table, w1e, w1x, b1, w2, b2,
                           activation_dtype=jnp.float32)
    y = jax.block_until_ready(y)
    assert y.shape == (T, B, N)
    err = float(jnp.max(jnp.abs(y - y_ref)))
    assert jnp.allclose(y, y_ref, rtol=5e-3, atol=1e-3), f"max abs err {err}"

    # --- multi-block grid path (B > Bb, padded batch rows), f32 --------------
    B2 = 10
    x0_2 = jax.nn.softmax(jax.random.normal(ks[7], (B2, N)), axis=-1).astype(jnp.float32)
    ids_2 = jax.random.randint(ks[8], (B2, N), 0, N).astype(jnp.int32)
    y2_ref = replicator_reference(t, x0_2, ids_2, embed_table, w1e, w1x, b1, w2, b2)
    y2 = replicator_forward(t, x0_2, ids_2, embed_table, w1e, w1x, b1, w2, b2,
                            activation_dtype=jnp.float32, batch_block=8)
    y2 = jax.block_until_ready(y2)
    assert y2.shape == (T, B2, N)
    err2 = float(jnp.max(jnp.abs(y2 - y2_ref)))
    assert jnp.allclose(y2, y2_ref, rtol=5e-3, atol=1e-3), f"max abs err {err2}"

    # --- default path: bf16 activations on chips with bf16 vector units ------
    if _bf16_vector_units_available():
        y16 = replicator_forward(t, x0, ids, embed_table, w1e, w1x, b1, w2, b2)
        y16 = jax.block_until_ready(y16)
        err16 = float(jnp.max(jnp.abs(y16 - y_ref)))
        assert jnp.allclose(y16, y_ref, rtol=5e-2, atol=2e-2), (
            f"bf16 max abs err {err16}")

    print("KERNEL_OK")
</pallas_src>

<mosaic_0001>
module attributes {stable_mosaic.version = 11 : i64} {
  func.func @replicator_ode_kernel(%arg0: i32, %arg1: memref<5xf32, #tpu.memory_space<smem>>, %arg2: memref<1xf32, #tpu.memory_space<smem>>, %arg3: memref<2x128xf32, #tpu.memory_space<vmem>>, %arg4: memref<2x32x128xf32, #tpu.memory_space<vmem>>, %arg5: memref<32x2xf32, #tpu.memory_space<vmem>>, %arg6: memref<4x2x128xf32, #tpu.memory_space<vmem>>) attributes {dimension_semantics = [#tpu.dimension_semantics<parallel>], iteration_bounds = array<i64: 1>, scalar_prefetch = 0 : i64, scratch_operands = 0 : i64, tpu.core_type = #tpu.core_type<tc>, window_params = [{transform_indices = @transform_0, window_bounds = array<i64: 5>}, {transform_indices = @transform_1, window_bounds = array<i64: 1>}, {transform_indices = @transform_2, window_bounds = array<i64: 2, 128>}, {transform_indices = @transform_3, window_bounds = array<i64: 2, 32, 128>}, {pipeline_mode = #tpu.pipeline_mode<synchronous>, transform_indices = @transform_4, window_bounds = array<i64: 32, 2>}, {transform_indices = @transform_5, window_bounds = array<i64: 4, 2, 128>}]} {
    %c0 = arith.constant 0 : index
    %c0_0 = arith.constant 0 : index
    %c0_1 = arith.constant 0 : index
    %0 = vector.load %arg4[%c0, %c0_0, %c0_1] : memref<2x32x128xf32, #tpu.memory_space<vmem>>, vector<2x32x128xf32>
    %c0_2 = arith.constant 0 : index
    %c0_3 = arith.constant 0 : index
    %1 = vector.load %arg5[%c0_2, %c0_3] : memref<32x2xf32, #tpu.memory_space<vmem>>, vector<32x2xf32>
    %2 = vector.extract_strided_slice %1 {offsets = [0, 0], sizes = [32, 1], strides = [1, 1]} : vector<32x2xf32> to vector<32x1xf32>
    %3 = vector.shape_cast %2 : vector<32x1xf32> to vector<1x32x1xf32>
    %4 = vector.extract_strided_slice %1 {offsets = [0, 1], sizes = [32, 1], strides = [1, 1]} : vector<32x2xf32> to vector<32x1xf32>
    %5 = vector.shape_cast %4 : vector<32x1xf32> to vector<1x32x1xf32>
    %c0_4 = arith.constant 0 : index
    %6 = memref.load %arg2[%c0_4] : memref<1xf32, #tpu.memory_space<smem>>
    %c0_5 = arith.constant 0 : index
    %c0_6 = arith.constant 0 : index
    %7 = vector.load %arg3[%c0_5, %c0_6] : memref<2x128xf32, #tpu.memory_space<vmem>>, vector<2x128xf32>
    %c0_i32 = arith.constant 0 : i32
    %c4_i32 = arith.constant 4 : i32
    %8 = arith.addi %c0_i32, %c4_i32 : i32
    %c1_i32 = arith.constant 1 : i32
    %9 = scf.for %arg7 = %c0_i32 to %8 step %c1_i32 iter_args(%arg8 = %7) -> (vector<2x128xf32>)  : i32 {
      %c1_i32_8 = arith.constant 1 : i32
      %10 = arith.addi %arg7, %c1_i32_8 : i32
      %11 = arith.index_cast %10 : i32 to index
      %12 = memref.load %arg1[%11] : memref<5xf32, #tpu.memory_space<smem>>
      %13 = arith.index_cast %arg7 : i32 to index
      %14 = memref.load %arg1[%13] : memref<5xf32, #tpu.memory_space<smem>>
      %15 = arith.subf %12, %14 : f32
      %cst = arith.constant 1.250000e-01 : f32
      %16 = arith.mulf %15, %cst : f32
      %cst_9 = arith.constant 5.000000e-01 : f32
      %17 = arith.mulf %cst_9, %16 : f32
      %cst_10 = arith.constant 0.166666672 : f32
      %18 = arith.mulf %16, %cst_10 : f32
      %c0_i32_11 = arith.constant 0 : i32
      %19 = vector.shape_cast %arg8 : vector<2x128xf32> to vector<2x1x128xf32>
      %20 = vector.broadcast %3 : vector<1x32x1xf32> to vector<2x32x128xf32>
      %21 = vector.broadcast %19 : vector<2x1x128xf32> to vector<2x32x128xf32>
      %22 = arith.mulf %20, %21 : vector<2x32x128xf32>
      %23 = arith.addf %0, %22 : vector<2x32x128xf32>
      %24 = math.tanh %23 : vector<2x32x128xf32>
      %25 = vector.broadcast %5 : vector<1x32x1xf32> to vector<2x32x128xf32>
      %26 = arith.mulf %25, %24 : vector<2x32x128xf32>
      %cst_12 = arith.constant dense<0.000000e+00> : vector<2x128xf32>
      %27 = vector.multi_reduction <add>, %26, %cst_12 [1] : vector<2x32x128xf32> to vector<2x128xf32>
      %28 = vector.broadcast %6 : f32 to vector<2x128xf32>
      %29 = arith.addf %27, %28 : vector<2x128xf32>
      %cst_13 = arith.constant dense<0.000000e+00> : vector<2xf32>
      %30 = vector.multi_reduction <add>, %arg8, %cst_13 [1] : vector<2x128xf32> to vector<2xf32>
      %31 = vector.shape_cast %30 : vector<2xf32> to vector<2x1xf32>
      %32 = vector.broadcast %19 : vector<2x1x128xf32> to vector<2x32x128xf32>
      %33 = arith.mulf %26, %32 : vector<2x32x128xf32>
      %cst_14 = arith.constant dense<0.000000e+00> : vector<2x128xf32>
      %34 = vector.multi_reduction <add>, %33, %cst_14 [1] : vector<2x32x128xf32> to vector<2x128xf32>
      %cst_15 = arith.constant dense<0.000000e+00> : vector<2xf32>
      %35 = vector.multi_reduction <add>, %34, %cst_15 [1] : vector<2x128xf32> to vector<2xf32>
      %36 = vector.shape_cast %35 : vector<2xf32> to vector<2x1xf32>
      %37 = vector.broadcast %6 : f32 to vector<2x1xf32>
      %38 = arith.mulf %37, %31 : vector<2x1xf32>
      %39 = arith.addf %36, %38 : vector<2x1xf32>
      %40 = vector.broadcast %39 : vector<2x1xf32> to vector<2x128xf32>
      %41 = arith.subf %29, %40 : vector<2x128xf32>
      %42 = arith.mulf %arg8, %41 : vector<2x128xf32>
      %43 = vector.broadcast %17 : f32 to vector<2x128xf32>
      %44 = arith.mulf %43, %42 : vector<2x128xf32>
      %45 = arith.addf %arg8, %44 : vector<2x128xf32>
      %46 = vector.shape_cast %45 : vector<2x128xf32> to vector<2x1x128xf32>
      %47 = vector.broadcast %3 : vector<1x32x1xf32> to vector<2x32x128xf32>
      %48 = vector.broadcast %46 : vector<2x1x128xf32> to vector<2x32x128xf32>
      %49 = arith.mulf %47, %48 : vector<2x32x128xf32>
      %50 = arith.addf %0, %49 : vector<2x32x128xf32>
      %51 = math.tanh %50 : vector<2x32x128xf32>
      %52 = vector.broadcast %5 : vector<1x32x1xf32> to vector<2x32x128xf32>
      %53 = arith.mulf %52, %51 : vector<2x32x128xf32>
      %cst_16 = arith.constant dense<0.000000e+00> : vector<2x128xf32>
      %54 = vector.multi_reduction <add>, %53, %cst_16 [1] : vector<2x32x128xf32> to vector<2x128xf32>
      %55 = vector.broadcast %6 : f32 to vector<2x128xf32>
      %56 = arith.addf %54, %55 : vector<2x128xf32>
      %cst_17 = arith.constant dense<0.000000e+00> : vector<2xf32>
      %57 = vector.multi_reduction <add>, %45, %cst_17 [1] : vector<2x128xf32> to vector<2xf32>
      %58 = vector.shape_cast %57 : vector<2xf32> to vector<2x1xf32>
      %59 = vector.broadcast %46 : vector<2x1x128xf32> to vector<2x32x128xf32>
      %60 = arith.mulf %53, %59 : vector<2x32x128xf32>
      %cst_18 = arith.constant dense<0.000000e+00> : vector<2x128xf32>
      %61 = vector.multi_reduction <add>, %60, %cst_18 [1] : vector<2x32x128xf32> to vector<2x128xf32>
      %cst_19 = arith.constant dense<0.000000e+00> : vector<2xf32>
      %62 = vector.multi_reduction <add>, %61, %cst_19 [1] : vector<2x128xf32> to vector<2xf32>
      %63 = vector.shape_cast %62 : vector<2xf32> to vector<2x1xf32>
      %64 = vector.broadcast %6 : f32 to vector<2x1xf32>
      %65 = arith.mulf %64, %58 : vector<2x1xf32>
      %66 = arith.addf %63, %65 : vector<2x1xf32>
      %67 = vector.broadcast %66 : vector<2x1xf32> to vector<2x128xf32>
      %68 = arith.subf %56, %67 : vector<2x128xf32>
      %69 = arith.mulf %45, %68 : vector<2x128xf32>
      %70 = vector.broadcast %17 : f32 to vector<2x128xf32>
      %71 = arith.mulf %70, %69 : vector<2x128xf32>
      %72 = arith.addf %arg8, %71 : vector<2x128xf32>
      %73 = vector.shape_cast %72 : vector<2x128xf32> to vector<2x1x128xf32>
      %74 = vector.broadcast %3 : vector<1x32x1xf32> to vector<2x32x128xf32>
      %75 = vector.broadcast %73 : vector<2x1x128xf32> to vector<2x32x128xf32>
      %76 = arith.mulf %74, %75 : vector<2x32x128xf32>
      %77 = arith.addf %0, %76 : vector<2x32x128xf32>
      %78 = math.tanh %77 : vector<2x32x128xf32>
      %79 = vector.broadcast %5 : vector<1x32x1xf32> to vector<2x32x128xf32>
      %80 = arith.mulf %79, %78 : vector<2x32x128xf32>
      %cst_20 = arith.constant dense<0.000000e+00> : vector<2x128xf32>
      %81 = vector.multi_reduction <add>, %80, %cst_20 [1] : vector<2x32x128xf32> to vector<2x128xf32>
      %82 = vector.broadcast %6 : f32 to vector<2x128xf32>
      %83 = arith.addf %81, %82 : vector<2x128xf32>
      %cst_21 = arith.constant dense<0.000000e+00> : vector<2xf32>
      %84 = vector.multi_reduction <add>, %72, %cst_21 [1] : vector<2x128xf32> to vector<2xf32>
      %85 = vector.shape_cast %84 : vector<2xf32> to vector<2x1xf32>
      %86 = vector.broadcast %73 : vector<2x1x128xf32> to vector<2x32x128xf32>
      %87 = arith.mulf %80, %86 : vector<2x32x128xf32>
      %cst_22 = arith.constant dense<0.000000e+00> : vector<2x128xf32>
      %88 = vector.multi_reduction <add>, %87, %cst_22 [1] : vector<2x32x128xf32> to vector<2x128xf32>
      %cst_23 = arith.constant dense<0.000000e+00> : vector<2xf32>
      %89 = vector.multi_reduction <add>, %88, %cst_23 [1] : vector<2x128xf32> to vector<2xf32>
      %90 = vector.shape_cast %89 : vector<2xf32> to vector<2x1xf32>
      %91 = vector.broadcast %6 : f32 to vector<2x1xf32>
      %92 = arith.mulf %91, %85 : vector<2x1xf32>
      %93 = arith.addf %90, %92 : vector<2x1xf32>
      %94 = vector.broadcast %93 : vector<2x1xf32> to vector<2x128xf32>
      %95 = arith.subf %83, %94 : vector<2x128xf32>
      %96 = arith.mulf %72, %95 : vector<2x128xf32>
      %97 = vector.broadcast %16 : f32 to vector<2x128xf32>
      %98 = arith.mulf %97, %96 : vector<2x128xf32>
      %99 = arith.addf %arg8, %98 : vector<2x128xf32>
      %100 = vector.shape_cast %99 : vector<2x128xf32> to vector<2x1x128xf32>
      %101 = vector.broadcast %3 : vector<1x32x1xf32> to vector<2x32x128xf32>
      %102 = vector.broadcast %100 : vector<2x1x128xf32> to vector<2x32x128xf32>
      %103 = arith.mulf %101, %102 : vector<2x32x128xf32>
      %104 = arith.addf %0, %103 : vector<2x32x128xf32>
      %105 = math.tanh %104 : vector<2x32x128xf32>
      %106 = vector.broadcast %5 : vector<1x32x1xf32> to vector<2x32x128xf32>
      %107 = arith.mulf %106, %105 : vector<2x32x128xf32>
      %cst_24 = arith.constant dense<0.000000e+00> : vector<2x128xf32>
      %108 = vector.multi_reduction <add>, %107, %cst_24 [1] : vector<2x32x128xf32> to vector<2x128xf32>
      %109 = vector.broadcast %6 : f32 to vector<2x128xf32>
      %110 = arith.addf %108, %109 : vector<2x128xf32>
      %cst_25 = arith.constant dense<0.000000e+00> : vector<2xf32>
      %111 = vector.multi_reduction <add>, %99, %cst_25 [1] : vector<2x128xf32> to vector<2xf32>
      %112 = vector.shape_cast %111 : vector<2xf32> to vector<2x1xf32>
      %113 = vector.broadcast %100 : vector<2x1x128xf32> to vector<2x32x128xf32>
      %114 = arith.mulf %107, %113 : vector<2x32x128xf32>
      %cst_26 = arith.constant dense<0.000000e+00> : vector<2x128xf32>
      %115 = vector.multi_reduction <add>, %114, %cst_26 [1] : vector<2x32x128xf32> to vector<2x128xf32>
      %cst_27 = arith.constant dense<0.000000e+00> : vector<2xf32>
      %116 = vector.multi_reduction <add>, %115, %cst_27 [1] : vector<2x128xf32> to vector<2xf32>
      %117 = vector.shape_cast %116 : vector<2xf32> to vector<2x1xf32>
      %118 = vector.broadcast %6 : f32 to vector<2x1xf32>
      %119 = arith.mulf %118, %112 : vector<2x1xf32>
      %120 = arith.addf %117, %119 : vector<2x1xf32>
      %121 = vector.broadcast %120 : vector<2x1xf32> to vector<2x128xf32>
      %122 = arith.subf %110, %121 : vector<2x128xf32>
      %123 = arith.mulf %99, %122 : vector<2x128xf32>
      %cst_28 = arith.constant 2.000000e+00 : f32
      %124 = vector.broadcast %cst_28 : f32 to vector<2x128xf32>
      %125 = arith.mulf %124, %69 : vector<2x128xf32>
      %126 = arith.addf %42, %125 : vector<2x128xf32>
      %cst_29 = arith.constant 2.000000e+00 : f32
      %127 = vector.broadcast %cst_29 : f32 to vector<2x128xf32>
      %128 = arith.mulf %127, %96 : vector<2x128xf32>
      %129 = arith.addf %126, %128 : vector<2x128xf32>
      %130 = arith.addf %129, %123 : vector<2x128xf32>
      %131 = vector.broadcast %18 : f32 to vector<2x128xf32>
      %132 = arith.mulf %131, %130 : vector<2x128xf32>
      %133 = arith.addf %arg8, %132 : vector<2x128xf32>
      %c1_i32_30 = arith.constant 1 : i32
      %134 = vector.shape_cast %133 : vector<2x128xf32> to vector<2x1x128xf32>
      %135 = vector.broadcast %3 : vector<1x32x1xf32> to vector<2x32x128xf32>
      %136 = vector.broadcast %134 : vector<2x1x128xf32> to vector<2x32x128xf32>
      %137 = arith.mulf %135, %136 : vector<2x32x128xf32>
      %138 = arith.addf %0, %137 : vector<2x32x128xf32>
      %139 = math.tanh %138 : vector<2x32x128xf32>
      %140 = vector.broadcast %5 : vector<1x32x1xf32> to vector<2x32x128xf32>
      %141 = arith.mulf %140, %139 : vector<2x32x128xf32>
      %cst_31 = arith.constant dense<0.000000e+00> : vector<2x128xf32>
      %142 = vector.multi_reduction <add>, %141, %cst_31 [1] : vector<2x32x128xf32> to vector<2x128xf32>
      %143 = vector.broadcast %6 : f32 to vector<2x128xf32>
      %144 = arith.addf %142, %143 : vector<2x128xf32>
      %cst_32 = arith.constant dense<0.000000e+00> : vector<2xf32>
      %145 = vector.multi_reduction <add>, %133, %cst_32 [1] : vector<2x128xf32> to vector<2xf32>
      %146 = vector.shape_cast %145 : vector<2xf32> to vector<2x1xf32>
      %147 = vector.broadcast %134 : vector<2x1x128xf32> to vector<2x32x128xf32>
      %148 = arith.mulf %141, %147 : vector<2x32x128xf32>
      %cst_33 = arith.constant dense<0.000000e+00> : vector<2x128xf32>
      %149 = vector.multi_reduction <add>, %148, %cst_33 [1] : vector<2x32x128xf32> to vector<2x128xf32>
      %cst_34 = arith.constant dense<0.000000e+00> : vector<2xf32>
      %150 = vector.multi_reduction <add>, %149, %cst_34 [1] : vector<2x128xf32> to vector<2xf32>
      %151 = vector.shape_cast %150 : vector<2xf32> to vector<2x1xf32>
      %152 = vector.broadcast %6 : f32 to vector<2x1xf32>
      %153 = arith.mulf %152, %146 : vector<2x1xf32>
      %154 = arith.addf %151, %153 : vector<2x1xf32>
      %155 = vector.broadcast %154 : vector<2x1xf32> to vector<2x128xf32>
      %156 = arith.subf %144, %155 : vector<2x128xf32>
      %157 = arith.mulf %133, %156 : vector<2x128xf32>
      %158 = vector.broadcast %17 : f32 to vector<2x128xf32>
      %159 = arith.mulf %158, %157 : vector<2x128xf32>
      %160 = arith.addf %133, %159 : vector<2x128xf32>
      %161 = vector.shape_cast %160 : vector<2x128xf32> to vector<2x1x128xf32>
      %162 = vector.broadcast %3 : vector<1x32x1xf32> to vector<2x32x128xf32>
      %163 = vector.broadcast %161 : vector<2x1x128xf32> to vector<2x32x128xf32>
      %164 = arith.mulf %162, %163 : vector<2x32x128xf32>
      %165 = arith.addf %0, %164 : vector<2x32x128xf32>
      %166 = math.tanh %165 : vector<2x32x128xf32>
      %167 = vector.broadcast %5 : vector<1x32x1xf32> to vector<2x32x128xf32>
      %168 = arith.mulf %167, %166 : vector<2x32x128xf32>
      %cst_35 = arith.constant dense<0.000000e+00> : vector<2x128xf32>
      %169 = vector.multi_reduction <add>, %168, %cst_35 [1] : vector<2x32x128xf32> to vector<2x128xf32>
      %170 = vector.broadcast %6 : f32 to vector<2x128xf32>
      %171 = arith.addf %169, %170 : vector<2x128xf32>
      %cst_36 = arith.constant dense<0.000000e+00> : vector<2xf32>
      %172 = vector.multi_reduction <add>, %160, %cst_36 [1] : vector<2x128xf32> to vector<2xf32>
      %173 = vector.shape_cast %172 : vector<2xf32> to vector<2x1xf32>
      %174 = vector.broadcast %161 : vector<2x1x128xf32> to vector<2x32x128xf32>
      %175 = arith.mulf %168, %174 : vector<2x32x128xf32>
      %cst_37 = arith.constant dense<0.000000e+00> : vector<2x128xf32>
      %176 = vector.multi_reduction <add>, %175, %cst_37 [1] : vector<2x32x128xf32> to vector<2x128xf32>
      %cst_38 = arith.constant dense<0.000000e+00> : vector<2xf32>
      %177 = vector.multi_reduction <add>, %176, %cst_38 [1] : vector<2x128xf32> to vector<2xf32>
      %178 = vector.shape_cast %177 : vector<2xf32> to vector<2x1xf32>
      %179 = vector.broadcast %6 : f32 to vector<2x1xf32>
      %180 = arith.mulf %179, %173 : vector<2x1xf32>
      %181 = arith.addf %178, %180 : vector<2x1xf32>
      %182 = vector.broadcast %181 : vector<2x1xf32> to vector<2x128xf32>
      %183 = arith.subf %171, %182 : vector<2x128xf32>
      %184 = arith.mulf %160, %183 : vector<2x128xf32>
      %185 = vector.broadcast %17 : f32 to vector<2x128xf32>
      %186 = arith.mulf %185, %184 : vector<2x128xf32>
      %187 = arith.addf %133, %186 : vector<2x128xf32>
      %188 = vector.shape_cast %187 : vector<2x128xf32> to vector<2x1x128xf32>
      %189 = vector.broadcast %3 : vector<1x32x1xf32> to vector<2x32x128xf32>
      %190 = vector.broadcast %188 : vector<2x1x128xf32> to vector<2x32x128xf32>
      %191 = arith.mulf %189, %190 : vector<2x32x128xf32>
      %192 = arith.addf %0, %191 : vector<2x32x128xf32>
      %193 = math.tanh %192 : vector<2x32x128xf32>
      %194 = vector.broadcast %5 : vector<1x32x1xf32> to vector<2x32x128xf32>
      %195 = arith.mulf %194, %193 : vector<2x32x128xf32>
      %cst_39 = arith.constant dense<0.000000e+00> : vector<2x128xf32>
      %196 = vector.multi_reduction <add>, %195, %cst_39 [1] : vector<2x32x128xf32> to vector<2x128xf32>
      %197 = vector.broadcast %6 : f32 to vector<2x128xf32>
      %198 = arith.addf %196, %197 : vector<2x128xf32>
      %cst_40 = arith.constant dense<0.000000e+00> : vector<2xf32>
      %199 = vector.multi_reduction <add>, %187, %cst_40 [1] : vector<2x128xf32> to vector<2xf32>
      %200 = vector.shape_cast %199 : vector<2xf32> to vector<2x1xf32>
      %201 = vector.broadcast %188 : vector<2x1x128xf32> to vector<2x32x128xf32>
      %202 = arith.mulf %195, %201 : vector<2x32x128xf32>
      %cst_41 = arith.constant dense<0.000000e+00> : vector<2x128xf32>
      %203 = vector.multi_reduction <add>, %202, %cst_41 [1] : vector<2x32x128xf32> to vector<2x128xf32>
      %cst_42 = arith.constant dense<0.000000e+00> : vector<2xf32>
      %204 = vector.multi_reduction <add>, %203, %cst_42 [1] : vector<2x128xf32> to vector<2xf32>
      %205 = vector.shape_cast %204 : vector<2xf32> to vector<2x1xf32>
      %206 = vector.broadcast %6 : f32 to vector<2x1xf32>
      %207 = arith.mulf %206, %200 : vector<2x1xf32>
      %208 = arith.addf %205, %207 : vector<2x1xf32>
      %209 = vector.broadcast %208 : vector<2x1xf32> to vector<2x128xf32>
      %210 = arith.subf %198, %209 : vector<2x128xf32>
      %211 = arith.mulf %187, %210 : vector<2x128xf32>
      %212 = vector.broadcast %16 : f32 to vector<2x128xf32>
      %213 = arith.mulf %212, %211 : vector<2x128xf32>
      %214 = arith.addf %133, %213 : vector<2x128xf32>
      %215 = vector.shape_cast %214 : vector<2x128xf32> to vector<2x1x128xf32>
      %216 = vector.broadcast %3 : vector<1x32x1xf32> to vector<2x32x128xf32>
      %217 = vector.broadcast %215 : vector<2x1x128xf32> to vector<2x32x128xf32>
      %218 = arith.mulf %216, %217 : vector<2x32x128xf32>
      %219 = arith.addf %0, %218 : vector<2x32x128xf32>
      %220 = math.tanh %219 : vector<2x32x128xf32>
      %221 = vector.broadcast %5 : vector<1x32x1xf32> to vector<2x32x128xf32>
      %222 = arith.mulf %221, %220 : vector<2x32x128xf32>
      %cst_43 = arith.constant dense<0.000000e+00> : vector<2x128xf32>
      %223 = vector.multi_reduction <add>, %222, %cst_43 [1] : vector<2x32x128xf32> to vector<2x128xf32>
      %224 = vector.broadcast %6 : f32 to vector<2x128xf32>
      %225 = arith.addf %223, %224 : vector<2x128xf32>
      %cst_44 = arith.constant dense<0.000000e+00> : vector<2xf32>
      %226 = vector.multi_reduction <add>, %214, %cst_44 [1] : vector<2x128xf32> to vector<2xf32>
      %227 = vector.shape_cast %226 : vector<2xf32> to vector<2x1xf32>
      %228 = vector.broadcast %215 : vector<2x1x128xf32> to vector<2x32x128xf32>
      %229 = arith.mulf %222, %228 : vector<2x32x128xf32>
      %cst_45 = arith.constant dense<0.000000e+00> : vector<2x128xf32>
      %230 = vector.multi_reduction <add>, %229, %cst_45 [1] : vector<2x32x128xf32> to vector<2x128xf32>
      %cst_46 = arith.constant dense<0.000000e+00> : vector<2xf32>
      %231 = vector.multi_reduction <add>, %230, %cst_46 [1] : vector<2x128xf32> to vector<2xf32>
      %232 = vector.shape_cast %231 : vector<2xf32> to vector<2x1xf32>
      %233 = vector.broadcast %6 : f32 to vector<2x1xf32>
      %234 = arith.mulf %233, %227 : vector<2x1xf32>
      %235 = arith.addf %232, %234 : vector<2x1xf32>
      %236 = vector.broadcast %235 : vector<2x1xf32> to vector<2x128xf32>
      %237 = arith.subf %225, %236 : vector<2x128xf32>
      %238 = arith.mulf %214, %237 : vector<2x128xf32>
      %cst_47 = arith.constant 2.000000e+00 : f32
      %239 = vector.broadcast %cst_47 : f32 to vector<2x128xf32>
      %240 = arith.mulf %239, %184 : vector<2x128xf32>
      %241 = arith.addf %157, %240 : vector<2x128xf32>
      %cst_48 = arith.constant 2.000000e+00 : f32
      %242 = vector.broadcast %cst_48 : f32 to vector<2x128xf32>
      %243 = arith.mulf %242, %211 : vector<2x128xf32>
      %244 = arith.addf %241, %243 : vector<2x128xf32>
      %245 = arith.addf %244, %238 : vector<2x128xf32>
      %246 = vector.broadcast %18 : f32 to vector<2x128xf32>
      %247 = arith.mulf %246, %245 : vector<2x128xf32>
      %248 = arith.addf %133, %247 : vector<2x128xf32>
      %c2_i32 = arith.constant 2 : i32
      %249 = vector.shape_cast %248 : vector<2x128xf32> to vector<2x1x128xf32>
      %250 = vector.broadcast %3 : vector<1x32x1xf32> to vector<2x32x128xf32>
      %251 = vector.broadcast %249 : vector<2x1x128xf32> to vector<2x32x128xf32>
      %252 = arith.mulf %250, %251 : vector<2x32x128xf32>
      %253 = arith.addf %0, %252 : vector<2x32x128xf32>
      %254 = math.tanh %253 : vector<2x32x128xf32>
      %255 = vector.broadcast %5 : vector<1x32x1xf32> to vector<2x32x128xf32>
      %256 = arith.mulf %255, %254 : vector<2x32x128xf32>
      %cst_49 = arith.constant dense<0.000000e+00> : vector<2x128xf32>
      %257 = vector.multi_reduction <add>, %256, %cst_49 [1] : vector<2x32x128xf32> to vector<2x128xf32>
      %258 = vector.broadcast %6 : f32 to vector<2x128xf32>
      %259 = arith.addf %257, %258 : vector<2x128xf32>
      %cst_50 = arith.constant dense<0.000000e+00> : vector<2xf32>
      %260 = vector.multi_reduction <add>, %248, %cst_50 [1] : vector<2x128xf32> to vector<2xf32>
      %261 = vector.shape_cast %260 : vector<2xf32> to vector<2x1xf32>
      %262 = vector.broadcast %249 : vector<2x1x128xf32> to vector<2x32x128xf32>
      %263 = arith.mulf %256, %262 : vector<2x32x128xf32>
      %cst_51 = arith.constant dense<0.000000e+00> : vector<2x128xf32>
      %264 = vector.multi_reduction <add>, %263, %cst_51 [1] : vector<2x32x128xf32> to vector<2x128xf32>
      %cst_52 = arith.constant dense<0.000000e+00> : vector<2xf32>
      %265 = vector.multi_reduction <add>, %264, %cst_52 [1] : vector<2x128xf32> to vector<2xf32>
      %266 = vector.shape_cast %265 : vector<2xf32> to vector<2x1xf32>
      %267 = vector.broadcast %6 : f32 to vector<2x1xf32>
      %268 = arith.mulf %267, %261 : vector<2x1xf32>
      %269 = arith.addf %266, %268 : vector<2x1xf32>
      %270 = vector.broadcast %269 : vector<2x1xf32> to vector<2x128xf32>
      %271 = arith.subf %259, %270 : vector<2x128xf32>
      %272 = arith.mulf %248, %271 : vector<2x128xf32>
      %273 = vector.broadcast %17 : f32 to vector<2x128xf32>
      %274 = arith.mulf %273, %272 : vector<2x128xf32>
      %275 = arith.addf %248, %274 : vector<2x128xf32>
      %276 = vector.shape_cast %275 : vector<2x128xf32> to vector<2x1x128xf32>
      %277 = vector.broadcast %3 : vector<1x32x1xf32> to vector<2x32x128xf32>
      %278 = vector.broadcast %276 : vector<2x1x128xf32> to vector<2x32x128xf32>
      %279 = arith.mulf %277, %278 : vector<2x32x128xf32>
      %280 = arith.addf %0, %279 : vector<2x32x128xf32>
      %281 = math.tanh %280 : vector<2x32x128xf32>
      %282 = vector.broadcast %5 : vector<1x32x1xf32> to vector<2x32x128xf32>
      %283 = arith.mulf %282, %281 : vector<2x32x128xf32>
      %cst_53 = arith.constant dense<0.000000e+00> : vector<2x128xf32>
      %284 = vector.multi_reduction <add>, %283, %cst_53 [1] : vector<2x32x128xf32> to vector<2x128xf32>
      %285 = vector.broadcast %6 : f32 to vector<2x128xf32>
      %286 = arith.addf %284, %285 : vector<2x128xf32>
      %cst_54 = arith.constant dense<0.000000e+00> : vector<2xf32>
      %287 = vector.multi_reduction <add>, %275, %cst_54 [1] : vector<2x128xf32> to vector<2xf32>
      %288 = vector.shape_cast %287 : vector<2xf32> to vector<2x1xf32>
      %289 = vector.broadcast %276 : vector<2x1x128xf32> to vector<2x32x128xf32>
      %290 = arith.mulf %283, %289 : vector<2x32x128xf32>
      %cst_55 = arith.constant dense<0.000000e+00> : vector<2x128xf32>
      %291 = vector.multi_reduction <add>, %290, %cst_55 [1] : vector<2x32x128xf32> to vector<2x128xf32>
      %cst_56 = arith.constant dense<0.000000e+00> : vector<2xf32>
      %292 = vector.multi_reduction <add>, %291, %cst_56 [1] : vector<2x128xf32> to vector<2xf32>
      %293 = vector.shape_cast %292 : vector<2xf32> to vector<2x1xf32>
      %294 = vector.broadcast %6 : f32 to vector<2x1xf32>
      %295 = arith.mulf %294, %288 : vector<2x1xf32>
      %296 = arith.addf %293, %295 : vector<2x1xf32>
      %297 = vector.broadcast %296 : vector<2x1xf32> to vector<2x128xf32>
      %298 = arith.subf %286, %297 : vector<2x128xf32>
      %299 = arith.mulf %275, %298 : vector<2x128xf32>
      %300 = vector.broadcast %17 : f32 to vector<2x128xf32>
      %301 = arith.mulf %300, %299 : vector<2x128xf32>
      %302 = arith.addf %248, %301 : vector<2x128xf32>
      %303 = vector.shape_cast %302 : vector<2x128xf32> to vector<2x1x128xf32>
      %304 = vector.broadcast %3 : vector<1x32x1xf32> to vector<2x32x128xf32>
      %305 = vector.broadcast %303 : vector<2x1x128xf32> to vector<2x32x128xf32>
      %306 = arith.mulf %304, %305 : vector<2x32x128xf32>
      %307 = arith.addf %0, %306 : vector<2x32x128xf32>
      %308 = math.tanh %307 : vector<2x32x128xf32>
      %309 = vector.broadcast %5 : vector<1x32x1xf32> to vector<2x32x128xf32>
      %310 = arith.mulf %309, %308 : vector<2x32x128xf32>
      %cst_57 = arith.constant dense<0.000000e+00> : vector<2x128xf32>
      %311 = vector.multi_reduction <add>, %310, %cst_57 [1] : vector<2x32x128xf32> to vector<2x128xf32>
      %312 = vector.broadcast %6 : f32 to vector<2x128xf32>
      %313 = arith.addf %311, %312 : vector<2x128xf32>
      %cst_58 = arith.constant dense<0.000000e+00> : vector<2xf32>
      %314 = vector.multi_reduction <add>, %302, %cst_58 [1] : vector<2x128xf32> to vector<2xf32>
      %315 = vector.shape_cast %314 : vector<2xf32> to vector<2x1xf32>
      %316 = vector.broadcast %303 : vector<2x1x128xf32> to vector<2x32x128xf32>
      %317 = arith.mulf %310, %316 : vector<2x32x128xf32>
      %cst_59 = arith.constant dense<0.000000e+00> : vector<2x128xf32>
      %318 = vector.multi_reduction <add>, %317, %cst_59 [1] : vector<2x32x128xf32> to vector<2x128xf32>
      %cst_60 = arith.constant dense<0.000000e+00> : vector<2xf32>
      %319 = vector.multi_reduction <add>, %318, %cst_60 [1] : vector<2x128xf32> to vector<2xf32>
      %320 = vector.shape_cast %319 : vector<2xf32> to vector<2x1xf32>
      %321 = vector.broadcast %6 : f32 to vector<2x1xf32>
      %322 = arith.mulf %321, %315 : vector<2x1xf32>
      %323 = arith.addf %320, %322 : vector<2x1xf32>
      %324 = vector.broadcast %323 : vector<2x1xf32> to vector<2x128xf32>
      %325 = arith.subf %313, %324 : vector<2x128xf32>
      %326 = arith.mulf %302, %325 : vector<2x128xf32>
      %327 = vector.broadcast %16 : f32 to vector<2x128xf32>
      %328 = arith.mulf %327, %326 : vector<2x128xf32>
      %329 = arith.addf %248, %328 : vector<2x128xf32>
      %330 = vector.shape_cast %329 : vector<2x128xf32> to vector<2x1x128xf32>
      %331 = vector.broadcast %3 : vector<1x32x1xf32> to vector<2x32x128xf32>
      %332 = vector.broadcast %330 : vector<2x1x128xf32> to vector<2x32x128xf32>
      %333 = arith.mulf %331, %332 : vector<2x32x128xf32>
      %334 = arith.addf %0, %333 : vector<2x32x128xf32>
      %335 = math.tanh %334 : vector<2x32x128xf32>
      %336 = vector.broadcast %5 : vector<1x32x1xf32> to vector<2x32x128xf32>
      %337 = arith.mulf %336, %335 : vector<2x32x128xf32>
      %cst_61 = arith.constant dense<0.000000e+00> : vector<2x128xf32>
      %338 = vector.multi_reduction <add>, %337, %cst_61 [1] : vector<2x32x128xf32> to vector<2x128xf32>
      %339 = vector.broadcast %6 : f32 to vector<2x128xf32>
      %340 = arith.addf %338, %339 : vector<2x128xf32>
      %cst_62 = arith.constant dense<0.000000e+00> : vector<2xf32>
      %341 = vector.multi_reduction <add>, %329, %cst_62 [1] : vector<2x128xf32> to vector<2xf32>
      %342 = vector.shape_cast %341 : vector<2xf32> to vector<2x1xf32>
      %343 = vector.broadcast %330 : vector<2x1x128xf32> to vector<2x32x128xf32>
      %344 = arith.mulf %337, %343 : vector<2x32x128xf32>
      %cst_63 = arith.constant dense<0.000000e+00> : vector<2x128xf32>
      %345 = vector.multi_reduction <add>, %344, %cst_63 [1] : vector<2x32x128xf32> to vector<2x128xf32>
      %cst_64 = arith.constant dense<0.000000e+00> : vector<2xf32>
      %346 = vector.multi_reduction <add>, %345, %cst_64 [1] : vector<2x128xf32> to vector<2xf32>
      %347 = vector.shape_cast %346 : vector<2xf32> to vector<2x1xf32>
      %348 = vector.broadcast %6 : f32 to vector<2x1xf32>
      %349 = arith.mulf %348, %342 : vector<2x1xf32>
      %350 = arith.addf %347, %349 : vector<2x1xf32>
      %351 = vector.broadcast %350 : vector<2x1xf32> to vector<2x128xf32>
      %352 = arith.subf %340, %351 : vector<2x128xf32>
      %353 = arith.mulf %329, %352 : vector<2x128xf32>
      %cst_65 = arith.constant 2.000000e+00 : f32
      %354 = vector.broadcast %cst_65 : f32 to vector<2x128xf32>
      %355 = arith.mulf %354, %299 : vector<2x128xf32>
      %356 = arith.addf %272, %355 : vector<2x128xf32>
      %cst_66 = arith.constant 2.000000e+00 : f32
      %357 = vector.broadcast %cst_66 : f32 to vector<2x128xf32>
      %358 = arith.mulf %357, %326 : vector<2x128xf32>
      %359 = arith.addf %356, %358 : vector<2x128xf32>
      %360 = arith.addf %359, %353 : vector<2x128xf32>
      %361 = vector.broadcast %18 : f32 to vector<2x128xf32>
      %362 = arith.mulf %361, %360 : vector<2x128xf32>
      %363 = arith.addf %248, %362 : vector<2x128xf32>
      %c3_i32 = arith.constant 3 : i32
      %364 = vector.shape_cast %363 : vector<2x128xf32> to vector<2x1x128xf32>
      %365 = vector.broadcast %3 : vector<1x32x1xf32> to vector<2x32x128xf32>
      %366 = vector.broadcast %364 : vector<2x1x128xf32> to vector<2x32x128xf32>
      %367 = arith.mulf %365, %366 : vector<2x32x128xf32>
      %368 = arith.addf %0, %367 : vector<2x32x128xf32>
      %369 = math.tanh %368 : vector<2x32x128xf32>
      %370 = vector.broadcast %5 : vector<1x32x1xf32> to vector<2x32x128xf32>
      %371 = arith.mulf %370, %369 : vector<2x32x128xf32>
      %cst_67 = arith.constant dense<0.000000e+00> : vector<2x128xf32>
      %372 = vector.multi_reduction <add>, %371, %cst_67 [1] : vector<2x32x128xf32> to vector<2x128xf32>
      %373 = vector.broadcast %6 : f32 to vector<2x128xf32>
      %374 = arith.addf %372, %373 : vector<2x128xf32>
      %cst_68 = arith.constant dense<0.000000e+00> : vector<2xf32>
      %375 = vector.multi_reduction <add>, %363, %cst_68 [1] : vector<2x128xf32> to vector<2xf32>
      %376 = vector.shape_cast %375 : vector<2xf32> to vector<2x1xf32>
      %377 = vector.broadcast %364 : vector<2x1x128xf32> to vector<2x32x128xf32>
      %378 = arith.mulf %371, %377 : vector<2x32x128xf32>
      %cst_69 = arith.constant dense<0.000000e+00> : vector<2x128xf32>
      %379 = vector.multi_reduction <add>, %378, %cst_69 [1] : vector<2x32x128xf32> to vector<2x128xf32>
      %cst_70 = arith.constant dense<0.000000e+00> : vector<2xf32>
      %380 = vector.multi_reduction <add>, %379, %cst_70 [1] : vector<2x128xf32> to vector<2xf32>
      %381 = vector.shape_cast %380 : vector<2xf32> to vector<2x1xf32>
      %382 = vector.broadcast %6 : f32 to vector<2x1xf32>
      %383 = arith.mulf %382, %376 : vector<2x1xf32>
      %384 = arith.addf %381, %383 : vector<2x1xf32>
      %385 = vector.broadcast %384 : vector<2x1xf32> to vector<2x128xf32>
      %386 = arith.subf %374, %385 : vector<2x128xf32>
      %387 = arith.mulf %363, %386 : vector<2x128xf32>
      %388 = vector.broadcast %17 : f32 to vector<2x128xf32>
      %389 = arith.mulf %388, %387 : vector<2x128xf32>
      %390 = arith.addf %363, %389 : vector<2x128xf32>
      %391 = vector.shape_cast %390 : vector<2x128xf32> to vector<2x1x128xf32>
      %392 = vector.broadcast %3 : vector<1x32x1xf32> to vector<2x32x128xf32>
      %393 = vector.broadcast %391 : vector<2x1x128xf32> to vector<2x32x128xf32>
      %394 = arith.mulf %392, %393 : vector<2x32x128xf32>
      %395 = arith.addf %0, %394 : vector<2x32x128xf32>
      %396 = math.tanh %395 : vector<2x32x128xf32>
      %397 = vector.broadcast %5 : vector<1x32x1xf32> to vector<2x32x128xf32>
      %398 = arith.mulf %397, %396 : vector<2x32x128xf32>
      %cst_71 = arith.constant dense<0.000000e+00> : vector<2x128xf32>
      %399 = vector.multi_reduction <add>, %398, %cst_71 [1] : vector<2x32x128xf32> to vector<2x128xf32>
      %400 = vector.broadcast %6 : f32 to vector<2x128xf32>
      %401 = arith.addf %399, %400 : vector<2x128xf32>
      %cst_72 = arith.constant dense<0.000000e+00> : vector<2xf32>
      %402 = vector.multi_reduction <add>, %390, %cst_72 [1] : vector<2x128xf32> to vector<2xf32>
      %403 = vector.shape_cast %402 : vector<2xf32> to vector<2x1xf32>
      %404 = vector.broadcast %391 : vector<2x1x128xf32> to vector<2x32x128xf32>
      %405 = arith.mulf %398, %404 : vector<2x32x128xf32>
      %cst_73 = arith.constant dense<0.000000e+00> : vector<2x128xf32>
      %406 = vector.multi_reduction <add>, %405, %cst_73 [1] : vector<2x32x128xf32> to vector<2x128xf32>
      %cst_74 = arith.constant dense<0.000000e+00> : vector<2xf32>
      %407 = vector.multi_reduction <add>, %406, %cst_74 [1] : vector<2x128xf32> to vector<2xf32>
      %408 = vector.shape_cast %407 : vector<2xf32> to vector<2x1xf32>
      %409 = vector.broadcast %6 : f32 to vector<2x1xf32>
      %410 = arith.mulf %409, %403 : vector<2x1xf32>
      %411 = arith.addf %408, %410 : vector<2x1xf32>
      %412 = vector.broadcast %411 : vector<2x1xf32> to vector<2x128xf32>
      %413 = arith.subf %401, %412 : vector<2x128xf32>
      %414 = arith.mulf %390, %413 : vector<2x128xf32>
      %415 = vector.broadcast %17 : f32 to vector<2x128xf32>
      %416 = arith.mulf %415, %414 : vector<2x128xf32>
      %417 = arith.addf %363, %416 : vector<2x128xf32>
      %418 = vector.shape_cast %417 : vector<2x128xf32> to vector<2x1x128xf32>
      %419 = vector.broadcast %3 : vector<1x32x1xf32> to vector<2x32x128xf32>
      %420 = vector.broadcast %418 : vector<2x1x128xf32> to vector<2x32x128xf32>
      %421 = arith.mulf %419, %420 : vector<2x32x128xf32>
      %422 = arith.addf %0, %421 : vector<2x32x128xf32>
      %423 = math.tanh %422 : vector<2x32x128xf32>
      %424 = vector.broadcast %5 : vector<1x32x1xf32> to vector<2x32x128xf32>
      %425 = arith.mulf %424, %423 : vector<2x32x128xf32>
      %cst_75 = arith.constant dense<0.000000e+00> : vector<2x128xf32>
      %426 = vector.multi_reduction <add>, %425, %cst_75 [1] : vector<2x32x128xf32> to vector<2x128xf32>
      %427 = vector.broadcast %6 : f32 to vector<2x128xf32>
      %428 = arith.addf %426, %427 : vector<2x128xf32>
      %cst_76 = arith.constant dense<0.000000e+00> : vector<2xf32>
      %429 = vector.multi_reduction <add>, %417, %cst_76 [1] : vector<2x128xf32> to vector<2xf32>
      %430 = vector.shape_cast %429 : vector<2xf32> to vector<2x1xf32>
      %431 = vector.broadcast %418 : vector<2x1x128xf32> to vector<2x32x128xf32>
      %432 = arith.mulf %425, %431 : vector<2x32x128xf32>
      %cst_77 = arith.constant dense<0.000000e+00> : vector<2x128xf32>
      %433 = vector.multi_reduction <add>, %432, %cst_77 [1] : vector<2x32x128xf32> to vector<2x128xf32>
      %cst_78 = arith.constant dense<0.000000e+00> : vector<2xf32>
      %434 = vector.multi_reduction <add>, %433, %cst_78 [1] : vector<2x128xf32> to vector<2xf32>
      %435 = vector.shape_cast %434 : vector<2xf32> to vector<2x1xf32>
      %436 = vector.broadcast %6 : f32 to vector<2x1xf32>
      %437 = arith.mulf %436, %430 : vector<2x1xf32>
      %438 = arith.addf %435, %437 : vector<2x1xf32>
      %439 = vector.broadcast %438 : vector<2x1xf32> to vector<2x128xf32>
      %440 = arith.subf %428, %439 : vector<2x128xf32>
      %441 = arith.mulf %417, %440 : vector<2x128xf32>
      %442 = vector.broadcast %16 : f32 to vector<2x128xf32>
      %443 = arith.mulf %442, %441 : vector<2x128xf32>
      %444 = arith.addf %363, %443 : vector<2x128xf32>
      %445 = vector.shape_cast %444 : vector<2x128xf32> to vector<2x1x128xf32>
      %446 = vector.broadcast %3 : vector<1x32x1xf32> to vector<2x32x128xf32>
      %447 = vector.broadcast %445 : vector<2x1x128xf32> to vector<2x32x128xf32>
      %448 = arith.mulf %446, %447 : vector<2x32x128xf32>
      %449 = arith.addf %0, %448 : vector<2x32x128xf32>
      %450 = math.tanh %449 : vector<2x32x128xf32>
      %451 = vector.broadcast %5 : vector<1x32x1xf32> to vector<2x32x128xf32>
      %452 = arith.mulf %451, %450 : vector<2x32x128xf32>
      %cst_79 = arith.constant dense<0.000000e+00> : vector<2x128xf32>
      %453 = vector.multi_reduction <add>, %452, %cst_79 [1] : vector<2x32x128xf32> to vector<2x128xf32>
      %454 = vector.broadcast %6 : f32 to vector<2x128xf32>
      %455 = arith.addf %453, %454 : vector<2x128xf32>
      %cst_80 = arith.constant dense<0.000000e+00> : vector<2xf32>
      %456 = vector.multi_reduction <add>, %444, %cst_80 [1] : vector<2x128xf32> to vector<2xf32>
      %457 = vector.shape_cast %456 : vector<2xf32> to vector<2x1xf32>
      %458 = vector.broadcast %445 : vector<2x1x128xf32> to vector<2x32x128xf32>
      %459 = arith.mulf %452, %458 : vector<2x32x128xf32>
      %cst_81 = arith.constant dense<0.000000e+00> : vector<2x128xf32>
      %460 = vector.multi_reduction <add>, %459, %cst_81 [1] : vector<2x32x128xf32> to vector<2x128xf32>
      %cst_82 = arith.constant dense<0.000000e+00> : vector<2xf32>
      %461 = vector.multi_reduction <add>, %460, %cst_82 [1] : vector<2x128xf32> to vector<2xf32>
      %462 = vector.shape_cast %461 : vector<2xf32> to vector<2x1xf32>
      %463 = vector.broadcast %6 : f32 to vector<2x1xf32>
      %464 = arith.mulf %463, %457 : vector<2x1xf32>
      %465 = arith.addf %462, %464 : vector<2x1xf32>
      %466 = vector.broadcast %465 : vector<2x1xf32> to vector<2x128xf32>
      %467 = arith.subf %455, %466 : vector<2x128xf32>
      %468 = arith.mulf %444, %467 : vector<2x128xf32>
      %cst_83 = arith.constant 2.000000e+00 : f32
      %469 = vector.broadcast %cst_83 : f32 to vector<2x128xf32>
      %470 = arith.mulf %469, %414 : vector<2x128xf32>
      %471 = arith.addf %387, %470 : vector<2x128xf32>
      %cst_84 = arith.constant 2.000000e+00 : f32
      %472 = vector.broadcast %cst_84 : f32 to vector<2x128xf32>
      %473 = arith.mulf %472, %441 : vector<2x128xf32>
      %474 = arith.addf %471, %473 : vector<2x128xf32>
      %475 = arith.addf %474, %468 : vector<2x128xf32>
      %476 = vector.broadcast %18 : f32 to vector<2x128xf32>
      %477 = arith.mulf %476, %475 : vector<2x128xf32>
      %478 = arith.addf %363, %477 : vector<2x128xf32>
      %c4_i32_85 = arith.constant 4 : i32
      %479 = vector.shape_cast %478 : vector<2x128xf32> to vector<2x1x128xf32>
      %480 = vector.broadcast %3 : vector<1x32x1xf32> to vector<2x32x128xf32>
      %481 = vector.broadcast %479 : vector<2x1x128xf32> to vector<2x32x128xf32>
      %482 = arith.mulf %480, %481 : vector<2x32x128xf32>
      %483 = arith.addf %0, %482 : vector<2x32x128xf32>
      %484 = math.tanh %483 : vector<2x32x128xf32>
      %485 = vector.broadcast %5 : vector<1x32x1xf32> to vector<2x32x128xf32>
      %486 = arith.mulf %485, %484 : vector<2x32x128xf32>
      %cst_86 = arith.constant dense<0.000000e+00> : vector<2x128xf32>
      %487 = vector.multi_reduction <add>, %486, %cst_86 [1] : vector<2x32x128xf32> to vector<2x128xf32>
      %488 = vector.broadcast %6 : f32 to vector<2x128xf32>
      %489 = arith.addf %487, %488 : vector<2x128xf32>
      %cst_87 = arith.constant dense<0.000000e+00> : vector<2xf32>
      %490 = vector.multi_reduction <add>, %478, %cst_87 [1] : vector<2x128xf32> to vector<2xf32>
      %491 = vector.shape_cast %490 : vector<2xf32> to vector<2x1xf32>
      %492 = vector.broadcast %479 : vector<2x1x128xf32> to vector<2x32x128xf32>
      %493 = arith.mulf %486, %492 : vector<2x32x128xf32>
      %cst_88 = arith.constant dense<0.000000e+00> : vector<2x128xf32>
      %494 = vector.multi_reduction <add>, %493, %cst_88 [1] : vector<2x32x128xf32> to vector<2x128xf32>
      %cst_89 = arith.constant dense<0.000000e+00> : vector<2xf32>
      %495 = vector.multi_reduction <add>, %494, %cst_89 [1] : vector<2x128xf32> to vector<2xf32>
      %496 = vector.shape_cast %495 : vector<2xf32> to vector<2x1xf32>
      %497 = vector.broadcast %6 : f32 to vector<2x1xf32>
      %498 = arith.mulf %497, %491 : vector<2x1xf32>
      %499 = arith.addf %496, %498 : vector<2x1xf32>
      %500 = vector.broadcast %499 : vector<2x1xf32> to vector<2x128xf32>
      %501 = arith.subf %489, %500 : vector<2x128xf32>
      %502 = arith.mulf %478, %501 : vector<2x128xf32>
      %503 = vector.broadcast %17 : f32 to vector<2x128xf32>
      %504 = arith.mulf %503, %502 : vector<2x128xf32>
      %505 = arith.addf %478, %504 : vector<2x128xf32>
      %506 = vector.shape_cast %505 : vector<2x128xf32> to vector<2x1x128xf32>
      %507 = vector.broadcast %3 : vector<1x32x1xf32> to vector<2x32x128xf32>
      %508 = vector.broadcast %506 : vector<2x1x128xf32> to vector<2x32x128xf32>
      %509 = arith.mulf %507, %508 : vector<2x32x128xf32>
      %510 = arith.addf %0, %509 : vector<2x32x128xf32>
      %511 = math.tanh %510 : vector<2x32x128xf32>
      %512 = vector.broadcast %5 : vector<1x32x1xf32> to vector<2x32x128xf32>
      %513 = arith.mulf %512, %511 : vector<2x32x128xf32>
      %cst_90 = arith.constant dense<0.000000e+00> : vector<2x128xf32>
      %514 = vector.multi_reduction <add>, %513, %cst_90 [1] : vector<2x32x128xf32> to vector<2x128xf32>
      %515 = vector.broadcast %6 : f32 to vector<2x128xf32>
      %516 = arith.addf %514, %515 : vector<2x128xf32>
      %cst_91 = arith.constant dense<0.000000e+00> : vector<2xf32>
      %517 = vector.multi_reduction <add>, %505, %cst_91 [1] : vector<2x128xf32> to vector<2xf32>
      %518 = vector.shape_cast %517 : vector<2xf32> to vector<2x1xf32>
      %519 = vector.broadcast %506 : vector<2x1x128xf32> to vector<2x32x128xf32>
      %520 = arith.mulf %513, %519 : vector<2x32x128xf32>
      %cst_92 = arith.constant dense<0.000000e+00> : vector<2x128xf32>
      %521 = vector.multi_reduction <add>, %520, %cst_92 [1] : vector<2x32x128xf32> to vector<2x128xf32>
      %cst_93 = arith.constant dense<0.000000e+00> : vector<2xf32>
      %522 = vector.multi_reduction <add>, %521, %cst_93 [1] : vector<2x128xf32> to vector<2xf32>
      %523 = vector.shape_cast %522 : vector<2xf32> to vector<2x1xf32>
      %524 = vector.broadcast %6 : f32 to vector<2x1xf32>
      %525 = arith.mulf %524, %518 : vector<2x1xf32>
      %526 = arith.addf %523, %525 : vector<2x1xf32>
      %527 = vector.broadcast %526 : vector<2x1xf32> to vector<2x128xf32>
      %528 = arith.subf %516, %527 : vector<2x128xf32>
      %529 = arith.mulf %505, %528 : vector<2x128xf32>
      %530 = vector.broadcast %17 : f32 to vector<2x128xf32>
      %531 = arith.mulf %530, %529 : vector<2x128xf32>
      %532 = arith.addf %478, %531 : vector<2x128xf32>
      %533 = vector.shape_cast %532 : vector<2x128xf32> to vector<2x1x128xf32>
      %534 = vector.broadcast %3 : vector<1x32x1xf32> to vector<2x32x128xf32>
      %535 = vector.broadcast %533 : vector<2x1x128xf32> to vector<2x32x128xf32>
      %536 = arith.mulf %534, %535 : vector<2x32x128xf32>
      %537 = arith.addf %0, %536 : vector<2x32x128xf32>
      %538 = math.tanh %537 : vector<2x32x128xf32>
      %539 = vector.broadcast %5 : vector<1x32x1xf32> to vector<2x32x128xf32>
      %540 = arith.mulf %539, %538 : vector<2x32x128xf32>
      %cst_94 = arith.constant dense<0.000000e+00> : vector<2x128xf32>
      %541 = vector.multi_reduction <add>, %540, %cst_94 [1] : vector<2x32x128xf32> to vector<2x128xf32>
      %542 = vector.broadcast %6 : f32 to vector<2x128xf32>
      %543 = arith.addf %541, %542 : vector<2x128xf32>
      %cst_95 = arith.constant dense<0.000000e+00> : vector<2xf32>
      %544 = vector.multi_reduction <add>, %532, %cst_95 [1] : vector<2x128xf32> to vector<2xf32>
      %545 = vector.shape_cast %544 : vector<2xf32> to vector<2x1xf32>
      %546 = vector.broadcast %533 : vector<2x1x128xf32> to vector<2x32x128xf32>
      %547 = arith.mulf %540, %546 : vector<2x32x128xf32>
      %cst_96 = arith.constant dense<0.000000e+00> : vector<2x128xf32>
      %548 = vector.multi_reduction <add>, %547, %cst_96 [1] : vector<2x32x128xf32> to vector<2x128xf32>
      %cst_97 = arith.constant dense<0.000000e+00> : vector<2xf32>
      %549 = vector.multi_reduction <add>, %548, %cst_97 [1] : vector<2x128xf32> to vector<2xf32>
      %550 = vector.shape_cast %549 : vector<2xf32> to vector<2x1xf32>
      %551 = vector.broadcast %6 : f32 to vector<2x1xf32>
      %552 = arith.mulf %551, %545 : vector<2x1xf32>
      %553 = arith.addf %550, %552 : vector<2x1xf32>
      %554 = vector.broadcast %553 : vector<2x1xf32> to vector<2x128xf32>
      %555 = arith.subf %543, %554 : vector<2x128xf32>
      %556 = arith.mulf %532, %555 : vector<2x128xf32>
      %557 = vector.broadcast %16 : f32 to vector<2x128xf32>
      %558 = arith.mulf %557, %556 : vector<2x128xf32>
      %559 = arith.addf %478, %558 : vector<2x128xf32>
      %560 = vector.shape_cast %559 : vector<2x128xf32> to vector<2x1x128xf32>
      %561 = vector.broadcast %3 : vector<1x32x1xf32> to vector<2x32x128xf32>
      %562 = vector.broadcast %560 : vector<2x1x128xf32> to vector<2x32x128xf32>
      %563 = arith.mulf %561, %562 : vector<2x32x128xf32>
      %564 = arith.addf %0, %563 : vector<2x32x128xf32>
      %565 = math.tanh %564 : vector<2x32x128xf32>
      %566 = vector.broadcast %5 : vector<1x32x1xf32> to vector<2x32x128xf32>
      %567 = arith.mulf %566, %565 : vector<2x32x128xf32>
      %cst_98 = arith.constant dense<0.000000e+00> : vector<2x128xf32>
      %568 = vector.multi_reduction <add>, %567, %cst_98 [1] : vector<2x32x128xf32> to vector<2x128xf32>
      %569 = vector.broadcast %6 : f32 to vector<2x128xf32>
      %570 = arith.addf %568, %569 : vector<2x128xf32>
      %cst_99 = arith.constant dense<0.000000e+00> : vector<2xf32>
      %571 = vector.multi_reduction <add>, %559, %cst_99 [1] : vector<2x128xf32> to vector<2xf32>
      %572 = vector.shape_cast %571 : vector<2xf32> to vector<2x1xf32>
      %573 = vector.broadcast %560 : vector<2x1x128xf32> to vector<2x32x128xf32>
      %574 = arith.mulf %567, %573 : vector<2x32x128xf32>
      %cst_100 = arith.constant dense<0.000000e+00> : vector<2x128xf32>
      %575 = vector.multi_reduction <add>, %574, %cst_100 [1] : vector<2x32x128xf32> to vector<2x128xf32>
      %cst_101 = arith.constant dense<0.000000e+00> : vector<2xf32>
      %576 = vector.multi_reduction <add>, %575, %cst_101 [1] : vector<2x128xf32> to vector<2xf32>
      %577 = vector.shape_cast %576 : vector<2xf32> to vector<2x1xf32>
      %578 = vector.broadcast %6 : f32 to vector<2x1xf32>
      %579 = arith.mulf %578, %572 : vector<2x1xf32>
      %580 = arith.addf %577, %579 : vector<2x1xf32>
      %581 = vector.broadcast %580 : vector<2x1xf32> to vector<2x128xf32>
      %582 = arith.subf %570, %581 : vector<2x128xf32>
      %583 = arith.mulf %559, %582 : vector<2x128xf32>
      %cst_102 = arith.constant 2.000000e+00 : f32
      %584 = vector.broadcast %cst_102 : f32 to vector<2x128xf32>
      %585 = arith.mulf %584, %529 : vector<2x128xf32>
      %586 = arith.addf %502, %585 : vector<2x128xf32>
      %cst_103 = arith.constant 2.000000e+00 : f32
      %587 = vector.broadcast %cst_103 : f32 to vector<2x128xf32>
      %588 = arith.mulf %587, %556 : vector<2x128xf32>
      %589 = arith.addf %586, %588 : vector<2x128xf32>
      %590 = arith.addf %589, %583 : vector<2x128xf32>
      %591 = vector.broadcast %18 : f32 to vector<2x128xf32>
      %592 = arith.mulf %591, %590 : vector<2x128xf32>
      %593 = arith.addf %478, %592 : vector<2x128xf32>
      %c5_i32 = arith.constant 5 : i32
      %594 = vector.shape_cast %593 : vector<2x128xf32> to vector<2x1x128xf32>
      %595 = vector.broadcast %3 : vector<1x32x1xf32> to vector<2x32x128xf32>
      %596 = vector.broadcast %594 : vector<2x1x128xf32> to vector<2x32x128xf32>
      %597 = arith.mulf %595, %596 : vector<2x32x128xf32>
      %598 = arith.addf %0, %597 : vector<2x32x128xf32>
      %599 = math.tanh %598 : vector<2x32x128xf32>
      %600 = vector.broadcast %5 : vector<1x32x1xf32> to vector<2x32x128xf32>
      %601 = arith.mulf %600, %599 : vector<2x32x128xf32>
      %cst_104 = arith.constant dense<0.000000e+00> : vector<2x128xf32>
      %602 = vector.multi_reduction <add>, %601, %cst_104 [1] : vector<2x32x128xf32> to vector<2x128xf32>
      %603 = vector.broadcast %6 : f32 to vector<2x128xf32>
      %604 = arith.addf %602, %603 : vector<2x128xf32>
      %cst_105 = arith.constant dense<0.000000e+00> : vector<2xf32>
      %605 = vector.multi_reduction <add>, %593, %cst_105 [1] : vector<2x128xf32> to vector<2xf32>
      %606 = vector.shape_cast %605 : vector<2xf32> to vector<2x1xf32>
      %607 = vector.broadcast %594 : vector<2x1x128xf32> to vector<2x32x128xf32>
      %608 = arith.mulf %601, %607 : vector<2x32x128xf32>
      %cst_106 = arith.constant dense<0.000000e+00> : vector<2x128xf32>
      %609 = vector.multi_reduction <add>, %608, %cst_106 [1] : vector<2x32x128xf32> to vector<2x128xf32>
      %cst_107 = arith.constant dense<0.000000e+00> : vector<2xf32>
      %610 = vector.multi_reduction <add>, %609, %cst_107 [1] : vector<2x128xf32> to vector<2xf32>
      %611 = vector.shape_cast %610 : vector<2xf32> to vector<2x1xf32>
      %612 = vector.broadcast %6 : f32 to vector<2x1xf32>
      %613 = arith.mulf %612, %606 : vector<2x1xf32>
      %614 = arith.addf %611, %613 : vector<2x1xf32>
      %615 = vector.broadcast %614 : vector<2x1xf32> to vector<2x128xf32>
      %616 = arith.subf %604, %615 : vector<2x128xf32>
      %617 = arith.mulf %593, %616 : vector<2x128xf32>
      %618 = vector.broadcast %17 : f32 to vector<2x128xf32>
      %619 = arith.mulf %618, %617 : vector<2x128xf32>
      %620 = arith.addf %593, %619 : vector<2x128xf32>
      %621 = vector.shape_cast %620 : vector<2x128xf32> to vector<2x1x128xf32>
      %622 = vector.broadcast %3 : vector<1x32x1xf32> to vector<2x32x128xf32>
      %623 = vector.broadcast %621 : vector<2x1x128xf32> to vector<2x32x128xf32>
      %624 = arith.mulf %622, %623 : vector<2x32x128xf32>
      %625 = arith.addf %0, %624 : vector<2x32x128xf32>
      %626 = math.tanh %625 : vector<2x32x128xf32>
      %627 = vector.broadcast %5 : vector<1x32x1xf32> to vector<2x32x128xf32>
      %628 = arith.mulf %627, %626 : vector<2x32x128xf32>
      %cst_108 = arith.constant dense<0.000000e+00> : vector<2x128xf32>
      %629 = vector.multi_reduction <add>, %628, %cst_108 [1] : vector<2x32x128xf32> to vector<2x128xf32>
      %630 = vector.broadcast %6 : f32 to vector<2x128xf32>
      %631 = arith.addf %629, %630 : vector<2x128xf32>
      %cst_109 = arith.constant dense<0.000000e+00> : vector<2xf32>
      %632 = vector.multi_reduction <add>, %620, %cst_109 [1] : vector<2x128xf32> to vector<2xf32>
      %633 = vector.shape_cast %632 : vector<2xf32> to vector<2x1xf32>
      %634 = vector.broadcast %621 : vector<2x1x128xf32> to vector<2x32x128xf32>
      %635 = arith.mulf %628, %634 : vector<2x32x128xf32>
      %cst_110 = arith.constant dense<0.000000e+00> : vector<2x128xf32>
      %636 = vector.multi_reduction <add>, %635, %cst_110 [1] : vector<2x32x128xf32> to vector<2x128xf32>
      %cst_111 = arith.constant dense<0.000000e+00> : vector<2xf32>
      %637 = vector.multi_reduction <add>, %636, %cst_111 [1] : vector<2x128xf32> to vector<2xf32>
      %638 = vector.shape_cast %637 : vector<2xf32> to vector<2x1xf32>
      %639 = vector.broadcast %6 : f32 to vector<2x1xf32>
      %640 = arith.mulf %639, %633 : vector<2x1xf32>
      %641 = arith.addf %638, %640 : vector<2x1xf32>
      %642 = vector.broadcast %641 : vector<2x1xf32> to vector<2x128xf32>
      %643 = arith.subf %631, %642 : vector<2x128xf32>
      %644 = arith.mulf %620, %643 : vector<2x128xf32>
      %645 = vector.broadcast %17 : f32 to vector<2x128xf32>
      %646 = arith.mulf %645, %644 : vector<2x128xf32>
      %647 = arith.addf %593, %646 : vector<2x128xf32>
      %648 = vector.shape_cast %647 : vector<2x128xf32> to vector<2x1x128xf32>
      %649 = vector.broadcast %3 : vector<1x32x1xf32> to vector<2x32x128xf32>
      %650 = vector.broadcast %648 : vector<2x1x128xf32> to vector<2x32x128xf32>
      %651 = arith.mulf %649, %650 : vector<2x32x128xf32>
      %652 = arith.addf %0, %651 : vector<2x32x128xf32>
      %653 = math.tanh %652 : vector<2x32x128xf32>
      %654 = vector.broadcast %5 : vector<1x32x1xf32> to vector<2x32x128xf32>
      %655 = arith.mulf %654, %653 : vector<2x32x128xf32>
      %cst_112 = arith.constant dense<0.000000e+00> : vector<2x128xf32>
      %656 = vector.multi_reduction <add>, %655, %cst_112 [1] : vector<2x32x128xf32> to vector<2x128xf32>
      %657 = vector.broadcast %6 : f32 to vector<2x128xf32>
      %658 = arith.addf %656, %657 : vector<2x128xf32>
      %cst_113 = arith.constant dense<0.000000e+00> : vector<2xf32>
      %659 = vector.multi_reduction <add>, %647, %cst_113 [1] : vector<2x128xf32> to vector<2xf32>
      %660 = vector.shape_cast %659 : vector<2xf32> to vector<2x1xf32>
      %661 = vector.broadcast %648 : vector<2x1x128xf32> to vector<2x32x128xf32>
      %662 = arith.mulf %655, %661 : vector<2x32x128xf32>
      %cst_114 = arith.constant dense<0.000000e+00> : vector<2x128xf32>
      %663 = vector.multi_reduction <add>, %662, %cst_114 [1] : vector<2x32x128xf32> to vector<2x128xf32>
      %cst_115 = arith.constant dense<0.000000e+00> : vector<2xf32>
      %664 = vector.multi_reduction <add>, %663, %cst_115 [1] : vector<2x128xf32> to vector<2xf32>
      %665 = vector.shape_cast %664 : vector<2xf32> to vector<2x1xf32>
      %666 = vector.broadcast %6 : f32 to vector<2x1xf32>
      %667 = arith.mulf %666, %660 : vector<2x1xf32>
      %668 = arith.addf %665, %667 : vector<2x1xf32>
      %669 = vector.broadcast %668 : vector<2x1xf32> to vector<2x128xf32>
      %670 = arith.subf %658, %669 : vector<2x128xf32>
      %671 = arith.mulf %647, %670 : vector<2x128xf32>
      %672 = vector.broadcast %16 : f32 to vector<2x128xf32>
      %673 = arith.mulf %672, %671 : vector<2x128xf32>
      %674 = arith.addf %593, %673 : vector<2x128xf32>
      %675 = vector.shape_cast %674 : vector<2x128xf32> to vector<2x1x128xf32>
      %676 = vector.broadcast %3 : vector<1x32x1xf32> to vector<2x32x128xf32>
      %677 = vector.broadcast %675 : vector<2x1x128xf32> to vector<2x32x128xf32>
      %678 = arith.mulf %676, %677 : vector<2x32x128xf32>
      %679 = arith.addf %0, %678 : vector<2x32x128xf32>
      %680 = math.tanh %679 : vector<2x32x128xf32>
      %681 = vector.broadcast %5 : vector<1x32x1xf32> to vector<2x32x128xf32>
      %682 = arith.mulf %681, %680 : vector<2x32x128xf32>
      %cst_116 = arith.constant dense<0.000000e+00> : vector<2x128xf32>
      %683 = vector.multi_reduction <add>, %682, %cst_116 [1] : vector<2x32x128xf32> to vector<2x128xf32>
      %684 = vector.broadcast %6 : f32 to vector<2x128xf32>
      %685 = arith.addf %683, %684 : vector<2x128xf32>
      %cst_117 = arith.constant dense<0.000000e+00> : vector<2xf32>
      %686 = vector.multi_reduction <add>, %674, %cst_117 [1] : vector<2x128xf32> to vector<2xf32>
      %687 = vector.shape_cast %686 : vector<2xf32> to vector<2x1xf32>
      %688 = vector.broadcast %675 : vector<2x1x128xf32> to vector<2x32x128xf32>
      %689 = arith.mulf %682, %688 : vector<2x32x128xf32>
      %cst_118 = arith.constant dense<0.000000e+00> : vector<2x128xf32>
      %690 = vector.multi_reduction <add>, %689, %cst_118 [1] : vector<2x32x128xf32> to vector<2x128xf32>
      %cst_119 = arith.constant dense<0.000000e+00> : vector<2xf32>
      %691 = vector.multi_reduction <add>, %690, %cst_119 [1] : vector<2x128xf32> to vector<2xf32>
      %692 = vector.shape_cast %691 : vector<2xf32> to vector<2x1xf32>
      %693 = vector.broadcast %6 : f32 to vector<2x1xf32>
      %694 = arith.mulf %693, %687 : vector<2x1xf32>
      %695 = arith.addf %692, %694 : vector<2x1xf32>
      %696 = vector.broadcast %695 : vector<2x1xf32> to vector<2x128xf32>
      %697 = arith.subf %685, %696 : vector<2x128xf32>
      %698 = arith.mulf %674, %697 : vector<2x128xf32>
      %cst_120 = arith.constant 2.000000e+00 : f32
      %699 = vector.broadcast %cst_120 : f32 to vector<2x128xf32>
      %700 = arith.mulf %699, %644 : vector<2x128xf32>
      %701 = arith.addf %617, %700 : vector<2x128xf32>
      %cst_121 = arith.constant 2.000000e+00 : f32
      %702 = vector.broadcast %cst_121 : f32 to vector<2x128xf32>
      %703 = arith.mulf %702, %671 : vector<2x128xf32>
      %704 = arith.addf %701, %703 : vector<2x128xf32>
      %705 = arith.addf %704, %698 : vector<2x128xf32>
      %706 = vector.broadcast %18 : f32 to vector<2x128xf32>
      %707 = arith.mulf %706, %705 : vector<2x128xf32>
      %708 = arith.addf %593, %707 : vector<2x128xf32>
      %c6_i32 = arith.constant 6 : i32
      %709 = vector.shape_cast %708 : vector<2x128xf32> to vector<2x1x128xf32>
      %710 = vector.broadcast %3 : vector<1x32x1xf32> to vector<2x32x128xf32>
      %711 = vector.broadcast %709 : vector<2x1x128xf32> to vector<2x32x128xf32>
      %712 = arith.mulf %710, %711 : vector<2x32x128xf32>
      %713 = arith.addf %0, %712 : vector<2x32x128xf32>
      %714 = math.tanh %713 : vector<2x32x128xf32>
      %715 = vector.broadcast %5 : vector<1x32x1xf32> to vector<2x32x128xf32>
      %716 = arith.mulf %715, %714 : vector<2x32x128xf32>
      %cst_122 = arith.constant dense<0.000000e+00> : vector<2x128xf32>
      %717 = vector.multi_reduction <add>, %716, %cst_122 [1] : vector<2x32x128xf32> to vector<2x128xf32>
      %718 = vector.broadcast %6 : f32 to vector<2x128xf32>
      %719 = arith.addf %717, %718 : vector<2x128xf32>
      %cst_123 = arith.constant dense<0.000000e+00> : vector<2xf32>
      %720 = vector.multi_reduction <add>, %708, %cst_123 [1] : vector<2x128xf32> to vector<2xf32>
      %721 = vector.shape_cast %720 : vector<2xf32> to vector<2x1xf32>
      %722 = vector.broadcast %709 : vector<2x1x128xf32> to vector<2x32x128xf32>
      %723 = arith.mulf %716, %722 : vector<2x32x128xf32>
      %cst_124 = arith.constant dense<0.000000e+00> : vector<2x128xf32>
      %724 = vector.multi_reduction <add>, %723, %cst_124 [1] : vector<2x32x128xf32> to vector<2x128xf32>
      %cst_125 = arith.constant dense<0.000000e+00> : vector<2xf32>
      %725 = vector.multi_reduction <add>, %724, %cst_125 [1] : vector<2x128xf32> to vector<2xf32>
      %726 = vector.shape_cast %725 : vector<2xf32> to vector<2x1xf32>
      %727 = vector.broadcast %6 : f32 to vector<2x1xf32>
      %728 = arith.mulf %727, %721 : vector<2x1xf32>
      %729 = arith.addf %726, %728 : vector<2x1xf32>
      %730 = vector.broadcast %729 : vector<2x1xf32> to vector<2x128xf32>
      %731 = arith.subf %719, %730 : vector<2x128xf32>
      %732 = arith.mulf %708, %731 : vector<2x128xf32>
      %733 = vector.broadcast %17 : f32 to vector<2x128xf32>
      %734 = arith.mulf %733, %732 : vector<2x128xf32>
      %735 = arith.addf %708, %734 : vector<2x128xf32>
      %736 = vector.shape_cast %735 : vector<2x128xf32> to vector<2x1x128xf32>
      %737 = vector.broadcast %3 : vector<1x32x1xf32> to vector<2x32x128xf32>
      %738 = vector.broadcast %736 : vector<2x1x128xf32> to vector<2x32x128xf32>
      %739 = arith.mulf %737, %738 : vector<2x32x128xf32>
      %740 = arith.addf %0, %739 : vector<2x32x128xf32>
      %741 = math.tanh %740 : vector<2x32x128xf32>
      %742 = vector.broadcast %5 : vector<1x32x1xf32> to vector<2x32x128xf32>
      %743 = arith.mulf %742, %741 : vector<2x32x128xf32>
      %cst_126 = arith.constant dense<0.000000e+00> : vector<2x128xf32>
      %744 = vector.multi_reduction <add>, %743, %cst_126 [1] : vector<2x32x128xf32> to vector<2x128xf32>
      %745 = vector.broadcast %6 : f32 to vector<2x128xf32>
      %746 = arith.addf %744, %745 : vector<2x128xf32>
      %cst_127 = arith.constant dense<0.000000e+00> : vector<2xf32>
      %747 = vector.multi_reduction <add>, %735, %cst_127 [1] : vector<2x128xf32> to vector<2xf32>
      %748 = vector.shape_cast %747 : vector<2xf32> to vector<2x1xf32>
      %749 = vector.broadcast %736 : vector<2x1x128xf32> to vector<2x32x128xf32>
      %750 = arith.mulf %743, %749 : vector<2x32x128xf32>
      %cst_128 = arith.constant dense<0.000000e+00> : vector<2x128xf32>
      %751 = vector.multi_reduction <add>, %750, %cst_128 [1] : vector<2x32x128xf32> to vector<2x128xf32>
      %cst_129 = arith.constant dense<0.000000e+00> : vector<2xf32>
      %752 = vector.multi_reduction <add>, %751, %cst_129 [1] : vector<2x128xf32> to vector<2xf32>
      %753 = vector.shape_cast %752 : vector<2xf32> to vector<2x1xf32>
      %754 = vector.broadcast %6 : f32 to vector<2x1xf32>
      %755 = arith.mulf %754, %748 : vector<2x1xf32>
      %756 = arith.addf %753, %755 : vector<2x1xf32>
      %757 = vector.broadcast %756 : vector<2x1xf32> to vector<2x128xf32>
      %758 = arith.subf %746, %757 : vector<2x128xf32>
      %759 = arith.mulf %735, %758 : vector<2x128xf32>
      %760 = vector.broadcast %17 : f32 to vector<2x128xf32>
      %761 = arith.mulf %760, %759 : vector<2x128xf32>
      %762 = arith.addf %708, %761 : vector<2x128xf32>
      %763 = vector.shape_cast %762 : vector<2x128xf32> to vector<2x1x128xf32>
      %764 = vector.broadcast %3 : vector<1x32x1xf32> to vector<2x32x128xf32>
      %765 = vector.broadcast %763 : vector<2x1x128xf32> to vector<2x32x128xf32>
      %766 = arith.mulf %764, %765 : vector<2x32x128xf32>
      %767 = arith.addf %0, %766 : vector<2x32x128xf32>
      %768 = math.tanh %767 : vector<2x32x128xf32>
      %769 = vector.broadcast %5 : vector<1x32x1xf32> to vector<2x32x128xf32>
      %770 = arith.mulf %769, %768 : vector<2x32x128xf32>
      %cst_130 = arith.constant dense<0.000000e+00> : vector<2x128xf32>
      %771 = vector.multi_reduction <add>, %770, %cst_130 [1] : vector<2x32x128xf32> to vector<2x128xf32>
      %772 = vector.broadcast %6 : f32 to vector<2x128xf32>
      %773 = arith.addf %771, %772 : vector<2x128xf32>
      %cst_131 = arith.constant dense<0.000000e+00> : vector<2xf32>
      %774 = vector.multi_reduction <add>, %762, %cst_131 [1] : vector<2x128xf32> to vector<2xf32>
      %775 = vector.shape_cast %774 : vector<2xf32> to vector<2x1xf32>
      %776 = vector.broadcast %763 : vector<2x1x128xf32> to vector<2x32x128xf32>
      %777 = arith.mulf %770, %776 : vector<2x32x128xf32>
      %cst_132 = arith.constant dense<0.000000e+00> : vector<2x128xf32>
      %778 = vector.multi_reduction <add>, %777, %cst_132 [1] : vector<2x32x128xf32> to vector<2x128xf32>
      %cst_133 = arith.constant dense<0.000000e+00> : vector<2xf32>
      %779 = vector.multi_reduction <add>, %778, %cst_133 [1] : vector<2x128xf32> to vector<2xf32>
      %780 = vector.shape_cast %779 : vector<2xf32> to vector<2x1xf32>
      %781 = vector.broadcast %6 : f32 to vector<2x1xf32>
      %782 = arith.mulf %781, %775 : vector<2x1xf32>
      %783 = arith.addf %780, %782 : vector<2x1xf32>
      %784 = vector.broadcast %783 : vector<2x1xf32> to vector<2x128xf32>
      %785 = arith.subf %773, %784 : vector<2x128xf32>
      %786 = arith.mulf %762, %785 : vector<2x128xf32>
      %787 = vector.broadcast %16 : f32 to vector<2x128xf32>
      %788 = arith.mulf %787, %786 : vector<2x128xf32>
      %789 = arith.addf %708, %788 : vector<2x128xf32>
      %790 = vector.shape_cast %789 : vector<2x128xf32> to vector<2x1x128xf32>
      %791 = vector.broadcast %3 : vector<1x32x1xf32> to vector<2x32x128xf32>
      %792 = vector.broadcast %790 : vector<2x1x128xf32> to vector<2x32x128xf32>
      %793 = arith.mulf %791, %792 : vector<2x32x128xf32>
      %794 = arith.addf %0, %793 : vector<2x32x128xf32>
      %795 = math.tanh %794 : vector<2x32x128xf32>
      %796 = vector.broadcast %5 : vector<1x32x1xf32> to vector<2x32x128xf32>
      %797 = arith.mulf %796, %795 : vector<2x32x128xf32>
      %cst_134 = arith.constant dense<0.000000e+00> : vector<2x128xf32>
      %798 = vector.multi_reduction <add>, %797, %cst_134 [1] : vector<2x32x128xf32> to vector<2x128xf32>
      %799 = vector.broadcast %6 : f32 to vector<2x128xf32>
      %800 = arith.addf %798, %799 : vector<2x128xf32>
      %cst_135 = arith.constant dense<0.000000e+00> : vector<2xf32>
      %801 = vector.multi_reduction <add>, %789, %cst_135 [1] : vector<2x128xf32> to vector<2xf32>
      %802 = vector.shape_cast %801 : vector<2xf32> to vector<2x1xf32>
      %803 = vector.broadcast %790 : vector<2x1x128xf32> to vector<2x32x128xf32>
      %804 = arith.mulf %797, %803 : vector<2x32x128xf32>
      %cst_136 = arith.constant dense<0.000000e+00> : vector<2x128xf32>
      %805 = vector.multi_reduction <add>, %804, %cst_136 [1] : vector<2x32x128xf32> to vector<2x128xf32>
      %cst_137 = arith.constant dense<0.000000e+00> : vector<2xf32>
      %806 = vector.multi_reduction <add>, %805, %cst_137 [1] : vector<2x128xf32> to vector<2xf32>
      %807 = vector.shape_cast %806 : vector<2xf32> to vector<2x1xf32>
      %808 = vector.broadcast %6 : f32 to vector<2x1xf32>
      %809 = arith.mulf %808, %802 : vector<2x1xf32>
      %810 = arith.addf %807, %809 : vector<2x1xf32>
      %811 = vector.broadcast %810 : vector<2x1xf32> to vector<2x128xf32>
      %812 = arith.subf %800, %811 : vector<2x128xf32>
      %813 = arith.mulf %789, %812 : vector<2x128xf32>
      %cst_138 = arith.constant 2.000000e+00 : f32
      %814 = vector.broadcast %cst_138 : f32 to vector<2x128xf32>
      %815 = arith.mulf %814, %759 : vector<2x128xf32>
      %816 = arith.addf %732, %815 : vector<2x128xf32>
      %cst_139 = arith.constant 2.000000e+00 : f32
      %817 = vector.broadcast %cst_139 : f32 to vector<2x128xf32>
      %818 = arith.mulf %817, %786 : vector<2x128xf32>
      %819 = arith.addf %816, %818 : vector<2x128xf32>
      %820 = arith.addf %819, %813 : vector<2x128xf32>
      %821 = vector.broadcast %18 : f32 to vector<2x128xf32>
      %822 = arith.mulf %821, %820 : vector<2x128xf32>
      %823 = arith.addf %708, %822 : vector<2x128xf32>
      %c7_i32 = arith.constant 7 : i32
      %824 = vector.shape_cast %823 : vector<2x128xf32> to vector<2x1x128xf32>
      %825 = vector.broadcast %3 : vector<1x32x1xf32> to vector<2x32x128xf32>
      %826 = vector.broadcast %824 : vector<2x1x128xf32> to vector<2x32x128xf32>
      %827 = arith.mulf %825, %826 : vector<2x32x128xf32>
      %828 = arith.addf %0, %827 : vector<2x32x128xf32>
      %829 = math.tanh %828 : vector<2x32x128xf32>
      %830 = vector.broadcast %5 : vector<1x32x1xf32> to vector<2x32x128xf32>
      %831 = arith.mulf %830, %829 : vector<2x32x128xf32>
      %cst_140 = arith.constant dense<0.000000e+00> : vector<2x128xf32>
      %832 = vector.multi_reduction <add>, %831, %cst_140 [1] : vector<2x32x128xf32> to vector<2x128xf32>
      %833 = vector.broadcast %6 : f32 to vector<2x128xf32>
      %834 = arith.addf %832, %833 : vector<2x128xf32>
      %cst_141 = arith.constant dense<0.000000e+00> : vector<2xf32>
      %835 = vector.multi_reduction <add>, %823, %cst_141 [1] : vector<2x128xf32> to vector<2xf32>
      %836 = vector.shape_cast %835 : vector<2xf32> to vector<2x1xf32>
      %837 = vector.broadcast %824 : vector<2x1x128xf32> to vector<2x32x128xf32>
      %838 = arith.mulf %831, %837 : vector<2x32x128xf32>
      %cst_142 = arith.constant dense<0.000000e+00> : vector<2x128xf32>
      %839 = vector.multi_reduction <add>, %838, %cst_142 [1] : vector<2x32x128xf32> to vector<2x128xf32>
      %cst_143 = arith.constant dense<0.000000e+00> : vector<2xf32>
      %840 = vector.multi_reduction <add>, %839, %cst_143 [1] : vector<2x128xf32> to vector<2xf32>
      %841 = vector.shape_cast %840 : vector<2xf32> to vector<2x1xf32>
      %842 = vector.broadcast %6 : f32 to vector<2x1xf32>
      %843 = arith.mulf %842, %836 : vector<2x1xf32>
      %844 = arith.addf %841, %843 : vector<2x1xf32>
      %845 = vector.broadcast %844 : vector<2x1xf32> to vector<2x128xf32>
      %846 = arith.subf %834, %845 : vector<2x128xf32>
      %847 = arith.mulf %823, %846 : vector<2x128xf32>
      %848 = vector.broadcast %17 : f32 to vector<2x128xf32>
      %849 = arith.mulf %848, %847 : vector<2x128xf32>
      %850 = arith.addf %823, %849 : vector<2x128xf32>
      %851 = vector.shape_cast %850 : vector<2x128xf32> to vector<2x1x128xf32>
      %852 = vector.broadcast %3 : vector<1x32x1xf32> to vector<2x32x128xf32>
      %853 = vector.broadcast %851 : vector<2x1x128xf32> to vector<2x32x128xf32>
      %854 = arith.mulf %852, %853 : vector<2x32x128xf32>
      %855 = arith.addf %0, %854 : vector<2x32x128xf32>
      %856 = math.tanh %855 : vector<2x32x128xf32>
      %857 = vector.broadcast %5 : vector<1x32x1xf32> to vector<2x32x128xf32>
      %858 = arith.mulf %857, %856 : vector<2x32x128xf32>
      %cst_144 = arith.constant dense<0.000000e+00> : vector<2x128xf32>
      %859 = vector.multi_reduction <add>, %858, %cst_144 [1] : vector<2x32x128xf32> to vector<2x128xf32>
      %860 = vector.broadcast %6 : f32 to vector<2x128xf32>
      %861 = arith.addf %859, %860 : vector<2x128xf32>
      %cst_145 = arith.constant dense<0.000000e+00> : vector<2xf32>
      %862 = vector.multi_reduction <add>, %850, %cst_145 [1] : vector<2x128xf32> to vector<2xf32>
      %863 = vector.shape_cast %862 : vector<2xf32> to vector<2x1xf32>
      %864 = vector.broadcast %851 : vector<2x1x128xf32> to vector<2x32x128xf32>
      %865 = arith.mulf %858, %864 : vector<2x32x128xf32>
      %cst_146 = arith.constant dense<0.000000e+00> : vector<2x128xf32>
      %866 = vector.multi_reduction <add>, %865, %cst_146 [1] : vector<2x32x128xf32> to vector<2x128xf32>
      %cst_147 = arith.constant dense<0.000000e+00> : vector<2xf32>
      %867 = vector.multi_reduction <add>, %866, %cst_147 [1] : vector<2x128xf32> to vector<2xf32>
      %868 = vector.shape_cast %867 : vector<2xf32> to vector<2x1xf32>
      %869 = vector.broadcast %6 : f32 to vector<2x1xf32>
      %870 = arith.mulf %869, %863 : vector<2x1xf32>
      %871 = arith.addf %868, %870 : vector<2x1xf32>
      %872 = vector.broadcast %871 : vector<2x1xf32> to vector<2x128xf32>
      %873 = arith.subf %861, %872 : vector<2x128xf32>
      %874 = arith.mulf %850, %873 : vector<2x128xf32>
      %875 = vector.broadcast %17 : f32 to vector<2x128xf32>
      %876 = arith.mulf %875, %874 : vector<2x128xf32>
      %877 = arith.addf %823, %876 : vector<2x128xf32>
      %878 = vector.shape_cast %877 : vector<2x128xf32> to vector<2x1x128xf32>
      %879 = vector.broadcast %3 : vector<1x32x1xf32> to vector<2x32x128xf32>
      %880 = vector.broadcast %878 : vector<2x1x128xf32> to vector<2x32x128xf32>
      %881 = arith.mulf %879, %880 : vector<2x32x128xf32>
      %882 = arith.addf %0, %881 : vector<2x32x128xf32>
      %883 = math.tanh %882 : vector<2x32x128xf32>
      %884 = vector.broadcast %5 : vector<1x32x1xf32> to vector<2x32x128xf32>
      %885 = arith.mulf %884, %883 : vector<2x32x128xf32>
      %cst_148 = arith.constant dense<0.000000e+00> : vector<2x128xf32>
      %886 = vector.multi_reduction <add>, %885, %cst_148 [1] : vector<2x32x128xf32> to vector<2x128xf32>
      %887 = vector.broadcast %6 : f32 to vector<2x128xf32>
      %888 = arith.addf %886, %887 : vector<2x128xf32>
      %cst_149 = arith.constant dense<0.000000e+00> : vector<2xf32>
      %889 = vector.multi_reduction <add>, %877, %cst_149 [1] : vector<2x128xf32> to vector<2xf32>
      %890 = vector.shape_cast %889 : vector<2xf32> to vector<2x1xf32>
      %891 = vector.broadcast %878 : vector<2x1x128xf32> to vector<2x32x128xf32>
      %892 = arith.mulf %885, %891 : vector<2x32x128xf32>
      %cst_150 = arith.constant dense<0.000000e+00> : vector<2x128xf32>
      %893 = vector.multi_reduction <add>, %892, %cst_150 [1] : vector<2x32x128xf32> to vector<2x128xf32>
      %cst_151 = arith.constant dense<0.000000e+00> : vector<2xf32>
      %894 = vector.multi_reduction <add>, %893, %cst_151 [1] : vector<2x128xf32> to vector<2xf32>
      %895 = vector.shape_cast %894 : vector<2xf32> to vector<2x1xf32>
      %896 = vector.broadcast %6 : f32 to vector<2x1xf32>
      %897 = arith.mulf %896, %890 : vector<2x1xf32>
      %898 = arith.addf %895, %897 : vector<2x1xf32>
      %899 = vector.broadcast %898 : vector<2x1xf32> to vector<2x128xf32>
      %900 = arith.subf %888, %899 : vector<2x128xf32>
      %901 = arith.mulf %877, %900 : vector<2x128xf32>
      %902 = vector.broadcast %16 : f32 to vector<2x128xf32>
      %903 = arith.mulf %902, %901 : vector<2x128xf32>
      %904 = arith.addf %823, %903 : vector<2x128xf32>
      %905 = vector.shape_cast %904 : vector<2x128xf32> to vector<2x1x128xf32>
      %906 = vector.broadcast %3 : vector<1x32x1xf32> to vector<2x32x128xf32>
      %907 = vector.broadcast %905 : vector<2x1x128xf32> to vector<2x32x128xf32>
      %908 = arith.mulf %906, %907 : vector<2x32x128xf32>
      %909 = arith.addf %0, %908 : vector<2x32x128xf32>
      %910 = math.tanh %909 : vector<2x32x128xf32>
      %911 = vector.broadcast %5 : vector<1x32x1xf32> to vector<2x32x128xf32>
      %912 = arith.mulf %911, %910 : vector<2x32x128xf32>
      %cst_152 = arith.constant dense<0.000000e+00> : vector<2x128xf32>
      %913 = vector.multi_reduction <add>, %912, %cst_152 [1] : vector<2x32x128xf32> to vector<2x128xf32>
      %914 = vector.broadcast %6 : f32 to vector<2x128xf32>
      %915 = arith.addf %913, %914 : vector<2x128xf32>
      %cst_153 = arith.constant dense<0.000000e+00> : vector<2xf32>
      %916 = vector.multi_reduction <add>, %904, %cst_153 [1] : vector<2x128xf32> to vector<2xf32>
      %917 = vector.shape_cast %916 : vector<2xf32> to vector<2x1xf32>
      %918 = vector.broadcast %905 : vector<2x1x128xf32> to vector<2x32x128xf32>
      %919 = arith.mulf %912, %918 : vector<2x32x128xf32>
      %cst_154 = arith.constant dense<0.000000e+00> : vector<2x128xf32>
      %920 = vector.multi_reduction <add>, %919, %cst_154 [1] : vector<2x32x128xf32> to vector<2x128xf32>
      %cst_155 = arith.constant dense<0.000000e+00> : vector<2xf32>
      %921 = vector.multi_reduction <add>, %920, %cst_155 [1] : vector<2x128xf32> to vector<2xf32>
      %922 = vector.shape_cast %921 : vector<2xf32> to vector<2x1xf32>
      %923 = vector.broadcast %6 : f32 to vector<2x1xf32>
      %924 = arith.mulf %923, %917 : vector<2x1xf32>
      %925 = arith.addf %922, %924 : vector<2x1xf32>
      %926 = vector.broadcast %925 : vector<2x1xf32> to vector<2x128xf32>
      %927 = arith.subf %915, %926 : vector<2x128xf32>
      %928 = arith.mulf %904, %927 : vector<2x128xf32>
      %cst_156 = arith.constant 2.000000e+00 : f32
      %929 = vector.broadcast %cst_156 : f32 to vector<2x128xf32>
      %930 = arith.mulf %929, %874 : vector<2x128xf32>
      %931 = arith.addf %847, %930 : vector<2x128xf32>
      %cst_157 = arith.constant 2.000000e+00 : f32
      %932 = vector.broadcast %cst_157 : f32 to vector<2x128xf32>
      %933 = arith.mulf %932, %901 : vector<2x128xf32>
      %934 = arith.addf %931, %933 : vector<2x128xf32>
      %935 = arith.addf %934, %928 : vector<2x128xf32>
      %936 = vector.broadcast %18 : f32 to vector<2x128xf32>
      %937 = arith.mulf %936, %935 : vector<2x128xf32>
      %938 = arith.addf %823, %937 : vector<2x128xf32>
      %939 = arith.index_cast %arg7 : i32 to index
      %c0_158 = arith.constant 0 : index
      %c0_159 = arith.constant 0 : index
      %940 = vector.load %arg6[%939, %c0_158, %c0_159] : memref<4x2x128xf32, #tpu.memory_space<vmem>>, vector<1x2x128xf32>
      %941 = vector.shape_cast %940 : vector<1x2x128xf32> to vector<2x128xf32>
      %942 = vector.shape_cast %938 : vector<2x128xf32> to vector<1x2x128xf32>
      tpu.vector_store %arg6[%939, %c0_158, %c0_159], %942 {strides = array<i32>} : memref<4x2x128xf32, #tpu.memory_space<vmem>>, vector<1x2x128xf32>,
      scf.yield %938 : vector<2x128xf32>
    }
    %c4_i32_7 = arith.constant 4 : i32
    return
  }
  func.func @transform_0(%arg0: i32) -> i32 {
    %c0_i32 = arith.constant 0 : i32
    %c0_i32_0 = arith.constant 0 : i32
    return %c0_i32 : i32
  }
  func.func @transform_1(%arg0: i32) -> i32 {
    %c0_i32 = arith.constant 0 : i32
    %c0_i32_0 = arith.constant 0 : i32
    return %c0_i32 : i32
  }
  func.func @transform_2(%arg0: i32) -> (i32, i32) {
    %c0_i32 = arith.constant 0 : i32
    %c0_i32_0 = arith.constant 0 : i32
    return %arg0, %c0_i32 : i32, i32
  }
  func.func @transform_3(%arg0: i32) -> (i32, i32, i32) {
    %c0_i32 = arith.constant 0 : i32
    %c0_i32_0 = arith.constant 0 : i32
    %c0_i32_1 = arith.constant 0 : i32
    return %arg0, %c0_i32, %c0_i32_0 : i32, i32, i32
  }
  func.func @transform_4(%arg0: i32) -> (i32, i32) {
    %c0_i32 = arith.constant 0 : i32
    %c0_i32_0 = arith.constant 0 : i32
    %c0_i32_1 = arith.constant 0 : i32
    return %c0_i32, %c0_i32_0 : i32, i32
  }
  func.func @transform_5(%arg0: i32) -> (i32, i32, i32) {
    %c0_i32 = arith.constant 0 : i32
    %c0_i32_0 = arith.constant 0 : i32
    %c0_i32_1 = arith.constant 0 : i32
    return %c0_i32, %arg0, %c0_i32_0 : i32, i32, i32
  }
}

</mosaic_0001>

<bundles_post_ra>
// kernel: tpu_custom_call.1
= control target key start
LH: loop header
LB: loop body
LE: loop exit
PB: predicated region body
PF: predicated region fallthrough
CT: control target
= control target key end

     0   :  { %11 = vsyncpa [#allocation6], 0  ;;  %s6839_s0 = inlined_call_operand.vmem [shape: f32[5], index: 0, kind: input, shape index: {}]   ;;  %s6840_s1 = inlined_call_operand.<no memory space> [shape: f32[1], index: 1, kind: input, shape index: {}]   ;;  %s6841_s2 = inlined_call_operand.vmem [shape: f32[2,128], index: 2, kind: input, shape index: {}]   ;;  %s6842_s3 = inlined_call_operand.hbm [shape: f32[2,32,128], index: 3, kind: input, shape index: {}]   ;;  %s6843_s4 = inlined_call_operand.vmem [shape: f32[32,2], index: 4, kind: input, shape index: {}]   ;;  %s6844_s5 = inlined_call_operand.hbm [shape: f32[4,2,128], index: 5, kind: output, shape index: {}]  }
   0x1   :  { %12 = vsyncpa [#allocation4], 0 }
   0x2   :  { %13 = vsyncpa [#allocation5], 0  ;;  %s20_s20 = sshll.u32 %s6839_s0, 4  ;;  %s21_s20 = int_to_ptr.vmem [resolvable:$true] %s20_s20 }
   0x3   :  { %s5117_s21 = scalar_lea.vmem %s21_s20, 16  ;;  %p5122_p1 = scmp.lt.s32.totalorder %s21_s20, %s21_s20 }
   0x4   :  { %p5118_p0 = scmp.ne.s32.totalorder %s21_s20, %s5117_s21  ;;  %p5123_p2 = scmp.lt.s32.totalorder %s5117_s21, %s5117_s21 }
   0x6   :  { %p5124_p3 = por %p5123_p2, %p5122_p1 }
   0x8   :  { %p5125_p4 = pnand %p5124_p3, %p5118_p0 }
   0xa   :  { %5128 = shalt.err (!%p5125_p4)
}
   0xb   :  { %s5195_s22 = smov [#allocation3]   ;;  %s5196_s23 = smov [#allocation7]  }
   0xc   :  { %23 = dma.vmem_to_smem %s21_s20, 16, %s5195_s22, [#allocation6]  }
   0xd   :  { %s33_s24 = sshll.u32 %s5196_s23, 4  ;;  %s5129_s27 = scalar_lea.hbm %s6842_s3, 1024  ;;  %s34_s24 = int_to_ptr.vmem [resolvable:$true] %s33_s24 }
   0xe   :  { %p5130_p5 = scmp.ne.s32.totalorder %s6842_s3, %s5129_s27  ;;  %p5133_p6 = scmp.lt.u32.totalorder %s5129_s27, %s6842_s3 }
  0x10   :  { %p5135_p7 = pnand %p5133_p6, %p5130_p5 }
  0x12   :  { %5138 = shalt.err (!%p5135_p7)
}
  0x13   :  { %s5139_s6 = scalar_lea.vmem %s34_s24, 1024  ;;  %p5144_p9 = scmp.lt.s32.totalorder %s34_s24, %s34_s24 }
  0x14   :  { %p5140_p8 = scmp.ne.s32.totalorder %s34_s24, %s5139_s6  ;;  %p5145_p10 = scmp.lt.s32.totalorder %s5139_s6, %s5139_s6 }
  0x16   :  { %p5146_p11 = por %p5145_p10, %p5144_p9 }
  0x18   :  { %p5147_p12 = pnand %p5146_p11, %p5140_p8 }
  0x1a   :  { %5150 = shalt.err (!%p5147_p12)
}
  0x1b   :  { %s5197_s7 = smov 128   ;;  %s5198_s8 = smov 8  }
  0x1c   :  { %39 = dma.hbm_to_vmem [thread:$0]  %s6842_s3, 1024, %s34_s24, [#allocation4], %s5197_s7, %s5197_s7, %s5198_s8  }
  0x1d   :  { %5181 = dma.done.wait [#allocation6], 16  }
  0x1e   :  { %5182 = vsyncadd [#allocation6], 4294967280 }
  0x1f   :  { %5183 = dma.done.wait [#allocation4], 1024  }
  0x20   :  { %5184 = vsyncadd [#allocation4], 4294966272 }
  0x21   :  { %48 = sfence }
  0x22   :  { %v5250_v0 = vld [vmem:[#allocation7] sm:$0xff]  ;;  %v5252_v1 = vld [vmem:[#allocation7 + $0x8] sm:$0xff]  ;;  %v5254_v2 = vld [vmem:[#allocation7 + $0x10] sm:$0xff]  ;;  %s5291_s20 = smov 0  }
  0x23   :  { %v5256_v3 = vld [vmem:[#allocation7 + $0x18] sm:$0xff]  ;;  %v5258_v4 = vld [vmem:[#allocation7 + $0x20] sm:$0xff]  ;;  %v5260_v5 = vld [vmem:[#allocation7 + $0x28] sm:$0xff] }
  0x24   :  { %v5262_v6 = vld [vmem:[#allocation7 + $0x30] sm:$0xff]  ;;  %v5264_v7 = vld [vmem:[#allocation7 + $0x38] sm:$0xff]  ;;  %v5269_v8 = vld [vmem:[%s6843_s4] sm:$0xff] }
  0x25   :  { %v5274_v9 = vld [vmem:[%s6843_s4 + $0x8] sm:$0xff]  ;;  %v5279_v10 = vld [vmem:[%s6843_s4 + $0x10] sm:$0xff]  ;;  %v5284_v11 = vld [vmem:[%s6843_s4 + $0x18] sm:$0xff] }
  0x26   :  { %v62_v12 = vld [vmem:[%s6841_s2] sm:$0x3]  }
  0x27 LB: > { %v5199_v13 = vmov 0   ;;  %v5200_v14 = vmov 1   ;;  %vm199_vm0 = vcmask 1041408   ;;  %v5201_v16 = vmov 1966171168   ;;  %s5372_s2 = sadd.s32 1, %s5193_s20   ;;  %s5193_s20 = sphi %s5291_s20, %s6845_s20   ;;  %v5189_v12 = vphi %v62_v12, %v4542_v12  }
  0x28   : > { %4602 = vset.pattern.permute.xlu1 %v5199_v13  ;;  %4601 = vset.pattern.permute.xlu0 %v5199_v13  ;;  %v200_v15 = vsel %vm199_vm0, %v5189_v12, 0.0  ;;  %v79_v17 = vunpack.c.l.s4 %v5201_v16  ;;  %v81_v18 = vlaneseq  ;;  %vm231_vm1 = vcmask 1041409   ;;  %s71_s4 = sld [smem:[#allocation3 + %s5372_s2]]  ;;  %s4574_s28 = sshll.u32 %s5193_s20, 1 }
  0x29   : > { %112 = vperm.xlu1 %4602, %v5279_v10   ;;  %102 = vperm.xlu0 %4601, %v5269_v8   ;;  %s72_s21 = sld [smem:[#allocation3 + %s5193_s20]]  ;;  %s4544_s29 = scalar_lea.vmem [#allocation8], %s4574_s28 }
  0x2a   : > { %v80_v19 = vunpack.c.0.s8 %v79_v17  ;;  %v82_v20 = vshrl.u32 %v81_v18, 7  ;;  %p65_p13 = scmp.ge.s32.totalorder %s5372_s2, 4   ;;  %s6845_s20 = smov %s5372_s2 }
  0x2b   :  { %s5202_s0 = smov (%p65_p13), [#allocation8]  }
  0x2c   : > { %v5309_v21 = vsub.s32 %v80_v19, %v82_v20  ;;  %v5313_v24 = vsub.s32 0, %v82_v20  ;;  %s4551_s30 = sshll.u32 (%p65_p13), %s5202_s0, 4  ;;  %s4552_s30 = int_to_ptr.vmem [resolvable:$true] %s4551_s30 }
  0x2d   : > { %117 = vperm.xlu1 %4602, %v5284_v11   ;;  %107 = vperm.xlu0 %4601, %v5274_v9   ;;  %s5151_s6 = scalar_lea.vmem (%p65_p13), %s4552_s30, 128  ;;  %p5156_p1 = scmp.lt.s32.totalorder (%p65_p13), %s4552_s30, %s4552_s30 }
  0x2e   : > { %v84_v22 = vrot.slane %v5189_v12, %v5309_v21  ;;  %p5152_p0 = scmp.ne.s32.totalorder (%p65_p13), %s4552_s30, %s5151_s6  ;;  %p5157_p2 = scmp.lt.s32.totalorder (%p65_p13), %s5151_s6, %s5151_s6 }
  0x2f   : > { %s73_s24 = ssub.f32 %s71_s4, %s72_s21 }
  0x30   : > { %v85_v23 = vcombine.high %v84_v22, %v84_v22  ;;  %v92_v25 = vrot.slane %v84_v22, %v5309_v21  ;;  %p5158_p3 = por (%p65_p13), %p5157_p2, %p5156_p1 }
  0x31   : > { %4604 = vset.pattern.permute.xlu1 %v5200_v14  ;;  %4603 = vset.pattern.permute.xlu0 %v5200_v14  ;;  %s5382_s25 = smul.f32 0.125, %s73_s24 }
  0x32   : > { %159 = vperm.xlu1 %4604, %v5274_v9   ;;  %155 = vperm.xlu0 %4603, %v5269_v8   ;;  %v99_v26 = vrot.slane %v85_v23, %v5309_v21  ;;  %v123_v27 = vrot.slane %v92_v25, %v5313_v24  ;;  %p5159_p4 = pnand (%p65_p13), %p5158_p3, %p5152_p0 }
  0x33   : > { %s75_s26 = smul.f32 0.5, %s5382_s25 }
  0x34   : > { %v5319_v28 = vrot.slane %v99_v26, %v5313_v24  ;;  %s76_s27 = smul.f32 0.16666667, %s5382_s25 }
  0x36   : > { %163 = vperm.xlu1 %4604, %v5279_v10   ;;  %167 = vperm.xlu0 %4603, %v5284_v11  }
  0x5a   : > { %201 = vadd.xlane.f32.xlu1 %v200_v15 }
  0xa8   : > { %v5321_v29 = vpop.permute.xlu1 %112  ;;  %v5323_v30 = vpop.permute.xlu0 %102 }
  0xa9   : > { %v130_v31 = vmul.f32 %v123_v27, %v5323_v30  ;;  %v132_v32 = vmul.f32 %v123_v27, %v5321_v29  ;;  %v134_v33 = vmul.f32 %v5319_v28, %v5323_v30  ;;  %v136_v41 = vmul.f32 %v5319_v28, %v5321_v29 }
  0xab   : > { %v138_v34 = vadd.f32 %v130_v31, %v5250_v0  ;;  %v140_v37 = vadd.f32 %v132_v32, %v5254_v2  ;;  %v142_v45 = vadd.f32 %v134_v33, %v5258_v4  ;;  %v144_v47 = vadd.f32 %v136_v41, %v5262_v6 }
  0xac   : > { %v5330_v35 = vpop.permute.xlu1 %117  ;;  %v5332_v36 = vpop.permute.xlu0 %107 }
  0xad   : > { %v131_v38 = vmul.f32 %v123_v27, %v5332_v36  ;;  %v133_v39 = vmul.f32 %v123_v27, %v5330_v35  ;;  %v135_v40 = vmul.f32 %v5319_v28, %v5332_v36  ;;  %v137_v42 = vmul.f32 %v5319_v28, %v5330_v35 }
  0xae   : > { %4605 = vtanh.f32 %v138_v34 }
  0xaf   : > { %v139_v43 = vadd.f32 %v131_v38, %v5252_v1  ;;  %v141_v44 = vadd.f32 %v133_v39, %v5256_v3  ;;  %v143_v46 = vadd.f32 %v135_v40, %v5260_v5  ;;  %4607 = vtanh.f32 %v140_v37 }
  0xb0   : > { %v145_v48 = vadd.f32 %v137_v42, %v5264_v7 }
  0xb1   : > { %4609 = vtanh.f32 %v139_v43  ;;  %v5349_v49 = vpop.permute.xlu1 %159  ;;  %v5351_v50 = vpop.permute.xlu0 %155 }
  0xb2   : > { %4611 = vtanh.f32 %v141_v44 }
  0xb3   : > { %4613 = vtanh.f32 %v142_v45 }
  0xb4   : > { %4615 = vtanh.f32 %v143_v46 }
  0xb5   : > { %4617 = vtanh.f32 %v144_v47  ;;  %v5353_v52 = vpop.permute.xlu1 %163  ;;  %v5356_v56 = vpop.permute.xlu0 %167 }
  0xb6   : > { %4619 = vtanh.f32 %v145_v48 }
  0xb8   : > { %v4606_v51 = vpop.eup %4605 }
  0xb9   : > { %v170_v53 = vmul.f32 %v4606_v51, %v5351_v50  ;;  %v4608_v54 = vpop.eup %4607 }
  0xba   : > { %v172_v59 = vmul.f32 %v4608_v54, %v5353_v52 }
  0xbb   : > { %v4610_v55 = vpop.eup %4609  ;;  %v203_v61 = vmul.f32 %v170_v53, %v123_v27 }
  0xbc   : > { %v4612_v57 = vpop.eup %4611  ;;  %v171_v58 = vmul.f32 %v4610_v55, %v5349_v49  ;;  %v205_v20 = vmul.f32 %v172_v59, %v123_v27 }
  0xbd   : > { %v4614_v60 = vpop.eup %4613  ;;  %v173_v63 = vmul.f32 %v4612_v57, %v5356_v56 }
  0xbe   : > { %v4616_v62 = vpop.eup %4615  ;;  %v174_v13 = vmul.f32 %v4614_v60, %v5351_v50  ;;  %v204_v14 = vmul.f32 %v171_v58, %v123_v27  ;;  %v178_v15 = vadd.f32 %v171_v58, %v170_v53 }
  0xbf   : > { %v4618_v16 = vpop.eup %4617  ;;  %v175_v17 = vmul.f32 %v4616_v62, %v5349_v49  ;;  %v206_v33 = vmul.f32 %v173_v63, %v123_v27 }
  0xc0   : > { %v4620_v18 = vpop.eup %4619  ;;  %v176_v19 = vmul.f32 %v4618_v16, %v5353_v52  ;;  %v211_v22 = vadd.f32 %v204_v14, %v203_v61  ;;  %v179_v23 = vadd.f32 %v178_v15, %v172_v59  ;;  %v207_v26 = vmul.f32 %v174_v13, %v5319_v28 }
  0xc1   : > { %v177_v25 = vmul.f32 %v4620_v18, %v5356_v56  ;;  %v208_v31 = vmul.f32 %v175_v17, %v5319_v28  ;;  %v187_v32 = vadd.f32 %v175_v17, %v174_v13 }
  0xc2   : > { %v212_v34 = vadd.f32 %v211_v22, %v205_v20  ;;  %v180_v37 = vadd.f32 %v179_v23, %v173_v63  ;;  %v209_v38 = vmul.f32 %v176_v19, %v5319_v28  ;;  %v5379_v22 = vstv %s6840_s1 }
  0xc3   : > { %v220_v39 = vadd.f32 %v208_v31, %v207_v26  ;;  %v188_v40 = vadd.f32 %v187_v32, %v176_v19  ;;  %v210_v42 = vmul.f32 %v177_v25, %v5319_v28 }
  0xc4   : > { %v213_v41 = vadd.f32 %v212_v34, %v206_v33  ;;  %v181_v63 = vrot.slane %v180_v37, 4 }
  0xc5   : > { %v221_v43 = vadd.f32 %v220_v39, %v209_v38  ;;  %v189_v44 = vadd.f32 %v188_v40, %v177_v25 }
  0xc6   : > { %v214_v45 = vrot.slane %v213_v41, 4  ;;  %v182_v14 = vadd.f32 %v181_v63, %v180_v37 }
  0xc7   : > { %v222_v46 = vadd.f32 %v221_v43, %v210_v42  ;;  %v190_v62 = vrot.slane %v189_v44, 4  ;;  %v5388_v43 = vstv %s75_s26 }
  0xc8   : > { %v215_v47 = vadd.f32 %v214_v45, %v213_v41  ;;  %v183_v16 = vrot.slane %v182_v14, 2 }
  0xc9   : > { %v223_v48 = vrot.slane %v222_v46, 4  ;;  %v191_v13 = vadd.f32 %v190_v62, %v189_v44 }
  0xca   : > { %v216_v51 = vrot.slane %v215_v47, 2  ;;  %v184_v18 = vadd.f32 %v183_v16, %v182_v14 }
  0xcb   : > { %v224_v53 = vadd.f32 %v223_v48, %v222_v46  ;;  %v192_v15 = vrot.slane %v191_v13, 2 }
  0xcc   : > { %v217_v54 = vadd.f32 %v216_v51, %v215_v47  ;;  %v185_v25 = vrot.slane %v184_v18, 1 }
  0xcd   : > { %v225_v27 = vrot.slane %v224_v53, 2  ;;  %v193_v17 = vadd.f32 %v192_v15, %v191_v13 }
  0xce   : > { %v218_v55 = vrot.slane %v217_v54, 1  ;;  %v186_v32 = vadd.f32 %v185_v25, %v184_v18 }
  0xcf   : > { %v226_v57 = vadd.f32 %v225_v27, %v224_v53  ;;  %v194_v20 = vrot.slane %v193_v17, 1 }
  0xd0   : > { %v219_v58 = vadd.f32 %v218_v55, %v217_v54  ;;  %v197_v38 = vadd.f32 %v5379_v22, %v186_v32 }
  0xd1   : > { %v227_v59 = vrot.slane %v226_v57, 1  ;;  %v195_v26 = vadd.f32 %v194_v20, %v193_v17 }
  0xd3   : > { %v228_v60 = vadd.f32 %v227_v59, %v226_v57  ;;  %v198_v34 = vadd.f32 %v5379_v22, %v195_v26 }
  0xd5   : > { %v232_v28 = vsel %vm231_vm1, %v228_v60, %v219_v58 }
  0xd6   : > { %v234_v61 = vsel %vm199_vm0, %v232_v28, 0.0 }
  0xd7   : > { %235 = vadd.xlane.f32.xlu0 %v234_v61 }
  0xe7   : > { %v202_v19 = vpop.xlane.xlu1 %201 }
  0xe8   : > { %v237_v23 = vmul.f32 %v202_v19, %v5379_v22 }
 0x164   : > { %v236_v31 = vpop.xlane.xlu0 %235 }
 0x165   : > { %v238_v33 = vadd.f32 %v237_v23, %v236_v31 }
 0x167   : > { %v240_v37 = vrot.slane %v238_v33, 1  ;;  %v243_v40 = vsub.f32 %v197_v38, %v238_v33 }
 0x169   : > { %v244_v39 = vsub.f32 %v198_v34, %v240_v37 }
 0x16b   : > { %v247_v41 = vrot.slane %v244_v39, 7 }
 0x16d   : > { %v248_v42 = vsel %vm231_vm1, %v247_v41, %v243_v40 }
 0x16e   : > { %v5391_v44 = vmul.f32 %v5189_v12, %v248_v42 }
 0x170   : > { %v252_v45 = vmul.f32 %v5388_v43, %v5391_v44 }
 0x172   : > { %v5396_v46 = vadd.f32 %v5189_v12, %v252_v45 }
 0x174   : > { %v339_v47 = vsel %vm199_vm0, %v5396_v46, 0.0  ;;  %v261_v48 = vrot.slane %v5396_v46, %v5309_v21 }
 0x175   : > { %340 = vadd.xlane.f32.xlu0 %v339_v47 }
 0x176   : > { %v262_v51 = vcombine.high %v261_v48, %v261_v48  ;;  %v269_v53 = vrot.slane %v261_v48, %v5309_v21 }
 0x178   : > { %v276_v54 = vrot.slane %v262_v51, %v5309_v21  ;;  %v280_v27 = vrot.slane %v269_v53, %v5313_v24 }
 0x17a   : > { %v284_v55 = vrot.slane %v276_v54, %v5313_v24  ;;  %v287_v57 = vmul.f32 %v280_v27, %v5323_v30  ;;  %v288_v58 = vmul.f32 %v280_v27, %v5332_v36  ;;  %v289_v59 = vmul.f32 %v280_v27, %v5321_v29 }
 0x17b   : > { %v290_v60 = vmul.f32 %v280_v27, %v5330_v35 }
 0x17c   : > { %v291_v28 = vmul.f32 %v284_v55, %v5323_v30  ;;  %v292_v61 = vmul.f32 %v284_v55, %v5332_v36  ;;  %v293_v62 = vmul.f32 %v284_v55, %v5321_v29  ;;  %v295_v63 = vadd.f32 %v287_v57, %v5250_v0 }
 0x17d   : > { %v296_v13 = vadd.f32 %v288_v58, %v5252_v1  ;;  %v297_v14 = vadd.f32 %v289_v59, %v5254_v2  ;;  %v294_v15 = vmul.f32 %v284_v55, %v5330_v35  ;;  %v298_v16 = vadd.f32 %v290_v60, %v5256_v3 }
 0x17e   : > { %v299_v17 = vadd.f32 %v291_v28, %v5258_v4  ;;  %4621 = vtanh.f32 %v295_v63  ;;  %v300_v18 = vadd.f32 %v292_v61, %v5260_v5  ;;  %v301_v19 = vadd.f32 %v293_v62, %v5262_v6 }
 0x17f   : > { %4623 = vtanh.f32 %v296_v13  ;;  %v302_v20 = vadd.f32 %v294_v15, %v5264_v7 }
 0x180   : > { %4625 = vtanh.f32 %v297_v14 }
 0x181   : > { %4627 = vtanh.f32 %v298_v16 }
 0x182   : > { %4629 = vtanh.f32 %v299_v17 }
 0x183   : > { %4631 = vtanh.f32 %v300_v18 }
 0x184   : > { %4633 = vtanh.f32 %v301_v19 }
 0x185   : > { %4635 = vtanh.f32 %v302_v20 }
 0x188   : > { %v4622_v23 = vpop.eup %4621 }
 0x189   : > { %v4624_v25 = vpop.eup %4623  ;;  %v311_v26 = vmul.f32 %v4622_v23, %v5351_v50 }
 0x18a   : > { %v4626_v31 = vpop.eup %4625  ;;  %v312_v32 = vmul.f32 %v4624_v25, %v5349_v49 }
 0x18b   : > { %v4628_v33 = vpop.eup %4627  ;;  %v313_v34 = vmul.f32 %v4626_v31, %v5353_v52  ;;  %v342_v37 = vmul.f32 %v311_v26, %v280_v27 }
 0x18c   : > { %v4630_v38 = vpop.eup %4629  ;;  %v314_v39 = vmul.f32 %v4628_v33, %v5356_v56  ;;  %v343_v40 = vmul.f32 %v312_v32, %v280_v27  ;;  %v319_v41 = vadd.f32 %v312_v32, %v311_v26 }
 0x18d   : > { %v4632_v42 = vpop.eup %4631  ;;  %v315_v45 = vmul.f32 %v4630_v38, %v5351_v50  ;;  %v344_v51 = vmul.f32 %v313_v34, %v280_v27 }
 0x18e   : > { %v4634_v47 = vpop.eup %4633  ;;  %v316_v48 = vmul.f32 %v4632_v42, %v5349_v49  ;;  %v350_v53 = vadd.f32 %v343_v40, %v342_v37  ;;  %v320_v54 = vadd.f32 %v319_v41, %v313_v34  ;;  %v345_v59 = vmul.f32 %v314_v39, %v280_v27 }
 0x18f   : > { %v4636_v57 = vpop.eup %4635  ;;  %v317_v58 = vmul.f32 %v4634_v47, %v5353_v52  ;;  %v346_v60 = vmul.f32 %v315_v45, %v284_v55 }
 0x190   : > { %v318_v28 = vmul.f32 %v4636_v57, %v5356_v56  ;;  %v347_v61 = vmul.f32 %v316_v48, %v284_v55  ;;  %v351_v62 = vadd.f32 %v350_v53, %v344_v51  ;;  %v321_v63 = vadd.f32 %v320_v54, %v314_v39 }
 0x191   : > { %v328_v13 = vadd.f32 %v316_v48, %v315_v45  ;;  %v348_v14 = vmul.f32 %v317_v58, %v284_v55 }
 0x192   : > { %v352_v15 = vadd.f32 %v351_v62, %v345_v59  ;;  %v359_v16 = vadd.f32 %v347_v61, %v346_v60  ;;  %v349_v18 = vmul.f32 %v318_v28, %v284_v55  ;;  %v322_v47 = vrot.slane %v321_v63, 4 }
 0x193   : > { %v329_v17 = vadd.f32 %v328_v13, %v317_v58 }
 0x194   : > { %v353_v19 = vrot.slane %v352_v15, 4  ;;  %v360_v20 = vadd.f32 %v359_v16, %v348_v14  ;;  %v323_v51 = vadd.f32 %v322_v47, %v321_v63 }
 0x195   : > { %v330_v23 = vadd.f32 %v329_v17, %v318_v28 }
 0x196   : > { %v354_v25 = vadd.f32 %v353_v19, %v352_v15  ;;  %v361_v26 = vadd.f32 %v360_v20, %v349_v18  ;;  %v324_v54 = vrot.slane %v323_v51, 2 }
 0x197   : > { %v331_v55 = vrot.slane %v330_v23, 4 }
 0x198   : > { %v355_v31 = vrot.slane %v354_v25, 2  ;;  %v362_v32 = vrot.slane %v361_v26, 4  ;;  %v325_v58 = vadd.f32 %v324_v54, %v323_v51 }
 0x199   : > { %v332_v48 = vadd.f32 %v331_v55, %v330_v23 }
 0x19a   : > { %v356_v27 = vadd.f32 %v355_v31, %v354_v25  ;;  %v363_v33 = vadd.f32 %v362_v32, %v361_v26  ;;  %v326_v28 = vrot.slane %v325_v58, 1 }
 0x19b   : > { %v333_v53 = vrot.slane %v332_v48, 2 }
 0x19c   : > { %v364_v34 = vrot.slane %v363_v33, 2  ;;  %v357_v37 = vrot.slane %v356_v27, 1  ;;  %v327_v14 = vadd.f32 %v326_v28, %v325_v58 }
 0x19d   : > { %v334_v57 = vadd.f32 %v333_v53, %v332_v48 }
 0x19e   : > { %v365_v38 = vadd.f32 %v364_v34, %v363_v33  ;;  %v358_v39 = vadd.f32 %v357_v37, %v356_v27  ;;  %v337_v18 = vadd.f32 %v327_v14, %v5379_v22 }
 0x19f   : > { %v335_v59 = vrot.slane %v334_v57, 1 }
 0x1a0   : > { %v366_v40 = vrot.slane %v365_v38, 1 }
 0x1a1   : > { %v336_v62 = vadd.f32 %v335_v59, %v334_v57 }
 0x1a2   : > { %v367_v41 = vadd.f32 %v366_v40, %v365_v38 }
 0x1a3   : > { %v338_v16 = vadd.f32 %v336_v62, %v5379_v22 }
 0x1a4   : > { %v370_v42 = vsel %vm231_vm1, %v367_v41, %v358_v39 }
 0x1a5   : > { %v372_v45 = vsel %vm199_vm0, %v370_v42, 0.0 }
 0x1a6   : > { %373 = vadd.xlane.f32.xlu1 %v372_v45 }
 0x202   : > { %v341_v60 = vpop.xlane.xlu0 %340 }
 0x203   : > { %v375_v61 = vmul.f32 %v341_v60, %v5379_v22 }
 0x233   : > { %v374_v13 = vpop.xlane.xlu1 %373 }
 0x234   : > { %v376_v15 = vadd.f32 %v375_v61, %v374_v13 }
 0x236   : > { %v378_v17 = vrot.slane %v376_v15, 1  ;;  %v381_v63 = vsub.f32 %v337_v18, %v376_v15 }
 0x238   : > { %v382_v19 = vsub.f32 %v338_v16, %v378_v17 }
 0x23a   : > { %v385_v20 = vrot.slane %v382_v19, 7 }
 0x23c   : > { %v386_v23 = vsel %vm231_vm1, %v385_v20, %v381_v63 }
 0x23d   : > { %v5437_v25 = vmul.f32 %v386_v23, %v5396_v46 }
 0x23f   : > { %v389_v26 = vmul.f32 %v5437_v25, %v5388_v43 }
 0x241   : > { %v5442_v31 = vadd.f32 %v5189_v12, %v389_v26 }
 0x243   : > { %v476_v32 = vsel %vm199_vm0, %v5442_v31, 0.0  ;;  %v398_v27 = vrot.slane %v5442_v31, %v5309_v21 }
 0x244   : > { %477 = vadd.xlane.f32.xlu0 %v476_v32 }
 0x245   : > { %v399_v33 = vcombine.high %v398_v27, %v398_v27  ;;  %v406_v34 = vrot.slane %v398_v27, %v5309_v21 }
 0x247   : > { %v413_v37 = vrot.slane %v399_v33, %v5309_v21  ;;  %v417_v46 = vrot.slane %v406_v34, %v5313_v24 }
 0x249   : > { %v421_v38 = vrot.slane %v413_v37, %v5313_v24  ;;  %v424_v40 = vmul.f32 %v417_v46, %v5323_v30  ;;  %v425_v39 = vmul.f32 %v417_v46, %v5332_v36  ;;  %v426_v41 = vmul.f32 %v417_v46, %v5321_v29 }
 0x24a   : > { %v427_v42 = vmul.f32 %v417_v46, %v5330_v35 }
 0x24b   : > { %v428_v45 = vmul.f32 %v421_v38, %v5323_v30  ;;  %v429_v55 = vmul.f32 %v421_v38, %v5332_v36  ;;  %v430_v47 = vmul.f32 %v421_v38, %v5321_v29  ;;  %v432_v48 = vadd.f32 %v424_v40, %v5250_v0 }
 0x24c   : > { %v433_v51 = vadd.f32 %v425_v39, %v5252_v1  ;;  %v434_v53 = vadd.f32 %v426_v41, %v5254_v2  ;;  %v431_v54 = vmul.f32 %v421_v38, %v5330_v35  ;;  %v435_v57 = vadd.f32 %v427_v42, %v5256_v3 }
 0x24d   : > { %v436_v58 = vadd.f32 %v428_v45, %v5258_v4  ;;  %4637 = vtanh.f32 %v432_v48  ;;  %v437_v59 = vadd.f32 %v429_v55, %v5260_v5  ;;  %v438_v60 = vadd.f32 %v430_v47, %v5262_v6 }
 0x24e   : > { %4639 = vtanh.f32 %v433_v51  ;;  %v439_v28 = vadd.f32 %v431_v54, %v5264_v7 }
 0x24f   : > { %4641 = vtanh.f32 %v434_v53 }
 0x250   : > { %4643 = vtanh.f32 %v435_v57 }
 0x251   : > { %4645 = vtanh.f32 %v436_v58 }
 0x252   : > { %4647 = vtanh.f32 %v437_v59 }
 0x253   : > { %4649 = vtanh.f32 %v438_v60 }
 0x254   : > { %4651 = vtanh.f32 %v439_v28 }
 0x257   : > { %v4638_v61 = vpop.eup %4637 }
 0x258   : > { %v4640_v62 = vpop.eup %4639  ;;  %v448_v13 = vmul.f32 %v4638_v61, %v5351_v50 }
 0x259   : > { %v4642_v14 = vpop.eup %4641  ;;  %v449_v15 = vmul.f32 %v4640_v62, %v5349_v49 }
 0x25a   : > { %v4644_v16 = vpop.eup %4643  ;;  %v450_v17 = vmul.f32 %v4642_v14, %v5353_v52  ;;  %v479_v18 = vmul.f32 %v448_v13, %v417_v46 }
 0x25b   : > { %v4646_v19 = vpop.eup %4645  ;;  %v451_v63 = vmul.f32 %v4644_v16, %v5356_v56  ;;  %v480_v20 = vmul.f32 %v449_v15, %v417_v46  ;;  %v456_v23 = vadd.f32 %v449_v15, %v448_v13 }
 0x25c   : > { %v4648_v26 = vpop.eup %4647  ;;  %v452_v32 = vmul.f32 %v4646_v19, %v5351_v50  ;;  %v481_v34 = vmul.f32 %v450_v17, %v417_v46 }
 0x25d   : > { %v4650_v27 = vpop.eup %4649  ;;  %v453_v33 = vmul.f32 %v4648_v26, %v5349_v49  ;;  %v487_v37 = vadd.f32 %v480_v20, %v479_v18  ;;  %v457_v40 = vadd.f32 %v456_v23, %v450_v17  ;;  %v482_v42 = vmul.f32 %v451_v63, %v417_v46 }
 0x25e   : > { %v4652_v39 = vpop.eup %4651  ;;  %v454_v41 = vmul.f32 %v4650_v27, %v5353_v52  ;;  %v483_v45 = vmul.f32 %v452_v32, %v421_v38 }
 0x25f   : > { %v455_v55 = vmul.f32 %v4652_v39, %v5356_v56  ;;  %v484_v47 = vmul.f32 %v453_v33, %v421_v38  ;;  %v488_v48 = vadd.f32 %v487_v37, %v481_v34  ;;  %v458_v51 = vadd.f32 %v457_v40, %v451_v63 }
 0x260   : > { %v465_v53 = vadd.f32 %v453_v33, %v452_v32  ;;  %v485_v54 = vmul.f32 %v454_v41, %v421_v38 }
 0x261   : > { %v489_v57 = vadd.f32 %v488_v48, %v482_v42  ;;  %v496_v58 = vadd.f32 %v484_v47, %v483_v45  ;;  %v486_v60 = vmul.f32 %v455_v55, %v421_v38  ;;  %v459_v33 = vrot.slane %v458_v51, 4 }
 0x262   : > { %v466_v59 = vadd.f32 %v465_v53, %v454_v41 }
 0x263   : > { %v490_v28 = vrot.slane %v489_v57, 4  ;;  %v497_v61 = vadd.f32 %v496_v58, %v485_v54  ;;  %v460_v37 = vadd.f32 %v459_v33, %v458_v51 }
 0x264   : > { %v467_v62 = vadd.f32 %v466_v59, %v455_v55 }
 0x265   : > { %v491_v13 = vadd.f32 %v490_v28, %v489_v57  ;;  %v498_v14 = vadd.f32 %v497_v61, %v486_v60  ;;  %v461_v39 = vrot.slane %v460_v37, 2 }
 0x266   : > { %v468_v38 = vrot.slane %v467_v62, 4 }
 0x267   : > { %v492_v15 = vrot.slane %v491_v13, 2  ;;  %v499_v16 = vrot.slane %v498_v14, 4  ;;  %v462_v42 = vadd.f32 %v461_v39, %v460_v37 }
 0x268   : > { %v469_v34 = vadd.f32 %v468_v38, %v467_v62 }
 0x269   : > { %v493_v46 = vadd.f32 %v492_v15, %v491_v13  ;;  %v500_v17 = vadd.f32 %v499_v16, %v498_v14  ;;  %v463_v47 = vrot.slane %v462_v42, 1  ;;  %v664_v13 = vmul.f32 2.0, %v5437_v25 }
 0x26a   : > { %v470_v40 = vrot.slane %v469_v34, 2  ;;  %v5484_v15 = vstv %s5382_s25 }
 0x26b   : > { %v501_v18 = vrot.slane %v500_v17, 2  ;;  %v494_v19 = vrot.slane %v493_v46, 1  ;;  %v464_v57 = vadd.f32 %v463_v47, %v462_v42 }
 0x26c   : > { %v471_v41 = vadd.f32 %v470_v40, %v469_v34 }
 0x26d   : > { %v502_v20 = vadd.f32 %v501_v18, %v500_v17  ;;  %v495_v63 = vadd.f32 %v494_v19, %v493_v46  ;;  %v474_v28 = vadd.f32 %v464_v57, %v5379_v22  ;;  %v665_v46 = vadd.f32 %v664_v13, %v5391_v44 }
 0x26e   : > { %v472_v45 = vrot.slane %v471_v41, 1 }
 0x26f   : > { %v503_v23 = vrot.slane %v502_v20, 1 }
 0x270   : > { %v473_v53 = vadd.f32 %v472_v45, %v471_v41 }
 0x271   : > { %v504_v26 = vadd.f32 %v503_v23, %v502_v20 }
 0x272   : > { %v475_v59 = vadd.f32 %v473_v53, %v5379_v22 }
 0x273   : > { %v507_v32 = vsel %vm231_vm1, %v504_v26, %v495_v63 }
 0x274   : > { %v509_v27 = vsel %vm199_vm0, %v507_v32, 0.0 }
 0x275   : > { %510 = vadd.xlane.f32.xlu1 %v509_v27 }
 0x2d1   : > { %v478_v55 = vpop.xlane.xlu0 %477 }
 0x2d2   : > { %v512_v48 = vmul.f32 %v478_v55, %v5379_v22 }
 0x302   : > { %v511_v54 = vpop.xlane.xlu1 %510 }
 0x303   : > { %v513_v58 = vadd.f32 %v512_v48, %v511_v54 }
 0x305   : > { %v515_v60 = vrot.slane %v513_v58, 1  ;;  %v518_v61 = vsub.f32 %v474_v28, %v513_v58 }
 0x307   : > { %v519_v51 = vsub.f32 %v475_v59, %v515_v60 }
 0x309   : > { %v522_v62 = vrot.slane %v519_v51, 7 }
 0x30b   : > { %v523_v14 = vsel %vm231_vm1, %v522_v62, %v518_v61 }
 0x30c   : > { %v525_v16 = vmul.f32 %v523_v14, %v5442_v31 }
 0x30e   : > { %v666_v17 = vmul.f32 2.0, %v525_v16  ;;  %v527_v18 = vmul.f32 %v5484_v15, %v525_v16 }
 0x310   : > { %v5490_v19 = vadd.f32 %v5189_v12, %v527_v18  ;;  %v5492_v20 = vadd.f32 %v666_v17, %v665_v46 }
 0x312   : > { %v614_v23 = vsel %vm199_vm0, %v5490_v19, 0.0  ;;  %v536_v25 = vrot.slane %v5490_v19, %v5309_v21 }
 0x313   : > { %615 = vadd.xlane.f32.xlu0 %v614_v23 }
 0x314   : > { %v537_v63 = vcombine.high %v536_v25, %v536_v25  ;;  %v544_v31 = vrot.slane %v536_v25, %v5309_v21 }
 0x316   : > { %v551_v44 = vrot.slane %v537_v63, %v5309_v21  ;;  %v555_v26 = vrot.slane %v544_v31, %v5313_v24 }
 0x318   : > { %v559_v32 = vrot.slane %v551_v44, %v5313_v24  ;;  %v562_v27 = vmul.f32 %v555_v26, %v5323_v30  ;;  %v563_v38 = vmul.f32 %v555_v26, %v5332_v36  ;;  %v564_v33 = vmul.f32 %v555_v26, %v5321_v29 }
 0x319   : > { %v565_v34 = vmul.f32 %v555_v26, %v5330_v35 }
 0x31a   : > { %v566_v37 = vmul.f32 %v559_v32, %v5323_v30  ;;  %v567_v40 = vmul.f32 %v559_v32, %v5332_v36  ;;  %v568_v39 = vmul.f32 %v559_v32, %v5321_v29  ;;  %v570_v41 = vadd.f32 %v562_v27, %v5250_v0 }
 0x31b   : > { %v571_v42 = vadd.f32 %v563_v38, %v5252_v1  ;;  %v572_v45 = vadd.f32 %v564_v33, %v5254_v2  ;;  %v569_v55 = vmul.f32 %v559_v32, %v5330_v35  ;;  %v573_v47 = vadd.f32 %v565_v34, %v5256_v3 }
 0x31c   : > { %v574_v48 = vadd.f32 %v566_v37, %v5258_v4  ;;  %4653 = vtanh.f32 %v570_v41  ;;  %v575_v53 = vadd.f32 %v567_v40, %v5260_v5  ;;  %v576_v54 = vadd.f32 %v568_v39, %v5262_v6 }
 0x31d   : > { %4655 = vtanh.f32 %v571_v42  ;;  %v577_v57 = vadd.f32 %v569_v55, %v5264_v7 }
 0x31e   : > { %4657 = vtanh.f32 %v572_v45 }
 0x31f   : > { %4659 = vtanh.f32 %v573_v47 }
 0x320   : > { %4661 = vtanh.f32 %v574_v48 }
 0x321   : > { %4663 = vtanh.f32 %v575_v53 }
 0x322   : > { %4665 = vtanh.f32 %v576_v54 }
 0x323   : > { %4667 = vtanh.f32 %v577_v57 }
 0x326   : > { %v4654_v58 = vpop.eup %4653 }
 0x327   : > { %v4656_v59 = vpop.eup %4655  ;;  %v586_v60 = vmul.f32 %v4654_v58, %v5351_v50 }
 0x328   : > { %v4658_v28 = vpop.eup %4657  ;;  %v587_v51 = vmul.f32 %v4656_v59, %v5349_v49 }
 0x329   : > { %v4660_v61 = vpop.eup %4659  ;;  %v588_v62 = vmul.f32 %v4658_v28, %v5353_v52  ;;  %v617_v13 = vmul.f32 %v586_v60, %v555_v26 }
 0x32a   : > { %v4662_v14 = vpop.eup %4661  ;;  %v589_v16 = vmul.f32 %v4660_v61, %v5356_v56  ;;  %v618_v46 = vmul.f32 %v587_v51, %v555_v26  ;;  %v594_v17 = vadd.f32 %v587_v51, %v586_v60 }
 0x32b   : > { %v4664_v18 = vpop.eup %4663  ;;  %v590_v23 = vmul.f32 %v4662_v14, %v5351_v50  ;;  %v619_v31 = vmul.f32 %v588_v62, %v555_v26 }
 0x32c   : > { %v4666_v25 = vpop.eup %4665  ;;  %v591_v63 = vmul.f32 %v4664_v18, %v5349_v49  ;;  %v625_v44 = vadd.f32 %v618_v46, %v617_v13  ;;  %v595_v27 = vadd.f32 %v594_v17, %v588_v62  ;;  %v620_v34 = vmul.f32 %v589_v16, %v555_v26 }
 0x32d   : > { %v4668_v38 = vpop.eup %4667  ;;  %v592_v33 = vmul.f32 %v4666_v25, %v5353_v52  ;;  %v621_v37 = vmul.f32 %v590_v23, %v559_v32 }
 0x32e   : > { %v593_v40 = vmul.f32 %v4668_v38, %v5356_v56  ;;  %v622_v39 = vmul.f32 %v591_v63, %v559_v32  ;;  %v626_v41 = vadd.f32 %v625_v44, %v619_v31  ;;  %v596_v42 = vadd.f32 %v595_v27, %v589_v16 }
 0x32f   : > { %v603_v45 = vadd.f32 %v591_v63, %v590_v23  ;;  %v623_v55 = vmul.f32 %v592_v33, %v559_v32 }
 0x330   : > { %v627_v47 = vadd.f32 %v626_v41, %v620_v34  ;;  %v634_v48 = vadd.f32 %v622_v39, %v621_v37  ;;  %v624_v54 = vmul.f32 %v593_v40, %v559_v32  ;;  %v597_v63 = vrot.slane %v596_v42, 4 }
 0x331   : > { %v604_v53 = vadd.f32 %v603_v45, %v592_v33 }
 0x332   : > { %v628_v57 = vrot.slane %v627_v47, 4  ;;  %v635_v58 = vadd.f32 %v634_v48, %v623_v55  ;;  %v598_v44 = vadd.f32 %v597_v63, %v596_v42 }
 0x333   : > { %v605_v59 = vadd.f32 %v604_v53, %v593_v40 }
 0x334   : > { %v629_v60 = vadd.f32 %v628_v57, %v627_v47  ;;  %v636_v28 = vadd.f32 %v635_v58, %v624_v54  ;;  %v599_v38 = vrot.slane %v598_v44, 2 }
 0x335   : > { %v606_v32 = vrot.slane %v605_v59, 4 }
 0x336   : > { %v630_v51 = vrot.slane %v629_v60, 2  ;;  %v637_v61 = vrot.slane %v636_v28, 4  ;;  %v600_v34 = vadd.f32 %v599_v38, %v598_v44 }
 0x337   : > { %v607_v31 = vadd.f32 %v606_v32, %v605_v59 }
 0x338   : > { %v631_v26 = vadd.f32 %v630_v51, %v629_v60  ;;  %v638_v62 = vadd.f32 %v637_v61, %v636_v28  ;;  %v601_v39 = vrot.slane %v600_v34, 1  ;;  %v5534_v51 = vstv %s76_s27 }
 0x339   : > { %v608_v27 = vrot.slane %v607_v31, 2 }
 0x33a   : > { %v639_v13 = vrot.slane %v638_v62, 2  ;;  %v632_v14 = vrot.slane %v631_v26, 1  ;;  %v602_v47 = vadd.f32 %v601_v39, %v600_v34 }
 0x33b   : > { %v609_v33 = vadd.f32 %v608_v27, %v607_v31 }
 0x33c   : > { %v640_v46 = vadd.f32 %v639_v13, %v638_v62  ;;  %v633_v16 = vadd.f32 %v632_v14, %v631_v26  ;;  %v612_v57 = vadd.f32 %v602_v47, %v5379_v22 }
 0x33d   : > { %v610_v37 = vrot.slane %v609_v33, 1 }
 0x33e   : > { %v641_v17 = vrot.slane %v640_v46, 1 }
 0x33f   : > { %v611_v45 = vadd.f32 %v610_v37, %v609_v33 }
 0x340   : > { %v642_v18 = vadd.f32 %v641_v17, %v640_v46 }
 0x341   : > { %v613_v53 = vadd.f32 %v611_v45, %v5379_v22 }
 0x342   : > { %v645_v23 = vsel %vm231_vm1, %v642_v18, %v633_v16 }
 0x343   : > { %v647_v25 = vsel %vm199_vm0, %v645_v23, 0.0 }
 0x344   : > { %648 = vadd.xlane.f32.xlu1 %v647_v25 }
 0x3a0   : > { %v616_v40 = vpop.xlane.xlu0 %615 }
 0x3a1   : > { %v650_v41 = vmul.f32 %v616_v40, %v5379_v22 }
 0x3d1   : > { %v649_v55 = vpop.xlane.xlu1 %648 }
 0x3d2   : > { %v651_v48 = vadd.f32 %v650_v41, %v649_v55 }
 0x3d4   : > { %v653_v54 = vrot.slane %v651_v48, 1  ;;  %v656_v58 = vsub.f32 %v612_v57, %v651_v48 }
 0x3d6   : > { %v657_v42 = vsub.f32 %v613_v53, %v653_v54 }
 0x3d8   : > { %v660_v59 = vrot.slane %v657_v42, 7 }
 0x3da   : > { %v661_v60 = vsel %vm231_vm1, %v660_v59, %v656_v58 }
 0x3db   : > { %v663_v28 = vmul.f32 %v661_v60, %v5490_v19 }
 0x3dd   : > { %v668_v61 = vadd.f32 %v5492_v20, %v663_v28 }
 0x3df   : > { %v670_v26 = vmul.f32 %v5534_v51, %v668_v61 }
 0x3e1   : > { %v5539_v62 = vadd.f32 %v5189_v12, %v670_v26 }
 0x3e3   : > { %v679_v13 = vrot.slane %v5539_v62, %v5309_v21  ;;  %v757_v14 = vsel %vm199_vm0, %v5539_v62, 0.0 }
 0x3e4   : > { %758 = vadd.xlane.f32.xlu0 %v757_v14 }
 0x3e5   : > { %v680_v46 = vcombine.high %v679_v13, %v679_v13  ;;  %v687_v17 = vrot.slane %v679_v13, %v5309_v21 }
 0x3e7   : > { %v694_v19 = vrot.slane %v680_v46, %v5309_v21  ;;  %v698_v16 = vrot.slane %v687_v17, %v5313_v24 }
 0x3e9   : > { %v702_v20 = vrot.slane %v694_v19, %v5313_v24  ;;  %v705_v18 = vmul.f32 %v698_v16, %v5323_v30  ;;  %v706_v12 = vmul.f32 %v698_v16, %v5332_v36  ;;  %v707_v23 = vmul.f32 %v698_v16, %v5321_v29 }
 0x3ea   : > { %v708_v25 = vmul.f32 %v698_v16, %v5330_v35 }
 0x3eb   : > { %v709_v32 = vmul.f32 %v702_v20, %v5323_v30  ;;  %v710_v63 = vmul.f32 %v702_v20, %v5332_v36  ;;  %v711_v31 = vmul.f32 %v702_v20, %v5321_v29  ;;  %v713_v44 = vadd.f32 %v705_v18, %v5250_v0 }
 0x3ec   : > { %v714_v27 = vadd.f32 %v706_v12, %v5252_v1  ;;  %v715_v38 = vadd.f32 %v707_v23, %v5254_v2  ;;  %v712_v33 = vmul.f32 %v702_v20, %v5330_v35  ;;  %v716_v34 = vadd.f32 %v708_v25, %v5256_v3 }
 0x3ed   : > { %v717_v37 = vadd.f32 %v709_v32, %v5258_v4  ;;  %4669 = vtanh.f32 %v713_v44  ;;  %v718_v40 = vadd.f32 %v710_v63, %v5260_v5  ;;  %v719_v39 = vadd.f32 %v711_v31, %v5262_v6 }
 0x3ee   : > { %4671 = vtanh.f32 %v714_v27  ;;  %v720_v41 = vadd.f32 %v712_v33, %v5264_v7 }
 0x3ef   : > { %4673 = vtanh.f32 %v715_v38 }
 0x3f0   : > { %4675 = vtanh.f32 %v716_v34 }
 0x3f1   : > { %4677 = vtanh.f32 %v717_v37 }
 0x3f2   : > { %4679 = vtanh.f32 %v718_v40 }
 0x3f3   : > { %4681 = vtanh.f32 %v719_v39 }
 0x3f4   : > { %4683 = vtanh.f32 %v720_v41 }
 0x3f7   : > { %v4670_v45 = vpop.eup %4669 }
 0x3f8   : > { %v4672_v55 = vpop.eup %4671  ;;  %v729_v47 = vmul.f32 %v4670_v45, %v5351_v50 }
 0x3f9   : > { %v4674_v48 = vpop.eup %4673  ;;  %v730_v53 = vmul.f32 %v4672_v55, %v5349_v49 }
 0x3fa   : > { %v4676_v54 = vpop.eup %4675  ;;  %v731_v57 = vmul.f32 %v4674_v48, %v5353_v52  ;;  %v760_v42 = vmul.f32 %v729_v47, %v698_v16 }
 0x3fb   : > { %v4678_v58 = vpop.eup %4677  ;;  %v732_v59 = vmul.f32 %v4676_v54, %v5356_v56  ;;  %v761_v60 = vmul.f32 %v730_v53, %v698_v16  ;;  %v737_v28 = vadd.f32 %v730_v53, %v729_v47 }
 0x3fc   : > { %v4680_v61 = vpop.eup %4679  ;;  %v733_v26 = vmul.f32 %v4678_v58, %v5351_v50  ;;  %v762_v46 = vmul.f32 %v731_v57, %v698_v16 }
 0x3fd   : > { %v4682_v13 = vpop.eup %4681  ;;  %v734_v14 = vmul.f32 %v4680_v61, %v5349_v49  ;;  %v768_v17 = vadd.f32 %v761_v60, %v760_v42  ;;  %v738_v19 = vadd.f32 %v737_v28, %v731_v57  ;;  %v763_v23 = vmul.f32 %v732_v59, %v698_v16 }
 0x3fe   : > { %v4684_v18 = vpop.eup %4683  ;;  %v735_v12 = vmul.f32 %v4682_v13, %v5353_v52  ;;  %v764_v25 = vmul.f32 %v733_v26, %v702_v20 }
 0x3ff   : > { %v736_v32 = vmul.f32 %v4684_v18, %v5356_v56  ;;  %v765_v63 = vmul.f32 %v734_v14, %v702_v20  ;;  %v769_v31 = vadd.f32 %v768_v17, %v762_v46  ;;  %v739_v44 = vadd.f32 %v738_v19, %v732_v59 }
 0x400   : > { %v746_v27 = vadd.f32 %v734_v14, %v733_v26  ;;  %v766_v38 = vmul.f32 %v735_v12, %v702_v20 }
 0x401   : > { %v770_v33 = vadd.f32 %v769_v31, %v763_v23  ;;  %v777_v34 = vadd.f32 %v765_v63, %v764_v25  ;;  %v767_v40 = vmul.f32 %v736_v32, %v702_v20  ;;  %v740_v13 = vrot.slane %v739_v44, 4 }
 0x402   : > { %v747_v37 = vadd.f32 %v746_v27, %v735_v12 }
 0x403   : > { %v771_v39 = vrot.slane %v770_v33, 4  ;;  %v778_v41 = vadd.f32 %v777_v34, %v766_v38  ;;  %v741_v46 = vadd.f32 %v740_v13, %v739_v44 }
 0x404   : > { %v748_v45 = vadd.f32 %v747_v37, %v736_v32 }
 0x405   : > { %v772_v55 = vadd.f32 %v771_v39, %v770_v33  ;;  %v779_v47 = vadd.f32 %v778_v41, %v767_v40  ;;  %v742_v19 = vrot.slane %v741_v46, 2 }
 0x406   : > { %v749_v20 = vrot.slane %v748_v45, 4 }
 0x407   : > { %v773_v48 = vrot.slane %v772_v55, 2  ;;  %v780_v53 = vrot.slane %v779_v47, 4  ;;  %v743_v12 = vadd.f32 %v742_v19, %v741_v46 }
 0x408   : > { %v750_v14 = vadd.f32 %v749_v20, %v748_v45 }
 0x409   : > { %v774_v16 = vadd.f32 %v773_v48, %v772_v55  ;;  %v781_v54 = vadd.f32 %v780_v53, %v779_v47  ;;  %v744_v32 = vrot.slane %v743_v12, 1 }
 0x40a   : > { %v751_v17 = vrot.slane %v750_v14, 2 }
 0x40b   : > { %v782_v57 = vrot.slane %v781_v54, 2  ;;  %v775_v42 = vrot.slane %v774_v16, 1  ;;  %v745_v38 = vadd.f32 %v744_v32, %v743_v12 }
 0x40c   : > { %v752_v18 = vadd.f32 %v751_v17, %v750_v14 }
 0x40d   : > { %v783_v58 = vadd.f32 %v782_v57, %v781_v54  ;;  %v776_v59 = vadd.f32 %v775_v42, %v774_v16  ;;  %v755_v40 = vadd.f32 %v745_v38, %v5379_v22 }
 0x40e   : > { %v753_v23 = vrot.slane %v752_v18, 1 }
 0x40f   : > { %v784_v60 = vrot.slane %v783_v58, 1 }
 0x410   : > { %v754_v31 = vadd.f32 %v753_v23, %v752_v18 }
 0x411   : > { %v785_v28 = vadd.f32 %v784_v60, %v783_v58 }
 0x412   : > { %v756_v34 = vadd.f32 %v754_v31, %v5379_v22 }
 0x413   : > { %v788_v61 = vsel %vm231_vm1, %v785_v28, %v776_v59 }
 0x414   : > { %v790_v26 = vsel %vm199_vm0, %v788_v61, 0.0 }
 0x415   : > { %791 = vadd.xlane.f32.xlu1 %v790_v26 }
 0x471   : > { %v759_v25 = vpop.xlane.xlu0 %758 }
 0x472   : > { %v793_v63 = vmul.f32 %v759_v25, %v5379_v22 }
 0x4a2   : > { %v792_v27 = vpop.xlane.xlu1 %791 }
 0x4a3   : > { %v794_v33 = vadd.f32 %v793_v63, %v792_v27 }
 0x4a5   : > { %v796_v37 = vrot.slane %v794_v33, 1  ;;  %v799_v44 = vsub.f32 %v755_v40, %v794_v33 }
 0x4a7   : > { %v800_v39 = vsub.f32 %v756_v34, %v796_v37 }
 0x4a9   : > { %v803_v41 = vrot.slane %v800_v39, 7 }
 0x4ab   : > { %v804_v45 = vsel %vm231_vm1, %v803_v41, %v799_v44 }
 0x4ac   : > { %v5580_v55 = vmul.f32 %v804_v45, %v5539_v62 }
 0x4ae   : > { %v807_v47 = vmul.f32 %v5580_v55, %v5388_v43 }
 0x4b0   : > { %v5585_v48 = vadd.f32 %v807_v47, %v5539_v62 }
 0x4b2   : > { %v894_v53 = vsel %vm199_vm0, %v5585_v48, 0.0  ;;  %v816_v16 = vrot.slane %v5585_v48, %v5309_v21 }
 0x4b3   : > { %895 = vadd.xlane.f32.xlu0 %v894_v53 }
 0x4b4   : > { %v817_v54 = vcombine.high %v816_v16, %v816_v16  ;;  %v824_v57 = vrot.slane %v816_v16, %v5309_v21 }
 0x4b6   : > { %v831_v42 = vrot.slane %v817_v54, %v5309_v21  ;;  %v835_v58 = vrot.slane %v824_v57, %v5313_v24 }
 0x4b8   : > { %v839_v60 = vrot.slane %v831_v42, %v5313_v24  ;;  %v842_v59 = vmul.f32 %v835_v58, %v5323_v30  ;;  %v843_v28 = vmul.f32 %v835_v58, %v5332_v36  ;;  %v844_v61 = vmul.f32 %v835_v58, %v5321_v29 }
 0x4b9   : > { %v845_v26 = vmul.f32 %v835_v58, %v5330_v35 }
 0x4ba   : > { %v846_v20 = vmul.f32 %v839_v60, %v5323_v30  ;;  %v847_v13 = vmul.f32 %v839_v60, %v5332_v36  ;;  %v848_v14 = vmul.f32 %v839_v60, %v5321_v29  ;;  %v850_v46 = vadd.f32 %v842_v59, %v5250_v0 }
 0x4bb   : > { %v851_v17 = vadd.f32 %v843_v28, %v5252_v1  ;;  %v852_v19 = vadd.f32 %v844_v61, %v5254_v2  ;;  %v849_v18 = vmul.f32 %v839_v60, %v5330_v35  ;;  %v853_v12 = vadd.f32 %v845_v26, %v5256_v3 }
 0x4bc   : > { %v854_v23 = vadd.f32 %v846_v20, %v5258_v4  ;;  %4685 = vtanh.f32 %v850_v46  ;;  %v855_v25 = vadd.f32 %v847_v13, %v5260_v5  ;;  %v856_v32 = vadd.f32 %v848_v14, %v5262_v6 }
 0x4bd   : > { %4687 = vtanh.f32 %v851_v17  ;;  %v857_v63 = vadd.f32 %v849_v18, %v5264_v7 }
 0x4be   : > { %4689 = vtanh.f32 %v852_v19 }
 0x4bf   : > { %4691 = vtanh.f32 %v853_v12 }
 0x4c0   : > { %4693 = vtanh.f32 %v854_v23 }
 0x4c1   : > { %4695 = vtanh.f32 %v855_v25 }
 0x4c2   : > { %4697 = vtanh.f32 %v856_v32 }
 0x4c3   : > { %4699 = vtanh.f32 %v857_v63 }
 0x4c6   : > { %v4686_v31 = vpop.eup %4685 }
 0x4c7   : > { %v4688_v27 = vpop.eup %4687  ;;  %v866_v38 = vmul.f32 %v4686_v31, %v5351_v50 }
 0x4c8   : > { %v4690_v33 = vpop.eup %4689  ;;  %v867_v34 = vmul.f32 %v4688_v27, %v5349_v49 }
 0x4c9   : > { %v4692_v37 = vpop.eup %4691  ;;  %v868_v40 = vmul.f32 %v4690_v33, %v5353_v52  ;;  %v897_v39 = vmul.f32 %v866_v38, %v835_v58 }
 0x4ca   : > { %v4694_v44 = vpop.eup %4693  ;;  %v869_v41 = vmul.f32 %v4692_v37, %v5356_v56  ;;  %v898_v45 = vmul.f32 %v867_v34, %v835_v58  ;;  %v874_v47 = vadd.f32 %v867_v34, %v866_v38 }
 0x4cb   : > { %v4696_v53 = vpop.eup %4695  ;;  %v870_v16 = vmul.f32 %v4694_v44, %v5351_v50  ;;  %v899_v42 = vmul.f32 %v868_v40, %v835_v58 }
 0x4cc   : > { %v4698_v54 = vpop.eup %4697  ;;  %v871_v57 = vmul.f32 %v4696_v53, %v5349_v49  ;;  %v905_v59 = vadd.f32 %v898_v45, %v897_v39  ;;  %v875_v28 = vadd.f32 %v874_v47, %v868_v40  ;;  %v900_v20 = vmul.f32 %v869_v41, %v835_v58 }
 0x4cd   : > { %v4700_v61 = vpop.eup %4699  ;;  %v872_v26 = vmul.f32 %v4698_v54, %v5353_v52  ;;  %v901_v13 = vmul.f32 %v870_v16, %v839_v60 }
 0x4ce   : > { %v873_v14 = vmul.f32 %v4700_v61, %v5356_v56  ;;  %v902_v46 = vmul.f32 %v871_v57, %v839_v60  ;;  %v906_v17 = vadd.f32 %v905_v59, %v899_v42  ;;  %v876_v19 = vadd.f32 %v875_v28, %v869_v41 }
 0x4cf   : > { %v883_v18 = vadd.f32 %v871_v57, %v870_v16  ;;  %v903_v12 = vmul.f32 %v872_v26, %v839_v60 }
 0x4d0   : > { %v907_v23 = vadd.f32 %v906_v17, %v900_v20  ;;  %v914_v25 = vadd.f32 %v902_v46, %v901_v13  ;;  %v904_v63 = vmul.f32 %v873_v14, %v839_v60  ;;  %v877_v42 = vrot.slane %v876_v19, 4 }
 0x4d1   : > { %v884_v32 = vadd.f32 %v883_v18, %v872_v26 }
 0x4d2   : > { %v908_v31 = vrot.slane %v907_v23, 4  ;;  %v915_v27 = vadd.f32 %v914_v25, %v903_v12  ;;  %v878_v28 = vadd.f32 %v877_v42, %v876_v19 }
 0x4d3   : > { %v885_v38 = vadd.f32 %v884_v32, %v873_v14 }
 0x4d4   : > { %v909_v33 = vadd.f32 %v908_v31, %v907_v23  ;;  %v916_v34 = vadd.f32 %v915_v27, %v904_v63  ;;  %v879_v26 = vrot.slane %v878_v28, 2 }
 0x4d5   : > { %v886_v60 = vrot.slane %v885_v38, 4 }
 0x4d6   : > { %v910_v37 = vrot.slane %v909_v33, 2  ;;  %v917_v40 = vrot.slane %v916_v34, 4  ;;  %v880_v13 = vadd.f32 %v879_v26, %v878_v28 }
 0x4d7   : > { %v887_v59 = vadd.f32 %v886_v60, %v885_v38 }
 0x4d8   : > { %v911_v58 = vadd.f32 %v910_v37, %v909_v33  ;;  %v918_v39 = vadd.f32 %v917_v40, %v916_v34  ;;  %v881_v17 = vrot.slane %v880_v13, 1 }
 0x4d9   : > { %v888_v61 = vrot.slane %v887_v59, 2 }
 0x4da   : > { %v919_v44 = vrot.slane %v918_v39, 2  ;;  %v912_v45 = vrot.slane %v911_v58, 1  ;;  %v882_v25 = vadd.f32 %v881_v17, %v880_v13 }
 0x4db   : > { %v889_v20 = vadd.f32 %v888_v61, %v887_v59 }
 0x4dc   : > { %v920_v47 = vadd.f32 %v919_v44, %v918_v39  ;;  %v913_v41 = vadd.f32 %v912_v45, %v911_v58  ;;  %v892_v27 = vadd.f32 %v882_v25, %v5379_v22 }
 0x4dd   : > { %v890_v14 = vrot.slane %v889_v20, 1 }
 0x4de   : > { %v921_v53 = vrot.slane %v920_v47, 1 }
 0x4df   : > { %v891_v12 = vadd.f32 %v890_v14, %v889_v20 }
 0x4e0   : > { %v922_v16 = vadd.f32 %v921_v53, %v920_v47 }
 0x4e1   : > { %v893_v63 = vadd.f32 %v891_v12, %v5379_v22 }
 0x4e2   : > { %v925_v54 = vsel %vm231_vm1, %v922_v16, %v913_v41 }
 0x4e3   : > { %v927_v57 = vsel %vm199_vm0, %v925_v54, 0.0 }
 0x4e4   : > { %928 = vadd.xlane.f32.xlu1 %v927_v57 }
 0x540   : > { %v896_v46 = vpop.xlane.xlu0 %895 }
 0x541   : > { %v930_v18 = vmul.f32 %v896_v46, %v5379_v22 }
 0x571   : > { %v929_v23 = vpop.xlane.xlu1 %928 }
 0x572   : > { %v931_v32 = vadd.f32 %v930_v18, %v929_v23 }
 0x574   : > { %v933_v31 = vrot.slane %v931_v32, 1  ;;  %v936_v19 = vsub.f32 %v892_v27, %v931_v32 }
 0x576   : > { %v937_v38 = vsub.f32 %v893_v63, %v933_v31 }
 0x578   : > { %v940_v33 = vrot.slane %v937_v38, 7 }
 0x57a   : > { %v941_v34 = vsel %vm231_vm1, %v940_v33, %v936_v19 }
 0x57b   : > { %v5626_v37 = vmul.f32 %v941_v34, %v5585_v48 }
 0x57d   : > { %v944_v40 = vmul.f32 %v5626_v37, %v5388_v43 }
 0x57f   : > { %v5631_v58 = vadd.f32 %v944_v40, %v5539_v62 }
 0x581   : > { %v1031_v39 = vsel %vm199_vm0, %v5631_v58, 0.0  ;;  %v953_v44 = vrot.slane %v5631_v58, %v5309_v21 }
 0x582   : > { %1032 = vadd.xlane.f32.xlu0 %v1031_v39 }
 0x583   : > { %v954_v45 = vcombine.high %v953_v44, %v953_v44  ;;  %v961_v47 = vrot.slane %v953_v44, %v5309_v21 }
 0x585   : > { %v968_v53 = vrot.slane %v954_v45, %v5309_v21  ;;  %v972_v48 = vrot.slane %v961_v47, %v5313_v24 }
 0x587   : > { %v976_v41 = vrot.slane %v968_v53, %v5313_v24  ;;  %v979_v16 = vmul.f32 %v972_v48, %v5323_v30  ;;  %v980_v54 = vmul.f32 %v972_v48, %v5332_v36  ;;  %v981_v57 = vmul.f32 %v972_v48, %v5321_v29 }
 0x588   : > { %v982_v60 = vmul.f32 %v972_v48, %v5330_v35 }
 0x589   : > { %v983_v42 = vmul.f32 %v976_v41, %v5323_v30  ;;  %v984_v59 = vmul.f32 %v976_v41, %v5332_v36  ;;  %v985_v28 = vmul.f32 %v976_v41, %v5321_v29  ;;  %v987_v61 = vadd.f32 %v979_v16, %v5250_v0 }
 0x58a   : > { %v988_v26 = vadd.f32 %v980_v54, %v5252_v1  ;;  %v989_v20 = vadd.f32 %v981_v57, %v5254_v2  ;;  %v986_v13 = vmul.f32 %v976_v41, %v5330_v35  ;;  %v990_v14 = vadd.f32 %v982_v60, %v5256_v3 }
 0x58b   : > { %v991_v46 = vadd.f32 %v983_v42, %v5258_v4  ;;  %4701 = vtanh.f32 %v987_v61  ;;  %v992_v17 = vadd.f32 %v984_v59, %v5260_v5  ;;  %v993_v18 = vadd.f32 %v985_v28, %v5262_v6 }
 0x58c   : > { %4703 = vtanh.f32 %v988_v26  ;;  %v994_v12 = vadd.f32 %v986_v13, %v5264_v7 }
 0x58d   : > { %4705 = vtanh.f32 %v989_v20 }
 0x58e   : > { %4707 = vtanh.f32 %v990_v14 }
 0x58f   : > { %4709 = vtanh.f32 %v991_v46 }
 0x590   : > { %4711 = vtanh.f32 %v992_v17 }
 0x591   : > { %4713 = vtanh.f32 %v993_v18 }
 0x592   : > { %4715 = vtanh.f32 %v994_v12 }
 0x595   : > { %v4702_v23 = vpop.eup %4701 }
 0x596   : > { %v4704_v25 = vpop.eup %4703  ;;  %v1003_v32 = vmul.f32 %v4702_v23, %v5351_v50 }
 0x597   : > { %v4706_v63 = vpop.eup %4705  ;;  %v1004_v31 = vmul.f32 %v4704_v25, %v5349_v49 }
 0x598   : > { %v4708_v27 = vpop.eup %4707  ;;  %v1005_v38 = vmul.f32 %v4706_v63, %v5353_v52  ;;  %v1034_v19 = vmul.f32 %v1003_v32, %v972_v48 }
 0x599   : > { %v4710_v33 = vpop.eup %4709  ;;  %v1006_v34 = vmul.f32 %v4708_v27, %v5356_v56  ;;  %v1035_v40 = vmul.f32 %v1004_v31, %v972_v48  ;;  %v1011_v39 = vadd.f32 %v1004_v31, %v1003_v32 }
 0x59a   : > { %v4712_v44 = vpop.eup %4711  ;;  %v1007_v45 = vmul.f32 %v4710_v33, %v5351_v50  ;;  %v1036_v16 = vmul.f32 %v1005_v38, %v972_v48 }
 0x59b   : > { %v4714_v47 = vpop.eup %4713  ;;  %v1008_v53 = vmul.f32 %v4712_v44, %v5349_v49  ;;  %v1042_v54 = vadd.f32 %v1035_v40, %v1034_v19  ;;  %v1012_v57 = vadd.f32 %v1011_v39, %v1005_v38  ;;  %v1037_v59 = vmul.f32 %v1006_v34, %v972_v48 }
 0x59c   : > { %v4716_v60 = vpop.eup %4715  ;;  %v1009_v42 = vmul.f32 %v4714_v47, %v5353_v52  ;;  %v1038_v28 = vmul.f32 %v1007_v45, %v976_v41 }
 0x59d   : > { %v1010_v61 = vmul.f32 %v4716_v60, %v5356_v56  ;;  %v1039_v26 = vmul.f32 %v1008_v53, %v976_v41  ;;  %v1043_v20 = vadd.f32 %v1042_v54, %v1036_v16  ;;  %v1013_v13 = vadd.f32 %v1012_v57, %v1006_v34 }
 0x59e   : > { %v1020_v14 = vadd.f32 %v1008_v53, %v1007_v45  ;;  %v1040_v46 = vmul.f32 %v1009_v42, %v976_v41 }
 0x59f   : > { %v1044_v17 = vadd.f32 %v1043_v20, %v1037_v59  ;;  %v1051_v18 = vadd.f32 %v1039_v26, %v1038_v28  ;;  %v1041_v23 = vmul.f32 %v1010_v61, %v976_v41  ;;  %v1014_v54 = vrot.slane %v1013_v13, 4 }
 0x5a0   : > { %v1021_v12 = vadd.f32 %v1020_v14, %v1009_v42 }
 0x5a1   : > { %v1045_v25 = vrot.slane %v1044_v17, 4  ;;  %v1052_v32 = vadd.f32 %v1051_v18, %v1040_v46  ;;  %v1015_v60 = vadd.f32 %v1014_v54, %v1013_v13 }
 0x5a2   : > { %v1022_v63 = vadd.f32 %v1021_v12, %v1010_v61 }
 0x5a3   : > { %v1046_v31 = vadd.f32 %v1045_v25, %v1044_v17  ;;  %v1053_v27 = vadd.f32 %v1052_v32, %v1041_v23  ;;  %v1016_v59 = vrot.slane %v1015_v60, 2 }
 0x5a4   : > { %v1023_v41 = vrot.slane %v1022_v63, 4 }
 0x5a5   : > { %v1047_v38 = vrot.slane %v1046_v31, 2  ;;  %v1054_v19 = vrot.slane %v1053_v27, 4  ;;  %v1017_v61 = vadd.f32 %v1016_v59, %v1015_v60 }
 0x5a6   : > { %v1024_v57 = vadd.f32 %v1023_v41, %v1022_v63 }
 0x5a7   : > { %v1048_v48 = vadd.f32 %v1047_v38, %v1046_v31  ;;  %v1055_v33 = vadd.f32 %v1054_v19, %v1053_v27  ;;  %v1018_v14 = vrot.slane %v1017_v61, 1  ;;  %v1218_v38 = vmul.f32 2.0, %v5626_v37 }
 0x5a8   : > { %v1025_v42 = vrot.slane %v1024_v57, 2 }
 0x5a9   : > { %v1056_v40 = vrot.slane %v1055_v33, 2  ;;  %v1049_v39 = vrot.slane %v1048_v48, 1  ;;  %v1019_v12 = vadd.f32 %v1018_v14, %v1017_v61 }
 0x5aa   : > { %v1026_v28 = vadd.f32 %v1025_v42, %v1024_v57 }
 0x5ab   : > { %v1057_v44 = vadd.f32 %v1056_v40, %v1055_v33  ;;  %v1050_v34 = vadd.f32 %v1049_v39, %v1048_v48  ;;  %v1029_v31 = vadd.f32 %v1019_v12, %v5379_v22  ;;  %v1219_v33 = vadd.f32 %v1218_v38, %v5580_v55 }
 0x5ac   : > { %v1027_v26 = vrot.slane %v1026_v28, 1 }
 0x5ad   : > { %v1058_v47 = vrot.slane %v1057_v44, 1 }
 0x5ae   : > { %v1028_v17 = vadd.f32 %v1027_v26, %v1026_v28 }
 0x5af   : > { %v1059_v45 = vadd.f32 %v1058_v47, %v1057_v44 }
 0x5b0   : > { %v1030_v25 = vadd.f32 %v1028_v17, %v5379_v22 }
 0x5b1   : > { %v1062_v53 = vsel %vm231_vm1, %v1059_v45, %v1050_v34 }
 0x5b2   : > { %v1064_v16 = vsel %vm199_vm0, %v1062_v53, 0.0 }
 0x5b3   : > { %1065 = vadd.xlane.f32.xlu1 %v1064_v16 }
 0x60f   : > { %v1033_v20 = vpop.xlane.xlu0 %1032 }
 0x610   : > { %v1067_v46 = vmul.f32 %v1033_v20, %v5379_v22 }
 0x640   : > { %v1066_v18 = vpop.xlane.xlu1 %1065 }
 0x641   : > { %v1068_v23 = vadd.f32 %v1067_v46, %v1066_v18 }
 0x643   : > { %v1070_v32 = vrot.slane %v1068_v23, 1  ;;  %v1073_v13 = vsub.f32 %v1029_v31, %v1068_v23 }
 0x645   : > { %v1074_v63 = vsub.f32 %v1030_v25, %v1070_v32 }
 0x647   : > { %v1077_v27 = vrot.slane %v1074_v63, 7 }
 0x649   : > { %v1078_v19 = vsel %vm231_vm1, %v1077_v27, %v1073_v13 }
 0x64a   : > { %v1080_v48 = vmul.f32 %v1078_v19, %v5631_v58 }
 0x64c   : > { %v1220_v40 = vmul.f32 2.0, %v1080_v48  ;;  %v1081_v39 = vmul.f32 %v1080_v48, %v5484_v15 }
 0x64e   : > { %v5676_v44 = vadd.f32 %v1081_v39, %v5539_v62  ;;  %v5678_v47 = vadd.f32 %v1220_v40, %v1219_v33 }
 0x650   : > { %v1168_v34 = vsel %vm199_vm0, %v5676_v44, 0.0  ;;  %v1090_v37 = vrot.slane %v5676_v44, %v5309_v21 }
 0x651   : > { %1169 = vadd.xlane.f32.xlu0 %v1168_v34 }
 0x652   : > { %v1091_v45 = vcombine.high %v1090_v37, %v1090_v37  ;;  %v1098_v58 = vrot.slane %v1090_v37, %v5309_v21 }
 0x654   : > { %v1105_v55 = vrot.slane %v1091_v45, %v5309_v21  ;;  %v1109_v53 = vrot.slane %v1098_v58, %v5313_v24 }
 0x656   : > { %v1113_v16 = vrot.slane %v1105_v55, %v5313_v24  ;;  %v1116_v41 = vmul.f32 %v1109_v53, %v5323_v30  ;;  %v1117_v54 = vmul.f32 %v1109_v53, %v5332_v36  ;;  %v1118_v57 = vmul.f32 %v1109_v53, %v5321_v29 }
 0x657   : > { %v1119_v60 = vmul.f32 %v1109_v53, %v5330_v35 }
 0x658   : > { %v1120_v42 = vmul.f32 %v1113_v16, %v5323_v30  ;;  %v1121_v59 = vmul.f32 %v1113_v16, %v5332_v36  ;;  %v1122_v28 = vmul.f32 %v1113_v16, %v5321_v29  ;;  %v1124_v61 = vadd.f32 %v1116_v41, %v5250_v0 }
 0x659   : > { %v1125_v26 = vadd.f32 %v1117_v54, %v5252_v1  ;;  %v1126_v20 = vadd.f32 %v1118_v57, %v5254_v2  ;;  %v1123_v14 = vmul.f32 %v1113_v16, %v5330_v35  ;;  %v1127_v46 = vadd.f32 %v1119_v60, %v5256_v3 }
 0x65a   : > { %v1128_v17 = vadd.f32 %v1120_v42, %v5258_v4  ;;  %4717 = vtanh.f32 %v1124_v61  ;;  %v1129_v18 = vadd.f32 %v1121_v59, %v5260_v5  ;;  %v1130_v12 = vadd.f32 %v1122_v28, %v5262_v6 }
 0x65b   : > { %4719 = vtanh.f32 %v1125_v26  ;;  %v1131_v23 = vadd.f32 %v1123_v14, %v5264_v7 }
 0x65c   : > { %4721 = vtanh.f32 %v1126_v20 }
 0x65d   : > { %4723 = vtanh.f32 %v1127_v46 }
 0x65e   : > { %4725 = vtanh.f32 %v1128_v17 }
 0x65f   : > { %4727 = vtanh.f32 %v1129_v18 }
 0x660   : > { %4729 = vtanh.f32 %v1130_v12 }
 0x661   : > { %4731 = vtanh.f32 %v1131_v23 }
 0x664   : > { %v4718_v25 = vpop.eup %4717 }
 0x665   : > { %v4720_v32 = vpop.eup %4719  ;;  %v1140_v31 = vmul.f32 %v4718_v25, %v5351_v50 }
 0x666   : > { %v4722_v63 = vpop.eup %4721  ;;  %v1141_v13 = vmul.f32 %v4720_v32, %v5349_v49 }
 0x667   : > { %v4724_v27 = vpop.eup %4723  ;;  %v1142_v38 = vmul.f32 %v4722_v63, %v5353_v52  ;;  %v1171_v19 = vmul.f32 %v1140_v31, %v1109_v53 }
 0x668   : > { %v4726_v48 = vpop.eup %4725  ;;  %v1143_v33 = vmul.f32 %v4724_v27, %v5356_v56  ;;  %v1172_v40 = vmul.f32 %v1141_v13, %v1109_v53  ;;  %v1148_v39 = vadd.f32 %v1141_v13, %v1140_v31 }
 0x669   : > { %v4728_v34 = vpop.eup %4727  ;;  %v1144_v37 = vmul.f32 %v4726_v48, %v5351_v50  ;;  %v1173_v55 = vmul.f32 %v1142_v38, %v1109_v53 }
 0x66a   : > { %v4730_v45 = vpop.eup %4729  ;;  %v1145_v58 = vmul.f32 %v4728_v34, %v5349_v49  ;;  %v1179_v41 = vadd.f32 %v1172_v40, %v1171_v19  ;;  %v1149_v54 = vadd.f32 %v1148_v39, %v1142_v38  ;;  %v1174_v42 = vmul.f32 %v1143_v33, %v1109_v53 }
 0x66b   : > { %v4732_v57 = vpop.eup %4731  ;;  %v1146_v60 = vmul.f32 %v4730_v45, %v5353_v52  ;;  %v1175_v59 = vmul.f32 %v1144_v37, %v1113_v16 }
 0x66c   : > { %v1147_v28 = vmul.f32 %v4732_v57, %v5356_v56  ;;  %v1176_v61 = vmul.f32 %v1145_v58, %v1113_v16  ;;  %v1180_v26 = vadd.f32 %v1179_v41, %v1173_v55  ;;  %v1150_v20 = vadd.f32 %v1149_v54, %v1143_v33 }
 0x66d   : > { %v1157_v14 = vadd.f32 %v1145_v58, %v1144_v37  ;;  %v1177_v46 = vmul.f32 %v1146_v60, %v1113_v16 }
 0x66e   : > { %v1181_v17 = vadd.f32 %v1180_v26, %v1174_v42  ;;  %v1188_v18 = vadd.f32 %v1176_v61, %v1175_v59  ;;  %v1178_v23 = vmul.f32 %v1147_v28, %v1113_v16  ;;  %v1151_v55 = vrot.slane %v1150_v20, 4 }
 0x66f   : > { %v1158_v12 = vadd.f32 %v1157_v14, %v1146_v60 }
 0x670   : > { %v1182_v25 = vrot.slane %v1181_v17, 4  ;;  %v1189_v32 = vadd.f32 %v1188_v18, %v1177_v46  ;;  %v1152_v54 = vadd.f32 %v1151_v55, %v1150_v20 }
 0x671   : > { %v1159_v31 = vadd.f32 %v1158_v12, %v1147_v28 }
 0x672   : > { %v1183_v63 = vadd.f32 %v1182_v25, %v1181_v17  ;;  %v1190_v13 = vadd.f32 %v1189_v32, %v1178_v23  ;;  %v1153_v60 = vrot.slane %v1152_v54, 2 }
 0x673   : > { %v1160_v16 = vrot.slane %v1159_v31, 4 }
 0x674   : > { %v1184_v27 = vrot.slane %v1183_v63, 2  ;;  %v1191_v38 = vrot.slane %v1190_v13, 4  ;;  %v1154_v59 = vadd.f32 %v1153_v60, %v1152_v54 }
 0x675   : > { %v1161_v41 = vadd.f32 %v1160_v16, %v1159_v31 }
 0x676   : > { %v1185_v53 = vadd.f32 %v1184_v27, %v1183_v63  ;;  %v1192_v19 = vadd.f32 %v1191_v38, %v1190_v13  ;;  %v1155_v26 = vrot.slane %v1154_v59, 1 }
 0x677   : > { %v1162_v57 = vrot.slane %v1161_v41, 2 }
 0x678   : > { %v1193_v48 = vrot.slane %v1192_v19, 2  ;;  %v1186_v40 = vrot.slane %v1185_v53, 1  ;;  %v1156_v18 = vadd.f32 %v1155_v26, %v1154_v59 }
 0x679   : > { %v1163_v42 = vadd.f32 %v1162_v57, %v1161_v41 }
 0x67a   : > { %v1194_v39 = vadd.f32 %v1193_v48, %v1192_v19  ;;  %v1187_v33 = vadd.f32 %v1186_v40, %v1185_v53  ;;  %v1166_v32 = vadd.f32 %v1156_v18, %v5379_v22 }
 0x67b   : > { %v1164_v28 = vrot.slane %v1163_v42, 1 }
 0x67c   : > { %v1195_v34 = vrot.slane %v1194_v39, 1 }
 0x67d   : > { %v1165_v46 = vadd.f32 %v1164_v28, %v1163_v42 }
 0x67e   : > { %v1196_v37 = vadd.f32 %v1195_v34, %v1194_v39 }
 0x67f   : > { %v1167_v23 = vadd.f32 %v1165_v46, %v5379_v22 }
 0x680   : > { %v1199_v45 = vsel %vm231_vm1, %v1196_v37, %v1187_v33 }
 0x681   : > { %v1201_v58 = vsel %vm199_vm0, %v1199_v45, 0.0 }
 0x682   : > { %1202 = vadd.xlane.f32.xlu1 %v1201_v58 }
 0x6de   : > { %v1170_v61 = vpop.xlane.xlu0 %1169 }
 0x6df   : > { %v1204_v14 = vmul.f32 %v1170_v61, %v5379_v22 }
 0x70f   : > { %v1203_v17 = vpop.xlane.xlu1 %1202 }
 0x710   : > { %v1205_v12 = vadd.f32 %v1204_v14, %v1203_v17 }
 0x712   : > { %v1207_v25 = vrot.slane %v1205_v12, 1  ;;  %v1210_v20 = vsub.f32 %v1166_v32, %v1205_v12 }
 0x714   : > { %v1211_v31 = vsub.f32 %v1167_v23, %v1207_v25 }
 0x716   : > { %v1214_v63 = vrot.slane %v1211_v31, 7 }
 0x718   : > { %v1215_v13 = vsel %vm231_vm1, %v1214_v63, %v1210_v20 }
 0x719   : > { %v1217_v27 = vmul.f32 %v1215_v13, %v5676_v44 }
 0x71b   : > { %v1222_v38 = vadd.f32 %v5678_v47, %v1217_v27 }
 0x71d   : > { %v1223_v53 = vmul.f32 %v1222_v38, %v5534_v51 }
 0x71f   : > { %v5722_v19 = vadd.f32 %v1223_v53, %v5539_v62 }
 0x721   : > { %v1232_v48 = vrot.slane %v5722_v19, %v5309_v21  ;;  %v1310_v40 = vsel %vm199_vm0, %v5722_v19, 0.0 }
 0x722   : > { %1311 = vadd.xlane.f32.xlu0 %v1310_v40 }
 0x723   : > { %v1233_v39 = vcombine.high %v1232_v48, %v1232_v48  ;;  %v1240_v34 = vrot.slane %v1232_v48, %v5309_v21 }
 0x725   : > { %v1247_v33 = vrot.slane %v1233_v39, %v5309_v21  ;;  %v1251_v44 = vrot.slane %v1240_v34, %v5313_v24 }
 0x727   : > { %v1255_v47 = vrot.slane %v1247_v33, %v5313_v24  ;;  %v1258_v37 = vmul.f32 %v1251_v44, %v5323_v30  ;;  %v1259_v62 = vmul.f32 %v1251_v44, %v5332_v36  ;;  %v1260_v45 = vmul.f32 %v1251_v44, %v5321_v29 }
 0x728   : > { %v1261_v58 = vmul.f32 %v1251_v44, %v5330_v35 }
 0x729   : > { %v1262_v16 = vmul.f32 %v1255_v47, %v5323_v30  ;;  %v1263_v55 = vmul.f32 %v1255_v47, %v5332_v36  ;;  %v1264_v41 = vmul.f32 %v1255_v47, %v5321_v29  ;;  %v1266_v54 = vadd.f32 %v1258_v37, %v5250_v0 }
 0x72a   : > { %v1267_v57 = vadd.f32 %v1259_v62, %v5252_v1  ;;  %v1268_v60 = vadd.f32 %v1260_v45, %v5254_v2  ;;  %v1265_v42 = vmul.f32 %v1255_v47, %v5330_v35  ;;  %v1269_v59 = vadd.f32 %v1261_v58, %v5256_v3 }
 0x72b   : > { %v1270_v28 = vadd.f32 %v1262_v16, %v5258_v4  ;;  %4733 = vtanh.f32 %v1266_v54  ;;  %v1271_v61 = vadd.f32 %v1263_v55, %v5260_v5  ;;  %v1272_v26 = vadd.f32 %v1264_v41, %v5262_v6 }
 0x72c   : > { %4735 = vtanh.f32 %v1267_v57  ;;  %v1273_v14 = vadd.f32 %v1265_v42, %v5264_v7 }
 0x72d   : > { %4737 = vtanh.f32 %v1268_v60 }
 0x72e   : > { %4739 = vtanh.f32 %v1269_v59 }
 0x72f   : > { %4741 = vtanh.f32 %v1270_v28 }
 0x730   : > { %4743 = vtanh.f32 %v1271_v61 }
 0x731   : > { %4745 = vtanh.f32 %v1272_v26 }
 0x732   : > { %4747 = vtanh.f32 %v1273_v14 }
 0x735   : > { %v4734_v46 = vpop.eup %4733 }
 0x736   : > { %v4736_v17 = vpop.eup %4735  ;;  %v1282_v18 = vmul.f32 %v4734_v46, %v5351_v50 }
 0x737   : > { %v4738_v12 = vpop.eup %4737  ;;  %v1283_v23 = vmul.f32 %v4736_v17, %v5349_v49 }
 0x738   : > { %v4740_v25 = vpop.eup %4739  ;;  %v1284_v32 = vmul.f32 %v4738_v12, %v5353_v52  ;;  %v1313_v31 = vmul.f32 %v1282_v18, %v1251_v44 }
 0x739   : > { %v4742_v20 = vpop.eup %4741  ;;  %v1285_v63 = vmul.f32 %v4740_v25, %v5356_v56  ;;  %v1314_v13 = vmul.f32 %v1283_v23, %v1251_v44  ;;  %v1290_v27 = vadd.f32 %v1283_v23, %v1282_v18 }
 0x73a   : > { %v4744_v38 = vpop.eup %4743  ;;  %v1286_v53 = vmul.f32 %v4742_v20, %v5351_v50  ;;  %v1315_v39 = vmul.f32 %v1284_v32, %v1251_v44 }
 0x73b   : > { %v4746_v48 = vpop.eup %4745  ;;  %v1287_v40 = vmul.f32 %v4744_v38, %v5349_v49  ;;  %v1321_v34 = vadd.f32 %v1314_v13, %v1313_v31  ;;  %v1291_v33 = vadd.f32 %v1290_v27, %v1284_v32  ;;  %v1316_v45 = vmul.f32 %v1285_v63, %v1251_v44 }
 0x73c   : > { %v4748_v37 = vpop.eup %4747  ;;  %v1288_v62 = vmul.f32 %v4746_v48, %v5353_v52  ;;  %v1317_v58 = vmul.f32 %v1286_v53, %v1255_v47 }
 0x73d   : > { %v1289_v16 = vmul.f32 %v4748_v37, %v5356_v56  ;;  %v1318_v55 = vmul.f32 %v1287_v40, %v1255_v47  ;;  %v1322_v41 = vadd.f32 %v1321_v34, %v1315_v39  ;;  %v1292_v54 = vadd.f32 %v1291_v33, %v1285_v63 }
 0x73e   : > { %v1299_v57 = vadd.f32 %v1287_v40, %v1286_v53  ;;  %v1319_v60 = vmul.f32 %v1288_v62, %v1255_v47 }
 0x73f   : > { %v1323_v42 = vadd.f32 %v1322_v41, %v1316_v45  ;;  %v1330_v59 = vadd.f32 %v1318_v55, %v1317_v58  ;;  %v1320_v61 = vmul.f32 %v1289_v16, %v1255_v47  ;;  %v1293_v48 = vrot.slane %v1292_v54, 4 }
 0x740   : > { %v1300_v28 = vadd.f32 %v1299_v57, %v1288_v62 }
 0x741   : > { %v1324_v26 = vrot.slane %v1323_v42, 4  ;;  %v1331_v14 = vadd.f32 %v1330_v59, %v1319_v60  ;;  %v1294_v39 = vadd.f32 %v1293_v48, %v1292_v54 }
 0x742   : > { %v1301_v46 = vadd.f32 %v1300_v28, %v1289_v16 }
 0x743   : > { %v1325_v17 = vadd.f32 %v1324_v26, %v1323_v42  ;;  %v1332_v18 = vadd.f32 %v1331_v14, %v1320_v61  ;;  %v1295_v33 = vrot.slane %v1294_v39, 2 }
 0x744   : > { %v1302_v47 = vrot.slane %v1301_v46, 4 }
 0x745   : > { %v1326_v12 = vrot.slane %v1325_v17, 2  ;;  %v1333_v23 = vrot.slane %v1332_v18, 4  ;;  %v1296_v62 = vadd.f32 %v1295_v33, %v1294_v39 }
 0x746   : > { %v1303_v40 = vadd.f32 %v1302_v47, %v1301_v46 }
 0x747   : > { %v1327_v44 = vadd.f32 %v1326_v12, %v1325_v17  ;;  %v1334_v25 = vadd.f32 %v1333_v23, %v1332_v18  ;;  %v1297_v16 = vrot.slane %v1296_v62, 1 }
 0x748   : > { %v1304_v34 = vrot.slane %v1303_v40, 2 }
 0x749   : > { %v1335_v32 = vrot.slane %v1334_v25, 2  ;;  %v1328_v31 = vrot.slane %v1327_v44, 1  ;;  %v1298_v60 = vadd.f32 %v1297_v16, %v1296_v62 }
 0x74a   : > { %v1305_v37 = vadd.f32 %v1304_v34, %v1303_v40 }
 0x74b   : > { %v1336_v20 = vadd.f32 %v1335_v32, %v1334_v25  ;;  %v1329_v63 = vadd.f32 %v1328_v31, %v1327_v44  ;;  %v1308_v61 = vadd.f32 %v1298_v60, %v5379_v22 }
 0x74c   : > { %v1306_v45 = vrot.slane %v1305_v37, 1 }
 0x74d   : > { %v1337_v13 = vrot.slane %v1336_v20, 1 }
 0x74e   : > { %v1307_v41 = vadd.f32 %v1306_v45, %v1305_v37 }
 0x74f   : > { %v1338_v27 = vadd.f32 %v1337_v13, %v1336_v20 }
 0x750   : > { %v1309_v59 = vadd.f32 %v1307_v41, %v5379_v22 }
 0x751   : > { %v1341_v38 = vsel %vm231_vm1, %v1338_v27, %v1329_v63 }
 0x752   : > { %v1343_v53 = vsel %vm199_vm0, %v1341_v38, 0.0 }
 0x753   : > { %1344 = vadd.xlane.f32.xlu1 %v1343_v53 }
 0x7af   : > { %v1312_v58 = vpop.xlane.xlu0 %1311 }
 0x7b0   : > { %v1346_v55 = vmul.f32 %v1312_v58, %v5379_v22 }
 0x7e0   : > { %v1345_v57 = vpop.xlane.xlu1 %1344 }
 0x7e1   : > { %v1347_v42 = vadd.f32 %v1346_v55, %v1345_v57 }
 0x7e3   : > { %v1349_v28 = vrot.slane %v1347_v42, 1  ;;  %v1352_v54 = vsub.f32 %v1308_v61, %v1347_v42 }
 0x7e5   : > { %v1353_v26 = vsub.f32 %v1309_v59, %v1349_v28 }
 0x7e7   : > { %v1356_v14 = vrot.slane %v1353_v26, 7 }
 0x7e9   : > { %v1357_v46 = vsel %vm231_vm1, %v1356_v14, %v1352_v54 }
 0x7ea   : > { %v5763_v17 = vmul.f32 %v1357_v46, %v5722_v19 }
 0x7ec   : > { %v1360_v18 = vmul.f32 %v5763_v17, %v5388_v43 }
 0x7ee   : > { %v5768_v12 = vadd.f32 %v1360_v18, %v5722_v19 }
 0x7f0   : > { %v1447_v23 = vsel %vm199_vm0, %v5768_v12, 0.0  ;;  %v1369_v44 = vrot.slane %v5768_v12, %v5309_v21 }
 0x7f1   : > { %1448 = vadd.xlane.f32.xlu0 %v1447_v23 }
 0x7f2   : > { %v1370_v25 = vcombine.high %v1369_v44, %v1369_v44  ;;  %v1377_v32 = vrot.slane %v1369_v44, %v5309_v21 }
 0x7f4   : > { %v1384_v31 = vrot.slane %v1370_v25, %v5309_v21  ;;  %v1388_v20 = vrot.slane %v1377_v32, %v5313_v24 }
 0x7f6   : > { %v1392_v13 = vrot.slane %v1384_v31, %v5313_v24  ;;  %v1395_v63 = vmul.f32 %v1388_v20, %v5323_v30  ;;  %v1396_v27 = vmul.f32 %v1388_v20, %v5332_v36  ;;  %v1397_v38 = vmul.f32 %v1388_v20, %v5321_v29 }
 0x7f7   : > { %v1398_v53 = vmul.f32 %v1388_v20, %v5330_v35 }
 0x7f8   : > { %v1399_v47 = vmul.f32 %v1392_v13, %v5323_v30  ;;  %v1400_v48 = vmul.f32 %v1392_v13, %v5332_v36  ;;  %v1401_v40 = vmul.f32 %v1392_v13, %v5321_v29  ;;  %v1403_v39 = vadd.f32 %v1395_v63, %v5250_v0 }
 0x7f9   : > { %v1404_v34 = vadd.f32 %v1396_v27, %v5252_v1  ;;  %v1405_v33 = vadd.f32 %v1397_v38, %v5254_v2  ;;  %v1402_v37 = vmul.f32 %v1392_v13, %v5330_v35  ;;  %v1406_v62 = vadd.f32 %v1398_v53, %v5256_v3 }
 0x7fa   : > { %v1407_v45 = vadd.f32 %v1399_v47, %v5258_v4  ;;  %4749 = vtanh.f32 %v1403_v39  ;;  %v1408_v58 = vadd.f32 %v1400_v48, %v5260_v5  ;;  %v1409_v16 = vadd.f32 %v1401_v40, %v5262_v6 }
 0x7fb   : > { %4751 = vtanh.f32 %v1404_v34  ;;  %v1410_v55 = vadd.f32 %v1402_v37, %v5264_v7 }
 0x7fc   : > { %4753 = vtanh.f32 %v1405_v33 }
 0x7fd   : > { %4755 = vtanh.f32 %v1406_v62 }
 0x7fe   : > { %4757 = vtanh.f32 %v1407_v45 }
 0x7ff   : > { %4759 = vtanh.f32 %v1408_v58 }
 0x800   : > { %4761 = vtanh.f32 %v1409_v16 }
 0x801   : > { %4763 = vtanh.f32 %v1410_v55 }
 0x804   : > { %v4750_v41 = vpop.eup %4749 }
 0x805   : > { %v4752_v57 = vpop.eup %4751  ;;  %v1419_v60 = vmul.f32 %v4750_v41, %v5351_v50 }
 0x806   : > { %v4754_v42 = vpop.eup %4753  ;;  %v1420_v59 = vmul.f32 %v4752_v57, %v5349_v49 }
 0x807   : > { %v4756_v28 = vpop.eup %4755  ;;  %v1421_v61 = vmul.f32 %v4754_v42, %v5353_v52  ;;  %v1450_v26 = vmul.f32 %v1419_v60, %v1388_v20 }
 0x808   : > { %v4758_v54 = vpop.eup %4757  ;;  %v1422_v14 = vmul.f32 %v4756_v28, %v5356_v56  ;;  %v1451_v46 = vmul.f32 %v1420_v59, %v1388_v20  ;;  %v1427_v18 = vadd.f32 %v1420_v59, %v1419_v60 }
 0x809   : > { %v4760_v23 = vpop.eup %4759  ;;  %v1423_v44 = vmul.f32 %v4758_v54, %v5351_v50  ;;  %v1452_v31 = vmul.f32 %v1421_v61, %v1388_v20 }
 0x80a   : > { %v4762_v25 = vpop.eup %4761  ;;  %v1424_v32 = vmul.f32 %v4760_v23, %v5349_v49  ;;  %v1458_v63 = vadd.f32 %v1451_v46, %v1450_v26  ;;  %v1428_v27 = vadd.f32 %v1427_v18, %v1421_v61  ;;  %v1453_v47 = vmul.f32 %v1422_v14, %v1388_v20 }
 0x80b   : > { %v4764_v38 = vpop.eup %4763  ;;  %v1425_v53 = vmul.f32 %v4762_v25, %v5353_v52  ;;  %v1454_v48 = vmul.f32 %v1423_v44, %v1392_v13 }
 0x80c   : > { %v1426_v40 = vmul.f32 %v4764_v38, %v5356_v56  ;;  %v1455_v39 = vmul.f32 %v1424_v32, %v1392_v13  ;;  %v1459_v34 = vadd.f32 %v1458_v63, %v1452_v31  ;;  %v1429_v33 = vadd.f32 %v1428_v27, %v1422_v14 }
 0x80d   : > { %v1436_v37 = vadd.f32 %v1424_v32, %v1423_v44  ;;  %v1456_v62 = vmul.f32 %v1425_v53, %v1392_v13 }
 0x80e   : > { %v1460_v45 = vadd.f32 %v1459_v34, %v1453_v47  ;;  %v1467_v58 = vadd.f32 %v1455_v39, %v1454_v48  ;;  %v1457_v55 = vmul.f32 %v1426_v40, %v1392_v13  ;;  %v1430_v31 = vrot.slane %v1429_v33, 4 }
 0x80f   : > { %v1437_v16 = vadd.f32 %v1436_v37, %v1425_v53 }
 0x810   : > { %v1461_v41 = vrot.slane %v1460_v45, 4  ;;  %v1468_v57 = vadd.f32 %v1467_v58, %v1456_v62  ;;  %v1431_v27 = vadd.f32 %v1430_v31, %v1429_v33 }
 0x811   : > { %v1438_v60 = vadd.f32 %v1437_v16, %v1426_v40 }
 0x812   : > { %v1462_v42 = vadd.f32 %v1461_v41, %v1460_v45  ;;  %v1469_v59 = vadd.f32 %v1468_v57, %v1457_v55  ;;  %v1432_v53 = vrot.slane %v1431_v27, 2 }
 0x813   : > { %v1439_v13 = vrot.slane %v1438_v60, 4 }
 0x814   : > { %v1463_v28 = vrot.slane %v1462_v42, 2  ;;  %v1470_v61 = vrot.slane %v1469_v59, 4  ;;  %v1433_v48 = vadd.f32 %v1432_v53, %v1431_v27 }
 0x815   : > { %v1440_v63 = vadd.f32 %v1439_v13, %v1438_v60 }
 0x816   : > { %v1464_v20 = vadd.f32 %v1463_v28, %v1462_v42  ;;  %v1471_v26 = vadd.f32 %v1470_v61, %v1469_v59  ;;  %v1434_v34 = vrot.slane %v1433_v48, 1 }
 0x817   : > { %v1441_v38 = vrot.slane %v1440_v63, 2 }
 0x818   : > { %v1472_v54 = vrot.slane %v1471_v26, 2  ;;  %v1465_v46 = vrot.slane %v1464_v20, 1  ;;  %v1435_v58 = vadd.f32 %v1434_v34, %v1433_v48 }
 0x819   : > { %v1442_v47 = vadd.f32 %v1441_v38, %v1440_v63 }
 0x81a   : > { %v1473_v18 = vadd.f32 %v1472_v54, %v1471_v26  ;;  %v1466_v14 = vadd.f32 %v1465_v46, %v1464_v20  ;;  %v1445_v57 = vadd.f32 %v1435_v58, %v5379_v22 }
 0x81b   : > { %v1443_v40 = vrot.slane %v1442_v47, 1 }
 0x81c   : > { %v1474_v23 = vrot.slane %v1473_v18, 1 }
 0x81d   : > { %v1444_v62 = vadd.f32 %v1443_v40, %v1442_v47 }
 0x81e   : > { %v1475_v44 = vadd.f32 %v1474_v23, %v1473_v18 }
 0x81f   : > { %v1446_v55 = vadd.f32 %v1444_v62, %v5379_v22 }
 0x820   : > { %v1478_v25 = vsel %vm231_vm1, %v1475_v44, %v1466_v14 }
 0x821   : > { %v1480_v32 = vsel %vm199_vm0, %v1478_v25, 0.0 }
 0x822   : > { %1481 = vadd.xlane.f32.xlu1 %v1480_v32 }
 0x87e   : > { %v1449_v39 = vpop.xlane.xlu0 %1448 }
 0x87f   : > { %v1483_v37 = vmul.f32 %v1449_v39, %v5379_v22 }
 0x8af   : > { %v1482_v45 = vpop.xlane.xlu1 %1481 }
 0x8b0   : > { %v1484_v16 = vadd.f32 %v1483_v37, %v1482_v45 }
 0x8b2   : > { %v1486_v41 = vrot.slane %v1484_v16, 1  ;;  %v1489_v33 = vsub.f32 %v1445_v57, %v1484_v16 }
 0x8b4   : > { %v1490_v60 = vsub.f32 %v1446_v55, %v1486_v41 }
 0x8b6   : > { %v1493_v42 = vrot.slane %v1490_v60, 7 }
 0x8b8   : > { %v1494_v59 = vsel %vm231_vm1, %v1493_v42, %v1489_v33 }
 0x8b9   : > { %v5809_v28 = vmul.f32 %v1494_v59, %v5768_v12 }
 0x8bb   : > { %v1497_v61 = vmul.f32 %v5809_v28, %v5388_v43 }
 0x8bd   : > { %v5814_v20 = vadd.f32 %v1497_v61, %v5722_v19 }
 0x8bf   : > { %v1584_v26 = vsel %vm199_vm0, %v5814_v20, 0.0  ;;  %v1506_v54 = vrot.slane %v5814_v20, %v5309_v21 }
 0x8c0   : > { %1585 = vadd.xlane.f32.xlu0 %v1584_v26 }
 0x8c1   : > { %v1507_v46 = vcombine.high %v1506_v54, %v1506_v54  ;;  %v1514_v18 = vrot.slane %v1506_v54, %v5309_v21 }
 0x8c3   : > { %v1521_v23 = vrot.slane %v1507_v46, %v5309_v21  ;;  %v1525_v12 = vrot.slane %v1514_v18, %v5313_v24 }
 0x8c5   : > { %v1529_v14 = vrot.slane %v1521_v23, %v5313_v24  ;;  %v1532_v44 = vmul.f32 %v1525_v12, %v5323_v30  ;;  %v1533_v25 = vmul.f32 %v1525_v12, %v5332_v36  ;;  %v1534_v32 = vmul.f32 %v1525_v12, %v5321_v29 }
 0x8c6   : > { %v1535_v13 = vmul.f32 %v1525_v12, %v5330_v35 }
 0x8c7   : > { %v1536_v31 = vmul.f32 %v1529_v14, %v5323_v30  ;;  %v1537_v63 = vmul.f32 %v1529_v14, %v5332_v36  ;;  %v1538_v27 = vmul.f32 %v1529_v14, %v5321_v29  ;;  %v1540_v38 = vadd.f32 %v1532_v44, %v5250_v0 }
 0x8c8   : > { %v1541_v53 = vadd.f32 %v1533_v25, %v5252_v1  ;;  %v1542_v47 = vadd.f32 %v1534_v32, %v5254_v2  ;;  %v1539_v48 = vmul.f32 %v1529_v14, %v5330_v35  ;;  %v1543_v40 = vadd.f32 %v1535_v13, %v5256_v3 }
 0x8c9   : > { %v1544_v39 = vadd.f32 %v1536_v31, %v5258_v4  ;;  %4765 = vtanh.f32 %v1540_v38  ;;  %v1545_v34 = vadd.f32 %v1537_v63, %v5260_v5  ;;  %v1546_v37 = vadd.f32 %v1538_v27, %v5262_v6 }
 0x8ca   : > { %4767 = vtanh.f32 %v1541_v53  ;;  %v1547_v62 = vadd.f32 %v1539_v48, %v5264_v7 }
 0x8cb   : > { %4769 = vtanh.f32 %v1542_v47 }
 0x8cc   : > { %4771 = vtanh.f32 %v1543_v40 }
 0x8cd   : > { %4773 = vtanh.f32 %v1544_v39 }
 0x8ce   : > { %4775 = vtanh.f32 %v1545_v34 }
 0x8cf   : > { %4777 = vtanh.f32 %v1546_v37 }
 0x8d0   : > { %4779 = vtanh.f32 %v1547_v62 }
 0x8d3   : > { %v4766_v45 = vpop.eup %4765 }
 0x8d4   : > { %v4768_v58 = vpop.eup %4767  ;;  %v1556_v16 = vmul.f32 %v4766_v45, %v5351_v50 }
 0x8d5   : > { %v4770_v55 = vpop.eup %4769  ;;  %v1557_v41 = vmul.f32 %v4768_v58, %v5349_v49 }
 0x8d6   : > { %v4772_v57 = vpop.eup %4771  ;;  %v1558_v60 = vmul.f32 %v4770_v55, %v5353_v52  ;;  %v1587_v33 = vmul.f32 %v1556_v16, %v1525_v12 }
 0x8d7   : > { %v4774_v42 = vpop.eup %4773  ;;  %v1559_v59 = vmul.f32 %v4772_v57, %v5356_v56  ;;  %v1588_v61 = vmul.f32 %v1557_v41, %v1525_v12  ;;  %v1564_v26 = vadd.f32 %v1557_v41, %v1556_v16 }
 0x8d8   : > { %v4776_v54 = vpop.eup %4775  ;;  %v1560_v46 = vmul.f32 %v4774_v42, %v5351_v50  ;;  %v1589_v44 = vmul.f32 %v1558_v60, %v1525_v12 }
 0x8d9   : > { %v4778_v18 = vpop.eup %4777  ;;  %v1561_v23 = vmul.f32 %v4776_v54, %v5349_v49  ;;  %v1595_v25 = vadd.f32 %v1588_v61, %v1587_v33  ;;  %v1565_v32 = vadd.f32 %v1564_v26, %v1558_v60  ;;  %v1590_v63 = vmul.f32 %v1559_v59, %v1525_v12 }
 0x8da   : > { %v4780_v13 = vpop.eup %4779  ;;  %v1562_v31 = vmul.f32 %v4778_v18, %v5353_v52  ;;  %v1591_v27 = vmul.f32 %v1560_v46, %v1529_v14 }
 0x8db   : > { %v1563_v38 = vmul.f32 %v4780_v13, %v5356_v56  ;;  %v1592_v53 = vmul.f32 %v1561_v23, %v1529_v14  ;;  %v1596_v47 = vadd.f32 %v1595_v25, %v1589_v44  ;;  %v1566_v48 = vadd.f32 %v1565_v32, %v1559_v59 }
 0x8dc   : > { %v1573_v40 = vadd.f32 %v1561_v23, %v1560_v46  ;;  %v1593_v39 = vmul.f32 %v1562_v31, %v1529_v14 }
 0x8dd   : > { %v1597_v34 = vadd.f32 %v1596_v47, %v1590_v63  ;;  %v1604_v37 = vadd.f32 %v1592_v53, %v1591_v27  ;;  %v1594_v45 = vmul.f32 %v1563_v38, %v1529_v14  ;;  %v1567_v25 = vrot.slane %v1566_v48, 4 }
 0x8de   : > { %v1574_v62 = vadd.f32 %v1573_v40, %v1562_v31 }
 0x8df   : > { %v1598_v58 = vrot.slane %v1597_v34, 4  ;;  %v1605_v16 = vadd.f32 %v1604_v37, %v1593_v39  ;;  %v1568_v13 = vadd.f32 %v1567_v25, %v1566_v48 }
 0x8e0   : > { %v1575_v55 = vadd.f32 %v1574_v62, %v1563_v38 }
 0x8e1   : > { %v1599_v41 = vadd.f32 %v1598_v58, %v1597_v34  ;;  %v1606_v57 = vadd.f32 %v1605_v16, %v1594_v45  ;;  %v1569_v63 = vrot.slane %v1568_v13, 2 }
 0x8e2   : > { %v1576_v14 = vrot.slane %v1575_v55, 4 }
 0x8e3   : > { %v1600_v60 = vrot.slane %v1599_v41, 2  ;;  %v1607_v33 = vrot.slane %v1606_v57, 4  ;;  %v1570_v38 = vadd.f32 %v1569_v63, %v1568_v13 }
 0x8e4   : > { %v1577_v32 = vadd.f32 %v1576_v14, %v1575_v55 }
 0x8e5   : > { %v1601_v12 = vadd.f32 %v1600_v60, %v1599_v41  ;;  %v1608_v42 = vadd.f32 %v1607_v33, %v1606_v57  ;;  %v1571_v40 = vrot.slane %v1570_v38, 1  ;;  %v1771_v60 = vmul.f32 2.0, %v5809_v28 }
 0x8e6   : > { %v1578_v31 = vrot.slane %v1577_v32, 2 }
 0x8e7   : > { %v1609_v61 = vrot.slane %v1608_v42, 2  ;;  %v1602_v26 = vrot.slane %v1601_v12, 1  ;;  %v1572_v62 = vadd.f32 %v1571_v40, %v1570_v38 }
 0x8e8   : > { %v1579_v27 = vadd.f32 %v1578_v31, %v1577_v32 }
 0x8e9   : > { %v1610_v54 = vadd.f32 %v1609_v61, %v1608_v42  ;;  %v1603_v59 = vadd.f32 %v1602_v26, %v1601_v12  ;;  %v1582_v41 = vadd.f32 %v1572_v62, %v5379_v22  ;;  %v1772_v42 = vadd.f32 %v1771_v60, %v5763_v17 }
 0x8ea   : > { %v1580_v53 = vrot.slane %v1579_v27, 1 }
 0x8eb   : > { %v1611_v18 = vrot.slane %v1610_v54, 1 }
 0x8ec   : > { %v1581_v34 = vadd.f32 %v1580_v53, %v1579_v27 }
 0x8ed   : > { %v1612_v46 = vadd.f32 %v1611_v18, %v1610_v54 }
 0x8ee   : > { %v1583_v58 = vadd.f32 %v1581_v34, %v5379_v22 }
 0x8ef   : > { %v1615_v23 = vsel %vm231_vm1, %v1612_v46, %v1603_v59 }
 0x8f0   : > { %v1617_v44 = vsel %vm199_vm0, %v1615_v23, 0.0 }
 0x8f1   : > { %1618 = vadd.xlane.f32.xlu1 %v1617_v44 }
 0x94d   : > { %v1586_v47 = vpop.xlane.xlu0 %1585 }
 0x94e   : > { %v1620_v39 = vmul.f32 %v1586_v47, %v5379_v22 }
 0x97e   : > { %v1619_v37 = vpop.xlane.xlu1 %1618 }
 0x97f   : > { %v1621_v45 = vadd.f32 %v1620_v39, %v1619_v37 }
 0x981   : > { %v1623_v16 = vrot.slane %v1621_v45, 1  ;;  %v1626_v48 = vsub.f32 %v1582_v41, %v1621_v45 }
 0x983   : > { %v1627_v55 = vsub.f32 %v1583_v58, %v1623_v16 }
 0x985   : > { %v1630_v57 = vrot.slane %v1627_v55, 7 }
 0x987   : > { %v1631_v33 = vsel %vm231_vm1, %v1630_v57, %v1626_v48 }
 0x988   : > { %v1633_v12 = vmul.f32 %v1631_v33, %v5814_v20 }
 0x98a   : > { %v1773_v61 = vmul.f32 2.0, %v1633_v12  ;;  %v1634_v26 = vmul.f32 %v1633_v12, %v5484_v15 }
 0x98c   : > { %v5859_v54 = vadd.f32 %v1634_v26, %v5722_v19  ;;  %v5861_v18 = vadd.f32 %v1773_v61, %v1772_v42 }
 0x98e   : > { %v1721_v59 = vsel %vm199_vm0, %v5859_v54, 0.0  ;;  %v1643_v28 = vrot.slane %v5859_v54, %v5309_v21 }
 0x98f   : > { %1722 = vadd.xlane.f32.xlu0 %v1721_v59 }
 0x990   : > { %v1644_v46 = vcombine.high %v1643_v28, %v1643_v28  ;;  %v1651_v20 = vrot.slane %v1643_v28, %v5309_v21 }
 0x992   : > { %v1658_v17 = vrot.slane %v1644_v46, %v5309_v21  ;;  %v1662_v23 = vrot.slane %v1651_v20, %v5313_v24 }
 0x994   : > { %v1666_v44 = vrot.slane %v1658_v17, %v5313_v24  ;;  %v1669_v14 = vmul.f32 %v1662_v23, %v5323_v30  ;;  %v1670_v25 = vmul.f32 %v1662_v23, %v5332_v36  ;;  %v1671_v32 = vmul.f32 %v1662_v23, %v5321_v29 }
 0x995   : > { %v1672_v13 = vmul.f32 %v1662_v23, %v5330_v35 }
 0x996   : > { %v1673_v31 = vmul.f32 %v1666_v44, %v5323_v30  ;;  %v1674_v63 = vmul.f32 %v1666_v44, %v5332_v36  ;;  %v1675_v27 = vmul.f32 %v1666_v44, %v5321_v29  ;;  %v1677_v38 = vadd.f32 %v1669_v14, %v5250_v0 }
 0x997   : > { %v1678_v53 = vadd.f32 %v1670_v25, %v5252_v1  ;;  %v1679_v47 = vadd.f32 %v1671_v32, %v5254_v2  ;;  %v1676_v40 = vmul.f32 %v1666_v44, %v5330_v35  ;;  %v1680_v39 = vadd.f32 %v1672_v13, %v5256_v3 }
 0x998   : > { %v1681_v34 = vadd.f32 %v1673_v31, %v5258_v4  ;;  %4781 = vtanh.f32 %v1677_v38  ;;  %v1682_v37 = vadd.f32 %v1674_v63, %v5260_v5  ;;  %v1683_v62 = vadd.f32 %v1675_v27, %v5262_v6 }
 0x999   : > { %4783 = vtanh.f32 %v1678_v53  ;;  %v1684_v45 = vadd.f32 %v1676_v40, %v5264_v7 }
 0x99a   : > { %4785 = vtanh.f32 %v1679_v47 }
 0x99b   : > { %4787 = vtanh.f32 %v1680_v39 }
 0x99c   : > { %4789 = vtanh.f32 %v1681_v34 }
 0x99d   : > { %4791 = vtanh.f32 %v1682_v37 }
 0x99e   : > { %4793 = vtanh.f32 %v1683_v62 }
 0x99f   : > { %4795 = vtanh.f32 %v1684_v45 }
 0x9a2   : > { %v4782_v58 = vpop.eup %4781 }
 0x9a3   : > { %v4784_v16 = vpop.eup %4783  ;;  %v1693_v41 = vmul.f32 %v4782_v58, %v5351_v50 }
 0x9a4   : > { %v4786_v55 = vpop.eup %4785  ;;  %v1694_v48 = vmul.f32 %v4784_v16, %v5349_v49 }
 0x9a5   : > { %v4788_v57 = vpop.eup %4787  ;;  %v1695_v60 = vmul.f32 %v4786_v55, %v5353_v52  ;;  %v1724_v33 = vmul.f32 %v1693_v41, %v1662_v23 }
 0x9a6   : > { %v4790_v12 = vpop.eup %4789  ;;  %v1696_v42 = vmul.f32 %v4788_v57, %v5356_v56  ;;  %v1725_v61 = vmul.f32 %v1694_v48, %v1662_v23  ;;  %v1701_v26 = vadd.f32 %v1694_v48, %v1693_v41 }
 0x9a7   : > { %v4792_v59 = vpop.eup %4791  ;;  %v1697_v28 = vmul.f32 %v4790_v12, %v5351_v50  ;;  %v1726_v17 = vmul.f32 %v1695_v60, %v1662_v23 }
 0x9a8   : > { %v4794_v46 = vpop.eup %4793  ;;  %v1698_v20 = vmul.f32 %v4792_v59, %v5349_v49  ;;  %v1732_v14 = vadd.f32 %v1725_v61, %v1724_v33  ;;  %v1702_v25 = vadd.f32 %v1701_v26, %v1695_v60  ;;  %v1727_v31 = vmul.f32 %v1696_v42, %v1662_v23 }
 0x9a9   : > { %v4796_v32 = vpop.eup %4795  ;;  %v1699_v13 = vmul.f32 %v4794_v46, %v5353_v52  ;;  %v1728_v63 = vmul.f32 %v1697_v28, %v1666_v44 }
 0x9aa   : > { %v1700_v27 = vmul.f32 %v4796_v32, %v5356_v56  ;;  %v1729_v38 = vmul.f32 %v1698_v20, %v1666_v44  ;;  %v1733_v53 = vadd.f32 %v1732_v14, %v1726_v17  ;;  %v1703_v47 = vadd.f32 %v1702_v25, %v1696_v42 }
 0x9ab   : > { %v1710_v40 = vadd.f32 %v1698_v20, %v1697_v28  ;;  %v1730_v39 = vmul.f32 %v1699_v13, %v1666_v44 }
 0x9ac   : > { %v1734_v34 = vadd.f32 %v1733_v53, %v1727_v31  ;;  %v1741_v37 = vadd.f32 %v1729_v38, %v1728_v63  ;;  %v1731_v45 = vmul.f32 %v1700_v27, %v1666_v44  ;;  %v1704_v17 = vrot.slane %v1703_v47, 4 }
 0x9ad   : > { %v1711_v62 = vadd.f32 %v1710_v40, %v1699_v13 }
 0x9ae   : > { %v1735_v58 = vrot.slane %v1734_v34, 4  ;;  %v1742_v16 = vadd.f32 %v1741_v37, %v1730_v39  ;;  %v1705_v25 = vadd.f32 %v1704_v17, %v1703_v47 }
 0x9af   : > { %v1712_v41 = vadd.f32 %v1711_v62, %v1700_v27 }
 0x9b0   : > { %v1736_v55 = vadd.f32 %v1735_v58, %v1734_v34  ;;  %v1743_v48 = vadd.f32 %v1742_v16, %v1731_v45  ;;  %v1706_v13 = vrot.slane %v1705_v25, 2 }
 0x9b1   : > { %v1713_v44 = vrot.slane %v1712_v41, 4 }
 0x9b2   : > { %v1737_v57 = vrot.slane %v1736_v55, 2  ;;  %v1744_v60 = vrot.slane %v1743_v48, 4  ;;  %v1707_v63 = vadd.f32 %v1706_v13, %v1705_v25 }
 0x9b3   : > { %v1714_v14 = vadd.f32 %v1713_v44, %v1712_v41 }
 0x9b4   : > { %v1738_v23 = vadd.f32 %v1737_v57, %v1736_v55  ;;  %v1745_v33 = vadd.f32 %v1744_v60, %v1743_v48  ;;  %v1708_v53 = vrot.slane %v1707_v63, 1 }
 0x9b5   : > { %v1715_v32 = vrot.slane %v1714_v14, 2 }
 0x9b6   : > { %v1746_v12 = vrot.slane %v1745_v33, 2  ;;  %v1739_v61 = vrot.slane %v1738_v23, 1  ;;  %v1709_v37 = vadd.f32 %v1708_v53, %v1707_v63 }
 0x9b7   : > { %v1716_v31 = vadd.f32 %v1715_v32, %v1714_v14 }
 0x9b8   : > { %v1747_v26 = vadd.f32 %v1746_v12, %v1745_v33  ;;  %v1740_v42 = vadd.f32 %v1739_v61, %v1738_v23  ;;  %v1719_v16 = vadd.f32 %v1709_v37, %v5379_v22 }
 0x9b9   : > { %v1717_v27 = vrot.slane %v1716_v31, 1 }
 0x9ba   : > { %v1748_v59 = vrot.slane %v1747_v26, 1 }
 0x9bb   : > { %v1718_v39 = vadd.f32 %v1717_v27, %v1716_v31 }
 0x9bc   : > { %v1749_v28 = vadd.f32 %v1748_v59, %v1747_v26 }
 0x9bd   : > { %v1720_v45 = vadd.f32 %v1718_v39, %v5379_v22 }
 0x9be   : > { %v1752_v46 = vsel %vm231_vm1, %v1749_v28, %v1740_v42 }
 0x9bf   : > { %v1754_v20 = vsel %vm199_vm0, %v1752_v46, 0.0 }
 0x9c0   : > { %1755 = vadd.xlane.f32.xlu1 %v1754_v20 }
 0xa1c   : > { %v1723_v38 = vpop.xlane.xlu0 %1722 }
 0xa1d   : > { %v1757_v40 = vmul.f32 %v1723_v38, %v5379_v22 }
 0xa4d   : > { %v1756_v34 = vpop.xlane.xlu1 %1755 }
 0xa4e   : > { %v1758_v62 = vadd.f32 %v1757_v40, %v1756_v34 }
 0xa50   : > { %v1760_v58 = vrot.slane %v1758_v62, 1  ;;  %v1763_v47 = vsub.f32 %v1719_v16, %v1758_v62 }
 0xa52   : > { %v1764_v41 = vsub.f32 %v1720_v45, %v1760_v58 }
 0xa54   : > { %v1767_v55 = vrot.slane %v1764_v41, 7 }
 0xa56   : > { %v1768_v48 = vsel %vm231_vm1, %v1767_v55, %v1763_v47 }
 0xa57   : > { %v1770_v57 = vmul.f32 %v1768_v48, %v5859_v54 }
 0xa59   : > { %v1775_v60 = vadd.f32 %v5861_v18, %v1770_v57 }
 0xa5b   : > { %v1776_v23 = vmul.f32 %v1775_v60, %v5534_v51 }
 0xa5d   : > { %v5905_v33 = vadd.f32 %v1776_v23, %v5722_v19 }
 0xa5f   : > { %v1785_v12 = vrot.slane %v5905_v33, %v5309_v21  ;;  %v1863_v61 = vsel %vm199_vm0, %v5905_v33, 0.0 }
 0xa60   : > { %1864 = vadd.xlane.f32.xlu0 %v1863_v61 }
 0xa61   : > { %v1786_v26 = vcombine.high %v1785_v12, %v1785_v12  ;;  %v1793_v59 = vrot.slane %v1785_v12, %v5309_v21 }
 0xa63   : > { %v1800_v42 = vrot.slane %v1786_v26, %v5309_v21  ;;  %v1804_v54 = vrot.slane %v1793_v59, %v5313_v24 }
 0xa65   : > { %v1808_v18 = vrot.slane %v1800_v42, %v5313_v24  ;;  %v1811_v28 = vmul.f32 %v1804_v54, %v5323_v30  ;;  %v1812_v19 = vmul.f32 %v1804_v54, %v5332_v36  ;;  %v1813_v46 = vmul.f32 %v1804_v54, %v5321_v29 }
 0xa66   : > { %v1814_v20 = vmul.f32 %v1804_v54, %v5330_v35 }
 0xa67   : > { %v1815_v44 = vmul.f32 %v1808_v18, %v5323_v30  ;;  %v1816_v17 = vmul.f32 %v1808_v18, %v5332_v36  ;;  %v1817_v14 = vmul.f32 %v1808_v18, %v5321_v29  ;;  %v1819_v25 = vadd.f32 %v1811_v28, %v5250_v0 }
 0xa68   : > { %v1820_v32 = vadd.f32 %v1812_v19, %v5252_v1  ;;  %v1821_v13 = vadd.f32 %v1813_v46, %v5254_v2  ;;  %v1818_v31 = vmul.f32 %v1808_v18, %v5330_v35  ;;  %v1822_v63 = vadd.f32 %v1814_v20, %v5256_v3 }
 0xa69   : > { %v1823_v27 = vadd.f32 %v1815_v44, %v5258_v4  ;;  %4797 = vtanh.f32 %v1819_v25  ;;  %v1824_v38 = vadd.f32 %v1816_v17, %v5260_v5  ;;  %v1825_v53 = vadd.f32 %v1817_v14, %v5262_v6 }
 0xa6a   : > { %4799 = vtanh.f32 %v1820_v32  ;;  %v1826_v40 = vadd.f32 %v1818_v31, %v5264_v7 }
 0xa6b   : > { %4801 = vtanh.f32 %v1821_v13 }
 0xa6c   : > { %4803 = vtanh.f32 %v1822_v63 }
 0xa6d   : > { %4805 = vtanh.f32 %v1823_v27 }
 0xa6e   : > { %4807 = vtanh.f32 %v1824_v38 }
 0xa6f   : > { %4809 = vtanh.f32 %v1825_v53 }
 0xa70   : > { %4811 = vtanh.f32 %v1826_v40 }
 0xa73   : > { %v4798_v39 = vpop.eup %4797 }
 0xa74   : > { %v4800_v34 = vpop.eup %4799  ;;  %v1835_v37 = vmul.f32 %v4798_v39, %v5351_v50 }
 0xa75   : > { %v4802_v62 = vpop.eup %4801  ;;  %v1836_v45 = vmul.f32 %v4800_v34, %v5349_v49 }
 0xa76   : > { %v4804_v58 = vpop.eup %4803  ;;  %v1837_v16 = vmul.f32 %v4802_v62, %v5353_v52  ;;  %v1866_v41 = vmul.f32 %v1835_v37, %v1804_v54 }
 0xa77   : > { %v4806_v47 = vpop.eup %4805  ;;  %v1838_v55 = vmul.f32 %v4804_v58, %v5356_v56  ;;  %v1867_v48 = vmul.f32 %v1836_v45, %v1804_v54  ;;  %v1843_v57 = vadd.f32 %v1836_v45, %v1835_v37 }
 0xa78   : > { %v4808_v60 = vpop.eup %4807  ;;  %v1839_v23 = vmul.f32 %v4806_v47, %v5351_v50  ;;  %v1868_v26 = vmul.f32 %v1837_v16, %v1804_v54 }
 0xa79   : > { %v4810_v12 = vpop.eup %4809  ;;  %v1840_v61 = vmul.f32 %v4808_v60, %v5349_v49  ;;  %v1874_v59 = vadd.f32 %v1867_v48, %v1866_v41  ;;  %v1844_v42 = vadd.f32 %v1843_v57, %v1837_v16  ;;  %v1869_v46 = vmul.f32 %v1838_v55, %v1804_v54 }
 0xa7a   : > { %v4812_v28 = vpop.eup %4811  ;;  %v1841_v19 = vmul.f32 %v4810_v12, %v5353_v52  ;;  %v1870_v20 = vmul.f32 %v1839_v23, %v1808_v18 }
 0xa7b   : > { %v1842_v44 = vmul.f32 %v4812_v28, %v5356_v56  ;;  %v1871_v17 = vmul.f32 %v1840_v61, %v1808_v18  ;;  %v1875_v14 = vadd.f32 %v1874_v59, %v1868_v26  ;;  %v1845_v25 = vadd.f32 %v1844_v42, %v1838_v55 }
 0xa7c   : > { %v1852_v32 = vadd.f32 %v1840_v61, %v1839_v23  ;;  %v1872_v13 = vmul.f32 %v1841_v19, %v1808_v18 }
 0xa7d   : > { %v1876_v31 = vadd.f32 %v1875_v14, %v1869_v46  ;;  %v1883_v63 = vadd.f32 %v1871_v17, %v1870_v20  ;;  %v1873_v38 = vmul.f32 %v1842_v44, %v1808_v18  ;;  %v1846_v12 = vrot.slane %v1845_v25, 4 }
 0xa7e   : > { %v1853_v27 = vadd.f32 %v1852_v32, %v1841_v19 }
 0xa7f   : > { %v1877_v53 = vrot.slane %v1876_v31, 4  ;;  %v1884_v40 = vadd.f32 %v1883_v63, %v1872_v13  ;;  %v1847_v26 = vadd.f32 %v1846_v12, %v1845_v25 }
 0xa80   : > { %v1854_v39 = vadd.f32 %v1853_v27, %v1842_v44 }
 0xa81   : > { %v1878_v34 = vadd.f32 %v1877_v53, %v1876_v31  ;;  %v1885_v37 = vadd.f32 %v1884_v40, %v1873_v38  ;;  %v1848_v42 = vrot.slane %v1847_v26, 2 }
 0xa82   : > { %v1855_v18 = vrot.slane %v1854_v39, 4 }
 0xa83   : > { %v1879_v62 = vrot.slane %v1878_v34, 2  ;;  %v1886_v45 = vrot.slane %v1885_v37, 4  ;;  %v1849_v19 = vadd.f32 %v1848_v42, %v1847_v26 }
 0xa84   : > { %v1856_v61 = vadd.f32 %v1855_v18, %v1854_v39 }
 0xa85   : > { %v1880_v54 = vadd.f32 %v1879_v62, %v1878_v34  ;;  %v1887_v58 = vadd.f32 %v1886_v45, %v1885_v37  ;;  %v1850_v44 = vrot.slane %v1849_v19, 1 }
 0xa86   : > { %v1857_v59 = vrot.slane %v1856_v61, 2 }
 0xa87   : > { %v1888_v16 = vrot.slane %v1887_v58, 2  ;;  %v1881_v41 = vrot.slane %v1880_v54, 1  ;;  %v1851_v13 = vadd.f32 %v1850_v44, %v1849_v19 }
 0xa88   : > { %v1858_v28 = vadd.f32 %v1857_v59, %v1856_v61 }
 0xa89   : > { %v1889_v47 = vadd.f32 %v1888_v16, %v1887_v58  ;;  %v1882_v55 = vadd.f32 %v1881_v41, %v1880_v54  ;;  %v1861_v38 = vadd.f32 %v1851_v13, %v5379_v22 }
 0xa8a   : > { %v1859_v46 = vrot.slane %v1858_v28, 1 }
 0xa8b   : > { %v1890_v48 = vrot.slane %v1889_v47, 1 }
 0xa8c   : > { %v1860_v14 = vadd.f32 %v1859_v46, %v1858_v28 }
 0xa8d   : > { %v1891_v57 = vadd.f32 %v1890_v48, %v1889_v47 }
 0xa8e   : > { %v1862_v63 = vadd.f32 %v1860_v14, %v5379_v22 }
 0xa8f   : > { %v1894_v60 = vsel %vm231_vm1, %v1891_v57, %v1882_v55 }
 0xa90   : > { %v1896_v23 = vsel %vm199_vm0, %v1894_v60, 0.0 }
 0xa91   : > { %1897 = vadd.xlane.f32.xlu1 %v1896_v23 }
 0xaed   : > { %v1865_v20 = vpop.xlane.xlu0 %1864 }
 0xaee   : > { %v1899_v17 = vmul.f32 %v1865_v20, %v5379_v22 }
 0xb1e   : > { %v1898_v32 = vpop.xlane.xlu1 %1897 }
 0xb1f   : > { %v1900_v31 = vadd.f32 %v1899_v17, %v1898_v32 }
 0xb21   : > { %v1902_v27 = vrot.slane %v1900_v31, 1  ;;  %v1905_v25 = vsub.f32 %v1861_v38, %v1900_v31 }
 0xb23   : > { %v1906_v53 = vsub.f32 %v1862_v63, %v1902_v27 }
 0xb25   : > { %v1909_v40 = vrot.slane %v1906_v53, 7 }
 0xb27   : > { %v1910_v39 = vsel %vm231_vm1, %v1909_v40, %v1905_v25 }
 0xb28   : > { %v5946_v34 = vmul.f32 %v1910_v39, %v5905_v33 }
 0xb2a   : > { %v1913_v37 = vmul.f32 %v5946_v34, %v5388_v43 }
 0xb2c   : > { %v5951_v62 = vadd.f32 %v1913_v37, %v5905_v33 }
 0xb2e   : > { %v2000_v45 = vsel %vm199_vm0, %v5951_v62, 0.0  ;;  %v1922_v54 = vrot.slane %v5951_v62, %v5309_v21 }
 0xb2f   : > { %2001 = vadd.xlane.f32.xlu0 %v2000_v45 }
 0xb30   : > { %v1923_v58 = vcombine.high %v1922_v54, %v1922_v54  ;;  %v1930_v16 = vrot.slane %v1922_v54, %v5309_v21 }
 0xb32   : > { %v1937_v41 = vrot.slane %v1923_v58, %v5309_v21  ;;  %v1941_v47 = vrot.slane %v1930_v16, %v5313_v24 }
 0xb34   : > { %v1945_v48 = vrot.slane %v1937_v41, %v5313_v24  ;;  %v1948_v55 = vmul.f32 %v1941_v47, %v5323_v30  ;;  %v1949_v57 = vmul.f32 %v1941_v47, %v5332_v36  ;;  %v1950_v60 = vmul.f32 %v1941_v47, %v5321_v29 }
 0xb35   : > { %v1951_v23 = vmul.f32 %v1941_v47, %v5330_v35 }
 0xb36   : > { %v1952_v18 = vmul.f32 %v1945_v48, %v5323_v30  ;;  %v1953_v12 = vmul.f32 %v1945_v48, %v5332_v36  ;;  %v1954_v61 = vmul.f32 %v1945_v48, %v5321_v29  ;;  %v1956_v26 = vadd.f32 %v1948_v55, %v5250_v0 }
 0xb37   : > { %v1957_v59 = vadd.f32 %v1949_v57, %v5252_v1  ;;  %v1958_v42 = vadd.f32 %v1950_v60, %v5254_v2  ;;  %v1955_v28 = vmul.f32 %v1945_v48, %v5330_v35  ;;  %v1959_v19 = vadd.f32 %v1951_v23, %v5256_v3 }
 0xb38   : > { %v1960_v46 = vadd.f32 %v1952_v18, %v5258_v4  ;;  %4813 = vtanh.f32 %v1956_v26  ;;  %v1961_v20 = vadd.f32 %v1953_v12, %v5260_v5  ;;  %v1962_v44 = vadd.f32 %v1954_v61, %v5262_v6 }
 0xb39   : > { %4815 = vtanh.f32 %v1957_v59  ;;  %v1963_v17 = vadd.f32 %v1955_v28, %v5264_v7 }
 0xb3a   : > { %4817 = vtanh.f32 %v1958_v42 }
 0xb3b   : > { %4819 = vtanh.f32 %v1959_v19 }
 0xb3c   : > { %4821 = vtanh.f32 %v1960_v46 }
 0xb3d   : > { %4823 = vtanh.f32 %v1961_v20 }
 0xb3e   : > { %4825 = vtanh.f32 %v1962_v44 }
 0xb3f   : > { %4827 = vtanh.f32 %v1963_v17 }
 0xb42   : > { %v4814_v14 = vpop.eup %4813 }
 0xb43   : > { %v4816_v32 = vpop.eup %4815  ;;  %v1972_v13 = vmul.f32 %v4814_v14, %v5351_v50 }
 0xb44   : > { %v4818_v31 = vpop.eup %4817  ;;  %v1973_v63 = vmul.f32 %v4816_v32, %v5349_v49 }
 0xb45   : > { %v4820_v27 = vpop.eup %4819  ;;  %v1974_v38 = vmul.f32 %v4818_v31, %v5353_v52  ;;  %v2003_v53 = vmul.f32 %v1972_v13, %v1941_v47 }
 0xb46   : > { %v4822_v25 = vpop.eup %4821  ;;  %v1975_v40 = vmul.f32 %v4820_v27, %v5356_v56  ;;  %v2004_v39 = vmul.f32 %v1973_v63, %v1941_v47  ;;  %v1980_v37 = vadd.f32 %v1973_v63, %v1972_v13 }
 0xb47   : > { %v4824_v45 = vpop.eup %4823  ;;  %v1976_v54 = vmul.f32 %v4822_v25, %v5351_v50  ;;  %v2005_v41 = vmul.f32 %v1974_v38, %v1941_v47 }
 0xb48   : > { %v4826_v58 = vpop.eup %4825  ;;  %v1977_v16 = vmul.f32 %v4824_v45, %v5349_v49  ;;  %v2011_v55 = vadd.f32 %v2004_v39, %v2003_v53  ;;  %v1981_v57 = vadd.f32 %v1980_v37, %v1974_v38  ;;  %v2006_v18 = vmul.f32 %v1975_v40, %v1941_v47 }
 0xb49   : > { %v4828_v60 = vpop.eup %4827  ;;  %v1978_v23 = vmul.f32 %v4826_v58, %v5353_v52  ;;  %v2007_v12 = vmul.f32 %v1976_v54, %v1945_v48 }
 0xb4a   : > { %v1979_v61 = vmul.f32 %v4828_v60, %v5356_v56  ;;  %v2008_v26 = vmul.f32 %v1977_v16, %v1945_v48  ;;  %v2012_v59 = vadd.f32 %v2011_v55, %v2005_v41  ;;  %v1982_v42 = vadd.f32 %v1981_v57, %v1975_v40 }
 0xb4b   : > { %v1989_v28 = vadd.f32 %v1977_v16, %v1976_v54  ;;  %v2009_v19 = vmul.f32 %v1978_v23, %v1945_v48 }
 0xb4c   : > { %v2013_v46 = vadd.f32 %v2012_v59, %v2006_v18  ;;  %v2020_v20 = vadd.f32 %v2008_v26, %v2007_v12  ;;  %v2010_v17 = vmul.f32 %v1979_v61, %v1945_v48  ;;  %v1983_v41 = vrot.slane %v1982_v42, 4 }
 0xb4d   : > { %v1990_v44 = vadd.f32 %v1989_v28, %v1978_v23 }
 0xb4e   : > { %v2014_v14 = vrot.slane %v2013_v46, 4  ;;  %v2021_v32 = vadd.f32 %v2020_v20, %v2009_v19  ;;  %v1984_v57 = vadd.f32 %v1983_v41, %v1982_v42 }
 0xb4f   : > { %v1991_v13 = vadd.f32 %v1990_v44, %v1979_v61 }
 0xb50   : > { %v2015_v31 = vadd.f32 %v2014_v14, %v2013_v46  ;;  %v2022_v63 = vadd.f32 %v2021_v32, %v2010_v17  ;;  %v1985_v23 = vrot.slane %v1984_v57, 2 }
 0xb51   : > { %v1992_v48 = vrot.slane %v1991_v13, 4 }
 0xb52   : > { %v2016_v27 = vrot.slane %v2015_v31, 2  ;;  %v2023_v38 = vrot.slane %v2022_v63, 4  ;;  %v1986_v12 = vadd.f32 %v1985_v23, %v1984_v57 }
 0xb53   : > { %v1993_v55 = vadd.f32 %v1992_v48, %v1991_v13 }
 0xb54   : > { %v2017_v47 = vadd.f32 %v2016_v27, %v2015_v31  ;;  %v2024_v53 = vadd.f32 %v2023_v38, %v2022_v63  ;;  %v1987_v59 = vrot.slane %v1986_v12, 1 }
 0xb55   : > { %v1994_v60 = vrot.slane %v1993_v55, 2 }
 0xb56   : > { %v2025_v25 = vrot.slane %v2024_v53, 2  ;;  %v2018_v39 = vrot.slane %v2017_v47, 1  ;;  %v1988_v20 = vadd.f32 %v1987_v59, %v1986_v12 }
 0xb57   : > { %v1995_v18 = vadd.f32 %v1994_v60, %v1993_v55 }
 0xb58   : > { %v2026_v37 = vadd.f32 %v2025_v25, %v2024_v53  ;;  %v2019_v40 = vadd.f32 %v2018_v39, %v2017_v47  ;;  %v1998_v32 = vadd.f32 %v1988_v20, %v5379_v22 }
 0xb59   : > { %v1996_v61 = vrot.slane %v1995_v18, 1 }
 0xb5a   : > { %v2027_v45 = vrot.slane %v2026_v37, 1 }
 0xb5b   : > { %v1997_v19 = vadd.f32 %v1996_v61, %v1995_v18 }
 0xb5c   : > { %v2028_v54 = vadd.f32 %v2027_v45, %v2026_v37 }
 0xb5d   : > { %v1999_v17 = vadd.f32 %v1997_v19, %v5379_v22 }
 0xb5e   : > { %v2031_v58 = vsel %vm231_vm1, %v2028_v54, %v2019_v40 }
 0xb5f   : > { %v2033_v16 = vsel %vm199_vm0, %v2031_v58, 0.0 }
 0xb60   : > { %2034 = vadd.xlane.f32.xlu1 %v2033_v16 }
 0xbbc   : > { %v2002_v26 = vpop.xlane.xlu0 %2001 }
 0xbbd   : > { %v2036_v28 = vmul.f32 %v2002_v26, %v5379_v22 }
 0xbed   : > { %v2035_v46 = vpop.xlane.xlu1 %2034 }
 0xbee   : > { %v2037_v44 = vadd.f32 %v2036_v28, %v2035_v46 }
 0xbf0   : > { %v2039_v14 = vrot.slane %v2037_v44, 1  ;;  %v2042_v42 = vsub.f32 %v1998_v32, %v2037_v44 }
 0xbf2   : > { %v2043_v13 = vsub.f32 %v1999_v17, %v2039_v14 }
 0xbf4   : > { %v2046_v31 = vrot.slane %v2043_v13, 7 }
 0xbf6   : > { %v2047_v63 = vsel %vm231_vm1, %v2046_v31, %v2042_v42 }
 0xbf7   : > { %v5992_v27 = vmul.f32 %v2047_v63, %v5951_v62 }
 0xbf9   : > { %v2050_v38 = vmul.f32 %v5992_v27, %v5388_v43 }
 0xbfb   : > { %v5997_v47 = vadd.f32 %v2050_v38, %v5905_v33 }
 0xbfd   : > { %v2137_v53 = vsel %vm199_vm0, %v5997_v47, 0.0  ;;  %v2059_v25 = vrot.slane %v5997_v47, %v5309_v21 }
 0xbfe   : > { %2138 = vadd.xlane.f32.xlu0 %v2137_v53 }
 0xbff   : > { %v2060_v39 = vcombine.high %v2059_v25, %v2059_v25  ;;  %v2067_v37 = vrot.slane %v2059_v25, %v5309_v21 }
 0xc01   : > { %v2074_v45 = vrot.slane %v2060_v39, %v5309_v21  ;;  %v2078_v62 = vrot.slane %v2067_v37, %v5313_v24 }
 0xc03   : > { %v2082_v40 = vrot.slane %v2074_v45, %v5313_v24  ;;  %v2085_v54 = vmul.f32 %v2078_v62, %v5323_v30  ;;  %v2086_v58 = vmul.f32 %v2078_v62, %v5332_v36  ;;  %v2087_v16 = vmul.f32 %v2078_v62, %v5321_v29 }
 0xc04   : > { %v2088_v48 = vmul.f32 %v2078_v62, %v5330_v35 }
 0xc05   : > { %v2089_v41 = vmul.f32 %v2082_v40, %v5323_v30  ;;  %v2090_v55 = vmul.f32 %v2082_v40, %v5332_v36  ;;  %v2091_v57 = vmul.f32 %v2082_v40, %v5321_v29  ;;  %v2093_v60 = vadd.f32 %v2085_v54, %v5250_v0 }
 0xc06   : > { %v2094_v23 = vadd.f32 %v2086_v58, %v5252_v1  ;;  %v2095_v18 = vadd.f32 %v2087_v16, %v5254_v2  ;;  %v2092_v12 = vmul.f32 %v2082_v40, %v5330_v35  ;;  %v2096_v61 = vadd.f32 %v2088_v48, %v5256_v3 }
 0xc07   : > { %v2097_v26 = vadd.f32 %v2089_v41, %v5258_v4  ;;  %4829 = vtanh.f32 %v2093_v60  ;;  %v2098_v59 = vadd.f32 %v2090_v55, %v5260_v5  ;;  %v2099_v28 = vadd.f32 %v2091_v57, %v5262_v6 }
 0xc08   : > { %4831 = vtanh.f32 %v2094_v23  ;;  %v2100_v19 = vadd.f32 %v2092_v12, %v5264_v7 }
 0xc09   : > { %4833 = vtanh.f32 %v2095_v18 }
 0xc0a   : > { %4835 = vtanh.f32 %v2096_v61 }
 0xc0b   : > { %4837 = vtanh.f32 %v2097_v26 }
 0xc0c   : > { %4839 = vtanh.f32 %v2098_v59 }
 0xc0d   : > { %4841 = vtanh.f32 %v2099_v28 }
 0xc0e   : > { %4843 = vtanh.f32 %v2100_v19 }
 0xc11   : > { %v4830_v46 = vpop.eup %4829 }
 0xc12   : > { %v4832_v20 = vpop.eup %4831  ;;  %v2109_v44 = vmul.f32 %v4830_v46, %v5351_v50 }
 0xc13   : > { %v4834_v17 = vpop.eup %4833  ;;  %v2110_v14 = vmul.f32 %v4832_v20, %v5349_v49 }
 0xc14   : > { %v4836_v32 = vpop.eup %4835  ;;  %v2111_v13 = vmul.f32 %v4834_v17, %v5353_v52  ;;  %v2140_v42 = vmul.f32 %v2109_v44, %v2078_v62 }
 0xc15   : > { %v4838_v31 = vpop.eup %4837  ;;  %v2112_v63 = vmul.f32 %v4836_v32, %v5356_v56  ;;  %v2141_v38 = vmul.f32 %v2110_v14, %v2078_v62  ;;  %v2117_v53 = vadd.f32 %v2110_v14, %v2109_v44 }
 0xc16   : > { %v4840_v25 = vpop.eup %4839  ;;  %v2113_v39 = vmul.f32 %v4838_v31, %v5351_v50  ;;  %v2142_v54 = vmul.f32 %v2111_v13, %v2078_v62 }
 0xc17   : > { %v4842_v37 = vpop.eup %4841  ;;  %v2114_v45 = vmul.f32 %v4840_v25, %v5349_v49  ;;  %v2148_v58 = vadd.f32 %v2141_v38, %v2140_v42  ;;  %v2118_v16 = vadd.f32 %v2117_v53, %v2111_v13  ;;  %v2143_v55 = vmul.f32 %v2112_v63, %v2078_v62 }
 0xc18   : > { %v4844_v48 = vpop.eup %4843  ;;  %v2115_v41 = vmul.f32 %v4842_v37, %v5353_v52  ;;  %v2144_v57 = vmul.f32 %v2113_v39, %v2082_v40 }
 0xc19   : > { %v2116_v60 = vmul.f32 %v4844_v48, %v5356_v56  ;;  %v2145_v23 = vmul.f32 %v2114_v45, %v2082_v40  ;;  %v2149_v18 = vadd.f32 %v2148_v58, %v2142_v54  ;;  %v2119_v12 = vadd.f32 %v2118_v16, %v2112_v63 }
 0xc1a   : > { %v2126_v61 = vadd.f32 %v2114_v45, %v2113_v39  ;;  %v2146_v26 = vmul.f32 %v2115_v41, %v2082_v40 }
 0xc1b   : > { %v2150_v59 = vadd.f32 %v2149_v18, %v2143_v55  ;;  %v2157_v28 = vadd.f32 %v2145_v23, %v2144_v57  ;;  %v2147_v46 = vmul.f32 %v2116_v60, %v2082_v40  ;;  %v2120_v58 = vrot.slane %v2119_v12, 4 }
 0xc1c   : > { %v2127_v19 = vadd.f32 %v2126_v61, %v2115_v41 }
 0xc1d   : > { %v2151_v20 = vrot.slane %v2150_v59, 4  ;;  %v2158_v44 = vadd.f32 %v2157_v28, %v2146_v26  ;;  %v2121_v48 = vadd.f32 %v2120_v58, %v2119_v12 }
 0xc1e   : > { %v2128_v17 = vadd.f32 %v2127_v19, %v2116_v60 }
 0xc1f   : > { %v2152_v14 = vadd.f32 %v2151_v20, %v2150_v59  ;;  %v2159_v32 = vadd.f32 %v2158_v44, %v2147_v46  ;;  %v2122_v55 = vrot.slane %v2121_v48, 2 }
 0xc20   : > { %v2129_v40 = vrot.slane %v2128_v17, 4 }
 0xc21   : > { %v2153_v13 = vrot.slane %v2152_v14, 2  ;;  %v2160_v42 = vrot.slane %v2159_v32, 4  ;;  %v2123_v60 = vadd.f32 %v2122_v55, %v2121_v48 }
 0xc22   : > { %v2130_v16 = vadd.f32 %v2129_v40, %v2128_v17 }
 0xc23   : > { %v2154_v62 = vadd.f32 %v2153_v13, %v2152_v14  ;;  %v2161_v31 = vadd.f32 %v2160_v42, %v2159_v32  ;;  %v2124_v61 = vrot.slane %v2123_v60, 1  ;;  %v2324_v13 = vmul.f32 2.0, %v5992_v27 }
 0xc24   : > { %v2131_v41 = vrot.slane %v2130_v16, 2 }
 0xc25   : > { %v2162_v38 = vrot.slane %v2161_v31, 2  ;;  %v2155_v53 = vrot.slane %v2154_v62, 1  ;;  %v2125_v19 = vadd.f32 %v2124_v61, %v2123_v60 }
 0xc26   : > { %v2132_v57 = vadd.f32 %v2131_v41, %v2130_v16 }
 0xc27   : > { %v2163_v25 = vadd.f32 %v2162_v38, %v2161_v31  ;;  %v2156_v63 = vadd.f32 %v2155_v53, %v2154_v62  ;;  %v2135_v14 = vadd.f32 %v2125_v19, %v5379_v22  ;;  %v2325_v31 = vadd.f32 %v2324_v13, %v5946_v34 }
 0xc28   : > { %v2133_v23 = vrot.slane %v2132_v57, 1 }
 0xc29   : > { %v2164_v37 = vrot.slane %v2163_v25, 1 }
 0xc2a   : > { %v2134_v59 = vadd.f32 %v2133_v23, %v2132_v57 }
 0xc2b   : > { %v2165_v39 = vadd.f32 %v2164_v37, %v2163_v25 }
 0xc2c   : > { %v2136_v20 = vadd.f32 %v2134_v59, %v5379_v22 }
 0xc2d   : > { %v2168_v45 = vsel %vm231_vm1, %v2165_v39, %v2156_v63 }
 0xc2e   : > { %v2170_v54 = vsel %vm199_vm0, %v2168_v45, 0.0 }
 0xc2f   : > { %2171 = vadd.xlane.f32.xlu1 %v2170_v54 }
 0xc8b   : > { %v2139_v18 = vpop.xlane.xlu0 %2138 }
 0xc8c   : > { %v2173_v26 = vmul.f32 %v2139_v18, %v5379_v22 }
 0xcbc   : > { %v2172_v28 = vpop.xlane.xlu1 %2171 }
 0xcbd   : > { %v2174_v46 = vadd.f32 %v2173_v26, %v2172_v28 }
 0xcbf   : > { %v2176_v44 = vrot.slane %v2174_v46, 1  ;;  %v2179_v12 = vsub.f32 %v2135_v14, %v2174_v46 }
 0xcc1   : > { %v2180_v17 = vsub.f32 %v2136_v20, %v2176_v44 }
 0xcc3   : > { %v2183_v32 = vrot.slane %v2180_v17, 7 }
 0xcc5   : > { %v2184_v42 = vsel %vm231_vm1, %v2183_v32, %v2179_v12 }
 0xcc6   : > { %v2186_v62 = vmul.f32 %v2184_v42, %v5997_v47 }
 0xcc8   : > { %v2326_v38 = vmul.f32 2.0, %v2186_v62  ;;  %v2187_v53 = vmul.f32 %v2186_v62, %v5484_v15 }
 0xcca   : > { %v6042_v25 = vadd.f32 %v2187_v53, %v5905_v33  ;;  %v6044_v37 = vadd.f32 %v2326_v38, %v2325_v31 }
 0xccc   : > { %v2274_v63 = vsel %vm199_vm0, %v6042_v25, 0.0  ;;  %v2196_v27 = vrot.slane %v6042_v25, %v5309_v21 }
 0xccd   : > { %2275 = vadd.xlane.f32.xlu0 %v2274_v63 }
 0xcce   : > { %v2197_v39 = vcombine.high %v2196_v27, %v2196_v27  ;;  %v2204_v47 = vrot.slane %v2196_v27, %v5309_v21 }
 0xcd0   : > { %v2211_v34 = vrot.slane %v2197_v39, %v5309_v21  ;;  %v2215_v45 = vrot.slane %v2204_v47, %v5313_v24 }
 0xcd2   : > { %v2219_v54 = vrot.slane %v2211_v34, %v5313_v24  ;;  %v2222_v40 = vmul.f32 %v2215_v45, %v5323_v30  ;;  %v2223_v58 = vmul.f32 %v2215_v45, %v5332_v36  ;;  %v2224_v16 = vmul.f32 %v2215_v45, %v5321_v29 }
 0xcd3   : > { %v2225_v48 = vmul.f32 %v2215_v45, %v5330_v35 }
 0xcd4   : > { %v2226_v41 = vmul.f32 %v2219_v54, %v5323_v30  ;;  %v2227_v55 = vmul.f32 %v2219_v54, %v5332_v36  ;;  %v2228_v57 = vmul.f32 %v2219_v54, %v5321_v29  ;;  %v2230_v60 = vadd.f32 %v2222_v40, %v5250_v0 }
 0xcd5   : > { %v2231_v23 = vadd.f32 %v2223_v58, %v5252_v1  ;;  %v2232_v18 = vadd.f32 %v2224_v16, %v5254_v2  ;;  %v2229_v61 = vmul.f32 %v2219_v54, %v5330_v35  ;;  %v2233_v26 = vadd.f32 %v2225_v48, %v5256_v3 }
 0xcd6   : > { %v2234_v59 = vadd.f32 %v2226_v41, %v5258_v4  ;;  %4845 = vtanh.f32 %v2230_v60  ;;  %v2235_v28 = vadd.f32 %v2227_v55, %v5260_v5  ;;  %v2236_v19 = vadd.f32 %v2228_v57, %v5262_v6 }
 0xcd7   : > { %4847 = vtanh.f32 %v2231_v23  ;;  %v2237_v46 = vadd.f32 %v2229_v61, %v5264_v7 }
 0xcd8   : > { %4849 = vtanh.f32 %v2232_v18 }
 0xcd9   : > { %4851 = vtanh.f32 %v2233_v26 }
 0xcda   : > { %4853 = vtanh.f32 %v2234_v59 }
 0xcdb   : > { %4855 = vtanh.f32 %v2235_v28 }
 0xcdc   : > { %4857 = vtanh.f32 %v2236_v19 }
 0xcdd   : > { %4859 = vtanh.f32 %v2237_v46 }
 0xce0   : > { %v4846_v20 = vpop.eup %4845 }
 0xce1   : > { %v4848_v44 = vpop.eup %4847  ;;  %v2246_v14 = vmul.f32 %v4846_v20, %v5351_v50 }
 0xce2   : > { %v4850_v17 = vpop.eup %4849  ;;  %v2247_v12 = vmul.f32 %v4848_v44, %v5349_v49 }
 0xce3   : > { %v4852_v32 = vpop.eup %4851  ;;  %v2248_v13 = vmul.f32 %v4850_v17, %v5353_v52  ;;  %v2277_v42 = vmul.f32 %v2246_v14, %v2215_v45 }
 0xce4   : > { %v4854_v62 = vpop.eup %4853  ;;  %v2249_v31 = vmul.f32 %v4852_v32, %v5356_v56  ;;  %v2278_v38 = vmul.f32 %v2247_v12, %v2215_v45  ;;  %v2254_v53 = vadd.f32 %v2247_v12, %v2246_v14 }
 0xce5   : > { %v4856_v63 = vpop.eup %4855  ;;  %v2250_v27 = vmul.f32 %v4854_v62, %v5351_v50  ;;  %v2279_v34 = vmul.f32 %v2248_v13, %v2215_v45 }
 0xce6   : > { %v4858_v39 = vpop.eup %4857  ;;  %v2251_v47 = vmul.f32 %v4856_v63, %v5349_v49  ;;  %v2285_v40 = vadd.f32 %v2278_v38, %v2277_v42  ;;  %v2255_v58 = vadd.f32 %v2254_v53, %v2248_v13  ;;  %v2280_v41 = vmul.f32 %v2249_v31, %v2215_v45 }
 0xce7   : > { %v4860_v16 = vpop.eup %4859  ;;  %v2252_v48 = vmul.f32 %v4858_v39, %v5353_v52  ;;  %v2281_v55 = vmul.f32 %v2250_v27, %v2219_v54 }
 0xce8   : > { %v2253_v57 = vmul.f32 %v4860_v16, %v5356_v56  ;;  %v2282_v60 = vmul.f32 %v2251_v47, %v2219_v54  ;;  %v2286_v23 = vadd.f32 %v2285_v40, %v2279_v34  ;;  %v2256_v18 = vadd.f32 %v2255_v58, %v2249_v31 }
 0xce9   : > { %v2263_v61 = vadd.f32 %v2251_v47, %v2250_v27  ;;  %v2283_v26 = vmul.f32 %v2252_v48, %v2219_v54 }
 0xcea   : > { %v2287_v59 = vadd.f32 %v2286_v23, %v2280_v41  ;;  %v2294_v28 = vadd.f32 %v2282_v60, %v2281_v55  ;;  %v2284_v46 = vmul.f32 %v2253_v57, %v2219_v54  ;;  %v2257_v34 = vrot.slane %v2256_v18, 4 }
 0xceb   : > { %v2264_v19 = vadd.f32 %v2263_v61, %v2252_v48 }
 0xcec   : > { %v2288_v20 = vrot.slane %v2287_v59, 4  ;;  %v2295_v44 = vadd.f32 %v2294_v28, %v2283_v26  ;;  %v2258_v58 = vadd.f32 %v2257_v34, %v2256_v18 }
 0xced   : > { %v2265_v14 = vadd.f32 %v2264_v19, %v2253_v57 }
 0xcee   : > { %v2289_v17 = vadd.f32 %v2288_v20, %v2287_v59  ;;  %v2296_v12 = vadd.f32 %v2295_v44, %v2284_v46  ;;  %v2259_v48 = vrot.slane %v2258_v58, 2 }
 0xcef   : > { %v2266_v54 = vrot.slane %v2265_v14, 4 }
 0xcf0   : > { %v2290_v32 = vrot.slane %v2289_v17, 2  ;;  %v2297_v13 = vrot.slane %v2296_v12, 4  ;;  %v2260_v55 = vadd.f32 %v2259_v48, %v2258_v58 }
 0xcf1   : > { %v2267_v40 = vadd.f32 %v2266_v54, %v2265_v14 }
 0xcf2   : > { %v2291_v45 = vadd.f32 %v2290_v32, %v2289_v17  ;;  %v2298_v42 = vadd.f32 %v2297_v13, %v2296_v12  ;;  %v2261_v23 = vrot.slane %v2260_v55, 1 }
 0xcf3   : > { %v2268_v16 = vrot.slane %v2267_v40, 2 }
 0xcf4   : > { %v2299_v62 = vrot.slane %v2298_v42, 2  ;;  %v2292_v38 = vrot.slane %v2291_v45, 1  ;;  %v2262_v28 = vadd.f32 %v2261_v23, %v2260_v55 }
 0xcf5   : > { %v2269_v41 = vadd.f32 %v2268_v16, %v2267_v40 }
 0xcf6   : > { %v2300_v53 = vadd.f32 %v2299_v62, %v2298_v42  ;;  %v2293_v31 = vadd.f32 %v2292_v38, %v2291_v45  ;;  %v2272_v44 = vadd.f32 %v2262_v28, %v5379_v22 }
 0xcf7   : > { %v2270_v57 = vrot.slane %v2269_v41, 1 }
 0xcf8   : > { %v2301_v63 = vrot.slane %v2300_v53, 1 }
 0xcf9   : > { %v2271_v26 = vadd.f32 %v2270_v57, %v2269_v41 }
 0xcfa   : > { %v2302_v27 = vadd.f32 %v2301_v63, %v2300_v53 }
 0xcfb   : > { %v2273_v46 = vadd.f32 %v2271_v26, %v5379_v22 }
 0xcfc   : > { %v2305_v39 = vsel %vm231_vm1, %v2302_v27, %v2293_v31 }
 0xcfd   : > { %v2307_v47 = vsel %vm199_vm0, %v2305_v39, 0.0 }
 0xcfe   : > { %2308 = vadd.xlane.f32.xlu1 %v2307_v47 }
 0xd5a   : > { %v2276_v60 = vpop.xlane.xlu0 %2275 }
 0xd5b   : > { %v2310_v61 = vmul.f32 %v2276_v60, %v5379_v22 }
 0xd8b   : > { %v2309_v59 = vpop.xlane.xlu1 %2308 }
 0xd8c   : > { %v2311_v19 = vadd.f32 %v2310_v61, %v2309_v59 }
 0xd8e   : > { %v2313_v20 = vrot.slane %v2311_v19, 1  ;;  %v2316_v18 = vsub.f32 %v2272_v44, %v2311_v19 }
 0xd90   : > { %v2317_v14 = vsub.f32 %v2273_v46, %v2313_v20 }
 0xd92   : > { %v2320_v17 = vrot.slane %v2317_v14, 7 }
 0xd94   : > { %v2321_v12 = vsel %vm231_vm1, %v2320_v17, %v2316_v18 }
 0xd95   : > { %v2323_v32 = vmul.f32 %v2321_v12, %v6042_v25 }
 0xd97   : > { %v2328_v13 = vadd.f32 %v6044_v37, %v2323_v32 }
 0xd99   : > { %v2329_v45 = vmul.f32 %v2328_v13, %v5534_v51 }
 0xd9b   : > { %v6088_v42 = vadd.f32 %v2329_v45, %v5905_v33 }
 0xd9d   : > { %v2338_v62 = vrot.slane %v6088_v42, %v5309_v21  ;;  %v2416_v38 = vsel %vm199_vm0, %v6088_v42, 0.0 }
 0xd9e   : > { %2417 = vadd.xlane.f32.xlu0 %v2416_v38 }
 0xd9f   : > { %v2339_v53 = vcombine.high %v2338_v62, %v2338_v62  ;;  %v2346_v63 = vrot.slane %v2338_v62, %v5309_v21 }
 0xda1   : > { %v2353_v31 = vrot.slane %v2339_v53, %v5309_v21  ;;  %v2357_v25 = vrot.slane %v2346_v63, %v5313_v24 }
 0xda3   : > { %v2361_v37 = vrot.slane %v2353_v31, %v5313_v24  ;;  %v2364_v27 = vmul.f32 %v2357_v25, %v5323_v30  ;;  %v2365_v33 = vmul.f32 %v2357_v25, %v5332_v36  ;;  %v2366_v39 = vmul.f32 %v2357_v25, %v5321_v29 }
 0xda4   : > { %v2367_v47 = vmul.f32 %v2357_v25, %v5330_v35 }
 0xda5   : > { %v2368_v54 = vmul.f32 %v2361_v37, %v5323_v30  ;;  %v2369_v34 = vmul.f32 %v2361_v37, %v5332_v36  ;;  %v2370_v40 = vmul.f32 %v2361_v37, %v5321_v29  ;;  %v2372_v58 = vadd.f32 %v2364_v27, %v5250_v0 }
 0xda6   : > { %v2373_v16 = vadd.f32 %v2365_v33, %v5252_v1  ;;  %v2374_v48 = vadd.f32 %v2366_v39, %v5254_v2  ;;  %v2371_v41 = vmul.f32 %v2361_v37, %v5330_v35  ;;  %v2375_v55 = vadd.f32 %v2367_v47, %v5256_v3 }
 0xda7   : > { %v2376_v57 = vadd.f32 %v2368_v54, %v5258_v4  ;;  %4861 = vtanh.f32 %v2372_v58  ;;  %v2377_v60 = vadd.f32 %v2369_v34, %v5260_v5  ;;  %v2378_v23 = vadd.f32 %v2370_v40, %v5262_v6 }
 0xda8   : > { %4863 = vtanh.f32 %v2373_v16  ;;  %v2379_v61 = vadd.f32 %v2371_v41, %v5264_v7 }
 0xda9   : > { %4865 = vtanh.f32 %v2374_v48 }
 0xdaa   : > { %4867 = vtanh.f32 %v2375_v55 }
 0xdab   : > { %4869 = vtanh.f32 %v2376_v57 }
 0xdac   : > { %4871 = vtanh.f32 %v2377_v60 }
 0xdad   : > { %4873 = vtanh.f32 %v2378_v23 }
 0xdae   : > { %4875 = vtanh.f32 %v2379_v61 }
 0xdb1   : > { %v4862_v26 = vpop.eup %4861 }
 0xdb2   : > { %v4864_v59 = vpop.eup %4863  ;;  %v2388_v28 = vmul.f32 %v4862_v26, %v5351_v50 }
 0xdb3   : > { %v4866_v19 = vpop.eup %4865  ;;  %v2389_v46 = vmul.f32 %v4864_v59, %v5349_v49 }
 0xdb4   : > { %v4868_v20 = vpop.eup %4867  ;;  %v2390_v44 = vmul.f32 %v4866_v19, %v5353_v52  ;;  %v2419_v14 = vmul.f32 %v2388_v28, %v2357_v25 }
 0xdb5   : > { %v4870_v18 = vpop.eup %4869  ;;  %v2391_v17 = vmul.f32 %v4868_v20, %v5356_v56  ;;  %v2420_v12 = vmul.f32 %v2389_v46, %v2357_v25  ;;  %v2396_v32 = vadd.f32 %v2389_v46, %v2388_v28 }
 0xdb6   : > { %v4872_v13 = vpop.eup %4871  ;;  %v2392_v45 = vmul.f32 %v4870_v18, %v5351_v50  ;;  %v2421_v53 = vmul.f32 %v2390_v44, %v2357_v25 }
 0xdb7   : > { %v4874_v62 = vpop.eup %4873  ;;  %v2393_v38 = vmul.f32 %v4872_v13, %v5349_v49  ;;  %v2427_v63 = vadd.f32 %v2420_v12, %v2419_v14  ;;  %v2397_v31 = vadd.f32 %v2396_v32, %v2390_v44  ;;  %v2422_v39 = vmul.f32 %v2391_v17, %v2357_v25 }
 0xdb8   : > { %v4876_v27 = vpop.eup %4875  ;;  %v2394_v33 = vmul.f32 %v4874_v62, %v5353_v52  ;;  %v2423_v47 = vmul.f32 %v2392_v45, %v2361_v37 }
 0xdb9   : > { %v2395_v54 = vmul.f32 %v4876_v27, %v5356_v56  ;;  %v2424_v34 = vmul.f32 %v2393_v38, %v2361_v37  ;;  %v2428_v40 = vadd.f32 %v2427_v63, %v2421_v53  ;;  %v2398_v58 = vadd.f32 %v2397_v31, %v2391_v17 }
 0xdba   : > { %v2405_v16 = vadd.f32 %v2393_v38, %v2392_v45  ;;  %v2425_v48 = vmul.f32 %v2394_v33, %v2361_v37 }
 0xdbb   : > { %v2429_v41 = vadd.f32 %v2428_v40, %v2422_v39  ;;  %v2436_v55 = vadd.f32 %v2424_v34, %v2423_v47  ;;  %v2426_v60 = vmul.f32 %v2395_v54, %v2361_v37  ;;  %v2399_v62 = vrot.slane %v2398_v58, 4 }
 0xdbc   : > { %v2406_v57 = vadd.f32 %v2405_v16, %v2394_v33 }
 0xdbd   : > { %v2430_v23 = vrot.slane %v2429_v41, 4  ;;  %v2437_v61 = vadd.f32 %v2436_v55, %v2425_v48  ;;  %v2400_v53 = vadd.f32 %v2399_v62, %v2398_v58 }
 0xdbe   : > { %v2407_v26 = vadd.f32 %v2406_v57, %v2395_v54 }
 0xdbf   : > { %v2431_v59 = vadd.f32 %v2430_v23, %v2429_v41  ;;  %v2438_v28 = vadd.f32 %v2437_v61, %v2426_v60  ;;  %v2401_v31 = vrot.slane %v2400_v53, 2 }
 0xdc0   : > { %v2408_v37 = vrot.slane %v2407_v26, 4 }
 0xdc1   : > { %v2432_v19 = vrot.slane %v2431_v59, 2  ;;  %v2439_v46 = vrot.slane %v2438_v28, 4  ;;  %v2402_v33 = vadd.f32 %v2401_v31, %v2400_v53 }
 0xdc2   : > { %v2409_v38 = vadd.f32 %v2408_v37, %v2407_v26 }
 0xdc3   : > { %v2433_v25 = vadd.f32 %v2432_v19, %v2431_v59  ;;  %v2440_v20 = vadd.f32 %v2439_v46, %v2438_v28  ;;  %v2403_v54 = vrot.slane %v2402_v33, 1 }
 0xdc4   : > { %v2410_v63 = vrot.slane %v2409_v38, 2 }
 0xdc5   : > { %v2441_v44 = vrot.slane %v2440_v20, 2  ;;  %v2434_v14 = vrot.slane %v2433_v25, 1  ;;  %v2404_v48 = vadd.f32 %v2403_v54, %v2402_v33 }
 0xdc6   : > { %v2411_v27 = vadd.f32 %v2410_v63, %v2409_v38 }
 0xdc7   : > { %v2442_v18 = vadd.f32 %v2441_v44, %v2440_v20  ;;  %v2435_v17 = vadd.f32 %v2434_v14, %v2433_v25  ;;  %v2414_v60 = vadd.f32 %v2404_v48, %v5379_v22 }
 0xdc8   : > { %v2412_v39 = vrot.slane %v2411_v27, 1 }
 0xdc9   : > { %v2443_v12 = vrot.slane %v2442_v18, 1 }
 0xdca   : > { %v2413_v40 = vadd.f32 %v2412_v39, %v2411_v27 }
 0xdcb   : > { %v2444_v32 = vadd.f32 %v2443_v12, %v2442_v18 }
 0xdcc   : > { %v2415_v55 = vadd.f32 %v2413_v40, %v5379_v22 }
 0xdcd   : > { %v2447_v13 = vsel %vm231_vm1, %v2444_v32, %v2435_v17 }
 0xdce   : > { %v2449_v45 = vsel %vm199_vm0, %v2447_v13, 0.0 }
 0xdcf   : > { %2450 = vadd.xlane.f32.xlu1 %v2449_v45 }
 0xe2b   : > { %v2418_v47 = vpop.xlane.xlu0 %2417 }
 0xe2c   : > { %v2452_v34 = vmul.f32 %v2418_v47, %v5379_v22 }
 0xe5c   : > { %v2451_v16 = vpop.xlane.xlu1 %2450 }
 0xe5d   : > { %v2453_v41 = vadd.f32 %v2452_v34, %v2451_v16 }
 0xe5f   : > { %v2455_v57 = vrot.slane %v2453_v41, 1  ;;  %v2458_v58 = vsub.f32 %v2414_v60, %v2453_v41 }
 0xe61   : > { %v2459_v23 = vsub.f32 %v2415_v55, %v2455_v57 }
 0xe63   : > { %v2462_v61 = vrot.slane %v2459_v23, 7 }
 0xe65   : > { %v2463_v26 = vsel %vm231_vm1, %v2462_v61, %v2458_v58 }
 0xe66   : > { %v6129_v59 = vmul.f32 %v2463_v26, %v6088_v42 }
 0xe68   : > { %v2466_v28 = vmul.f32 %v6129_v59, %v5388_v43 }
 0xe6a   : > { %v6134_v19 = vadd.f32 %v2466_v28, %v6088_v42 }
 0xe6c   : > { %v2553_v46 = vsel %vm199_vm0, %v6134_v19, 0.0  ;;  %v2475_v25 = vrot.slane %v6134_v19, %v5309_v21 }
 0xe6d   : > { %2554 = vadd.xlane.f32.xlu0 %v2553_v46 }
 0xe6e   : > { %v2476_v20 = vcombine.high %v2475_v25, %v2475_v25  ;;  %v2483_v44 = vrot.slane %v2475_v25, %v5309_v21 }
 0xe70   : > { %v2490_v14 = vrot.slane %v2476_v20, %v5309_v21  ;;  %v2494_v18 = vrot.slane %v2483_v44, %v5313_v24 }
 0xe72   : > { %v2498_v12 = vrot.slane %v2490_v14, %v5313_v24  ;;  %v2501_v17 = vmul.f32 %v2494_v18, %v5323_v30  ;;  %v2502_v32 = vmul.f32 %v2494_v18, %v5332_v36  ;;  %v2503_v13 = vmul.f32 %v2494_v18, %v5321_v29 }
 0xe73   : > { %v2504_v45 = vmul.f32 %v2494_v18, %v5330_v35 }
 0xe74   : > { %v2505_v37 = vmul.f32 %v2498_v12, %v5323_v30  ;;  %v2506_v62 = vmul.f32 %v2498_v12, %v5332_v36  ;;  %v2507_v38 = vmul.f32 %v2498_v12, %v5321_v29  ;;  %v2509_v53 = vadd.f32 %v2501_v17, %v5250_v0 }
 0xe75   : > { %v2510_v63 = vadd.f32 %v2502_v32, %v5252_v1  ;;  %v2511_v31 = vadd.f32 %v2503_v13, %v5254_v2  ;;  %v2508_v27 = vmul.f32 %v2498_v12, %v5330_v35  ;;  %v2512_v33 = vadd.f32 %v2504_v45, %v5256_v3 }
 0xe76   : > { %v2513_v39 = vadd.f32 %v2505_v37, %v5258_v4  ;;  %4877 = vtanh.f32 %v2509_v53  ;;  %v2514_v47 = vadd.f32 %v2506_v62, %v5260_v5  ;;  %v2515_v54 = vadd.f32 %v2507_v38, %v5262_v6 }
 0xe77   : > { %4879 = vtanh.f32 %v2510_v63  ;;  %v2516_v34 = vadd.f32 %v2508_v27, %v5264_v7 }
 0xe78   : > { %4881 = vtanh.f32 %v2511_v31 }
 0xe79   : > { %4883 = vtanh.f32 %v2512_v33 }
 0xe7a   : > { %4885 = vtanh.f32 %v2513_v39 }
 0xe7b   : > { %4887 = vtanh.f32 %v2514_v47 }
 0xe7c   : > { %4889 = vtanh.f32 %v2515_v54 }
 0xe7d   : > { %4891 = vtanh.f32 %v2516_v34 }
 0xe80   : > { %v4878_v40 = vpop.eup %4877 }
 0xe81   : > { %v4880_v16 = vpop.eup %4879  ;;  %v2525_v48 = vmul.f32 %v4878_v40, %v5351_v50 }
 0xe82   : > { %v4882_v41 = vpop.eup %4881  ;;  %v2526_v55 = vmul.f32 %v4880_v16, %v5349_v49 }
 0xe83   : > { %v4884_v57 = vpop.eup %4883  ;;  %v2527_v60 = vmul.f32 %v4882_v41, %v5353_v52  ;;  %v2556_v23 = vmul.f32 %v2525_v48, %v2494_v18 }
 0xe84   : > { %v4886_v58 = vpop.eup %4885  ;;  %v2528_v61 = vmul.f32 %v4884_v57, %v5356_v56  ;;  %v2557_v26 = vmul.f32 %v2526_v55, %v2494_v18  ;;  %v2533_v28 = vadd.f32 %v2526_v55, %v2525_v48 }
 0xe85   : > { %v4888_v46 = vpop.eup %4887  ;;  %v2529_v25 = vmul.f32 %v4886_v58, %v5351_v50  ;;  %v2558_v14 = vmul.f32 %v2527_v60, %v2494_v18 }
 0xe86   : > { %v4890_v20 = vpop.eup %4889  ;;  %v2530_v44 = vmul.f32 %v4888_v46, %v5349_v49  ;;  %v2564_v17 = vadd.f32 %v2557_v26, %v2556_v23  ;;  %v2534_v32 = vadd.f32 %v2533_v28, %v2527_v60  ;;  %v2559_v37 = vmul.f32 %v2528_v61, %v2494_v18 }
 0xe87   : > { %v4892_v13 = vpop.eup %4891  ;;  %v2531_v45 = vmul.f32 %v4890_v20, %v5353_v52  ;;  %v2560_v62 = vmul.f32 %v2529_v25, %v2498_v12 }
 0xe88   : > { %v2532_v38 = vmul.f32 %v4892_v13, %v5356_v56  ;;  %v2561_v53 = vmul.f32 %v2530_v44, %v2498_v12  ;;  %v2565_v63 = vadd.f32 %v2564_v17, %v2558_v14  ;;  %v2535_v31 = vadd.f32 %v2534_v32, %v2528_v61 }
 0xe89   : > { %v2542_v27 = vadd.f32 %v2530_v44, %v2529_v25  ;;  %v2562_v33 = vmul.f32 %v2531_v45, %v2498_v12 }
 0xe8a   : > { %v2566_v39 = vadd.f32 %v2565_v63, %v2559_v37  ;;  %v2573_v47 = vadd.f32 %v2561_v53, %v2560_v62  ;;  %v2563_v34 = vmul.f32 %v2532_v38, %v2498_v12  ;;  %v2536_v14 = vrot.slane %v2535_v31, 4 }
 0xe8b   : > { %v2543_v54 = vadd.f32 %v2542_v27, %v2531_v45 }
 0xe8c   : > { %v2567_v40 = vrot.slane %v2566_v39, 4  ;;  %v2574_v16 = vadd.f32 %v2573_v47, %v2562_v33  ;;  %v2537_v32 = vadd.f32 %v2536_v14, %v2535_v31 }
 0xe8d   : > { %v2544_v48 = vadd.f32 %v2543_v54, %v2532_v38 }
 0xe8e   : > { %v2568_v41 = vadd.f32 %v2567_v40, %v2566_v39  ;;  %v2575_v55 = vadd.f32 %v2574_v16, %v2563_v34  ;;  %v2538_v45 = vrot.slane %v2537_v32, 2 }
 0xe8f   : > { %v2545_v12 = vrot.slane %v2544_v48, 4 }
 0xe90   : > { %v2569_v57 = vrot.slane %v2568_v41, 2  ;;  %v2576_v60 = vrot.slane %v2575_v55, 4  ;;  %v2539_v62 = vadd.f32 %v2538_v45, %v2537_v32 }
 0xe91   : > { %v2546_v17 = vadd.f32 %v2545_v12, %v2544_v48 }
 0xe92   : > { %v2570_v18 = vadd.f32 %v2569_v57, %v2568_v41  ;;  %v2577_v23 = vadd.f32 %v2576_v60, %v2575_v55  ;;  %v2540_v63 = vrot.slane %v2539_v62, 1 }
 0xe93   : > { %v2547_v13 = vrot.slane %v2546_v17, 2 }
 0xe94   : > { %v2578_v58 = vrot.slane %v2577_v23, 2  ;;  %v2571_v26 = vrot.slane %v2570_v18, 1  ;;  %v2541_v47 = vadd.f32 %v2540_v63, %v2539_v62 }
 0xe95   : > { %v2548_v37 = vadd.f32 %v2547_v13, %v2546_v17 }
 0xe96   : > { %v2579_v28 = vadd.f32 %v2578_v58, %v2577_v23  ;;  %v2572_v61 = vadd.f32 %v2571_v26, %v2570_v18  ;;  %v2551_v16 = vadd.f32 %v2541_v47, %v5379_v22 }
 0xe97   : > { %v2549_v38 = vrot.slane %v2548_v37, 1 }
 0xe98   : > { %v2580_v46 = vrot.slane %v2579_v28, 1 }
 0xe99   : > { %v2550_v33 = vadd.f32 %v2549_v38, %v2548_v37 }
 0xe9a   : > { %v2581_v25 = vadd.f32 %v2580_v46, %v2579_v28 }
 0xe9b   : > { %v2552_v34 = vadd.f32 %v2550_v33, %v5379_v22 }
 0xe9c   : > { %v2584_v20 = vsel %vm231_vm1, %v2581_v25, %v2572_v61 }
 0xe9d   : > { %v2586_v44 = vsel %vm199_vm0, %v2584_v20, 0.0 }
 0xe9e   : > { %2587 = vadd.xlane.f32.xlu1 %v2586_v44 }
 0xefa   : > { %v2555_v53 = vpop.xlane.xlu0 %2554 }
 0xefb   : > { %v2589_v27 = vmul.f32 %v2555_v53, %v5379_v22 }
 0xf2b   : > { %v2588_v39 = vpop.xlane.xlu1 %2587 }
 0xf2c   : > { %v2590_v54 = vadd.f32 %v2589_v27, %v2588_v39 }
 0xf2e   : > { %v2592_v40 = vrot.slane %v2590_v54, 1  ;;  %v2595_v31 = vsub.f32 %v2551_v16, %v2590_v54 }
 0xf30   : > { %v2596_v48 = vsub.f32 %v2552_v34, %v2592_v40 }
 0xf32   : > { %v2599_v41 = vrot.slane %v2596_v48, 7 }
 0xf34   : > { %v2600_v55 = vsel %vm231_vm1, %v2599_v41, %v2595_v31 }
 0xf35   : > { %v6175_v57 = vmul.f32 %v2600_v55, %v6134_v19 }
 0xf37   : > { %v2603_v60 = vmul.f32 %v6175_v57, %v5388_v43 }
 0xf39   : > { %v6180_v18 = vadd.f32 %v2603_v60, %v6088_v42 }
 0xf3b   : > { %v2690_v23 = vsel %vm199_vm0, %v6180_v18, 0.0  ;;  %v2612_v58 = vrot.slane %v6180_v18, %v5309_v21 }
 0xf3c   : > { %2691 = vadd.xlane.f32.xlu0 %v2690_v23 }
 0xf3d   : > { %v2613_v26 = vcombine.high %v2612_v58, %v2612_v58  ;;  %v2620_v28 = vrot.slane %v2612_v58, %v5309_v21 }
 0xf3f   : > { %v2627_v46 = vrot.slane %v2613_v26, %v5309_v21  ;;  %v2631_v19 = vrot.slane %v2620_v28, %v5313_v24 }
 0xf41   : > { %v2635_v61 = vrot.slane %v2627_v46, %v5313_v24  ;;  %v2638_v25 = vmul.f32 %v2631_v19, %v5323_v30  ;;  %v2639_v20 = vmul.f32 %v2631_v19, %v5332_v36  ;;  %v2640_v44 = vmul.f32 %v2631_v19, %v5321_v29 }
 0xf42   : > { %v2641_v12 = vmul.f32 %v2631_v19, %v5330_v35 }
 0xf43   : > { %v2642_v14 = vmul.f32 %v2635_v61, %v5323_v30  ;;  %v2643_v17 = vmul.f32 %v2635_v61, %v5332_v36  ;;  %v2644_v32 = vmul.f32 %v2635_v61, %v5321_v29  ;;  %v2646_v13 = vadd.f32 %v2638_v25, %v5250_v0 }
 0xf44   : > { %v2647_v45 = vadd.f32 %v2639_v20, %v5252_v1  ;;  %v2648_v37 = vadd.f32 %v2640_v44, %v5254_v2  ;;  %v2645_v62 = vmul.f32 %v2635_v61, %v5330_v35  ;;  %v2649_v38 = vadd.f32 %v2641_v12, %v5256_v3 }
 0xf45   : > { %v2650_v53 = vadd.f32 %v2642_v14, %v5258_v4  ;;  %4893 = vtanh.f32 %v2646_v13  ;;  %v2651_v63 = vadd.f32 %v2643_v17, %v5260_v5  ;;  %v2652_v27 = vadd.f32 %v2644_v32, %v5262_v6 }
 0xf46   : > { %4895 = vtanh.f32 %v2647_v45  ;;  %v2653_v33 = vadd.f32 %v2645_v62, %v5264_v7 }
 0xf47   : > { %4897 = vtanh.f32 %v2648_v37 }
 0xf48   : > { %4899 = vtanh.f32 %v2649_v38 }
 0xf49   : > { %4901 = vtanh.f32 %v2650_v53 }
 0xf4a   : > { %4903 = vtanh.f32 %v2651_v63 }
 0xf4b   : > { %4905 = vtanh.f32 %v2652_v27 }
 0xf4c   : > { %4907 = vtanh.f32 %v2653_v33 }
 0xf4f   : > { %v4894_v39 = vpop.eup %4893 }
 0xf50   : > { %v4896_v47 = vpop.eup %4895  ;;  %v2662_v54 = vmul.f32 %v4894_v39, %v5351_v50 }
 0xf51   : > { %v4898_v34 = vpop.eup %4897  ;;  %v2663_v40 = vmul.f32 %v4896_v47, %v5349_v49 }
 0xf52   : > { %v4900_v16 = vpop.eup %4899  ;;  %v2664_v48 = vmul.f32 %v4898_v34, %v5353_v52  ;;  %v2693_v31 = vmul.f32 %v2662_v54, %v2631_v19 }
 0xf53   : > { %v4902_v41 = vpop.eup %4901  ;;  %v2665_v55 = vmul.f32 %v4900_v16, %v5356_v56  ;;  %v2694_v60 = vmul.f32 %v2663_v40, %v2631_v19  ;;  %v2670_v23 = vadd.f32 %v2663_v40, %v2662_v54 }
 0xf54   : > { %v4904_v58 = vpop.eup %4903  ;;  %v2666_v26 = vmul.f32 %v4902_v41, %v5351_v50  ;;  %v2695_v25 = vmul.f32 %v2664_v48, %v2631_v19 }
 0xf55   : > { %v4906_v28 = vpop.eup %4905  ;;  %v2667_v46 = vmul.f32 %v4904_v58, %v5349_v49  ;;  %v2701_v20 = vadd.f32 %v2694_v60, %v2693_v31  ;;  %v2671_v44 = vadd.f32 %v2670_v23, %v2664_v48  ;;  %v2696_v17 = vmul.f32 %v2665_v55, %v2631_v19 }
 0xf56   : > { %v4908_v12 = vpop.eup %4907  ;;  %v2668_v14 = vmul.f32 %v4906_v28, %v5353_v52  ;;  %v2697_v32 = vmul.f32 %v2666_v26, %v2635_v61 }
 0xf57   : > { %v2669_v13 = vmul.f32 %v4908_v12, %v5356_v56  ;;  %v2698_v45 = vmul.f32 %v2667_v46, %v2635_v61  ;;  %v2702_v37 = vadd.f32 %v2701_v20, %v2695_v25  ;;  %v2672_v62 = vadd.f32 %v2671_v44, %v2665_v55 }
 0xf58   : > { %v2679_v38 = vadd.f32 %v2667_v46, %v2666_v26  ;;  %v2699_v53 = vmul.f32 %v2668_v14, %v2635_v61 }
 0xf59   : > { %v2703_v63 = vadd.f32 %v2702_v37, %v2696_v17  ;;  %v2710_v27 = vadd.f32 %v2698_v45, %v2697_v32  ;;  %v2700_v39 = vmul.f32 %v2669_v13, %v2635_v61  ;;  %v2673_v20 = vrot.slane %v2672_v62, 4 }
 0xf5a   : > { %v2680_v33 = vadd.f32 %v2679_v38, %v2668_v14 }
 0xf5b   : > { %v2704_v47 = vrot.slane %v2703_v63, 4  ;;  %v2711_v54 = vadd.f32 %v2710_v27, %v2699_v53  ;;  %v2674_v12 = vadd.f32 %v2673_v20, %v2672_v62 }
 0xf5c   : > { %v2681_v34 = vadd.f32 %v2680_v33, %v2669_v13 }
 0xf5d   : > { %v2705_v40 = vadd.f32 %v2704_v47, %v2703_v63  ;;  %v2712_v16 = vadd.f32 %v2711_v54, %v2700_v39  ;;  %v2675_v17 = vrot.slane %v2674_v12, 2 }
 0xf5e   : > { %v2682_v61 = vrot.slane %v2681_v34, 4 }
 0xf5f   : > { %v2706_v48 = vrot.slane %v2705_v40, 2  ;;  %v2713_v31 = vrot.slane %v2712_v16, 4  ;;  %v2676_v13 = vadd.f32 %v2675_v17, %v2674_v12 }
 0xf60   : > { %v2683_v44 = vadd.f32 %v2682_v61, %v2681_v34 }
 0xf61   : > { %v2707_v19 = vadd.f32 %v2706_v48, %v2705_v40  ;;  %v2714_v41 = vadd.f32 %v2713_v31, %v2712_v16  ;;  %v2677_v38 = vrot.slane %v2676_v13, 1  ;;  %v2877_v48 = vmul.f32 2.0, %v6175_v57 }
 0xf62   : > { %v2684_v14 = vrot.slane %v2683_v44, 2 }
 0xf63   : > { %v2715_v60 = vrot.slane %v2714_v41, 2  ;;  %v2708_v23 = vrot.slane %v2707_v19, 1  ;;  %v2678_v33 = vadd.f32 %v2677_v38, %v2676_v13 }
 0xf64   : > { %v2685_v32 = vadd.f32 %v2684_v14, %v2683_v44 }
 0xf65   : > { %v2716_v58 = vadd.f32 %v2715_v60, %v2714_v41  ;;  %v2709_v55 = vadd.f32 %v2708_v23, %v2707_v19  ;;  %v2688_v40 = vadd.f32 %v2678_v33, %v5379_v22  ;;  %v2878_v41 = vadd.f32 %v2877_v48, %v6129_v59 }
 0xf66   : > { %v2686_v45 = vrot.slane %v2685_v32, 1 }
 0xf67   : > { %v2717_v28 = vrot.slane %v2716_v58, 1 }
 0xf68   : > { %v2687_v63 = vadd.f32 %v2686_v45, %v2685_v32 }
 0xf69   : > { %v2718_v26 = vadd.f32 %v2717_v28, %v2716_v58 }
 0xf6a   : > { %v2689_v47 = vadd.f32 %v2687_v63, %v5379_v22 }
 0xf6b   : > { %v2721_v46 = vsel %vm231_vm1, %v2718_v26, %v2709_v55 }
 0xf6c   : > { %v2723_v25 = vsel %vm199_vm0, %v2721_v46, 0.0 }
 0xf6d   : > { %2724 = vadd.xlane.f32.xlu1 %v2723_v25 }
 0xfc9   : > { %v2692_v37 = vpop.xlane.xlu0 %2691 }
 0xfca   : > { %v2726_v53 = vmul.f32 %v2692_v37, %v5379_v22 }
 0xffa   : > { %v2725_v27 = vpop.xlane.xlu1 %2724 }
 0xffb   : > { %v2727_v39 = vadd.f32 %v2726_v53, %v2725_v27 }
 0xffd   : > { %v2729_v54 = vrot.slane %v2727_v39, 1  ;;  %v2732_v62 = vsub.f32 %v2688_v40, %v2727_v39 }
 0xfff   : > { %v2733_v34 = vsub.f32 %v2689_v47, %v2729_v54 }
0x1001   : > { %v2736_v16 = vrot.slane %v2733_v34, 7 }
0x1003   : > { %v2737_v31 = vsel %vm231_vm1, %v2736_v16, %v2732_v62 }
0x1004   : > { %v2739_v19 = vmul.f32 %v2737_v31, %v6180_v18 }
0x1006   : > { %v2879_v60 = vmul.f32 2.0, %v2739_v19  ;;  %v2740_v23 = vmul.f32 %v2739_v19, %v5484_v15 }
0x1008   : > { %v6225_v58 = vadd.f32 %v2740_v23, %v6088_v42  ;;  %v6227_v28 = vadd.f32 %v2879_v60, %v2878_v41 }
0x100a   : > { %v2827_v55 = vsel %vm199_vm0, %v6225_v58, 0.0  ;;  %v2749_v57 = vrot.slane %v6225_v58, %v5309_v21 }
0x100b   : > { %2828 = vadd.xlane.f32.xlu0 %v2827_v55 }
0x100c   : > { %v2750_v26 = vcombine.high %v2749_v57, %v2749_v57  ;;  %v2757_v18 = vrot.slane %v2749_v57, %v5309_v21 }
0x100e   : > { %v2764_v59 = vrot.slane %v2750_v26, %v5309_v21  ;;  %v2768_v46 = vrot.slane %v2757_v18, %v5313_v24 }
0x1010   : > { %v2772_v25 = vrot.slane %v2764_v59, %v5313_v24  ;;  %v2775_v61 = vmul.f32 %v2768_v46, %v5323_v30  ;;  %v2776_v20 = vmul.f32 %v2768_v46, %v5332_v36  ;;  %v2777_v44 = vmul.f32 %v2768_v46, %v5321_v29 }
0x1011   : > { %v2778_v12 = vmul.f32 %v2768_v46, %v5330_v35 }
0x1012   : > { %v2779_v14 = vmul.f32 %v2772_v25, %v5323_v30  ;;  %v2780_v17 = vmul.f32 %v2772_v25, %v5332_v36  ;;  %v2781_v32 = vmul.f32 %v2772_v25, %v5321_v29  ;;  %v2783_v13 = vadd.f32 %v2775_v61, %v5250_v0 }
0x1013   : > { %v2784_v45 = vadd.f32 %v2776_v20, %v5252_v1  ;;  %v2785_v37 = vadd.f32 %v2777_v44, %v5254_v2  ;;  %v2782_v38 = vmul.f32 %v2772_v25, %v5330_v35  ;;  %v2786_v53 = vadd.f32 %v2778_v12, %v5256_v3 }
0x1014   : > { %v2787_v63 = vadd.f32 %v2779_v14, %v5258_v4  ;;  %4909 = vtanh.f32 %v2783_v13  ;;  %v2788_v27 = vadd.f32 %v2780_v17, %v5260_v5  ;;  %v2789_v33 = vadd.f32 %v2781_v32, %v5262_v6 }
0x1015   : > { %4911 = vtanh.f32 %v2784_v45  ;;  %v2790_v39 = vadd.f32 %v2782_v38, %v5264_v7 }
0x1016   : > { %4913 = vtanh.f32 %v2785_v37 }
0x1017   : > { %4915 = vtanh.f32 %v2786_v53 }
0x1018   : > { %4917 = vtanh.f32 %v2787_v63 }
0x1019   : > { %4919 = vtanh.f32 %v2788_v27 }
0x101a   : > { %4921 = vtanh.f32 %v2789_v33 }
0x101b   : > { %4923 = vtanh.f32 %v2790_v39 }
0x101e   : > { %v4910_v47 = vpop.eup %4909 }
0x101f   : > { %v4912_v54 = vpop.eup %4911  ;;  %v2799_v40 = vmul.f32 %v4910_v47, %v5351_v50 }
0x1020   : > { %v4914_v34 = vpop.eup %4913  ;;  %v2800_v62 = vmul.f32 %v4912_v54, %v5349_v49 }
0x1021   : > { %v4916_v16 = vpop.eup %4915  ;;  %v2801_v48 = vmul.f32 %v4914_v34, %v5353_v52  ;;  %v2830_v31 = vmul.f32 %v2799_v40, %v2768_v46 }
0x1022   : > { %v4918_v19 = vpop.eup %4917  ;;  %v2802_v41 = vmul.f32 %v4916_v16, %v5356_v56  ;;  %v2831_v60 = vmul.f32 %v2800_v62, %v2768_v46  ;;  %v2807_v23 = vadd.f32 %v2800_v62, %v2799_v40 }
0x1023   : > { %v4920_v55 = vpop.eup %4919  ;;  %v2803_v57 = vmul.f32 %v4918_v19, %v5351_v50  ;;  %v2832_v59 = vmul.f32 %v2801_v48, %v2768_v46 }
0x1024   : > { %v4922_v26 = vpop.eup %4921  ;;  %v2804_v18 = vmul.f32 %v4920_v55, %v5349_v49  ;;  %v2838_v61 = vadd.f32 %v2831_v60, %v2830_v31  ;;  %v2808_v20 = vadd.f32 %v2807_v23, %v2801_v48  ;;  %v2833_v14 = vmul.f32 %v2802_v41, %v2768_v46 }
0x1025   : > { %v4924_v44 = vpop.eup %4923  ;;  %v2805_v12 = vmul.f32 %v4922_v26, %v5353_v52  ;;  %v2834_v17 = vmul.f32 %v2803_v57, %v2772_v25 }
0x1026   : > { %v2806_v32 = vmul.f32 %v4924_v44, %v5356_v56  ;;  %v2835_v13 = vmul.f32 %v2804_v18, %v2772_v25  ;;  %v2839_v45 = vadd.f32 %v2838_v61, %v2832_v59  ;;  %v2809_v37 = vadd.f32 %v2808_v20, %v2802_v41 }
0x1027   : > { %v2816_v38 = vadd.f32 %v2804_v18, %v2803_v57  ;;  %v2836_v53 = vmul.f32 %v2805_v12, %v2772_v25 }
0x1028   : > { %v2840_v63 = vadd.f32 %v2839_v45, %v2833_v14  ;;  %v2847_v27 = vadd.f32 %v2835_v13, %v2834_v17  ;;  %v2837_v39 = vmul.f32 %v2806_v32, %v2772_v25  ;;  %v2810_v59 = vrot.slane %v2809_v37, 4 }
0x1029   : > { %v2817_v33 = vadd.f32 %v2816_v38, %v2805_v12 }
0x102a   : > { %v2841_v47 = vrot.slane %v2840_v63, 4  ;;  %v2848_v54 = vadd.f32 %v2847_v27, %v2836_v53  ;;  %v2811_v20 = vadd.f32 %v2810_v59, %v2809_v37 }
0x102b   : > { %v2818_v40 = vadd.f32 %v2817_v33, %v2806_v32 }
0x102c   : > { %v2842_v34 = vadd.f32 %v2841_v47, %v2840_v63  ;;  %v2849_v62 = vadd.f32 %v2848_v54, %v2837_v39  ;;  %v2812_v12 = vrot.slane %v2811_v20, 2 }
0x102d   : > { %v2819_v25 = vrot.slane %v2818_v40, 4 }
0x102e   : > { %v2843_v16 = vrot.slane %v2842_v34, 2  ;;  %v2850_v48 = vrot.slane %v2849_v62, 4  ;;  %v2813_v17 = vadd.f32 %v2812_v12, %v2811_v20 }
0x102f   : > { %v2820_v61 = vadd.f32 %v2819_v25, %v2818_v40 }
0x1030   : > { %v2844_v46 = vadd.f32 %v2843_v16, %v2842_v34  ;;  %v2851_v31 = vadd.f32 %v2850_v48, %v2849_v62  ;;  %v2814_v45 = vrot.slane %v2813_v17, 1 }
0x1031   : > { %v2821_v44 = vrot.slane %v2820_v61, 2 }
0x1032   : > { %v2852_v19 = vrot.slane %v2851_v31, 2  ;;  %v2845_v60 = vrot.slane %v2844_v46, 1  ;;  %v2815_v27 = vadd.f32 %v2814_v45, %v2813_v17 }
0x1033   : > { %v2822_v14 = vadd.f32 %v2821_v44, %v2820_v61 }
0x1034   : > { %v2853_v23 = vadd.f32 %v2852_v19, %v2851_v31  ;;  %v2846_v41 = vadd.f32 %v2845_v60, %v2844_v46  ;;  %v2825_v54 = vadd.f32 %v2815_v27, %v5379_v22 }
0x1035   : > { %v2823_v32 = vrot.slane %v2822_v14, 1 }
0x1036   : > { %v2854_v55 = vrot.slane %v2853_v23, 1 }
0x1037   : > { %v2824_v53 = vadd.f32 %v2823_v32, %v2822_v14 }
0x1038   : > { %v2855_v57 = vadd.f32 %v2854_v55, %v2853_v23 }
0x1039   : > { %v2826_v39 = vadd.f32 %v2824_v53, %v5379_v22 }
0x103a   : > { %v2858_v26 = vsel %vm231_vm1, %v2855_v57, %v2846_v41 }
0x103b   : > { %v2860_v18 = vsel %vm199_vm0, %v2858_v26, 0.0 }
0x103c   : > { %2861 = vadd.xlane.f32.xlu1 %v2860_v18 }
0x1098   : > { %v2829_v13 = vpop.xlane.xlu0 %2828 }
0x1099   : > { %v2863_v38 = vmul.f32 %v2829_v13, %v5379_v22 }
0x10c9   : > { %v2862_v63 = vpop.xlane.xlu1 %2861 }
0x10ca   : > { %v2864_v33 = vadd.f32 %v2863_v38, %v2862_v63 }
0x10cc   : > { %v2866_v47 = vrot.slane %v2864_v33, 1  ;;  %v2869_v37 = vsub.f32 %v2825_v54, %v2864_v33 }
0x10ce   : > { %v2870_v40 = vsub.f32 %v2826_v39, %v2866_v47 }
0x10d0   : > { %v2873_v34 = vrot.slane %v2870_v40, 7 }
0x10d2   : > { %v2874_v62 = vsel %vm231_vm1, %v2873_v34, %v2869_v37 }
0x10d3   : > { %v2876_v16 = vmul.f32 %v2874_v62, %v6225_v58 }
0x10d5   : > { %v2881_v48 = vadd.f32 %v6227_v28, %v2876_v16 }
0x10d7   : > { %v2882_v46 = vmul.f32 %v2881_v48, %v5534_v51 }
0x10d9   : > { %v6271_v31 = vadd.f32 %v2882_v46, %v6088_v42 }
0x10db   : > { %v2891_v19 = vrot.slane %v6271_v31, %v5309_v21  ;;  %v2969_v60 = vsel %vm199_vm0, %v6271_v31, 0.0 }
0x10dc   : > { %2970 = vadd.xlane.f32.xlu0 %v2969_v60 }
0x10dd   : > { %v2892_v23 = vcombine.high %v2891_v19, %v2891_v19  ;;  %v2899_v55 = vrot.slane %v2891_v19, %v5309_v21 }
0x10df   : > { %v2906_v41 = vrot.slane %v2892_v23, %v5309_v21  ;;  %v2910_v58 = vrot.slane %v2899_v55, %v5313_v24 }
0x10e1   : > { %v2914_v28 = vrot.slane %v2906_v41, %v5313_v24  ;;  %v2917_v57 = vmul.f32 %v2910_v58, %v5323_v30  ;;  %v2918_v42 = vmul.f32 %v2910_v58, %v5332_v36  ;;  %v2919_v26 = vmul.f32 %v2910_v58, %v5321_v29 }
0x10e2   : > { %v2920_v18 = vmul.f32 %v2910_v58, %v5330_v35 }
0x10e3   : > { %v2921_v25 = vmul.f32 %v2914_v28, %v5323_v30  ;;  %v2922_v59 = vmul.f32 %v2914_v28, %v5332_v36  ;;  %v2923_v61 = vmul.f32 %v2914_v28, %v5321_v29  ;;  %v2925_v20 = vadd.f32 %v2917_v57, %v5250_v0 }
0x10e4   : > { %v2926_v44 = vadd.f32 %v2918_v42, %v5252_v1  ;;  %v2927_v12 = vadd.f32 %v2919_v26, %v5254_v2  ;;  %v2924_v14 = vmul.f32 %v2914_v28, %v5330_v35  ;;  %v2928_v17 = vadd.f32 %v2920_v18, %v5256_v3 }
0x10e5   : > { %v2929_v32 = vadd.f32 %v2921_v25, %v5258_v4  ;;  %4925 = vtanh.f32 %v2925_v20  ;;  %v2930_v13 = vadd.f32 %v2922_v59, %v5260_v5  ;;  %v2931_v45 = vadd.f32 %v2923_v61, %v5262_v6 }
0x10e6   : > { %4927 = vtanh.f32 %v2926_v44  ;;  %v2932_v38 = vadd.f32 %v2924_v14, %v5264_v7 }
0x10e7   : > { %4929 = vtanh.f32 %v2927_v12 }
0x10e8   : > { %4931 = vtanh.f32 %v2928_v17 }
0x10e9   : > { %4933 = vtanh.f32 %v2929_v32 }
0x10ea   : > { %4935 = vtanh.f32 %v2930_v13 }
0x10eb   : > { %4937 = vtanh.f32 %v2931_v45 }
0x10ec   : > { %4939 = vtanh.f32 %v2932_v38 }
0x10ef   : > { %v4926_v53 = vpop.eup %4925 }
0x10f0   : > { %v4928_v63 = vpop.eup %4927  ;;  %v2941_v27 = vmul.f32 %v4926_v53, %v5351_v50 }
0x10f1   : > { %v4930_v33 = vpop.eup %4929  ;;  %v2942_v39 = vmul.f32 %v4928_v63, %v5349_v49 }
0x10f2   : > { %v4932_v47 = vpop.eup %4931  ;;  %v2943_v54 = vmul.f32 %v4930_v33, %v5353_v52  ;;  %v2972_v40 = vmul.f32 %v2941_v27, %v2910_v58 }
0x10f3   : > { %v4934_v37 = vpop.eup %4933  ;;  %v2944_v34 = vmul.f32 %v4932_v47, %v5356_v56  ;;  %v2973_v62 = vmul.f32 %v2942_v39, %v2910_v58  ;;  %v2949_v16 = vadd.f32 %v2942_v39, %v2941_v27 }
0x10f4   : > { %v4936_v48 = vpop.eup %4935  ;;  %v2945_v46 = vmul.f32 %v4934_v37, %v5351_v50  ;;  %v2974_v23 = vmul.f32 %v2943_v54, %v2910_v58 }
0x10f5   : > { %v4938_v19 = vpop.eup %4937  ;;  %v2946_v60 = vmul.f32 %v4936_v48, %v5349_v49  ;;  %v2980_v55 = vadd.f32 %v2973_v62, %v2972_v40  ;;  %v2950_v41 = vadd.f32 %v2949_v16, %v2943_v54  ;;  %v2975_v26 = vmul.f32 %v2944_v34, %v2910_v58 }
0x10f6   : > { %v4940_v57 = vpop.eup %4939  ;;  %v2947_v42 = vmul.f32 %v4938_v19, %v5353_v52  ;;  %v2976_v18 = vmul.f32 %v2945_v46, %v2914_v28 }
0x10f7   : > { %v2948_v25 = vmul.f32 %v4940_v57, %v5356_v56  ;;  %v2977_v59 = vmul.f32 %v2946_v60, %v2914_v28  ;;  %v2981_v61 = vadd.f32 %v2980_v55, %v2974_v23  ;;  %v2951_v20 = vadd.f32 %v2950_v41, %v2944_v34 }
0x10f8   : > { %v2958_v44 = vadd.f32 %v2946_v60, %v2945_v46  ;;  %v2978_v12 = vmul.f32 %v2947_v42, %v2914_v28 }
0x10f9   : > { %v2982_v14 = vadd.f32 %v2981_v61, %v2975_v26  ;;  %v2989_v17 = vadd.f32 %v2977_v59, %v2976_v18  ;;  %v2979_v13 = vmul.f32 %v2948_v25, %v2914_v28  ;;  %v2952_v19 = vrot.slane %v2951_v20, 4 }
0x10fa   : > { %v2959_v32 = vadd.f32 %v2958_v44, %v2947_v42 }
0x10fb   : > { %v2983_v45 = vrot.slane %v2982_v14, 4  ;;  %v2990_v38 = vadd.f32 %v2989_v17, %v2978_v12  ;;  %v2953_v23 = vadd.f32 %v2952_v19, %v2951_v20 }
0x10fc   : > { %v2960_v53 = vadd.f32 %v2959_v32, %v2948_v25 }
0x10fd   : > { %v2984_v63 = vadd.f32 %v2983_v45, %v2982_v14  ;;  %v2991_v27 = vadd.f32 %v2990_v38, %v2979_v13  ;;  %v2954_v41 = vrot.slane %v2953_v23, 2 }
0x10fe   : > { %v2961_v28 = vrot.slane %v2960_v53, 4 }
0x10ff   : > { %v2985_v33 = vrot.slane %v2984_v63, 2  ;;  %v2992_v39 = vrot.slane %v2991_v27, 4  ;;  %v2955_v42 = vadd.f32 %v2954_v41, %v2953_v23 }
0x1100   : > { %v2962_v60 = vadd.f32 %v2961_v28, %v2960_v53 }
0x1101   : > { %v2986_v58 = vadd.f32 %v2985_v33, %v2984_v63  ;;  %v2993_v47 = vadd.f32 %v2992_v39, %v2991_v27  ;;  %v2956_v25 = vrot.slane %v2955_v42, 1 }
0x1102   : > { %v2963_v55 = vrot.slane %v2962_v60, 2 }
0x1103   : > { %v2994_v54 = vrot.slane %v2993_v47, 2  ;;  %v2987_v40 = vrot.slane %v2986_v58, 1  ;;  %v2957_v12 = vadd.f32 %v2956_v25, %v2955_v42 }
0x1104   : > { %v2964_v57 = vadd.f32 %v2963_v55, %v2962_v60 }
0x1105   : > { %v2995_v37 = vadd.f32 %v2994_v54, %v2993_v47  ;;  %v2988_v34 = vadd.f32 %v2987_v40, %v2986_v58  ;;  %v2967_v13 = vadd.f32 %v2957_v12, %v5379_v22 }
0x1106   : > { %v2965_v26 = vrot.slane %v2964_v57, 1 }
0x1107   : > { %v2996_v62 = vrot.slane %v2995_v37, 1 }
0x1108   : > { %v2966_v61 = vadd.f32 %v2965_v26, %v2964_v57 }
0x1109   : > { %v2997_v16 = vadd.f32 %v2996_v62, %v2995_v37 }
0x110a   : > { %v2968_v17 = vadd.f32 %v2966_v61, %v5379_v22 }
0x110b   : > { %v3000_v48 = vsel %vm231_vm1, %v2997_v16, %v2988_v34 }
0x110c   : > { %v3002_v46 = vsel %vm199_vm0, %v3000_v48, 0.0 }
0x110d   : > { %3003 = vadd.xlane.f32.xlu1 %v3002_v46 }
0x1169   : > { %v2971_v18 = vpop.xlane.xlu0 %2970 }
0x116a   : > { %v3005_v59 = vmul.f32 %v2971_v18, %v5379_v22 }
0x119a   : > { %v3004_v44 = vpop.xlane.xlu1 %3003 }
0x119b   : > { %v3006_v14 = vadd.f32 %v3005_v59, %v3004_v44 }
0x119d   : > { %v3008_v32 = vrot.slane %v3006_v14, 1  ;;  %v3011_v20 = vsub.f32 %v2967_v13, %v3006_v14 }
0x119f   : > { %v3012_v45 = vsub.f32 %v2968_v17, %v3008_v32 }
0x11a1   : > { %v3015_v38 = vrot.slane %v3012_v45, 7 }
0x11a3   : > { %v3016_v53 = vsel %vm231_vm1, %v3015_v38, %v3011_v20 }
0x11a4   : > { %v6312_v63 = vmul.f32 %v3016_v53, %v6271_v31 }
0x11a6   : > { %v3019_v27 = vmul.f32 %v6312_v63, %v5388_v43 }
0x11a8   : > { %v6317_v33 = vadd.f32 %v3019_v27, %v6271_v31 }
0x11aa   : > { %v3106_v39 = vsel %vm199_vm0, %v6317_v33, 0.0  ;;  %v3028_v58 = vrot.slane %v6317_v33, %v5309_v21 }
0x11ab   : > { %3107 = vadd.xlane.f32.xlu0 %v3106_v39 }
0x11ac   : > { %v3029_v47 = vcombine.high %v3028_v58, %v3028_v58  ;;  %v3036_v54 = vrot.slane %v3028_v58, %v5309_v21 }
0x11ae   : > { %v3043_v40 = vrot.slane %v3029_v47, %v5309_v21  ;;  %v3047_v37 = vrot.slane %v3036_v54, %v5313_v24 }
0x11b0   : > { %v3051_v62 = vrot.slane %v3043_v40, %v5313_v24  ;;  %v3054_v34 = vmul.f32 %v3047_v37, %v5323_v30  ;;  %v3055_v16 = vmul.f32 %v3047_v37, %v5332_v36  ;;  %v3056_v48 = vmul.f32 %v3047_v37, %v5321_v29 }
0x11b1   : > { %v3057_v46 = vmul.f32 %v3047_v37, %v5330_v35 }
0x11b2   : > { %v3058_v28 = vmul.f32 %v3051_v62, %v5323_v30  ;;  %v3059_v19 = vmul.f32 %v3051_v62, %v5332_v36  ;;  %v3060_v60 = vmul.f32 %v3051_v62, %v5321_v29  ;;  %v3062_v23 = vadd.f32 %v3054_v34, %v5250_v0 }
0x11b3   : > { %v3063_v55 = vadd.f32 %v3055_v16, %v5252_v1  ;;  %v3064_v41 = vadd.f32 %v3056_v48, %v5254_v2  ;;  %v3061_v57 = vmul.f32 %v3051_v62, %v5330_v35  ;;  %v3065_v42 = vadd.f32 %v3057_v46, %v5256_v3 }
0x11b4   : > { %v3066_v26 = vadd.f32 %v3058_v28, %v5258_v4  ;;  %4941 = vtanh.f32 %v3062_v23  ;;  %v3067_v18 = vadd.f32 %v3059_v19, %v5260_v5  ;;  %v3068_v25 = vadd.f32 %v3060_v60, %v5262_v6 }
0x11b5   : > { %4943 = vtanh.f32 %v3063_v55  ;;  %v3069_v59 = vadd.f32 %v3061_v57, %v5264_v7 }
0x11b6   : > { %4945 = vtanh.f32 %v3064_v41 }
0x11b7   : > { %4947 = vtanh.f32 %v3065_v42 }
0x11b8   : > { %4949 = vtanh.f32 %v3066_v26 }
0x11b9   : > { %4951 = vtanh.f32 %v3067_v18 }
0x11ba   : > { %4953 = vtanh.f32 %v3068_v25 }
0x11bb   : > { %4955 = vtanh.f32 %v3069_v59 }
0x11be   : > { %v4942_v61 = vpop.eup %4941 }
0x11bf   : > { %v4944_v44 = vpop.eup %4943  ;;  %v3078_v12 = vmul.f32 %v4942_v61, %v5351_v50 }
0x11c0   : > { %v4946_v14 = vpop.eup %4945  ;;  %v3079_v17 = vmul.f32 %v4944_v44, %v5349_v49 }
0x11c1   : > { %v4948_v32 = vpop.eup %4947  ;;  %v3080_v13 = vmul.f32 %v4946_v14, %v5353_v52  ;;  %v3109_v45 = vmul.f32 %v3078_v12, %v3047_v37 }
0x11c2   : > { %v4950_v20 = vpop.eup %4949  ;;  %v3081_v38 = vmul.f32 %v4948_v32, %v5356_v56  ;;  %v3110_v53 = vmul.f32 %v3079_v17, %v3047_v37  ;;  %v3086_v27 = vadd.f32 %v3079_v17, %v3078_v12 }
0x11c3   : > { %v4952_v39 = vpop.eup %4951  ;;  %v3082_v58 = vmul.f32 %v4950_v20, %v5351_v50  ;;  %v3111_v40 = vmul.f32 %v3080_v13, %v3047_v37 }
0x11c4   : > { %v4954_v47 = vpop.eup %4953  ;;  %v3083_v54 = vmul.f32 %v4952_v39, %v5349_v49  ;;  %v3117_v34 = vadd.f32 %v3110_v53, %v3109_v45  ;;  %v3087_v16 = vadd.f32 %v3086_v27, %v3080_v13  ;;  %v3112_v28 = vmul.f32 %v3081_v38, %v3047_v37 }
0x11c5   : > { %v4956_v48 = vpop.eup %4955  ;;  %v3084_v46 = vmul.f32 %v4954_v47, %v5353_v52  ;;  %v3113_v19 = vmul.f32 %v3082_v58, %v3051_v62 }
0x11c6   : > { %v3085_v60 = vmul.f32 %v4956_v48, %v5356_v56  ;;  %v3114_v23 = vmul.f32 %v3083_v54, %v3051_v62  ;;  %v3118_v55 = vadd.f32 %v3117_v34, %v3111_v40  ;;  %v3088_v41 = vadd.f32 %v3087_v16, %v3081_v38 }
0x11c7   : > { %v3095_v57 = vadd.f32 %v3083_v54, %v3082_v58  ;;  %v3115_v42 = vmul.f32 %v3084_v46, %v3051_v62 }
0x11c8   : > { %v3119_v26 = vadd.f32 %v3118_v55, %v3112_v28  ;;  %v3126_v18 = vadd.f32 %v3114_v23, %v3113_v19  ;;  %v3116_v59 = vmul.f32 %v3085_v60, %v3051_v62  ;;  %v3089_v40 = vrot.slane %v3088_v41, 4 }
0x11c9   : > { %v3096_v25 = vadd.f32 %v3095_v57, %v3084_v46 }
0x11ca   : > { %v3120_v61 = vrot.slane %v3119_v26, 4  ;;  %v3127_v44 = vadd.f32 %v3126_v18, %v3115_v42  ;;  %v3090_v16 = vadd.f32 %v3089_v40, %v3088_v41 }
0x11cb   : > { %v3097_v12 = vadd.f32 %v3096_v25, %v3085_v60 }
0x11cc   : > { %v3121_v14 = vadd.f32 %v3120_v61, %v3119_v26  ;;  %v3128_v17 = vadd.f32 %v3127_v44, %v3116_v59  ;;  %v3091_v46 = vrot.slane %v3090_v16, 2 }
0x11cd   : > { %v3098_v62 = vrot.slane %v3097_v12, 4 }
0x11ce   : > { %v3122_v32 = vrot.slane %v3121_v14, 2  ;;  %v3129_v13 = vrot.slane %v3128_v17, 4  ;;  %v3092_v19 = vadd.f32 %v3091_v46, %v3090_v16 }
0x11cf   : > { %v3099_v34 = vadd.f32 %v3098_v62, %v3097_v12 }
0x11d0   : > { %v3123_v37 = vadd.f32 %v3122_v32, %v3121_v14  ;;  %v3130_v45 = vadd.f32 %v3129_v13, %v3128_v17  ;;  %v3093_v55 = vrot.slane %v3092_v19, 1 }
0x11d1   : > { %v3100_v48 = vrot.slane %v3099_v34, 2 }
0x11d2   : > { %v3131_v20 = vrot.slane %v3130_v45, 2  ;;  %v3124_v53 = vrot.slane %v3123_v37, 1  ;;  %v3094_v18 = vadd.f32 %v3093_v55, %v3092_v19 }
0x11d3   : > { %v3101_v28 = vadd.f32 %v3100_v48, %v3099_v34 }
0x11d4   : > { %v3132_v27 = vadd.f32 %v3131_v20, %v3130_v45  ;;  %v3125_v38 = vadd.f32 %v3124_v53, %v3123_v37  ;;  %v3104_v44 = vadd.f32 %v3094_v18, %v5379_v22 }
0x11d5   : > { %v3102_v60 = vrot.slane %v3101_v28, 1 }
0x11d6   : > { %v3133_v39 = vrot.slane %v3132_v27, 1 }
0x11d7   : > { %v3103_v42 = vadd.f32 %v3102_v60, %v3101_v28 }
0x11d8   : > { %v3134_v58 = vadd.f32 %v3133_v39, %v3132_v27 }
0x11d9   : > { %v3105_v59 = vadd.f32 %v3103_v42, %v5379_v22 }
0x11da   : > { %v3137_v47 = vsel %vm231_vm1, %v3134_v58, %v3125_v38 }
0x11db   : > { %v3139_v54 = vsel %vm199_vm0, %v3137_v47, 0.0 }
0x11dc   : > { %3140 = vadd.xlane.f32.xlu1 %v3139_v54 }
0x1238   : > { %v3108_v23 = vpop.xlane.xlu0 %3107 }
0x1239   : > { %v3142_v57 = vmul.f32 %v3108_v23, %v5379_v22 }
0x1269   : > { %v3141_v26 = vpop.xlane.xlu1 %3140 }
0x126a   : > { %v3143_v25 = vadd.f32 %v3142_v57, %v3141_v26 }
0x126c   : > { %v3145_v61 = vrot.slane %v3143_v25, 1  ;;  %v3148_v41 = vsub.f32 %v3104_v44, %v3143_v25 }
0x126e   : > { %v3149_v12 = vsub.f32 %v3105_v59, %v3145_v61 }
0x1270   : > { %v3152_v14 = vrot.slane %v3149_v12, 7 }
0x1272   : > { %v3153_v17 = vsel %vm231_vm1, %v3152_v14, %v3148_v41 }
0x1273   : > { %v6358_v32 = vmul.f32 %v3153_v17, %v6317_v33 }
0x1275   : > { %v3156_v13 = vmul.f32 %v6358_v32, %v5388_v43 }
0x1277   : > { %v6363_v37 = vadd.f32 %v3156_v13, %v6271_v31 }
0x1279   : > { %v3243_v45 = vsel %vm199_vm0, %v6363_v37, 0.0  ;;  %v3165_v20 = vrot.slane %v6363_v37, %v5309_v21 }
0x127a   : > { %3244 = vadd.xlane.f32.xlu0 %v3243_v45 }
0x127b   : > { %v3166_v53 = vcombine.high %v3165_v20, %v3165_v20  ;;  %v3173_v27 = vrot.slane %v3165_v20, %v5309_v21 }
0x127d   : > { %v3180_v39 = vrot.slane %v3166_v53, %v5309_v21  ;;  %v3184_v33 = vrot.slane %v3173_v27, %v5313_v24 }
0x127f   : > { %v3188_v38 = vrot.slane %v3180_v39, %v5313_v24  ;;  %v3191_v58 = vmul.f32 %v3184_v33, %v5323_v30  ;;  %v3192_v47 = vmul.f32 %v3184_v33, %v5332_v36  ;;  %v3193_v54 = vmul.f32 %v3184_v33, %v5321_v29 }
0x1280   : > { %v3194_v62 = vmul.f32 %v3184_v33, %v5330_v35 }
0x1281   : > { %v3195_v40 = vmul.f32 %v3188_v38, %v5323_v30  ;;  %v3196_v34 = vmul.f32 %v3188_v38, %v5332_v36  ;;  %v3197_v16 = vmul.f32 %v3188_v38, %v5321_v29  ;;  %v3199_v48 = vadd.f32 %v3191_v58, %v5250_v0 }
0x1282   : > { %v3200_v46 = vadd.f32 %v3192_v47, %v5252_v1  ;;  %v3201_v28 = vadd.f32 %v3193_v54, %v5254_v2  ;;  %v3198_v19 = vmul.f32 %v3188_v38, %v5330_v35  ;;  %v3202_v60 = vadd.f32 %v3194_v62, %v5256_v3 }
0x1283   : > { %v3203_v23 = vadd.f32 %v3195_v40, %v5258_v4  ;;  %4957 = vtanh.f32 %v3199_v48  ;;  %v3204_v55 = vadd.f32 %v3196_v34, %v5260_v5  ;;  %v3205_v57 = vadd.f32 %v3197_v16, %v5262_v6 }
0x1284   : > { %4959 = vtanh.f32 %v3200_v46  ;;  %v3206_v42 = vadd.f32 %v3198_v19, %v5264_v7 }
0x1285   : > { %4961 = vtanh.f32 %v3201_v28 }
0x1286   : > { %4963 = vtanh.f32 %v3202_v60 }
0x1287   : > { %4965 = vtanh.f32 %v3203_v23 }
0x1288   : > { %4967 = vtanh.f32 %v3204_v55 }
0x1289   : > { %4969 = vtanh.f32 %v3205_v57 }
0x128a   : > { %4971 = vtanh.f32 %v3206_v42 }
0x128d   : > { %v4958_v26 = vpop.eup %4957 }
0x128e   : > { %v4960_v18 = vpop.eup %4959  ;;  %v3215_v25 = vmul.f32 %v4958_v26, %v5351_v50 }
0x128f   : > { %v4962_v59 = vpop.eup %4961  ;;  %v3216_v61 = vmul.f32 %v4960_v18, %v5349_v49 }
0x1290   : > { %v4964_v44 = vpop.eup %4963  ;;  %v3217_v12 = vmul.f32 %v4962_v59, %v5353_v52  ;;  %v3246_v41 = vmul.f32 %v3215_v25, %v3184_v33 }
0x1291   : > { %v4966_v14 = vpop.eup %4965  ;;  %v3218_v17 = vmul.f32 %v4964_v44, %v5356_v56  ;;  %v3247_v13 = vmul.f32 %v3216_v61, %v3184_v33  ;;  %v3223_v45 = vadd.f32 %v3216_v61, %v3215_v25 }
0x1292   : > { %v4968_v20 = vpop.eup %4967  ;;  %v3219_v53 = vmul.f32 %v4966_v14, %v5351_v50  ;;  %v3248_v58 = vmul.f32 %v3217_v12, %v3184_v33 }
0x1293   : > { %v4970_v27 = vpop.eup %4969  ;;  %v3220_v39 = vmul.f32 %v4968_v20, %v5349_v49  ;;  %v3254_v47 = vadd.f32 %v3247_v13, %v3246_v41  ;;  %v3224_v54 = vadd.f32 %v3223_v45, %v3217_v12  ;;  %v3249_v34 = vmul.f32 %v3218_v17, %v3184_v33 }
0x1294   : > { %v4972_v62 = vpop.eup %4971  ;;  %v3221_v40 = vmul.f32 %v4970_v27, %v5353_v52  ;;  %v3250_v16 = vmul.f32 %v3219_v53, %v3188_v38 }
0x1295   : > { %v3222_v48 = vmul.f32 %v4972_v62, %v5356_v56  ;;  %v3251_v46 = vmul.f32 %v3220_v39, %v3188_v38  ;;  %v3255_v28 = vadd.f32 %v3254_v47, %v3248_v58  ;;  %v3225_v19 = vadd.f32 %v3224_v54, %v3218_v17 }
0x1296   : > { %v3232_v60 = vadd.f32 %v3220_v39, %v3219_v53  ;;  %v3252_v23 = vmul.f32 %v3221_v40, %v3188_v38 }
0x1297   : > { %v3256_v55 = vadd.f32 %v3255_v28, %v3249_v34  ;;  %v3263_v57 = vadd.f32 %v3251_v46, %v3250_v16  ;;  %v3253_v26 = vmul.f32 %v3222_v48, %v3188_v38  ;;  %v3226_v47 = vrot.slane %v3225_v19, 4 }
0x1298   : > { %v3233_v42 = vadd.f32 %v3232_v60, %v3221_v40 }
0x1299   : > { %v3257_v18 = vrot.slane %v3256_v55, 4  ;;  %v3264_v25 = vadd.f32 %v3263_v57, %v3252_v23  ;;  %v3227_v62 = vadd.f32 %v3226_v47, %v3225_v19 }
0x129a   : > { %v3234_v59 = vadd.f32 %v3233_v42, %v3222_v48 }
0x129b   : > { %v3258_v61 = vadd.f32 %v3257_v18, %v3256_v55  ;;  %v3265_v44 = vadd.f32 %v3264_v25, %v3253_v26  ;;  %v3228_v34 = vrot.slane %v3227_v62, 2 }
0x129c   : > { %v3235_v38 = vrot.slane %v3234_v59, 4 }
0x129d   : > { %v3259_v12 = vrot.slane %v3258_v61, 2  ;;  %v3266_v41 = vrot.slane %v3265_v44, 4  ;;  %v3229_v48 = vadd.f32 %v3228_v34, %v3227_v62 }
0x129e   : > { %v3236_v54 = vadd.f32 %v3235_v38, %v3234_v59 }
0x129f   : > { %v3260_v33 = vadd.f32 %v3259_v12, %v3258_v61  ;;  %v3267_v14 = vadd.f32 %v3266_v41, %v3265_v44  ;;  %v3230_v60 = vrot.slane %v3229_v48, 1  ;;  %v3430_v12 = vmul.f32 2.0, %v6358_v32 }
0x12a0   : > { %v3237_v40 = vrot.slane %v3236_v54, 2 }
0x12a1   : > { %v3268_v13 = vrot.slane %v3267_v14, 2  ;;  %v3261_v45 = vrot.slane %v3260_v33, 1  ;;  %v3231_v42 = vadd.f32 %v3230_v60, %v3229_v48 }
0x12a2   : > { %v3238_v16 = vadd.f32 %v3237_v40, %v3236_v54 }
0x12a3   : > { %v3269_v20 = vadd.f32 %v3268_v13, %v3267_v14  ;;  %v3262_v17 = vadd.f32 %v3261_v45, %v3260_v33  ;;  %v3241_v61 = vadd.f32 %v3231_v42, %v5379_v22  ;;  %v3431_v14 = vadd.f32 %v3430_v12, %v6312_v63 }
0x12a4   : > { %v3239_v46 = vrot.slane %v3238_v16, 1 }
0x12a5   : > { %v3270_v27 = vrot.slane %v3269_v20, 1 }
0x12a6   : > { %v3240_v55 = vadd.f32 %v3239_v46, %v3238_v16 }
0x12a7   : > { %v3271_v53 = vadd.f32 %v3270_v27, %v3269_v20 }
0x12a8   : > { %v3242_v18 = vadd.f32 %v3240_v55, %v5379_v22 }
0x12a9   : > { %v3274_v39 = vsel %vm231_vm1, %v3271_v53, %v3262_v17 }
0x12aa   : > { %v3276_v58 = vsel %vm199_vm0, %v3274_v39, 0.0 }
0x12ab   : > { %3277 = vadd.xlane.f32.xlu1 %v3276_v58 }
0x1307   : > { %v3245_v28 = vpop.xlane.xlu0 %3244 }
0x1308   : > { %v3279_v23 = vmul.f32 %v3245_v28, %v5379_v22 }
0x1338   : > { %v3278_v57 = vpop.xlane.xlu1 %3277 }
0x1339   : > { %v3280_v26 = vadd.f32 %v3279_v23, %v3278_v57 }
0x133b   : > { %v3282_v25 = vrot.slane %v3280_v26, 1  ;;  %v3285_v19 = vsub.f32 %v3241_v61, %v3280_v26 }
0x133d   : > { %v3286_v59 = vsub.f32 %v3242_v18, %v3282_v25 }
0x133f   : > { %v3289_v44 = vrot.slane %v3286_v59, 7 }
0x1341   : > { %v3290_v41 = vsel %vm231_vm1, %v3289_v44, %v3285_v19 }
0x1342   : > { %v3292_v33 = vmul.f32 %v3290_v41, %v6363_v37 }
0x1344   : > { %v3432_v13 = vmul.f32 2.0, %v3292_v33  ;;  %v3293_v45 = vmul.f32 %v3292_v33, %v5484_v15 }
0x1346   : > { %v6408_v20 = vadd.f32 %v3293_v45, %v6271_v31  ;;  %v6410_v27 = vadd.f32 %v3432_v13, %v3431_v14 }
0x1348   : > { %v3380_v17 = vsel %vm199_vm0, %v6408_v20, 0.0  ;;  %v3302_v32 = vrot.slane %v6408_v20, %v5309_v21 }
0x1349   : > { %3381 = vadd.xlane.f32.xlu0 %v3380_v17 }
0x134a   : > { %v3303_v53 = vcombine.high %v3302_v32, %v3302_v32  ;;  %v3310_v37 = vrot.slane %v3302_v32, %v5309_v21 }
0x134c   : > { %v3317_v63 = vrot.slane %v3303_v53, %v5309_v21  ;;  %v3321_v39 = vrot.slane %v3310_v37, %v5313_v24 }
0x134e   : > { %v3325_v58 = vrot.slane %v3317_v63, %v5313_v24  ;;  %v3328_v38 = vmul.f32 %v3321_v39, %v5323_v30  ;;  %v3329_v47 = vmul.f32 %v3321_v39, %v5332_v36  ;;  %v3330_v54 = vmul.f32 %v3321_v39, %v5321_v29 }
0x134f   : > { %v3331_v62 = vmul.f32 %v3321_v39, %v5330_v35 }
0x1350   : > { %v3332_v40 = vmul.f32 %v3325_v58, %v5323_v30  ;;  %v3333_v34 = vmul.f32 %v3325_v58, %v5332_v36  ;;  %v3334_v16 = vmul.f32 %v3325_v58, %v5321_v29  ;;  %v3336_v48 = vadd.f32 %v3328_v38, %v5250_v0 }
0x1351   : > { %v3337_v46 = vadd.f32 %v3329_v47, %v5252_v1  ;;  %v3338_v28 = vadd.f32 %v3330_v54, %v5254_v2  ;;  %v3335_v60 = vmul.f32 %v3325_v58, %v5330_v35  ;;  %v3339_v23 = vadd.f32 %v3331_v62, %v5256_v3 }
0x1352   : > { %v3340_v55 = vadd.f32 %v3332_v40, %v5258_v4  ;;  %4973 = vtanh.f32 %v3336_v48  ;;  %v3341_v57 = vadd.f32 %v3333_v34, %v5260_v5  ;;  %v3342_v42 = vadd.f32 %v3334_v16, %v5262_v6 }
0x1353   : > { %4975 = vtanh.f32 %v3337_v46  ;;  %v3343_v26 = vadd.f32 %v3335_v60, %v5264_v7 }
0x1354   : > { %4977 = vtanh.f32 %v3338_v28 }
0x1355   : > { %4979 = vtanh.f32 %v3339_v23 }
0x1356   : > { %4981 = vtanh.f32 %v3340_v55 }
0x1357   : > { %4983 = vtanh.f32 %v3341_v57 }
0x1358   : > { %4985 = vtanh.f32 %v3342_v42 }
0x1359   : > { %4987 = vtanh.f32 %v3343_v26 }
0x135c   : > { %v4974_v18 = vpop.eup %4973 }
0x135d   : > { %v4976_v25 = vpop.eup %4975  ;;  %v3352_v61 = vmul.f32 %v4974_v18, %v5351_v50 }
0x135e   : > { %v4978_v59 = vpop.eup %4977  ;;  %v3353_v19 = vmul.f32 %v4976_v25, %v5349_v49 }
0x135f   : > { %v4980_v44 = vpop.eup %4979  ;;  %v3354_v12 = vmul.f32 %v4978_v59, %v5353_v52  ;;  %v3383_v41 = vmul.f32 %v3352_v61, %v3321_v39 }
0x1360   : > { %v4982_v33 = vpop.eup %4981  ;;  %v3355_v14 = vmul.f32 %v4980_v44, %v5356_v56  ;;  %v3384_v13 = vmul.f32 %v3353_v19, %v3321_v39  ;;  %v3360_v45 = vadd.f32 %v3353_v19, %v3352_v61 }
0x1361   : > { %v4984_v17 = vpop.eup %4983  ;;  %v3356_v32 = vmul.f32 %v4982_v33, %v5351_v50  ;;  %v3385_v63 = vmul.f32 %v3354_v12, %v3321_v39 }
0x1362   : > { %v4986_v53 = vpop.eup %4985  ;;  %v3357_v37 = vmul.f32 %v4984_v17, %v5349_v49  ;;  %v3391_v38 = vadd.f32 %v3384_v13, %v3383_v41  ;;  %v3361_v47 = vadd.f32 %v3360_v45, %v3354_v12  ;;  %v3386_v40 = vmul.f32 %v3355_v14, %v3321_v39 }
0x1363   : > { %v4988_v54 = vpop.eup %4987  ;;  %v3358_v62 = vmul.f32 %v4986_v53, %v5353_v52  ;;  %v3387_v34 = vmul.f32 %v3356_v32, %v3325_v58 }
0x1364   : > { %v3359_v16 = vmul.f32 %v4988_v54, %v5356_v56  ;;  %v3388_v48 = vmul.f32 %v3357_v37, %v3325_v58  ;;  %v3392_v46 = vadd.f32 %v3391_v38, %v3385_v63  ;;  %v3362_v28 = vadd.f32 %v3361_v47, %v3355_v14 }
0x1365   : > { %v3369_v60 = vadd.f32 %v3357_v37, %v3356_v32  ;;  %v3389_v23 = vmul.f32 %v3358_v62, %v3325_v58 }
0x1366   : > { %v3393_v55 = vadd.f32 %v3392_v46, %v3386_v40  ;;  %v3400_v57 = vadd.f32 %v3388_v48, %v3387_v34  ;;  %v3390_v26 = vmul.f32 %v3359_v16, %v3325_v58  ;;  %v3363_v63 = vrot.slane %v3362_v28, 4 }
0x1367   : > { %v3370_v42 = vadd.f32 %v3369_v60, %v3358_v62 }
0x1368   : > { %v3394_v18 = vrot.slane %v3393_v55, 4  ;;  %v3401_v25 = vadd.f32 %v3400_v57, %v3389_v23  ;;  %v3364_v47 = vadd.f32 %v3363_v63, %v3362_v28 }
0x1369   : > { %v3371_v61 = vadd.f32 %v3370_v42, %v3359_v16 }
0x136a   : > { %v3395_v59 = vadd.f32 %v3394_v18, %v3393_v55  ;;  %v3402_v19 = vadd.f32 %v3401_v25, %v3390_v26  ;;  %v3365_v62 = vrot.slane %v3364_v47, 2 }
0x136b   : > { %v3372_v58 = vrot.slane %v3371_v61, 4 }
0x136c   : > { %v3396_v44 = vrot.slane %v3395_v59, 2  ;;  %v3403_v12 = vrot.slane %v3402_v19, 4  ;;  %v3366_v34 = vadd.f32 %v3365_v62, %v3364_v47 }
0x136d   : > { %v3373_v38 = vadd.f32 %v3372_v58, %v3371_v61 }
0x136e   : > { %v3397_v39 = vadd.f32 %v3396_v44, %v3395_v59  ;;  %v3404_v41 = vadd.f32 %v3403_v12, %v3402_v19  ;;  %v3367_v46 = vrot.slane %v3366_v34, 1 }
0x136f   : > { %v3374_v54 = vrot.slane %v3373_v38, 2 }
0x1370   : > { %v3405_v33 = vrot.slane %v3404_v41, 2  ;;  %v3398_v13 = vrot.slane %v3397_v39, 1  ;;  %v3368_v57 = vadd.f32 %v3367_v46, %v3366_v34 }
0x1371   : > { %v3375_v40 = vadd.f32 %v3374_v54, %v3373_v38 }
0x1372   : > { %v3406_v45 = vadd.f32 %v3405_v33, %v3404_v41  ;;  %v3399_v14 = vadd.f32 %v3398_v13, %v3397_v39  ;;  %v3378_v25 = vadd.f32 %v3368_v57, %v5379_v22 }
0x1373   : > { %v3376_v16 = vrot.slane %v3375_v40, 1 }
0x1374   : > { %v3407_v17 = vrot.slane %v3406_v45, 1 }
0x1375   : > { %v3377_v23 = vadd.f32 %v3376_v16, %v3375_v40 }
0x1376   : > { %v3408_v32 = vadd.f32 %v3407_v17, %v3406_v45 }
0x1377   : > { %v3379_v26 = vadd.f32 %v3377_v23, %v5379_v22 }
0x1378   : > { %v3411_v53 = vsel %vm231_vm1, %v3408_v32, %v3399_v14 }
0x1379   : > { %v3413_v37 = vsel %vm199_vm0, %v3411_v53, 0.0 }
0x137a   : > { %3414 = vadd.xlane.f32.xlu1 %v3413_v37 }
0x13d6   : > { %v3382_v48 = vpop.xlane.xlu0 %3381 }
0x13d7   : > { %v3416_v60 = vmul.f32 %v3382_v48, %v5379_v22 }
0x1407   : > { %v3415_v55 = vpop.xlane.xlu1 %3414 }
0x1408   : > { %v3417_v42 = vadd.f32 %v3416_v60, %v3415_v55 }
0x140a   : > { %v3419_v18 = vrot.slane %v3417_v42, 1  ;;  %v3422_v28 = vsub.f32 %v3378_v25, %v3417_v42 }
0x140c   : > { %v3423_v61 = vsub.f32 %v3379_v26, %v3419_v18 }
0x140e   : > { %v3426_v59 = vrot.slane %v3423_v61, 7 }
0x1410   : > { %v3427_v19 = vsel %vm231_vm1, %v3426_v59, %v3422_v28 }
0x1411   : > { %v3429_v44 = vmul.f32 %v3427_v19, %v6408_v20 }
0x1413   : > { %v3434_v12 = vadd.f32 %v6410_v27, %v3429_v44 }
0x1415   : > { %v3435_v39 = vmul.f32 %v3434_v12, %v5534_v51 }
0x1417   : > { %v6454_v41 = vadd.f32 %v3435_v39, %v6271_v31 }
0x1419   : > { %v3444_v33 = vrot.slane %v6454_v41, %v5309_v21  ;;  %v3522_v13 = vsel %vm199_vm0, %v6454_v41, 0.0 }
0x141a   : > { %3523 = vadd.xlane.f32.xlu0 %v3522_v13 }
0x141b   : > { %v3445_v45 = vcombine.high %v3444_v33, %v3444_v33  ;;  %v3452_v17 = vrot.slane %v3444_v33, %v5309_v21 }
0x141d   : > { %v3459_v14 = vrot.slane %v3445_v45, %v5309_v21  ;;  %v3463_v20 = vrot.slane %v3452_v17, %v5313_v24 }
0x141f   : > { %v3467_v27 = vrot.slane %v3459_v14, %v5313_v24  ;;  %v3470_v32 = vmul.f32 %v3463_v20, %v5323_v30  ;;  %v3471_v31 = vmul.f32 %v3463_v20, %v5332_v36  ;;  %v3472_v53 = vmul.f32 %v3463_v20, %v5321_v29 }
0x1420   : > { %v3473_v37 = vmul.f32 %v3463_v20, %v5330_v35 }
0x1421   : > { %v3474_v58 = vmul.f32 %v3467_v27, %v5323_v30  ;;  %v3475_v63 = vmul.f32 %v3467_v27, %v5332_v36  ;;  %v3476_v38 = vmul.f32 %v3467_v27, %v5321_v29  ;;  %v3478_v47 = vadd.f32 %v3470_v32, %v5250_v0 }
0x1422   : > { %v3479_v54 = vadd.f32 %v3471_v31, %v5252_v1  ;;  %v3480_v62 = vadd.f32 %v3472_v53, %v5254_v2  ;;  %v3477_v40 = vmul.f32 %v3467_v27, %v5330_v35  ;;  %v3481_v34 = vadd.f32 %v3473_v37, %v5256_v3 }
0x1423   : > { %v3482_v16 = vadd.f32 %v3474_v58, %v5258_v4  ;;  %4989 = vtanh.f32 %v3478_v47  ;;  %v3483_v48 = vadd.f32 %v3475_v63, %v5260_v5  ;;  %v3484_v46 = vadd.f32 %v3476_v38, %v5262_v6 }
0x1424   : > { %4991 = vtanh.f32 %v3479_v54  ;;  %v3485_v60 = vadd.f32 %v3477_v40, %v5264_v7 }
0x1425   : > { %4993 = vtanh.f32 %v3480_v62 }
0x1426   : > { %4995 = vtanh.f32 %v3481_v34 }
0x1427   : > { %4997 = vtanh.f32 %v3482_v16 }
0x1428   : > { %4999 = vtanh.f32 %v3483_v48 }
0x1429   : > { %5001 = vtanh.f32 %v3484_v46 }
0x142a   : > { %5003 = vtanh.f32 %v3485_v60 }
0x142d   : > { %v4990_v23 = vpop.eup %4989 }
0x142e   : > { %v4992_v55 = vpop.eup %4991  ;;  %v3494_v57 = vmul.f32 %v4990_v23, %v5351_v50 }
0x142f   : > { %v4994_v42 = vpop.eup %4993  ;;  %v3495_v26 = vmul.f32 %v4992_v55, %v5349_v49 }
0x1430   : > { %v4996_v18 = vpop.eup %4995  ;;  %v3496_v25 = vmul.f32 %v4994_v42, %v5353_v52  ;;  %v3525_v61 = vmul.f32 %v3494_v57, %v3463_v20 }
0x1431   : > { %v4998_v28 = vpop.eup %4997  ;;  %v3497_v59 = vmul.f32 %v4996_v18, %v5356_v56  ;;  %v3526_v19 = vmul.f32 %v3495_v26, %v3463_v20  ;;  %v3502_v44 = vadd.f32 %v3495_v26, %v3494_v57 }
0x1432   : > { %v5000_v12 = vpop.eup %4999  ;;  %v3498_v39 = vmul.f32 %v4998_v28, %v5351_v50  ;;  %v3527_v45 = vmul.f32 %v3496_v25, %v3463_v20 }
0x1433   : > { %v5002_v33 = vpop.eup %5001  ;;  %v3499_v13 = vmul.f32 %v5000_v12, %v5349_v49  ;;  %v3533_v17 = vadd.f32 %v3526_v19, %v3525_v61  ;;  %v3503_v14 = vadd.f32 %v3502_v44, %v3496_v25  ;;  %v3528_v53 = vmul.f32 %v3497_v59, %v3463_v20 }
0x1434   : > { %v5004_v32 = vpop.eup %5003  ;;  %v3500_v31 = vmul.f32 %v5002_v33, %v5353_v52  ;;  %v3529_v37 = vmul.f32 %v3498_v39, %v3467_v27 }
0x1435   : > { %v3501_v58 = vmul.f32 %v5004_v32, %v5356_v56  ;;  %v3530_v63 = vmul.f32 %v3499_v13, %v3467_v27  ;;  %v3534_v38 = vadd.f32 %v3533_v17, %v3527_v45  ;;  %v3504_v47 = vadd.f32 %v3503_v14, %v3497_v59 }
0x1436   : > { %v3511_v54 = vadd.f32 %v3499_v13, %v3498_v39  ;;  %v3531_v62 = vmul.f32 %v3500_v31, %v3467_v27 }
0x1437   : > { %v3535_v40 = vadd.f32 %v3534_v38, %v3528_v53  ;;  %v3542_v34 = vadd.f32 %v3530_v63, %v3529_v37  ;;  %v3532_v48 = vmul.f32 %v3501_v58, %v3467_v27  ;;  %v3505_v33 = vrot.slane %v3504_v47, 4 }
0x1438   : > { %v3512_v16 = vadd.f32 %v3511_v54, %v3500_v31 }
0x1439   : > { %v3536_v46 = vrot.slane %v3535_v40, 4  ;;  %v3543_v60 = vadd.f32 %v3542_v34, %v3531_v62  ;;  %v3506_v45 = vadd.f32 %v3505_v33, %v3504_v47 }
0x143a   : > { %v3513_v23 = vadd.f32 %v3512_v16, %v3501_v58 }
0x143b   : > { %v3537_v55 = vadd.f32 %v3536_v46, %v3535_v40  ;;  %v3544_v57 = vadd.f32 %v3543_v60, %v3532_v48  ;;  %v3507_v14 = vrot.slane %v3506_v45, 2 }
0x143c   : > { %v3514_v27 = vrot.slane %v3513_v23, 4 }
0x143d   : > { %v3538_v42 = vrot.slane %v3537_v55, 2  ;;  %v3545_v26 = vrot.slane %v3544_v57, 4  ;;  %v3508_v31 = vadd.f32 %v3507_v14, %v3506_v45 }
0x143e   : > { %v3515_v13 = vadd.f32 %v3514_v27, %v3513_v23 }
0x143f   : > { %v3539_v20 = vadd.f32 %v3538_v42, %v3537_v55  ;;  %v3546_v18 = vadd.f32 %v3545_v26, %v3544_v57  ;;  %v3509_v58 = vrot.slane %v3508_v31, 1 }
0x1440   : > { %v3516_v17 = vrot.slane %v3515_v13, 2 }
0x1441   : > { %v3547_v25 = vrot.slane %v3546_v18, 2  ;;  %v3540_v61 = vrot.slane %v3539_v20, 1  ;;  %v3510_v62 = vadd.f32 %v3509_v58, %v3508_v31 }
0x1442   : > { %v3517_v32 = vadd.f32 %v3516_v17, %v3515_v13 }
0x1443   : > { %v3548_v28 = vadd.f32 %v3547_v25, %v3546_v18  ;;  %v3541_v59 = vadd.f32 %v3540_v61, %v3539_v20  ;;  %v3520_v48 = vadd.f32 %v3510_v62, %v5379_v22 }
0x1444   : > { %v3518_v53 = vrot.slane %v3517_v32, 1 }
0x1445   : > { %v3549_v19 = vrot.slane %v3548_v28, 1 }
0x1446   : > { %v3519_v38 = vadd.f32 %v3518_v53, %v3517_v32 }
0x1447   : > { %v3550_v44 = vadd.f32 %v3549_v19, %v3548_v28 }
0x1448   : > { %v3521_v34 = vadd.f32 %v3519_v38, %v5379_v22 }
0x1449   : > { %v3553_v12 = vsel %vm231_vm1, %v3550_v44, %v3541_v59 }
0x144a   : > { %v3555_v39 = vsel %vm199_vm0, %v3553_v12, 0.0 }
0x144b   : > { %3556 = vadd.xlane.f32.xlu1 %v3555_v39 }
0x14a7   : > { %v3524_v37 = vpop.xlane.xlu0 %3523 }
0x14a8   : > { %v3558_v63 = vmul.f32 %v3524_v37, %v5379_v22 }
0x14d8   : > { %v3557_v54 = vpop.xlane.xlu1 %3556 }
0x14d9   : > { %v3559_v40 = vadd.f32 %v3558_v63, %v3557_v54 }
0x14db   : > { %v3561_v16 = vrot.slane %v3559_v40, 1  ;;  %v3564_v47 = vsub.f32 %v3520_v48, %v3559_v40 }
0x14dd   : > { %v3565_v46 = vsub.f32 %v3521_v34, %v3561_v16 }
0x14df   : > { %v3568_v60 = vrot.slane %v3565_v46, 7 }
0x14e1   : > { %v3569_v23 = vsel %vm231_vm1, %v3568_v60, %v3564_v47 }
0x14e2   : > { %v6495_v55 = vmul.f32 %v3569_v23, %v6454_v41 }
0x14e4   : > { %v3572_v57 = vmul.f32 %v6495_v55, %v5388_v43 }
0x14e6   : > { %v6500_v42 = vadd.f32 %v3572_v57, %v6454_v41 }
0x14e8   : > { %v3659_v26 = vsel %vm199_vm0, %v6500_v42, 0.0  ;;  %v3581_v20 = vrot.slane %v6500_v42, %v5309_v21 }
0x14e9   : > { %3660 = vadd.xlane.f32.xlu0 %v3659_v26 }
0x14ea   : > { %v3582_v18 = vcombine.high %v3581_v20, %v3581_v20  ;;  %v3589_v25 = vrot.slane %v3581_v20, %v5309_v21 }
0x14ec   : > { %v3596_v61 = vrot.slane %v3582_v18, %v5309_v21  ;;  %v3600_v28 = vrot.slane %v3589_v25, %v5313_v24 }
0x14ee   : > { %v3604_v19 = vrot.slane %v3596_v61, %v5313_v24  ;;  %v3607_v59 = vmul.f32 %v3600_v28, %v5323_v30  ;;  %v3608_v44 = vmul.f32 %v3600_v28, %v5332_v36  ;;  %v3609_v12 = vmul.f32 %v3600_v28, %v5321_v29 }
0x14ef   : > { %v3610_v39 = vmul.f32 %v3600_v28, %v5330_v35 }
0x14f0   : > { %v3611_v27 = vmul.f32 %v3604_v19, %v5323_v30  ;;  %v3612_v33 = vmul.f32 %v3604_v19, %v5332_v36  ;;  %v3613_v13 = vmul.f32 %v3604_v19, %v5321_v29  ;;  %v3615_v45 = vadd.f32 %v3607_v59, %v5250_v0 }
0x14f1   : > { %v3616_v17 = vadd.f32 %v3608_v44, %v5252_v1  ;;  %v3617_v14 = vadd.f32 %v3609_v12, %v5254_v2  ;;  %v3614_v32 = vmul.f32 %v3604_v19, %v5330_v35  ;;  %v3618_v31 = vadd.f32 %v3610_v39, %v5256_v3 }
0x14f2   : > { %v3619_v53 = vadd.f32 %v3611_v27, %v5258_v4  ;;  %5005 = vtanh.f32 %v3615_v45  ;;  %v3620_v37 = vadd.f32 %v3612_v33, %v5260_v5  ;;  %v3621_v58 = vadd.f32 %v3613_v13, %v5262_v6 }
0x14f3   : > { %5007 = vtanh.f32 %v3616_v17  ;;  %v3622_v63 = vadd.f32 %v3614_v32, %v5264_v7 }
0x14f4   : > { %5009 = vtanh.f32 %v3617_v14 }
0x14f5   : > { %5011 = vtanh.f32 %v3618_v31 }
0x14f6   : > { %5013 = vtanh.f32 %v3619_v53 }
0x14f7   : > { %5015 = vtanh.f32 %v3620_v37 }
0x14f8   : > { %5017 = vtanh.f32 %v3621_v58 }
0x14f9   : > { %5019 = vtanh.f32 %v3622_v63 }
0x14fc   : > { %v5006_v38 = vpop.eup %5005 }
0x14fd   : > { %v5008_v54 = vpop.eup %5007  ;;  %v3631_v62 = vmul.f32 %v5006_v38, %v5351_v50 }
0x14fe   : > { %v5010_v40 = vpop.eup %5009  ;;  %v3632_v34 = vmul.f32 %v5008_v54, %v5349_v49 }
0x14ff   : > { %v5012_v16 = vpop.eup %5011  ;;  %v3633_v48 = vmul.f32 %v5010_v40, %v5353_v52  ;;  %v3662_v46 = vmul.f32 %v3631_v62, %v3600_v28 }
0x1500   : > { %v5014_v47 = vpop.eup %5013  ;;  %v3634_v60 = vmul.f32 %v5012_v16, %v5356_v56  ;;  %v3663_v23 = vmul.f32 %v3632_v34, %v3600_v28  ;;  %v3639_v57 = vadd.f32 %v3632_v34, %v3631_v62 }
0x1501   : > { %v5016_v26 = vpop.eup %5015  ;;  %v3635_v20 = vmul.f32 %v5014_v47, %v5351_v50  ;;  %v3664_v61 = vmul.f32 %v3633_v48, %v3600_v28 }
0x1502   : > { %v5018_v18 = vpop.eup %5017  ;;  %v3636_v25 = vmul.f32 %v5016_v26, %v5349_v49  ;;  %v3670_v59 = vadd.f32 %v3663_v23, %v3662_v46  ;;  %v3640_v44 = vadd.f32 %v3639_v57, %v3633_v48  ;;  %v3665_v27 = vmul.f32 %v3634_v60, %v3600_v28 }
0x1503   : > { %v5020_v12 = vpop.eup %5019  ;;  %v3637_v39 = vmul.f32 %v5018_v18, %v5353_v52  ;;  %v3666_v33 = vmul.f32 %v3635_v20, %v3604_v19 }
0x1504   : > { %v3638_v13 = vmul.f32 %v5020_v12, %v5356_v56  ;;  %v3667_v45 = vmul.f32 %v3636_v25, %v3604_v19  ;;  %v3671_v17 = vadd.f32 %v3670_v59, %v3664_v61  ;;  %v3641_v14 = vadd.f32 %v3640_v44, %v3634_v60 }
0x1505   : > { %v3648_v32 = vadd.f32 %v3636_v25, %v3635_v20  ;;  %v3668_v31 = vmul.f32 %v3637_v39, %v3604_v19 }
0x1506   : > { %v3672_v53 = vadd.f32 %v3671_v17, %v3665_v27  ;;  %v3679_v37 = vadd.f32 %v3667_v45, %v3666_v33  ;;  %v3669_v63 = vmul.f32 %v3638_v13, %v3604_v19  ;;  %v3642_v61 = vrot.slane %v3641_v14, 4 }
0x1507   : > { %v3649_v58 = vadd.f32 %v3648_v32, %v3637_v39 }
0x1508   : > { %v3673_v38 = vrot.slane %v3672_v53, 4  ;;  %v3680_v54 = vadd.f32 %v3679_v37, %v3668_v31  ;;  %v3643_v44 = vadd.f32 %v3642_v61, %v3641_v14 }
0x1509   : > { %v3650_v62 = vadd.f32 %v3649_v58, %v3638_v13 }
0x150a   : > { %v3674_v40 = vadd.f32 %v3673_v38, %v3672_v53  ;;  %v3681_v34 = vadd.f32 %v3680_v54, %v3669_v63  ;;  %v3644_v39 = vrot.slane %v3643_v44, 2 }
0x150b   : > { %v3651_v19 = vrot.slane %v3650_v62, 4 }
0x150c   : > { %v3675_v16 = vrot.slane %v3674_v40, 2  ;;  %v3682_v48 = vrot.slane %v3681_v34, 4  ;;  %v3645_v33 = vadd.f32 %v3644_v39, %v3643_v44 }
0x150d   : > { %v3652_v59 = vadd.f32 %v3651_v19, %v3650_v62 }
0x150e   : > { %v3676_v28 = vadd.f32 %v3675_v16, %v3674_v40  ;;  %v3683_v46 = vadd.f32 %v3682_v48, %v3681_v34  ;;  %v3646_v17 = vrot.slane %v3645_v33, 1 }
0x150f   : > { %v3653_v12 = vrot.slane %v3652_v59, 2 }
0x1510   : > { %v3684_v47 = vrot.slane %v3683_v46, 2  ;;  %v3677_v23 = vrot.slane %v3676_v28, 1  ;;  %v3647_v37 = vadd.f32 %v3646_v17, %v3645_v33 }
0x1511   : > { %v3654_v27 = vadd.f32 %v3653_v12, %v3652_v59 }
0x1512   : > { %v3685_v57 = vadd.f32 %v3684_v47, %v3683_v46  ;;  %v3678_v60 = vadd.f32 %v3677_v23, %v3676_v28  ;;  %v3657_v54 = vadd.f32 %v3647_v37, %v5379_v22 }
0x1513   : > { %v3655_v13 = vrot.slane %v3654_v27, 1 }
0x1514   : > { %v3686_v26 = vrot.slane %v3685_v57, 1 }
0x1515   : > { %v3656_v31 = vadd.f32 %v3655_v13, %v3654_v27 }
0x1516   : > { %v3687_v20 = vadd.f32 %v3686_v26, %v3685_v57 }
0x1517   : > { %v3658_v63 = vadd.f32 %v3656_v31, %v5379_v22 }
0x1518   : > { %v3690_v18 = vsel %vm231_vm1, %v3687_v20, %v3678_v60 }
0x1519   : > { %v3692_v25 = vsel %vm199_vm0, %v3690_v18, 0.0 }
0x151a   : > { %3693 = vadd.xlane.f32.xlu1 %v3692_v25 }
0x1576   : > { %v3661_v45 = vpop.xlane.xlu0 %3660 }
0x1577   : > { %v3695_v32 = vmul.f32 %v3661_v45, %v5379_v22 }
0x15a7   : > { %v3694_v53 = vpop.xlane.xlu1 %3693 }
0x15a8   : > { %v3696_v58 = vadd.f32 %v3695_v32, %v3694_v53 }
0x15aa   : > { %v3698_v38 = vrot.slane %v3696_v58, 1  ;;  %v3701_v14 = vsub.f32 %v3657_v54, %v3696_v58 }
0x15ac   : > { %v3702_v62 = vsub.f32 %v3658_v63, %v3698_v38 }
0x15ae   : > { %v3705_v40 = vrot.slane %v3702_v62, 7 }
0x15b0   : > { %v3706_v34 = vsel %vm231_vm1, %v3705_v40, %v3701_v14 }
0x15b1   : > { %v6541_v16 = vmul.f32 %v3706_v34, %v6500_v42 }
0x15b3   : > { %v3709_v48 = vmul.f32 %v6541_v16, %v5388_v43 }
0x15b5   : > { %v6546_v28 = vadd.f32 %v3709_v48, %v6454_v41 }
0x15b7   : > { %v3796_v46 = vsel %vm199_vm0, %v6546_v28, 0.0  ;;  %v3718_v47 = vrot.slane %v6546_v28, %v5309_v21 }
0x15b8   : > { %3797 = vadd.xlane.f32.xlu0 %v3796_v46 }
0x15b9   : > { %v3719_v23 = vcombine.high %v3718_v47, %v3718_v47  ;;  %v3726_v57 = vrot.slane %v3718_v47, %v5309_v21 }
0x15bb   : > { %v3733_v26 = vrot.slane %v3719_v23, %v5309_v21  ;;  %v3737_v42 = vrot.slane %v3726_v57, %v5313_v24 }
0x15bd   : > { %v3741_v60 = vrot.slane %v3733_v26, %v5313_v24  ;;  %v3744_v20 = vmul.f32 %v3737_v42, %v5323_v30  ;;  %v3745_v18 = vmul.f32 %v3737_v42, %v5332_v36  ;;  %v3746_v25 = vmul.f32 %v3737_v42, %v5321_v29 }
0x15be   : > { %v3747_v19 = vmul.f32 %v3737_v42, %v5330_v35 }
0x15bf   : > { %v3748_v61 = vmul.f32 %v3741_v60, %v5323_v30  ;;  %v3749_v59 = vmul.f32 %v3741_v60, %v5332_v36  ;;  %v3750_v44 = vmul.f32 %v3741_v60, %v5321_v29  ;;  %v3752_v12 = vadd.f32 %v3744_v20, %v5250_v0 }
0x15c0   : > { %v3753_v39 = vadd.f32 %v3745_v18, %v5252_v1  ;;  %v3754_v27 = vadd.f32 %v3746_v25, %v5254_v2  ;;  %v3751_v33 = vmul.f32 %v3741_v60, %v5330_v35  ;;  %v3755_v13 = vadd.f32 %v3747_v19, %v5256_v3 }
0x15c1   : > { %v3756_v45 = vadd.f32 %v3748_v61, %v5258_v4  ;;  %5021 = vtanh.f32 %v3752_v12  ;;  %v3757_v17 = vadd.f32 %v3749_v59, %v5260_v5  ;;  %v3758_v32 = vadd.f32 %v3750_v44, %v5262_v6 }
0x15c2   : > { %5023 = vtanh.f32 %v3753_v39  ;;  %v3759_v31 = vadd.f32 %v3751_v33, %v5264_v7 }
0x15c3   : > { %5025 = vtanh.f32 %v3754_v27 }
0x15c4   : > { %5027 = vtanh.f32 %v3755_v13 }
0x15c5   : > { %5029 = vtanh.f32 %v3756_v45 }
0x15c6   : > { %5031 = vtanh.f32 %v3757_v17 }
0x15c7   : > { %5033 = vtanh.f32 %v3758_v32 }
0x15c8   : > { %5035 = vtanh.f32 %v3759_v31 }
0x15cb   : > { %v5022_v53 = vpop.eup %5021 }
0x15cc   : > { %v5024_v37 = vpop.eup %5023  ;;  %v3768_v58 = vmul.f32 %v5022_v53, %v5351_v50 }
0x15cd   : > { %v5026_v63 = vpop.eup %5025  ;;  %v3769_v38 = vmul.f32 %v5024_v37, %v5349_v49 }
0x15ce   : > { %v5028_v54 = vpop.eup %5027  ;;  %v3770_v62 = vmul.f32 %v5026_v63, %v5353_v52  ;;  %v3799_v14 = vmul.f32 %v3768_v58, %v3737_v42 }
0x15cf   : > { %v5030_v40 = vpop.eup %5029  ;;  %v3771_v34 = vmul.f32 %v5028_v54, %v5356_v56  ;;  %v3800_v48 = vmul.f32 %v3769_v38, %v3737_v42  ;;  %v3776_v46 = vadd.f32 %v3769_v38, %v3768_v58 }
0x15d0   : > { %v5032_v47 = vpop.eup %5031  ;;  %v3772_v23 = vmul.f32 %v5030_v40, %v5351_v50  ;;  %v3801_v20 = vmul.f32 %v3770_v62, %v3737_v42 }
0x15d1   : > { %v5034_v57 = vpop.eup %5033  ;;  %v3773_v26 = vmul.f32 %v5032_v47, %v5349_v49  ;;  %v3807_v18 = vadd.f32 %v3800_v48, %v3799_v14  ;;  %v3777_v25 = vadd.f32 %v3776_v46, %v3770_v62  ;;  %v3802_v59 = vmul.f32 %v3771_v34, %v3737_v42 }
0x15d2   : > { %v5036_v19 = vpop.eup %5035  ;;  %v3774_v61 = vmul.f32 %v5034_v57, %v5353_v52  ;;  %v3803_v44 = vmul.f32 %v3772_v23, %v3741_v60 }
0x15d3   : > { %v3775_v12 = vmul.f32 %v5036_v19, %v5356_v56  ;;  %v3804_v39 = vmul.f32 %v3773_v26, %v3741_v60  ;;  %v3808_v27 = vadd.f32 %v3807_v18, %v3801_v20  ;;  %v3778_v33 = vadd.f32 %v3777_v25, %v3771_v34 }
0x15d4   : > { %v3785_v13 = vadd.f32 %v3773_v26, %v3772_v23  ;;  %v3805_v45 = vmul.f32 %v3774_v61, %v3741_v60 }
0x15d5   : > { %v3809_v17 = vadd.f32 %v3808_v27, %v3802_v59  ;;  %v3816_v32 = vadd.f32 %v3804_v39, %v3803_v44  ;;  %v3806_v53 = vmul.f32 %v3775_v12, %v3741_v60  ;;  %v3779_v18 = vrot.slane %v3778_v33, 4 }
0x15d6   : > { %v3786_v31 = vadd.f32 %v3785_v13, %v3774_v61 }
0x15d7   : > { %v3810_v37 = vrot.slane %v3809_v17, 4  ;;  %v3817_v58 = vadd.f32 %v3816_v32, %v3805_v45  ;;  %v3780_v19 = vadd.f32 %v3779_v18, %v3778_v33 }
0x15d8   : > { %v3787_v63 = vadd.f32 %v3786_v31, %v3775_v12 }
0x15d9   : > { %v3811_v38 = vadd.f32 %v3810_v37, %v3809_v17  ;;  %v3818_v54 = vadd.f32 %v3817_v58, %v3806_v53  ;;  %v3781_v59 = vrot.slane %v3780_v19, 2 }
0x15da   : > { %v3788_v60 = vrot.slane %v3787_v63, 4 }
0x15db   : > { %v3812_v62 = vrot.slane %v3811_v38, 2  ;;  %v3819_v14 = vrot.slane %v3818_v54, 4  ;;  %v3782_v12 = vadd.f32 %v3781_v59, %v3780_v19 }
0x15dc   : > { %v3789_v25 = vadd.f32 %v3788_v60, %v3787_v63 }
0x15dd   : > { %v3813_v42 = vadd.f32 %v3812_v62, %v3811_v38  ;;  %v3820_v40 = vadd.f32 %v3819_v14, %v3818_v54  ;;  %v3783_v13 = vrot.slane %v3782_v12, 1  ;;  %v3983_v62 = vmul.f32 2.0, %v6541_v16 }
0x15de   : > { %v3790_v61 = vrot.slane %v3789_v25, 2 }
0x15df   : > { %v3821_v48 = vrot.slane %v3820_v40, 2  ;;  %v3814_v46 = vrot.slane %v3813_v42, 1  ;;  %v3784_v31 = vadd.f32 %v3783_v13, %v3782_v12 }
0x15e0   : > { %v3791_v44 = vadd.f32 %v3790_v61, %v3789_v25 }
0x15e1   : > { %v3822_v47 = vadd.f32 %v3821_v48, %v3820_v40  ;;  %v3815_v34 = vadd.f32 %v3814_v46, %v3813_v42  ;;  %v3794_v38 = vadd.f32 %v3784_v31, %v5379_v22  ;;  %v3984_v40 = vadd.f32 %v3983_v62, %v6495_v55 }
0x15e2   : > { %v3792_v39 = vrot.slane %v3791_v44, 1 }
0x15e3   : > { %v3823_v57 = vrot.slane %v3822_v47, 1 }
0x15e4   : > { %v3793_v17 = vadd.f32 %v3792_v39, %v3791_v44 }
0x15e5   : > { %v3824_v23 = vadd.f32 %v3823_v57, %v3822_v47 }
0x15e6   : > { %v3795_v37 = vadd.f32 %v3793_v17, %v5379_v22 }
0x15e7   : > { %v3827_v26 = vsel %vm231_vm1, %v3824_v23, %v3815_v34 }
0x15e8   : > { %v3829_v20 = vsel %vm199_vm0, %v3827_v26, 0.0 }
0x15e9   : > { %3830 = vadd.xlane.f32.xlu1 %v3829_v20 }
0x1645   : > { %v3798_v27 = vpop.xlane.xlu0 %3797 }
0x1646   : > { %v3832_v45 = vmul.f32 %v3798_v27, %v5379_v22 }
0x1676   : > { %v3831_v32 = vpop.xlane.xlu1 %3830 }
0x1677   : > { %v3833_v53 = vadd.f32 %v3832_v45, %v3831_v32 }
0x1679   : > { %v3835_v58 = vrot.slane %v3833_v53, 1  ;;  %v3838_v33 = vsub.f32 %v3794_v38, %v3833_v53 }
0x167b   : > { %v3839_v63 = vsub.f32 %v3795_v37, %v3835_v58 }
0x167d   : > { %v3842_v54 = vrot.slane %v3839_v63, 7 }
0x167f   : > { %v3843_v14 = vsel %vm231_vm1, %v3842_v54, %v3838_v33 }
0x1680   : > { %v3845_v42 = vmul.f32 %v3843_v14, %v6546_v28 }
0x1682   : > { %v3985_v48 = vmul.f32 2.0, %v3845_v42  ;;  %v3846_v46 = vmul.f32 %v3845_v42, %v5484_v15 }
0x1684   : > { %v6591_v47 = vadd.f32 %v3846_v46, %v6454_v41  ;;  %v6593_v57 = vadd.f32 %v3985_v48, %v3984_v40 }
0x1686   : > { %v3933_v34 = vsel %vm199_vm0, %v6591_v47, 0.0  ;;  %v3855_v16 = vrot.slane %v6591_v47, %v5309_v21 }
0x1687   : > { %3934 = vadd.xlane.f32.xlu0 %v3933_v34 }
0x1688   : > { %v3856_v23 = vcombine.high %v3855_v16, %v3855_v16  ;;  %v3863_v28 = vrot.slane %v3855_v16, %v5309_v21 }
0x168a   : > { %v3870_v55 = vrot.slane %v3856_v23, %v5309_v21  ;;  %v3874_v26 = vrot.slane %v3863_v28, %v5313_v24 }
0x168c   : > { %v3878_v20 = vrot.slane %v3870_v55, %v5313_v24  ;;  %v3881_v60 = vmul.f32 %v3874_v26, %v5323_v30  ;;  %v3882_v18 = vmul.f32 %v3874_v26, %v5332_v36  ;;  %v3883_v25 = vmul.f32 %v3874_v26, %v5321_v29 }
0x168d   : > { %v3884_v19 = vmul.f32 %v3874_v26, %v5330_v35 }
0x168e   : > { %v3885_v61 = vmul.f32 %v3878_v20, %v5323_v30  ;;  %v3886_v59 = vmul.f32 %v3878_v20, %v5332_v36  ;;  %v3887_v44 = vmul.f32 %v3878_v20, %v5321_v29  ;;  %v3889_v12 = vadd.f32 %v3881_v60, %v5250_v0 }
0x168f   : > { %v3890_v39 = vadd.f32 %v3882_v18, %v5252_v1  ;;  %v3891_v27 = vadd.f32 %v3883_v25, %v5254_v2  ;;  %v3888_v13 = vmul.f32 %v3878_v20, %v5330_v35  ;;  %v3892_v45 = vadd.f32 %v3884_v19, %v5256_v3 }
0x1690   : > { %v3893_v17 = vadd.f32 %v3885_v61, %v5258_v4  ;;  %5037 = vtanh.f32 %v3889_v12  ;;  %v3894_v32 = vadd.f32 %v3886_v59, %v5260_v5  ;;  %v3895_v31 = vadd.f32 %v3887_v44, %v5262_v6 }
0x1691   : > { %5039 = vtanh.f32 %v3890_v39  ;;  %v3896_v53 = vadd.f32 %v3888_v13, %v5264_v7 }
0x1692   : > { %5041 = vtanh.f32 %v3891_v27 }
0x1693   : > { %5043 = vtanh.f32 %v3892_v45 }
0x1694   : > { %5045 = vtanh.f32 %v3893_v17 }
0x1695   : > { %5047 = vtanh.f32 %v3894_v32 }
0x1696   : > { %5049 = vtanh.f32 %v3895_v31 }
0x1697   : > { %5051 = vtanh.f32 %v3896_v53 }
0x169a   : > { %v5038_v37 = vpop.eup %5037 }
0x169b   : > { %v5040_v58 = vpop.eup %5039  ;;  %v3905_v38 = vmul.f32 %v5038_v37, %v5351_v50 }
0x169c   : > { %v5042_v63 = vpop.eup %5041  ;;  %v3906_v33 = vmul.f32 %v5040_v58, %v5349_v49 }
0x169d   : > { %v5044_v54 = vpop.eup %5043  ;;  %v3907_v62 = vmul.f32 %v5042_v63, %v5353_v52  ;;  %v3936_v14 = vmul.f32 %v3905_v38, %v3874_v26 }
0x169e   : > { %v5046_v42 = vpop.eup %5045  ;;  %v3908_v40 = vmul.f32 %v5044_v54, %v5356_v56  ;;  %v3937_v48 = vmul.f32 %v3906_v33, %v3874_v26  ;;  %v3913_v46 = vadd.f32 %v3906_v33, %v3905_v38 }
0x169f   : > { %v5048_v34 = vpop.eup %5047  ;;  %v3909_v16 = vmul.f32 %v5046_v42, %v5351_v50  ;;  %v3938_v55 = vmul.f32 %v3907_v62, %v3874_v26 }
0x16a0   : > { %v5050_v23 = vpop.eup %5049  ;;  %v3910_v28 = vmul.f32 %v5048_v34, %v5349_v49  ;;  %v3944_v60 = vadd.f32 %v3937_v48, %v3936_v14  ;;  %v3914_v18 = vadd.f32 %v3913_v46, %v3907_v62  ;;  %v3939_v61 = vmul.f32 %v3908_v40, %v3874_v26 }
0x16a1   : > { %v5052_v25 = vpop.eup %5051  ;;  %v3911_v19 = vmul.f32 %v5050_v23, %v5353_v52  ;;  %v3940_v59 = vmul.f32 %v3909_v16, %v3878_v20 }
0x16a2   : > { %v3912_v44 = vmul.f32 %v5052_v25, %v5356_v56  ;;  %v3941_v12 = vmul.f32 %v3910_v28, %v3878_v20  ;;  %v3945_v39 = vadd.f32 %v3944_v60, %v3938_v55  ;;  %v3915_v27 = vadd.f32 %v3914_v18, %v3908_v40 }
0x16a3   : > { %v3922_v13 = vadd.f32 %v3910_v28, %v3909_v16  ;;  %v3942_v45 = vmul.f32 %v3911_v19, %v3878_v20 }
0x16a4   : > { %v3946_v17 = vadd.f32 %v3945_v39, %v3939_v61  ;;  %v3953_v32 = vadd.f32 %v3941_v12, %v3940_v59  ;;  %v3943_v53 = vmul.f32 %v3912_v44, %v3878_v20  ;;  %v3916_v55 = vrot.slane %v3915_v27, 4 }
0x16a5   : > { %v3923_v31 = vadd.f32 %v3922_v13, %v3911_v19 }
0x16a6   : > { %v3947_v37 = vrot.slane %v3946_v17, 4  ;;  %v3954_v58 = vadd.f32 %v3953_v32, %v3942_v45  ;;  %v3917_v18 = vadd.f32 %v3916_v55, %v3915_v27 }
0x16a7   : > { %v3924_v38 = vadd.f32 %v3923_v31, %v3912_v44 }
0x16a8   : > { %v3948_v63 = vadd.f32 %v3947_v37, %v3946_v17  ;;  %v3955_v33 = vadd.f32 %v3954_v58, %v3943_v53  ;;  %v3918_v19 = vrot.slane %v3917_v18, 2 }
0x16a9   : > { %v3925_v20 = vrot.slane %v3924_v38, 4 }
0x16aa   : > { %v3949_v54 = vrot.slane %v3948_v63, 2  ;;  %v3956_v62 = vrot.slane %v3955_v33, 4  ;;  %v3919_v59 = vadd.f32 %v3918_v19, %v3917_v18 }
0x16ab   : > { %v3926_v60 = vadd.f32 %v3925_v20, %v3924_v38 }
0x16ac   : > { %v3950_v26 = vadd.f32 %v3949_v54, %v3948_v63  ;;  %v3957_v14 = vadd.f32 %v3956_v62, %v3955_v33  ;;  %v3920_v39 = vrot.slane %v3919_v59, 1 }
0x16ad   : > { %v3927_v25 = vrot.slane %v3926_v60, 2 }
0x16ae   : > { %v3958_v42 = vrot.slane %v3957_v14, 2  ;;  %v3951_v48 = vrot.slane %v3950_v26, 1  ;;  %v3921_v32 = vadd.f32 %v3920_v39, %v3919_v59 }
0x16af   : > { %v3928_v61 = vadd.f32 %v3927_v25, %v3926_v60 }
0x16b0   : > { %v3959_v46 = vadd.f32 %v3958_v42, %v3957_v14  ;;  %v3952_v40 = vadd.f32 %v3951_v48, %v3950_v26  ;;  %v3931_v58 = vadd.f32 %v3921_v32, %v5379_v22 }
0x16b1   : > { %v3929_v44 = vrot.slane %v3928_v61, 1 }
0x16b2   : > { %v3960_v34 = vrot.slane %v3959_v46, 1 }
0x16b3   : > { %v3930_v45 = vadd.f32 %v3929_v44, %v3928_v61 }
0x16b4   : > { %v3961_v16 = vadd.f32 %v3960_v34, %v3959_v46 }
0x16b5   : > { %v3932_v53 = vadd.f32 %v3930_v45, %v5379_v22 }
0x16b6   : > { %v3964_v23 = vsel %vm231_vm1, %v3961_v16, %v3952_v40 }
0x16b7   : > { %v3966_v28 = vsel %vm199_vm0, %v3964_v23, 0.0 }
0x16b8   : > { %3967 = vadd.xlane.f32.xlu1 %v3966_v28 }
0x1714   : > { %v3935_v12 = vpop.xlane.xlu0 %3934 }
0x1715   : > { %v3969_v13 = vmul.f32 %v3935_v12, %v5379_v22 }
0x1745   : > { %v3968_v17 = vpop.xlane.xlu1 %3967 }
0x1746   : > { %v3970_v31 = vadd.f32 %v3969_v13, %v3968_v17 }
0x1748   : > { %v3972_v37 = vrot.slane %v3970_v31, 1  ;;  %v3975_v27 = vsub.f32 %v3931_v58, %v3970_v31 }
0x174a   : > { %v3976_v38 = vsub.f32 %v3932_v53, %v3972_v37 }
0x174c   : > { %v3979_v63 = vrot.slane %v3976_v38, 7 }
0x174e   : > { %v3980_v33 = vsel %vm231_vm1, %v3979_v63, %v3975_v27 }
0x174f   : > { %v3982_v54 = vmul.f32 %v3980_v33, %v6591_v47 }
0x1751   : > { %v3987_v62 = vadd.f32 %v6593_v57, %v3982_v54 }
0x1753   : > { %v3988_v26 = vmul.f32 %v3987_v62, %v5534_v51 }
0x1755   : > { %v6637_v14 = vadd.f32 %v3988_v26, %v6454_v41 }
0x1757   : > { %v3997_v42 = vrot.slane %v6637_v14, %v5309_v21  ;;  %v4075_v48 = vsel %vm199_vm0, %v6637_v14, 0.0 }
0x1758   : > { %4076 = vadd.xlane.f32.xlu0 %v4075_v48 }
0x1759   : > { %v3998_v46 = vcombine.high %v3997_v42, %v3997_v42  ;;  %v4005_v34 = vrot.slane %v3997_v42, %v5309_v21 }
0x175b   : > { %v4012_v40 = vrot.slane %v3998_v46, %v5309_v21  ;;  %v4016_v47 = vrot.slane %v4005_v34, %v5313_v24 }
0x175d   : > { %v4020_v57 = vrot.slane %v4012_v40, %v5313_v24  ;;  %v4023_v16 = vmul.f32 %v4016_v47, %v5323_v30  ;;  %v4024_v41 = vmul.f32 %v4016_v47, %v5332_v36  ;;  %v4025_v23 = vmul.f32 %v4016_v47, %v5321_v29 }
0x175e   : > { %v4026_v28 = vmul.f32 %v4016_v47, %v5330_v35 }
0x175f   : > { %v4027_v20 = vmul.f32 %v4020_v57, %v5323_v30  ;;  %v4028_v55 = vmul.f32 %v4020_v57, %v5332_v36  ;;  %v4029_v60 = vmul.f32 %v4020_v57, %v5321_v29  ;;  %v4031_v18 = vadd.f32 %v4023_v16, %v5250_v0 }
0x1760   : > { %v4032_v25 = vadd.f32 %v4024_v41, %v5252_v1  ;;  %v4033_v19 = vadd.f32 %v4025_v23, %v5254_v2  ;;  %v4030_v61 = vmul.f32 %v4020_v57, %v5330_v35  ;;  %v4034_v59 = vadd.f32 %v4026_v28, %v5256_v3 }
0x1761   : > { %v4035_v44 = vadd.f32 %v4027_v20, %v5258_v4  ;;  %5053 = vtanh.f32 %v4031_v18  ;;  %v4036_v12 = vadd.f32 %v4028_v55, %v5260_v5  ;;  %v4037_v39 = vadd.f32 %v4029_v60, %v5262_v6 }
0x1762   : > { %5055 = vtanh.f32 %v4032_v25  ;;  %v4038_v13 = vadd.f32 %v4030_v61, %v5264_v7 }
0x1763   : > { %5057 = vtanh.f32 %v4033_v19 }
0x1764   : > { %5059 = vtanh.f32 %v4034_v59 }
0x1765   : > { %5061 = vtanh.f32 %v4035_v44 }
0x1766   : > { %5063 = vtanh.f32 %v4036_v12 }
0x1767   : > { %5065 = vtanh.f32 %v4037_v39 }
0x1768   : > { %5067 = vtanh.f32 %v4038_v13 }
0x176b   : > { %v5054_v45 = vpop.eup %5053 }
0x176c   : > { %v5056_v17 = vpop.eup %5055  ;;  %v4047_v32 = vmul.f32 %v5054_v45, %v5351_v50 }
0x176d   : > { %v5058_v31 = vpop.eup %5057  ;;  %v4048_v53 = vmul.f32 %v5056_v17, %v5349_v49 }
0x176e   : > { %v5060_v37 = vpop.eup %5059  ;;  %v4049_v58 = vmul.f32 %v5058_v31, %v5353_v52  ;;  %v4078_v38 = vmul.f32 %v4047_v32, %v4016_v47 }
0x176f   : > { %v5062_v27 = vpop.eup %5061  ;;  %v4050_v63 = vmul.f32 %v5060_v37, %v5356_v56  ;;  %v4079_v33 = vmul.f32 %v4048_v53, %v4016_v47  ;;  %v4055_v54 = vadd.f32 %v4048_v53, %v4047_v32 }
0x1770   : > { %v5064_v62 = vpop.eup %5063  ;;  %v4051_v26 = vmul.f32 %v5062_v27, %v5351_v50  ;;  %v4080_v46 = vmul.f32 %v4049_v58, %v4016_v47 }
0x1771   : > { %v5066_v42 = vpop.eup %5065  ;;  %v4052_v48 = vmul.f32 %v5064_v62, %v5349_v49  ;;  %v4086_v34 = vadd.f32 %v4079_v33, %v4078_v38  ;;  %v4056_v40 = vadd.f32 %v4055_v54, %v4049_v58  ;;  %v4081_v23 = vmul.f32 %v4050_v63, %v4016_v47 }
0x1772   : > { %v5068_v16 = vpop.eup %5067  ;;  %v4053_v41 = vmul.f32 %v5066_v42, %v5353_v52  ;;  %v4082_v28 = vmul.f32 %v4051_v26, %v4020_v57 }
0x1773   : > { %v4054_v20 = vmul.f32 %v5068_v16, %v5356_v56  ;;  %v4083_v55 = vmul.f32 %v4052_v48, %v4020_v57  ;;  %v4087_v60 = vadd.f32 %v4086_v34, %v4080_v46  ;;  %v4057_v18 = vadd.f32 %v4056_v40, %v4050_v63 }
0x1774   : > { %v4064_v25 = vadd.f32 %v4052_v48, %v4051_v26  ;;  %v4084_v19 = vmul.f32 %v4053_v41, %v4020_v57 }
0x1775   : > { %v4088_v61 = vadd.f32 %v4087_v60, %v4081_v23  ;;  %v4095_v59 = vadd.f32 %v4083_v55, %v4082_v28  ;;  %v4085_v12 = vmul.f32 %v4054_v20, %v4020_v57  ;;  %v4058_v42 = vrot.slane %v4057_v18, 4 }
0x1776   : > { %v4065_v44 = vadd.f32 %v4064_v25, %v4053_v41 }
0x1777   : > { %v4089_v39 = vrot.slane %v4088_v61, 4  ;;  %v4096_v13 = vadd.f32 %v4095_v59, %v4084_v19  ;;  %v4059_v46 = vadd.f32 %v4058_v42, %v4057_v18 }
0x1778   : > { %v4066_v45 = vadd.f32 %v4065_v44, %v4054_v20 }
0x1779   : > { %v4090_v17 = vadd.f32 %v4089_v39, %v4088_v61  ;;  %v4097_v32 = vadd.f32 %v4096_v13, %v4085_v12  ;;  %v4060_v40 = vrot.slane %v4059_v46, 2 }
0x177a   : > { %v4067_v57 = vrot.slane %v4066_v45, 4 }
0x177b   : > { %v4091_v31 = vrot.slane %v4090_v17, 2  ;;  %v4098_v53 = vrot.slane %v4097_v32, 4  ;;  %v4061_v41 = vadd.f32 %v4060_v40, %v4059_v46 }
0x177c   : > { %v4068_v48 = vadd.f32 %v4067_v57, %v4066_v45 }
0x177d   : > { %v4092_v47 = vadd.f32 %v4091_v31, %v4090_v17  ;;  %v4099_v37 = vadd.f32 %v4098_v53, %v4097_v32  ;;  %v4062_v20 = vrot.slane %v4061_v41, 1 }
0x177e   : > { %v4069_v34 = vrot.slane %v4068_v48, 2 }
0x177f   : > { %v4100_v58 = vrot.slane %v4099_v37, 2  ;;  %v4093_v38 = vrot.slane %v4092_v47, 1  ;;  %v4063_v19 = vadd.f32 %v4062_v20, %v4061_v41 }
0x1780   : > { %v4070_v16 = vadd.f32 %v4069_v34, %v4068_v48 }
0x1781   : > { %v4101_v27 = vadd.f32 %v4100_v58, %v4099_v37  ;;  %v4094_v63 = vadd.f32 %v4093_v38, %v4092_v47  ;;  %v4073_v12 = vadd.f32 %v4063_v19, %v5379_v22 }
0x1782   : > { %v4071_v23 = vrot.slane %v4070_v16, 1 }
0x1783   : > { %v4102_v33 = vrot.slane %v4101_v27, 1 }
0x1784   : > { %v4072_v60 = vadd.f32 %v4071_v23, %v4070_v16 }
0x1785   : > { %v4103_v54 = vadd.f32 %v4102_v33, %v4101_v27 }
0x1786   : > { %v4074_v59 = vadd.f32 %v4072_v60, %v5379_v22 }
0x1787   : > { %v4106_v62 = vsel %vm231_vm1, %v4103_v54, %v4094_v63 }
0x1788   : > { %v4108_v26 = vsel %vm199_vm0, %v4106_v62, 0.0 }
0x1789   : > { %4109 = vadd.xlane.f32.xlu1 %v4108_v26 }
0x17e5   : > { %v4077_v28 = vpop.xlane.xlu0 %4076 }
0x17e6   : > { %v4111_v55 = vmul.f32 %v4077_v28, %v5379_v22 }
0x1816   : > { %v4110_v25 = vpop.xlane.xlu1 %4109 }
0x1817   : > { %v4112_v61 = vadd.f32 %v4111_v55, %v4110_v25 }
0x1819   : > { %v4114_v44 = vrot.slane %v4112_v61, 1  ;;  %v4117_v18 = vsub.f32 %v4073_v12, %v4112_v61 }
0x181b   : > { %v4118_v39 = vsub.f32 %v4074_v59, %v4114_v44 }
0x181d   : > { %v4121_v13 = vrot.slane %v4118_v39, 7 }
0x181f   : > { %v4122_v45 = vsel %vm231_vm1, %v4121_v13, %v4117_v18 }
0x1820   : > { %v6678_v17 = vmul.f32 %v4122_v45, %v6637_v14 }
0x1822   : > { %v4125_v32 = vmul.f32 %v6678_v17, %v5388_v43 }
0x1824   : > { %v6683_v31 = vadd.f32 %v4125_v32, %v6637_v14 }
0x1826   : > { %v4212_v53 = vsel %vm199_vm0, %v6683_v31, 0.0  ;;  %v4134_v47 = vrot.slane %v6683_v31, %v5309_v21 }
0x1827   : > { %4213 = vadd.xlane.f32.xlu0 %v4212_v53 }
0x1828   : > { %v4135_v37 = vcombine.high %v4134_v47, %v4134_v47  ;;  %v4142_v58 = vrot.slane %v4134_v47, %v5309_v21 }
0x182a   : > { %v4149_v38 = vrot.slane %v4135_v37, %v5309_v21  ;;  %v4153_v27 = vrot.slane %v4142_v58, %v5313_v24 }
0x182c   : > { %v4157_v33 = vrot.slane %v4149_v38, %v5313_v24  ;;  %v4160_v63 = vmul.f32 %v4153_v27, %v5323_v30  ;;  %v4161_v54 = vmul.f32 %v4153_v27, %v5332_v36  ;;  %v4162_v62 = vmul.f32 %v4153_v27, %v5321_v29 }
0x182d   : > { %v4163_v26 = vmul.f32 %v4153_v27, %v5330_v35 }
0x182e   : > { %v4164_v57 = vmul.f32 %v4157_v33, %v5323_v30  ;;  %v4165_v42 = vmul.f32 %v4157_v33, %v5332_v36  ;;  %v4166_v48 = vmul.f32 %v4157_v33, %v5321_v29  ;;  %v4168_v46 = vadd.f32 %v4160_v63, %v5250_v0 }
0x182f   : > { %v4169_v34 = vadd.f32 %v4161_v54, %v5252_v1  ;;  %v4170_v40 = vadd.f32 %v4162_v62, %v5254_v2  ;;  %v4167_v16 = vmul.f32 %v4157_v33, %v5330_v35  ;;  %v4171_v41 = vadd.f32 %v4163_v26, %v5256_v3 }
0x1830   : > { %v4172_v23 = vadd.f32 %v4164_v57, %v5258_v4  ;;  %5069 = vtanh.f32 %v4168_v46  ;;  %v4173_v28 = vadd.f32 %v4165_v42, %v5260_v5  ;;  %v4174_v20 = vadd.f32 %v4166_v48, %v5262_v6 }
0x1831   : > { %5071 = vtanh.f32 %v4169_v34  ;;  %v4175_v55 = vadd.f32 %v4167_v16, %v5264_v7 }
0x1832   : > { %5073 = vtanh.f32 %v4170_v40 }
0x1833   : > { %5075 = vtanh.f32 %v4171_v41 }
0x1834   : > { %5077 = vtanh.f32 %v4172_v23 }
0x1835   : > { %5079 = vtanh.f32 %v4173_v28 }
0x1836   : > { %5081 = vtanh.f32 %v4174_v20 }
0x1837   : > { %5083 = vtanh.f32 %v4175_v55 }
0x183a   : > { %v5070_v60 = vpop.eup %5069 }
0x183b   : > { %v5072_v25 = vpop.eup %5071  ;;  %v4184_v19 = vmul.f32 %v5070_v60, %v5351_v50 }
0x183c   : > { %v5074_v61 = vpop.eup %5073  ;;  %v4185_v59 = vmul.f32 %v5072_v25, %v5349_v49 }
0x183d   : > { %v5076_v44 = vpop.eup %5075  ;;  %v4186_v12 = vmul.f32 %v5074_v61, %v5353_v52  ;;  %v4215_v39 = vmul.f32 %v4184_v19, %v4153_v27 }
0x183e   : > { %v5078_v18 = vpop.eup %5077  ;;  %v4187_v13 = vmul.f32 %v5076_v44, %v5356_v56  ;;  %v4216_v45 = vmul.f32 %v4185_v59, %v4153_v27  ;;  %v4192_v32 = vadd.f32 %v4185_v59, %v4184_v19 }
0x183f   : > { %v5080_v53 = vpop.eup %5079  ;;  %v4188_v47 = vmul.f32 %v5078_v18, %v5351_v50  ;;  %v4217_v38 = vmul.f32 %v4186_v12, %v4153_v27 }
0x1840   : > { %v5082_v37 = vpop.eup %5081  ;;  %v4189_v58 = vmul.f32 %v5080_v53, %v5349_v49  ;;  %v4223_v63 = vadd.f32 %v4216_v45, %v4215_v39  ;;  %v4193_v54 = vadd.f32 %v4192_v32, %v4186_v12  ;;  %v4218_v57 = vmul.f32 %v4187_v13, %v4153_v27 }
0x1841   : > { %v5084_v62 = vpop.eup %5083  ;;  %v4190_v26 = vmul.f32 %v5082_v37, %v5353_v52  ;;  %v4219_v42 = vmul.f32 %v4188_v47, %v4157_v33 }
0x1842   : > { %v4191_v48 = vmul.f32 %v5084_v62, %v5356_v56  ;;  %v4220_v46 = vmul.f32 %v4189_v58, %v4157_v33  ;;  %v4224_v34 = vadd.f32 %v4223_v63, %v4217_v38  ;;  %v4194_v40 = vadd.f32 %v4193_v54, %v4187_v13 }
0x1843   : > { %v4201_v16 = vadd.f32 %v4189_v58, %v4188_v47  ;;  %v4221_v41 = vmul.f32 %v4190_v26, %v4157_v33 }
0x1844   : > { %v4225_v23 = vadd.f32 %v4224_v34, %v4218_v57  ;;  %v4232_v28 = vadd.f32 %v4220_v46, %v4219_v42  ;;  %v4222_v55 = vmul.f32 %v4191_v48, %v4157_v33  ;;  %v4195_v38 = vrot.slane %v4194_v40, 4 }
0x1845   : > { %v4202_v20 = vadd.f32 %v4201_v16, %v4190_v26 }
0x1846   : > { %v4226_v60 = vrot.slane %v4225_v23, 4  ;;  %v4233_v25 = vadd.f32 %v4232_v28, %v4221_v41  ;;  %v4196_v54 = vadd.f32 %v4195_v38, %v4194_v40 }
0x1847   : > { %v4203_v19 = vadd.f32 %v4202_v20, %v4191_v48 }
0x1848   : > { %v4227_v61 = vadd.f32 %v4226_v60, %v4225_v23  ;;  %v4234_v59 = vadd.f32 %v4233_v25, %v4222_v55  ;;  %v4197_v26 = vrot.slane %v4196_v54, 2 }
0x1849   : > { %v4204_v33 = vrot.slane %v4203_v19, 4 }
0x184a   : > { %v4228_v44 = vrot.slane %v4227_v61, 2  ;;  %v4235_v12 = vrot.slane %v4234_v59, 4  ;;  %v4198_v42 = vadd.f32 %v4197_v26, %v4196_v54 }
0x184b   : > { %v4205_v63 = vadd.f32 %v4204_v33, %v4203_v19 }
0x184c   : > { %v4229_v27 = vadd.f32 %v4228_v44, %v4227_v61  ;;  %v4236_v39 = vadd.f32 %v4235_v12, %v4234_v59  ;;  %v4199_v34 = vrot.slane %v4198_v42, 1 }
0x184d   : > { %v4206_v62 = vrot.slane %v4205_v63, 2 }
0x184e   : > { %v4237_v18 = vrot.slane %v4236_v39, 2  ;;  %v4230_v45 = vrot.slane %v4229_v27, 1  ;;  %v4200_v28 = vadd.f32 %v4199_v34, %v4198_v42 }
0x184f   : > { %v4207_v57 = vadd.f32 %v4206_v62, %v4205_v63 }
0x1850   : > { %v4238_v32 = vadd.f32 %v4237_v18, %v4236_v39  ;;  %v4231_v13 = vadd.f32 %v4230_v45, %v4229_v27  ;;  %v4210_v25 = vadd.f32 %v4200_v28, %v5379_v22 }
0x1851   : > { %v4208_v48 = vrot.slane %v4207_v57, 1 }
0x1852   : > { %v4239_v53 = vrot.slane %v4238_v32, 1 }
0x1853   : > { %v4209_v41 = vadd.f32 %v4208_v48, %v4207_v57 }
0x1854   : > { %v4240_v47 = vadd.f32 %v4239_v53, %v4238_v32 }
0x1855   : > { %v4211_v55 = vadd.f32 %v4209_v41, %v5379_v22 }
0x1856   : > { %v4243_v37 = vsel %vm231_vm1, %v4240_v47, %v4231_v13 }
0x1857   : > { %v4245_v58 = vsel %vm199_vm0, %v4243_v37, 0.0 }
0x1858   : > { %4246 = vadd.xlane.f32.xlu1 %v4245_v58 }
0x18b4   : > { %v4214_v46 = vpop.xlane.xlu0 %4213 }
0x18b5   : > { %v4248_v16 = vmul.f32 %v4214_v46, %v5379_v22 }
0x18e5   : > { %v4247_v23 = vpop.xlane.xlu1 %4246 }
0x18e6   : > { %v4249_v20 = vadd.f32 %v4248_v16, %v4247_v23 }
0x18e8   : > { %v4251_v60 = vrot.slane %v4249_v20, 1  ;;  %v4254_v40 = vsub.f32 %v4210_v25, %v4249_v20 }
0x18ea   : > { %v4255_v19 = vsub.f32 %v4211_v55, %v4251_v60 }
0x18ec   : > { %v4258_v61 = vrot.slane %v4255_v19, 7 }
0x18ee   : > { %v4259_v59 = vsel %vm231_vm1, %v4258_v61, %v4254_v40 }
0x18ef   : > { %v6724_v44 = vmul.f32 %v4259_v59, %v6683_v31 }
0x18f1   : > { %v4262_v12 = vmul.f32 %v6724_v44, %v5388_v43 }
0x18f3   : > { %v6729_v27 = vadd.f32 %v4262_v12, %v6637_v14 }
0x18f5   : > { %v4349_v39 = vsel %vm199_vm0, %v6729_v27, 0.0  ;;  %v4271_v18 = vrot.slane %v6729_v27, %v5309_v21 }
0x18f6   : > { %4350 = vadd.xlane.f32.xlu0 %v4349_v39 }
0x18f7   : > { %v4272_v45 = vcombine.high %v4271_v18, %v4271_v18  ;;  %v4279_v32 = vrot.slane %v4271_v18, %v5309_v21 }
0x18f9   : > { %v4286_v53 = vrot.slane %v4272_v45, %v5309_v21  ;;  %v4290_v31 = vrot.slane %v4279_v32, %v5313_v24 }
0x18fb   : > { %v4294_v13 = vrot.slane %v4286_v53, %v5313_v24  ;;  %v4297_v43 = vmul.f32 %v4290_v31, %v5323_v30  ;;  %v4298_v47 = vmul.f32 %v4290_v31, %v5332_v36  ;;  %v4299_v37 = vmul.f32 %v4290_v31, %v5321_v29 }
0x18fc   : > { %v4300_v58 = vmul.f32 %v4290_v31, %v5330_v35 }
0x18fd   : > { %v4301_v33 = vmul.f32 %v4294_v13, %v5323_v30  ;;  %v4302_v38 = vmul.f32 %v4294_v13, %v5332_v36  ;;  %v4303_v63 = vmul.f32 %v4294_v13, %v5321_v29  ;;  %v4305_v54 = vadd.f32 %v4297_v43, %v5250_v0 }
0x18fe   : > { %v4306_v62 = vadd.f32 %v4298_v47, %v5252_v1  ;;  %v4307_v26 = vadd.f32 %v4299_v37, %v5254_v2  ;;  %v4304_v57 = vmul.f32 %v4294_v13, %v5330_v35  ;;  %v4308_v42 = vadd.f32 %v4300_v58, %v5256_v3 }
0x18ff   : > { %v4309_v48 = vadd.f32 %v4301_v33, %v5258_v4  ;;  %5085 = vtanh.f32 %v4305_v54  ;;  %v4310_v46 = vadd.f32 %v4302_v38, %v5260_v5  ;;  %v4311_v34 = vadd.f32 %v4303_v63, %v5262_v6 }
0x1900   : > { %5087 = vtanh.f32 %v4306_v62  ;;  %v4312_v16 = vadd.f32 %v4304_v57, %v5264_v7 }
0x1901   : > { %5089 = vtanh.f32 %v4307_v26 }
0x1902   : > { %5091 = vtanh.f32 %v4308_v42 }
0x1903   : > { %5093 = vtanh.f32 %v4309_v48 }
0x1904   : > { %5095 = vtanh.f32 %v4310_v46 }
0x1905   : > { %5097 = vtanh.f32 %v4311_v34 }
0x1906   : > { %5099 = vtanh.f32 %v4312_v16 }
0x1909   : > { %v5086_v41 = vpop.eup %5085 }
0x190a   : > { %v5088_v23 = vpop.eup %5087  ;;  %v4321_v28 = vmul.f32 %v5086_v41, %v5351_v50 }
0x190b   : > { %v5090_v20 = vpop.eup %5089  ;;  %v4322_v55 = vmul.f32 %v5088_v23, %v5349_v49 }
0x190c   : > { %v5092_v60 = vpop.eup %5091  ;;  %v4323_v25 = vmul.f32 %v5090_v20, %v5353_v52  ;;  %v4352_v19 = vmul.f32 %v4321_v28, %v4290_v31 }
0x190d   : > { %v5094_v40 = vpop.eup %5093  ;;  %v4324_v61 = vmul.f32 %v5092_v60, %v5356_v56  ;;  %v4353_v59 = vmul.f32 %v4322_v55, %v4290_v31  ;;  %v4329_v12 = vadd.f32 %v4322_v55, %v4321_v28 }
0x190e   : > { %v5096_v39 = vpop.eup %5095  ;;  %v4325_v18 = vmul.f32 %v5094_v40, %v5351_v50  ;;  %v4354_v53 = vmul.f32 %v4323_v25, %v4290_v31 }
0x190f   : > { %v5098_v45 = vpop.eup %5097  ;;  %v4326_v32 = vmul.f32 %v5096_v39, %v5349_v49  ;;  %v4360_v43 = vadd.f32 %v4353_v59, %v4352_v19  ;;  %v4330_v47 = vadd.f32 %v4329_v12, %v4323_v25  ;;  %v4355_v33 = vmul.f32 %v4324_v61, %v4290_v31 }
0x1910   : > { %v5100_v37 = vpop.eup %5099  ;;  %v4327_v58 = vmul.f32 %v5098_v45, %v5353_v52  ;;  %v4356_v38 = vmul.f32 %v4325_v18, %v4294_v13 }
0x1911   : > { %v4328_v63 = vmul.f32 %v5100_v37, %v5356_v56  ;;  %v4357_v54 = vmul.f32 %v4326_v32, %v4294_v13  ;;  %v4361_v62 = vadd.f32 %v4360_v43, %v4354_v53  ;;  %v4331_v26 = vadd.f32 %v4330_v47, %v4324_v61 }
0x1912   : > { %v4338_v57 = vadd.f32 %v4326_v32, %v4325_v18  ;;  %v4358_v42 = vmul.f32 %v4327_v58, %v4294_v13 }
0x1913   : > { %v4362_v48 = vadd.f32 %v4361_v62, %v4355_v33  ;;  %v4369_v46 = vadd.f32 %v4357_v54, %v4356_v38  ;;  %v4359_v16 = vmul.f32 %v4328_v63, %v4294_v13  ;;  %v4332_v53 = vrot.slane %v4331_v26, 4 }
0x1914   : > { %v4339_v34 = vadd.f32 %v4338_v57, %v4327_v58 }
0x1915   : > { %v4363_v41 = vrot.slane %v4362_v48, 4  ;;  %v4370_v23 = vadd.f32 %v4369_v46, %v4358_v42  ;;  %v4333_v47 = vadd.f32 %v4332_v53, %v4331_v26 }
0x1916   : > { %v4340_v28 = vadd.f32 %v4339_v34, %v4328_v63 }
0x1917   : > { %v4364_v20 = vadd.f32 %v4363_v41, %v4362_v48  ;;  %v4371_v55 = vadd.f32 %v4370_v23, %v4359_v16  ;;  %v4334_v58 = vrot.slane %v4333_v47, 2 }
0x1918   : > { %v4341_v13 = vrot.slane %v4340_v28, 4 }
0x1919   : > { %v4365_v60 = vrot.slane %v4364_v20, 2  ;;  %v4372_v25 = vrot.slane %v4371_v55, 4  ;;  %v4335_v38 = vadd.f32 %v4334_v58, %v4333_v47 }
0x191a   : > { %v4342_v43 = vadd.f32 %v4341_v13, %v4340_v28 }
0x191b   : > { %v4366_v31 = vadd.f32 %v4365_v60, %v4364_v20  ;;  %v4373_v19 = vadd.f32 %v4372_v25, %v4371_v55  ;;  %v4336_v62 = vrot.slane %v4335_v38, 1  ;;  %v4536_v55 = vmul.f32 2.0, %v6724_v44 }
0x191c   : > { %v4343_v37 = vrot.slane %v4342_v43, 2 }
0x191d   : > { %v4374_v40 = vrot.slane %v4373_v19, 2  ;;  %v4367_v59 = vrot.slane %v4366_v31, 1  ;;  %v4337_v46 = vadd.f32 %v4336_v62, %v4335_v38 }
0x191e   : > { %v4344_v33 = vadd.f32 %v4343_v37, %v4342_v43 }
0x191f   : > { %v4375_v12 = vadd.f32 %v4374_v40, %v4373_v19  ;;  %v4368_v61 = vadd.f32 %v4367_v59, %v4366_v31  ;;  %v4347_v23 = vadd.f32 %v4337_v46, %v5379_v22  ;;  %v4537_v31 = vadd.f32 %v4536_v55, %v6678_v17 }
0x1920   : > { %v4345_v63 = vrot.slane %v4344_v33, 1 }
0x1921   : > { %v4376_v39 = vrot.slane %v4375_v12, 1 }
0x1922   : > { %v4346_v42 = vadd.f32 %v4345_v63, %v4344_v33 }
0x1923   : > { %v4377_v18 = vadd.f32 %v4376_v39, %v4375_v12 }
0x1924   : > { %v4348_v16 = vadd.f32 %v4346_v42, %v5379_v22 }
0x1925   : > { %v4380_v45 = vsel %vm231_vm1, %v4377_v18, %v4368_v61 }
0x1926   : > { %v4382_v32 = vsel %vm199_vm0, %v4380_v45, 0.0 }
0x1927   : > { %4383 = vadd.xlane.f32.xlu1 %v4382_v32 }
0x1983   : > { %v4351_v54 = vpop.xlane.xlu0 %4350 }
0x1984   : > { %v4385_v57 = vmul.f32 %v4351_v54, %v5379_v22 }
0x19b4   : > { %v4384_v48 = vpop.xlane.xlu1 %4383 }
0x19b5   : > { %v4386_v34 = vadd.f32 %v4385_v57, %v4384_v48 }
0x19b7   : > { %v4388_v41 = vrot.slane %v4386_v34, 1  ;;  %v4391_v26 = vsub.f32 %v4347_v23, %v4386_v34 }
0x19b9   : > { %v4392_v28 = vsub.f32 %v4348_v16, %v4388_v41 }
0x19bb   : > { %v4395_v20 = vrot.slane %v4392_v28, 7 }
0x19bd   : > { %v4396_v60 = vsel %vm231_vm1, %v4395_v20, %v4391_v26 }
0x19be   : > { %v4398_v25 = vmul.f32 %v4396_v60, %v6729_v27 }
0x19c0   : > { %v4538_v19 = vmul.f32 2.0, %v4398_v25  ;;  %v4399_v40 = vmul.f32 %v4398_v25, %v5484_v15 }
0x19c2   : > { %v6774_v59 = vadd.f32 %v4399_v40, %v6637_v14  ;;  %v6776_v12 = vadd.f32 %v4538_v19, %v4537_v31 }
0x19c4   : > { %v4486_v39 = vsel %vm199_vm0, %v6774_v59, 0.0  ;;  %v4408_v44 = vrot.slane %v6774_v59, %v5309_v21 }
0x19c5   : > { %4487 = vadd.xlane.f32.xlu0 %v4486_v39 }
0x19c6   : > { %v4409_v61 = vcombine.high %v4408_v44, %v4408_v44  ;;  %v4416_v27 = vrot.slane %v4408_v44, %v5309_v21 }
0x19c8   : > { %v4423_v17 = vrot.slane %v4409_v61, %v5309_v21  ;;  %v4427_v18 = vrot.slane %v4416_v27, %v5313_v24 }
0x19ca   : > { %v4431_v15 = vrot.slane %v4423_v17, %v5313_v24  ;;  %v4434_v45 = vmul.f32 %v4427_v18, %v5323_v30  ;;  %v4435_v32 = vmul.f32 %v4427_v18, %v5332_v36  ;;  %v4436_v13 = vmul.f32 %v4427_v18, %v5321_v29 }
0x19cb   : > { %v4437_v53 = vmul.f32 %v4427_v18, %v5330_v35 }
0x19cc   : > { %v4438_v43 = vmul.f32 %v4431_v15, %v5323_v30  ;;  %v4439_v47 = vmul.f32 %v4431_v15, %v5332_v36  ;;  %v4440_v37 = vmul.f32 %v4431_v15, %v5321_v29  ;;  %v4442_v21 = vadd.f32 %v4434_v45, %v5250_v0 }
0x19cd   : > { %v4443_v58 = vadd.f32 %v4435_v32, %v5252_v1  ;;  %v4444_v24 = vadd.f32 %v4436_v13, %v5254_v2  ;;  %v4441_v33 = vmul.f32 %v4431_v15, %v5330_v35  ;;  %v4445_v38 = vadd.f32 %v4437_v53, %v5256_v3 }
0x19ce   : > { %v4446_v63 = vadd.f32 %v4438_v43, %v5258_v4  ;;  %5101 = vtanh.f32 %v4442_v21  ;;  %v4447_v54 = vadd.f32 %v4439_v47, %v5260_v5  ;;  %v4448_v30 = vadd.f32 %v4440_v37, %v5262_v6 }
0x19cf   : > { %5103 = vtanh.f32 %v4443_v58  ;;  %v4449_v29 = vadd.f32 %v4441_v33, %v5264_v7 }
0x19d0   : > { %5105 = vtanh.f32 %v4444_v24 }
0x19d1   : > { %5107 = vtanh.f32 %v4445_v38 }
0x19d2   : > { %5109 = vtanh.f32 %v4446_v63 }
0x19d3   : > { %5111 = vtanh.f32 %v4447_v54 }
0x19d4   : > { %5113 = vtanh.f32 %v4448_v30 }
0x19d5   : > { %5115 = vtanh.f32 %v4449_v29 }
0x19d8   : > { %v5102_v36 = vpop.eup %5101 }
0x19d9   : > { %v5104_v35 = vpop.eup %5103  ;;  %v4458_v62 = vmul.f32 %v5102_v36, %v5351_v50 }
0x19da   : > { %v5106_v57 = vpop.eup %5105  ;;  %v4459_v42 = vmul.f32 %v5104_v35, %v5349_v49 }
0x19db   : > { %v5108_v48 = vpop.eup %5107  ;;  %v4460_v46 = vmul.f32 %v5106_v57, %v5353_v52  ;;  %v4489_v34 = vmul.f32 %v4458_v62, %v4427_v18 }
0x19dc   : > { %v5110_v16 = vpop.eup %5109  ;;  %v4461_v41 = vmul.f32 %v5108_v48, %v5356_v56  ;;  %v4490_v23 = vmul.f32 %v4459_v42, %v4427_v18  ;;  %v4466_v28 = vadd.f32 %v4459_v42, %v4458_v62 }
0x19dd   : > { %v5112_v26 = vpop.eup %5111  ;;  %v4462_v20 = vmul.f32 %v5110_v16, %v5351_v50  ;;  %v4491_v25 = vmul.f32 %v4460_v46, %v4427_v18 }
0x19de   : > { %v5114_v55 = vpop.eup %5113  ;;  %v4463_v60 = vmul.f32 %v5112_v26, %v5349_v49  ;;  %v4497_v31 = vadd.f32 %v4490_v23, %v4489_v34  ;;  %v4467_v19 = vadd.f32 %v4466_v28, %v4460_v46  ;;  %v4492_v44 = vmul.f32 %v4461_v41, %v4427_v18 }
0x19df   : > { %v5116_v40 = vpop.eup %5115  ;;  %v4464_v39 = vmul.f32 %v5114_v55, %v5353_v52  ;;  %v4493_v61 = vmul.f32 %v4462_v20, %v4431_v15 }
0x19e0   : > { %v4465_v27 = vmul.f32 %v5116_v40, %v5356_v56  ;;  %v4494_v17 = vmul.f32 %v4463_v60, %v4431_v15  ;;  %v4498_v45 = vadd.f32 %v4497_v31, %v4491_v25  ;;  %v4468_v32 = vadd.f32 %v4467_v19, %v4461_v41 }
0x19e1   : > { %v4475_v13 = vadd.f32 %v4463_v60, %v4462_v20  ;;  %v4495_v53 = vmul.f32 %v4464_v39, %v4431_v15 }
0x19e2   : > { %v4499_v43 = vadd.f32 %v4498_v45, %v4492_v44  ;;  %v4506_v50 = vadd.f32 %v4494_v17, %v4493_v61  ;;  %v4496_v37 = vmul.f32 %v4465_v27, %v4431_v15  ;;  %v4469_v42 = vrot.slane %v4468_v32, 4 }
0x19e3   : > { %v4476_v47 = vadd.f32 %v4475_v13, %v4464_v39 }
0x19e4   : > { %v4500_v49 = vrot.slane %v4499_v43, 4  ;;  %v4507_v21 = vadd.f32 %v4506_v50, %v4495_v53  ;;  %v4470_v46 = vadd.f32 %v4469_v42, %v4468_v32 }
0x19e5   : > { %v4477_v58 = vadd.f32 %v4476_v47, %v4465_v27 }
0x19e6   : > { %v4501_v24 = vadd.f32 %v4500_v49, %v4499_v43  ;;  %v4508_v33 = vadd.f32 %v4507_v21, %v4496_v37  ;;  %v4471_v16 = vrot.slane %v4470_v46, 2 }
0x19e7   : > { %v4478_v15 = vrot.slane %v4477_v58, 4 }
0x19e8   : > { %v4502_v38 = vrot.slane %v4501_v24, 2  ;;  %v4509_v52 = vrot.slane %v4508_v33, 4  ;;  %v4472_v23 = vadd.f32 %v4471_v16, %v4470_v46 }
0x19e9   : > { %v4479_v48 = vadd.f32 %v4478_v15, %v4477_v58 }
0x19ea   : > { %v4503_v18 = vadd.f32 %v4502_v38, %v4501_v24  ;;  %v4510_v63 = vadd.f32 %v4509_v52, %v4508_v33  ;;  %v4473_v20 = vrot.slane %v4472_v23, 1 }
0x19eb   : > { %v4480_v34 = vrot.slane %v4479_v48, 2 }
0x19ec   : > { %v4511_v54 = vrot.slane %v4510_v63, 2  ;;  %v4504_v56 = vrot.slane %v4503_v18, 1  ;;  %v4474_v31 = vadd.f32 %v4473_v20, %v4472_v23 }
0x19ed   : > { %v4481_v41 = vadd.f32 %v4480_v34, %v4479_v48 }
0x19ee   : > { %v4512_v30 = vadd.f32 %v4511_v54, %v4510_v63  ;;  %v4505_v36 = vadd.f32 %v4504_v56, %v4503_v18  ;;  %v4484_v44 = vadd.f32 %v4474_v31, %v5379_v22 }
0x19ef   : > { %v4482_v28 = vrot.slane %v4481_v41, 1 }
0x19f0   : > { %v4513_v29 = vrot.slane %v4512_v30, 1 }
0x19f1   : > { %v4483_v60 = vadd.f32 %v4482_v28, %v4481_v41 }
0x19f2   : > { %v4514_v35 = vadd.f32 %v4513_v29, %v4512_v30 }
0x19f3   : > { %v4485_v40 = vadd.f32 %v4483_v60, %v5379_v22 }
0x19f4   : > { %v4517_v62 = vsel %vm231_vm1, %v4514_v35, %v4505_v36 }
0x19f5   : > { %v4519_v57 = vsel %vm199_vm0, %v4517_v62, 0.0 }
0x19f6   : > { %4520 = vadd.xlane.f32.xlu1 %v4519_v57 }
0x1a52   : > { %v4488_v26 = vpop.xlane.xlu0 %4487 }
0x1a53   : > { %v4522_v55 = vmul.f32 %v4488_v26, %v5379_v22 }
0x1a83   : > { %v4521_v25 = vpop.xlane.xlu1 %4520 }
0x1a84   : > { %v4523_v19 = vadd.f32 %v4522_v55, %v4521_v25 }
0x1a86   : > { %v4525_v39 = vrot.slane %v4523_v19, 1  ;;  %v4528_v27 = vsub.f32 %v4484_v44, %v4523_v19 }
0x1a88   : > { %v4529_v61 = vsub.f32 %v4485_v40, %v4525_v39 }
0x1a8a   : > { %v4532_v17 = vrot.slane %v4529_v61, 7 }
0x1a8c   : > { %v4533_v45 = vsel %vm231_vm1, %v4532_v17, %v4528_v27 }
0x1a8d   : > { %v4535_v32 = vmul.f32 %v4533_v45, %v6774_v59 }
0x1a8f   : > { %v4540_v13 = vadd.f32 %v6776_v12, %v4535_v32  ;;  %67 = sbr.rel (!%p65_p13) target bundleno = 39 (0x27), region = 56 }
0x1a91   : > { %v4541_v53 = vmul.f32 %v4540_v13, %v5534_v51 }
0x1a93   : > { %v4542_v12 = vadd.f32 %v4541_v53, %v6637_v14  }
0x1a95   : > { %4545 = vst [vmem:[%s4544_s29] sm:$0x3] %v4542_v12 }
0x1a96   :  { %5162 = shalt.err (!%p5159_p4)
}
0x1a97   :  { %s5163_s9 = scalar_lea.hbm %s6844_s5, 128 }
0x1a98   :  { %p5164_p5 = scmp.ne.s32.totalorder %s6844_s5, %s5163_s9  ;;  %p5167_p6 = scmp.lt.u32.totalorder %s5163_s9, %s6844_s5 }
0x1a9a   :  { %p5169_p7 = pnand %p5167_p6, %p5164_p5 }
0x1a9c   :  { %5172 = shalt.err (!%p5169_p7)
}
0x1a9d   :  { %s5203_s1 = smov 32   ;;  %s5204_s13 = smov 2  }
0x1a9e   :  { %4557 = dma.vmem_to_hbm [thread:$0]  %s4552_s30, 128, %s6844_s5, [#allocation5], %s5203_s1, %s5203_s1, %s5204_s13  }
0x1a9f   :  { %5185 = dma.done.wait [#allocation5], 128  }
0x1aa0   :  { %5186 = vsyncadd [#allocation5], 4294967168 }
0x1aa1   :  { %4561 = vsyncpa [#allocation4], 1 }
0x1aa2   :  { %4562 = vsyncpa [#allocation5], 1 }
0x1aa3   :  { %4563 = vsyncpa [#allocation6], 1 }

</bundles_post_ra>
